<compile_context>
chip_gen: v7x
topology: tpu7x:2x2x1
jax: 0.10.0
libtpu: 0.0.40
codegen_flags: <defaults>
</compile_context>

<pallas_src>
import functools
import math
from dataclasses import dataclass

import numpy as np
import jax
import jax.numpy as jnp
from jax.experimental import pallas as pl
from jax.experimental.pallas import tpu as pltpu


# ----------------------------------------------------------------------------
# Config (frozen -> hashable -> usable as a static jit argument)
# ----------------------------------------------------------------------------
@dataclass(frozen=True)
class ScOTConfig:
    embed_dim: int = 16
    depths: tuple = (2, 2)
    num_heads: tuple = (2, 4)
    window_size: int = 4
    mlp_ratio: float = 2.0
    use_conditioning: bool = True
    layer_norm_eps: float = 1e-5
    drop_path_rate: float = 0.0
    pretrained_window_sizes: tuple = None
    qkv_bias: bool = True
    chunk_size_feed_forward: int = 0


def _gelu(x):
    # exact (erf) GELU, matching torch.nn.GELU default
    return 0.5 * x * (1.0 + jax.lax.erf(x * (1.0 / math.sqrt(2.0))))


# ----------------------------------------------------------------------------
# Pallas kernels
# ----------------------------------------------------------------------------
def _fused_block_kernel(*refs, heads, n_windows, win_len, eps, has_mask):
    """Whole ScOTLayer for one batch element, in window order:
         attn = proj( softmax( scale*cos(q,k) + rel_bias [+ mask] ) @ v )
         hs   = x + CLN_before(attn)
         out  = hs + CLN_after( GELU(hs@W1+b1)@W2+b2 )
    x block: (1, L, C) with L = n_windows * win_len (window-ordered rows)."""
    if has_mask:
        (t_ref, x_ref, wqkv_ref, bqkv_ref, relb_ref, mask_ref, scale_ref,
         wproj_ref, bproj_ref, clnb_ref, w1_ref, b1_ref, w2_ref, b2_ref,
         clna_ref, o_ref) = refs
    else:
        (t_ref, x_ref, wqkv_ref, bqkv_ref, relb_ref, scale_ref,
         wproj_ref, bproj_ref, clnb_ref, w1_ref, b1_ref, w2_ref, b2_ref,
         clna_ref, o_ref) = refs
        mask_ref = None

    nW, N = n_windows, win_len
    _, L, C = x_ref.shape
    D = C // heads
    b = pl.program_id(0)
    t = t_ref[b]                                           # per-batch time scalar (SMEM)

    x = x_ref[0].astype(jnp.float32)                       # (L, C) window-order rows
    qkv = jnp.dot(x, wqkv_ref[...].astype(jnp.float32),
                  preferred_element_type=jnp.float32) + bqkv_ref[...]   # (L, 3C)
    wproj = wproj_ref[...].astype(jnp.float32)
    mask = mask_ref[...].astype(jnp.float32) if has_mask else None      # (nW, N, N)

    acc = None
    for h in range(heads):
        qh = qkv[:, h * D:(h + 1) * D].reshape(nW, N, D)
        kh = qkv[:, C + h * D:C + (h + 1) * D].reshape(nW, N, D)
        vh = qkv[:, 2 * C + h * D:2 * C + (h + 1) * D].reshape(nW, N, D)
        # cosine attention: F.normalize(q) @ F.normalize(k).T (eps=1e-12); fold per-head
        # logit scale into the q normalization factor (N multiplies instead of N*N).
        qf = jax.lax.rsqrt(jnp.maximum(jnp.sum(qh * qh, -1, keepdims=True), 1e-24)) * scale_ref[h]
        qn = qh * qf
        kn = kh * jax.lax.rsqrt(jnp.maximum(jnp.sum(kh * kh, -1, keepdims=True), 1e-24))
        s = jnp.einsum('wnd,wmd->wnm', qn, kn, preferred_element_type=jnp.float32)
        s = s + relb_ref[h][None, :, :]                    # precomputed rel-pos bias
        if has_mask:
            s = s + mask                                   # shift mask (only shifted blocks)
        s = s - jnp.max(s, axis=-1, keepdims=True)
        e = jnp.exp(s)
        p = e * pl.reciprocal(jnp.sum(e, axis=-1, keepdims=True), approx=True)
        ctx = jnp.einsum('wnm,wmd->wnd', p, vh, preferred_element_type=jnp.float32)
        # accumulate the output projection per head (no lane concatenate of heads)
        contrib = jnp.dot(ctx.reshape(L, D), wproj[h * D:(h + 1) * D, :],
                          preferred_element_type=jnp.float32)
        acc = contrib if acc is None else acc + contrib
    attn = acc + bproj_ref[...]                            # (L, C)

    # CLN_before + residual (shortcut == window-ordered input rows)
    sb = t * clnb_ref[0:1, :] + clnb_ref[1:2, :]
    bb = t * clnb_ref[2:3, :] + clnb_ref[3:4, :]
    mean = jnp.mean(attn, axis=-1, keepdims=True)
    var = jnp.mean(attn * attn, axis=-1, keepdims=True) - mean * mean   # matches reference CLN
    xn = (attn - mean) * jax.lax.rsqrt(var + eps)
    hs = x + sb * xn + bb

    # MLP (GELU) + CLN_after + residual
    inter = _gelu(jnp.dot(hs, w1_ref[...], preferred_element_type=jnp.float32) + b1_ref[...])
    mlp = jnp.dot(inter, w2_ref[...], preferred_element_type=jnp.float32) + b2_ref[...]
    sa = t * clna_ref[0:1, :] + clna_ref[1:2, :]
    ba = t * clna_ref[2:3, :] + clna_ref[3:4, :]
    m2 = jnp.mean(mlp, axis=-1, keepdims=True)
    v2 = jnp.mean(mlp * mlp, axis=-1, keepdims=True) - m2 * m2
    xn2 = (mlp - m2) * jax.lax.rsqrt(v2 + eps)
    o_ref[0] = (hs + sa * xn2 + ba).astype(o_ref.dtype)


def _patch_unmerge_kernel(t_ref, x_ref, wup_ref, cln_ref, wmix_ref, o_ref, *, eps):
    """Patch unmerging for one batch element: upsample matmul + per-chunk CLN + mixup matmul.
    CLN/mixup act per output pixel, i.e. independently on each (dim//2)-wide lane chunk of the
    upsample output, so they are applied here pre-pixel-shuffle; the spatial shuffle happens in
    XLA afterwards (exact).  x: (1, L, C); output: (1, L, 2C)."""
    b = pl.program_id(0)
    t = t_ref[b]
    _, L, C = x_ref.shape
    Cd = C // 2
    x = x_ref[0].astype(jnp.float32)
    up = jnp.dot(x, wup_ref[...], preferred_element_type=jnp.float32)   # (L, 2C)
    scale = t * cln_ref[0:1, :] + cln_ref[1:2, :]
    shift = t * cln_ref[2:3, :] + cln_ref[3:4, :]
    wmix = wmix_ref[...]
    chunks = []
    for g in range(4):
        c = up[:, g * Cd:(g + 1) * Cd]
        mean = jnp.mean(c, axis=-1, keepdims=True)
        var = jnp.mean(c * c, axis=-1, keepdims=True) - mean * mean
        xn = (c - mean) * jax.lax.rsqrt(var + eps)
        y = scale * xn + shift
        chunks.append(jnp.dot(y, wmix, preferred_element_type=jnp.float32))
    o_ref[0] = jnp.concatenate(chunks, axis=-1).astype(o_ref.dtype)


# ----------------------------------------------------------------------------
# Kernel wrappers
# ----------------------------------------------------------------------------
def fused_block(p, xw, time, *, heads, n_windows, win_len, eps, attn_mask=None):
    """xw: (B, nW*N, C) window-ordered rows; one grid step per batch element."""
    B, L, C = xw.shape
    M = p["w1"].shape[1]
    has_mask = attn_mask is not None
    t = time.reshape(-1).astype(jnp.float32)

    in_specs = [
        pl.BlockSpec(memory_space=pltpu.MemorySpace.SMEM),              # time (B,)
        pl.BlockSpec((1, L, C), lambda b: (b, 0, 0)),                   # windowed hidden states
        pl.BlockSpec((C, 3 * C), lambda b: (0, 0)),                     # fused QKV weight
        pl.BlockSpec((1, 3 * C), lambda b: (0, 0)),                     # fused QKV bias (K bias 0)
        pl.BlockSpec((heads, win_len, win_len), lambda b: (0, 0, 0)),   # precomputed rel-pos bias
    ]
    args = [t, xw, p["w_qkv"], p["b_qkv"], p["rel_bias"]]
    if has_mask:
        in_specs.append(pl.BlockSpec((n_windows, win_len, win_len), lambda b: (0, 0, 0)))
        args.append(attn_mask)
    in_specs += [
        pl.BlockSpec(memory_space=pltpu.MemorySpace.SMEM),              # per-head logit scale
        pl.BlockSpec((C, C), lambda b: (0, 0)),                         # proj weight
        pl.BlockSpec((1, C), lambda b: (0, 0)),                         # proj bias
        pl.BlockSpec((4, C), lambda b: (0, 0)),                         # CLN before [ww,wb,bw,bb]
        pl.BlockSpec((C, M), lambda b: (0, 0)),                         # MLP w1
        pl.BlockSpec((1, M), lambda b: (0, 0)),                         # MLP b1
        pl.BlockSpec((M, C), lambda b: (0, 0)),                         # MLP w2
        pl.BlockSpec((1, C), lambda b: (0, 0)),                         # MLP b2
        pl.BlockSpec((4, C), lambda b: (0, 0)),                         # CLN after
    ]
    args += [p["scale"], p["w_proj"], p["b_proj"], p["cln_before"],
             p["w1"], p["b1"], p["w2"], p["b2"], p["cln_after"]]

    return pl.pallas_call(
        functools.partial(_fused_block_kernel, heads=heads, n_windows=n_windows,
                          win_len=win_len, eps=eps, has_mask=has_mask),
        out_shape=jax.ShapeDtypeStruct((B, L, C), jnp.float32),
        grid=(B,),
        in_specs=in_specs,
        out_specs=pl.BlockSpec((1, L, C), lambda b: (b, 0, 0)),
        compiler_params=pltpu.CompilerParams(dimension_semantics=("parallel",)),
    )(*args)


def patch_unmerge_pallas(p, x, time, eps=1e-5):
    B, L, C = x.shape
    Cd = C // 2
    t = time.reshape(-1).astype(jnp.float32)
    return pl.pallas_call(
        functools.partial(_patch_unmerge_kernel, eps=eps),
        out_shape=jax.ShapeDtypeStruct((B, L, 2 * C), jnp.float32),
        grid=(B,),
        in_specs=[
            pl.BlockSpec(memory_space=pltpu.MemorySpace.SMEM),
            pl.BlockSpec((1, L, C), lambda b: (b, 0, 0)),
            pl.BlockSpec((C, 2 * C), lambda b: (0, 0)),
            pl.BlockSpec((4, Cd), lambda b: (0, 0)),
            pl.BlockSpec((Cd, Cd), lambda b: (0, 0)),
        ],
        out_specs=pl.BlockSpec((1, L, 2 * C), lambda b: (b, 0, 0)),
        compiler_params=pltpu.CompilerParams(dimension_semantics=("parallel",)),
    )(t, x, p["w_up"], p["cln"], p["w_mix"])


# ----------------------------------------------------------------------------
# Host-side constants (mask / rel-pos tables), cached
# ----------------------------------------------------------------------------
@functools.lru_cache(maxsize=None)
def _attn_mask_np(Hp, Wp, ws, shift):
    if shift <= 0:
        return None
    img = np.zeros((1, Hp, Wp, 1), np.float32)
    slices = (slice(0, -ws), slice(-ws, -shift), slice(-shift, None))
    cnt = 0
    for hs in slices:
        for wsl in slices:
            img[:, hs, wsl, :] = cnt
            cnt += 1
    mw = img.reshape(1, Hp // ws, ws, Wp // ws, ws, 1)
    mw = mw.transpose(0, 1, 3, 2, 4, 5).reshape(-1, ws * ws)
    diff = mw[:, None, :] - mw[:, :, None]
    return np.where(diff != 0, -100.0, 0.0).astype(np.float32)


def make_rel_coords_table(ws, pretrained_ws):
    h = np.arange(-(ws - 1), ws, dtype=np.float32)
    w = np.arange(-(ws - 1), ws, dtype=np.float32)
    table = np.stack(np.meshgrid(h, w, indexing="ij"), axis=-1)
    if pretrained_ws > 0:
        table[..., 0] /= pretrained_ws - 1
        table[..., 1] /= pretrained_ws - 1
    elif ws > 1:
        table[..., 0] /= ws - 1
        table[..., 1] /= ws - 1
    table *= 8.0
    table = np.sign(table) * np.log2(np.abs(table) + 1.0) / np.log2(8.0)
    return jnp.asarray(table.reshape(-1, 2))


def make_rel_pos_index(ws):
    coords = np.stack(np.meshgrid(np.arange(ws), np.arange(ws), indexing="ij"))
    cf = coords.reshape(2, -1)
    rel = (cf[:, :, None] - cf[:, None, :]).transpose(1, 2, 0).astype(np.int64)
    rel[..., 0] += ws - 1
    rel[..., 1] += ws - 1
    rel[..., 0] *= 2 * ws - 1
    return jnp.asarray(rel.sum(-1).astype(np.int32))


# ----------------------------------------------------------------------------
# Parameter initialization (deterministic, synthetic).  All parameter-only
# attention constants (rel. pos. bias, clamped logit scale) are precomputed here.
# ----------------------------------------------------------------------------
def _init_linear_wb(key, din, dout, bias=True):
    kw, kb = jax.random.split(key)
    W = 0.02 * jax.random.normal(kw, (din, dout), jnp.float32)
    b = 0.02 * jax.random.normal(kb, (dout,), jnp.float32) if bias \
        else jnp.zeros((dout,), jnp.float32)
    return W, b


def _init_cln(key, dim):
    ks = jax.random.split(key, 4)
    ww = 1.0 + 0.1 * jax.random.normal(ks[0], (dim,), jnp.float32)
    wb = 0.1 * jax.random.normal(ks[1], (dim,), jnp.float32)
    bw = 0.1 * jax.random.normal(ks[2], (dim,), jnp.float32)
    bb = 0.1 * jax.random.normal(ks[3], (dim,), jnp.float32)
    return jnp.stack([ww, wb, bw, bb])                     # (4, dim)


def init_attention(key, dim, num_heads, ws, pretrained_ws, qkv_bias=True):
    ks = jax.random.split(key, 6)
    Wq, bq = _init_linear_wb(ks[0], dim, dim, qkv_bias)
    Wk, _ = _init_linear_wb(ks[1], dim, dim, False)        # key has no bias
    Wv, bv = _init_linear_wb(ks[2], dim, dim, qkv_bias)
    Wp, bp = _init_linear_wb(ks[3], dim, dim, True)
    # continuous relative-position-bias MLP (parameter-only -> evaluate now, not in forward)
    W1, b1 = _init_linear_wb(ks[4], 2, 512, True)
    W2, _ = _init_linear_wb(ks[5], 512, num_heads, False)
    table = make_rel_coords_table(ws, pretrained_ws)
    bias_table = jax.nn.relu(table @ W1 + b1) @ W2         # ((2ws-1)^2, heads)
    idx = make_rel_pos_index(ws).reshape(-1)
    N = ws * ws
    rel = bias_table[idx].reshape(N, N, num_heads).transpose(2, 0, 1)
    rel_bias = 16.0 * jax.nn.sigmoid(rel)                  # (heads, N, N)

    logit_scale = jnp.full((num_heads,), math.log(10.0), jnp.float32)
    scale = jnp.exp(jnp.minimum(logit_scale, math.log(1.0 / 0.01)))   # (heads,)

    w_qkv = jnp.concatenate([Wq, Wk, Wv], axis=1)          # (dim, 3*dim)
    b_qkv = jnp.concatenate([bq, jnp.zeros((dim,), jnp.float32), bv]).reshape(1, 3 * dim)
    return {"w_qkv": w_qkv, "b_qkv": b_qkv, "rel_bias": rel_bias, "scale": scale,
            "w_proj": Wp, "b_proj": bp.reshape(1, dim)}


def init_scot_layer(key, config, dim, num_heads, ws, pretrained_ws):
    ks = jax.random.split(key, 5)
    mlp_dim = int(config.mlp_ratio * dim)
    p = init_attention(ks[0], dim, num_heads, ws, pretrained_ws, config.qkv_bias)
    p["cln_before"] = _init_cln(ks[1], dim)
    w1, b1 = _init_linear_wb(ks[2], dim, mlp_dim, True)
    w2, b2 = _init_linear_wb(ks[3], mlp_dim, dim, True)
    p["w1"], p["b1"] = w1, b1.reshape(1, -1)
    p["w2"], p["b2"] = w2, b2.reshape(1, -1)
    p["cln_after"] = _init_cln(ks[4], dim)
    return p


def init_patch_unmerging(key, dim):
    ks = jax.random.split(key, 3)
    w_up, _ = _init_linear_wb(ks[0], dim, 2 * dim, False)
    w_mix, _ = _init_linear_wb(ks[1], dim // 2, dim // 2, False)
    return {"w_up": w_up, "w_mix": w_mix, "cln": _init_cln(ks[2], dim // 2)}


def init_stage(key, config, dim, input_resolution, depth, num_heads, has_upsample, pretrained_ws):
    ws_cfg = config.window_size
    ws = input_resolution[0] if input_resolution[0] <= ws_cfg else ws_cfg
    blocks = []
    for _ in range(depth):
        key, sub = jax.random.split(key)
        blocks.append(init_scot_layer(sub, config, dim, num_heads, ws, pretrained_ws))
    up = None
    if has_upsample:
        key, sub = jax.random.split(key)
        up = init_patch_unmerging(sub, dim)
    return {"blocks": blocks, "upsample": up}


def init_decoder(key, config, grid_size):
    num_layers = len(config.depths)
    pws = config.pretrained_window_sizes if config.pretrained_window_sizes is not None \
        else (0,) * num_layers
    layers = []
    for i_layer in reversed(range(num_layers)):
        key, sub = jax.random.split(key)
        dim = int(config.embed_dim * 2 ** i_layer)
        input_resolution = (grid_size[0] // 2 ** i_layer, grid_size[1] // 2 ** i_layer)
        layers.append(init_stage(sub, config, dim, input_resolution, config.depths[i_layer],
                                 config.num_heads[i_layer], i_layer > 0, pws[i_layer]))
    return {"layers": layers}


# ----------------------------------------------------------------------------
# Forward pass (jitted end-to-end)
# ----------------------------------------------------------------------------
def scot_layer_forward(p, config, hidden_states, input_dimensions, time, num_heads, target_shift):
    H, W = input_dimensions
    ws_cfg = config.window_size
    ws = H if H <= ws_cfg else ws_cfg
    # NOTE: the spec module literally uses lexicographic tuple comparison here.
    shift = 0 if (H, W) <= (ws, ws) else target_shift

    B, _, C = hidden_states.shape
    x = hidden_states.reshape(B, H, W, C)
    pad_r = (ws - W % ws) % ws
    pad_b = (ws - H % ws) % ws
    if pad_r or pad_b:
        x = jnp.pad(x, ((0, 0), (0, pad_b), (0, pad_r), (0, 0)))
    Hp, Wp = H + pad_b, W + pad_r
    if shift > 0:
        x = jnp.roll(x, shift=(-shift, -shift), axis=(1, 2))
    Hn, Wn = Hp // ws, Wp // ws
    nW, N = Hn * Wn, ws * ws
    # window partition (row permutation) in XLA; the fused kernel works in window order,
    # which is valid because CLN / MLP / residual are row-wise (permutation-invariant).
    xw = x.reshape(B, Hn, ws, Wn, ws, C).transpose(0, 1, 3, 2, 4, 5).reshape(B, nW * N, C)

    mnp = _attn_mask_np(Hp, Wp, ws, shift)                 # host-cached; constant under jit
    attn_mask = None if mnp is None else jnp.asarray(mnp)

    yw = fused_block(p, xw, time, heads=num_heads, n_windows=nW, win_len=N,
                     eps=config.layer_norm_eps, attn_mask=attn_mask)

    # window reverse + un-shift + crop (row permutation) in XLA
    y = yw.reshape(B, Hn, Wn, ws, ws, C).transpose(0, 1, 3, 2, 4, 5).reshape(B, Hp, Wp, C)
    if shift > 0:
        y = jnp.roll(y, shift=(shift, shift), axis=(1, 2))
    if pad_r or pad_b:
        y = y[:, :H, :W, :]
    return y.reshape(B, H * W, C)


def patch_unmerging_forward(p, x, output_dims, time):
    Hout, Wout = output_dims
    B, L, C = x.shape
    Hin = Win = int(math.floor(L ** 0.5))                  # matches the spec (square assumption)
    Cd = C // 2
    up_mixed = patch_unmerge_pallas(p, x, time, eps=1e-5)  # (B, L, 2C), CLN+mixup already applied
    # pixel shuffle + crop in XLA (exact: CLN/mixup are per output pixel)
    y = up_mixed.reshape(B, Hin, Win, 2, 2, Cd)
    y = jnp.transpose(y, (0, 1, 3, 2, 4, 5)).reshape(B, 2 * Hin, 2 * Win, Cd)
    y = y[:, :Hout, :Wout, :]
    return y.reshape(B, -1, Cd)


def scot_stage_forward(p, config, hidden_states, input_dimensions, time,
                       num_heads, depth, upsampled_size):
    H, W = input_dimensions
    for j, blk in enumerate(p["blocks"]):
        i_orig = depth - 1 - j                             # blocks built in reversed(range(depth))
        target_shift = 0 if i_orig % 2 == 0 else config.window_size // 2
        hidden_states = scot_layer_forward(blk, config, hidden_states, (H, W), time,
                                           num_heads, target_shift)
    if p["upsample"] is not None:
        hidden_states = patch_unmerging_forward(p["upsample"], hidden_states, upsampled_size, time)
        return hidden_states, upsampled_size
    return hidden_states, (H, W)


@functools.partial(jax.jit, static_argnames=("config", "grid_size", "input_dimensions"))
def scot_decoder_forward(params, hidden_states, skip_states, time, *,
                         config, grid_size, input_dimensions):
    num_layers = len(config.depths)
    for i, stage in enumerate(params["layers"]):
        i_layer = num_layers - 1 - i
        if i != 0 and skip_states[len(skip_states) - i] is not None:
            hidden_states = hidden_states + skip_states[len(skip_states) - i]
        heads = config.num_heads[i_layer]
        depth = config.depths[i_layer]
        upsampled_size = ((grid_size[0] // 2 ** (i_layer - 1),
                           grid_size[1] // 2 ** (i_layer - 1)) if i_layer > 0 else None)
        hidden_states, input_dimensions = scot_stage_forward(
            stage, config, hidden_states, input_dimensions, time, heads, depth, upsampled_size)
    return hidden_states                                   # last_hidden_state


# ----------------------------------------------------------------------------
# Main
# ----------------------------------------------------------------------------
if __name__ == "__main__":
    config = ScOTConfig()
    grid_size = (8, 8)
    num_layers = len(config.depths)

    key = jax.random.PRNGKey(0)
    kp, kx, ks0, ks1, kt = jax.random.split(key, 5)

    params = init_decoder(kp, config, grid_size)

    B = 2
    start_dim = int(config.embed_dim * 2 ** (num_layers - 1))                     # 32
    start_res = (grid_size[0] // 2 ** (num_layers - 1),
                 grid_size[1] // 2 ** (num_layers - 1))                           # (4, 4)
    hidden_states = jax.random.normal(kx, (B, start_res[0] * start_res[1], start_dim), jnp.float32)

    # skip_states[len-i] consumed at decoder layer i>0; shapes match the post-upsample resolution.
    skip_states = (
        jax.random.normal(ks0, (B, start_res[0] * start_res[1], start_dim), jnp.float32),  # unused
        jax.random.normal(ks1, (B, grid_size[0] * grid_size[1], config.embed_dim), jnp.float32),
    )
    time = jax.random.uniform(kt, (B,), jnp.float32)

    out = scot_decoder_forward(params, hidden_states, skip_states, time,
                               config=config, grid_size=grid_size, input_dimensions=start_res)
    out = jax.block_until_ready(out)
    assert out.shape == (B, grid_size[0] * grid_size[1], config.embed_dim)
    # TODO(synk): if activations/dims are ever scaled up, flatten kernel I/O blocks to >=128-lane
    # slabs and revisit the resident-weights VMEM budget on v7x (64 MiB).
    print("KERNEL_OK")
</pallas_src>

<mosaic_0001>
module attributes {stable_mosaic.version = 11 : i64} {
  func.func @_fused_block_kernel(%arg0: i32, %arg1: memref<2xf32, #tpu.memory_space<smem>>, %arg2: memref<1x16x32xf32, #tpu.memory_space<vmem>>, %arg3: memref<32x96xf32, #tpu.memory_space<vmem>>, %arg4: memref<1x96xf32, #tpu.memory_space<vmem>>, %arg5: memref<4x16x16xf32, #tpu.memory_space<vmem>>, %arg6: memref<4xf32, #tpu.memory_space<smem>>, %arg7: memref<32x32xf32, #tpu.memory_space<vmem>>, %arg8: memref<1x32xf32, #tpu.memory_space<vmem>>, %arg9: memref<4x32xf32, #tpu.memory_space<vmem>>, %arg10: memref<32x64xf32, #tpu.memory_space<vmem>>, %arg11: memref<1x64xf32, #tpu.memory_space<vmem>>, %arg12: memref<64x32xf32, #tpu.memory_space<vmem>>, %arg13: memref<1x32xf32, #tpu.memory_space<vmem>>, %arg14: memref<4x32xf32, #tpu.memory_space<vmem>>, %arg15: memref<1x16x32xf32, #tpu.memory_space<vmem>>) attributes {dimension_semantics = [#tpu.dimension_semantics<parallel>], iteration_bounds = array<i64: 2>, scalar_prefetch = 0 : i64, scratch_operands = 0 : i64, tpu.core_type = #tpu.core_type<tc>, window_params = [{transform_indices = @transform_0, window_bounds = array<i64: 2>}, {transform_indices = @transform_1, window_bounds = array<i64: 1, 16, 32>}, {pipeline_mode = #tpu.pipeline_mode<synchronous>, transform_indices = @transform_2, window_bounds = array<i64: 32, 96>}, {pipeline_mode = #tpu.pipeline_mode<synchronous>, transform_indices = @transform_3, window_bounds = array<i64: 1, 96>}, {pipeline_mode = #tpu.pipeline_mode<synchronous>, transform_indices = @transform_4, window_bounds = array<i64: 4, 16, 16>}, {transform_indices = @transform_5, window_bounds = array<i64: 4>}, {pipeline_mode = #tpu.pipeline_mode<synchronous>, transform_indices = @transform_6, window_bounds = array<i64: 32, 32>}, {pipeline_mode = #tpu.pipeline_mode<synchronous>, transform_indices = @transform_7, window_bounds = array<i64: 1, 32>}, {pipeline_mode = #tpu.pipeline_mode<synchronous>, transform_indices = @transform_8, window_bounds = array<i64: 4, 32>}, {pipeline_mode = #tpu.pipeline_mode<synchronous>, transform_indices = @transform_9, window_bounds = array<i64: 32, 64>}, {pipeline_mode = #tpu.pipeline_mode<synchronous>, transform_indices = @transform_10, window_bounds = array<i64: 1, 64>}, {pipeline_mode = #tpu.pipeline_mode<synchronous>, transform_indices = @transform_11, window_bounds = array<i64: 64, 32>}, {pipeline_mode = #tpu.pipeline_mode<synchronous>, transform_indices = @transform_12, window_bounds = array<i64: 1, 32>}, {pipeline_mode = #tpu.pipeline_mode<synchronous>, transform_indices = @transform_13, window_bounds = array<i64: 4, 32>}, {transform_indices = @transform_14, window_bounds = array<i64: 1, 16, 32>}]} {
    %0 = arith.index_cast %arg0 : i32 to index
    %1 = memref.load %arg1[%0] : memref<2xf32, #tpu.memory_space<smem>>
    %c0 = arith.constant 0 : index
    %c0_0 = arith.constant 0 : index
    %c0_1 = arith.constant 0 : index
    %2 = vector.load %arg2[%c0, %c0_0, %c0_1] : memref<1x16x32xf32, #tpu.memory_space<vmem>>, vector<1x16x32xf32>
    %3 = vector.shape_cast %2 : vector<1x16x32xf32> to vector<16x32xf32>
    %c0_2 = arith.constant 0 : index
    %c0_3 = arith.constant 0 : index
    %4 = vector.load %arg3[%c0_2, %c0_3] : memref<32x96xf32, #tpu.memory_space<vmem>>, vector<32x96xf32>
    %cst = arith.constant dense<0.000000e+00> : vector<16x96xf32>
    %5 = tpu.matmul %3, %4, %cst {dimension_numbers = #tpu.dot_dimension_numbers<[1], [0], [0], [1], [0, 0, 1, 1], [], []>} : vector<16x32xf32>, vector<32x96xf32>, vector<16x96xf32> -> vector<16x96xf32>
    %c0_4 = arith.constant 0 : index
    %c0_5 = arith.constant 0 : index
    %6 = vector.load %arg4[%c0_4, %c0_5] : memref<1x96xf32, #tpu.memory_space<vmem>>, vector<1x96xf32>
    %7 = vector.broadcast %6 : vector<1x96xf32> to vector<16x96xf32>
    %8 = arith.addf %5, %7 : vector<16x96xf32>
    %c0_6 = arith.constant 0 : index
    %c0_7 = arith.constant 0 : index
    %9 = vector.load %arg7[%c0_6, %c0_7] : memref<32x32xf32, #tpu.memory_space<vmem>>, vector<32x32xf32>
    %10 = vector.extract_strided_slice %8 {offsets = [0, 0], sizes = [16, 8], strides = [1, 1]} : vector<16x96xf32> to vector<16x8xf32>
    %11 = vector.shape_cast %10 : vector<16x8xf32> to vector<1x16x8xf32>
    %12 = vector.extract_strided_slice %8 {offsets = [0, 32], sizes = [16, 8], strides = [1, 1]} : vector<16x96xf32> to vector<16x8xf32>
    %13 = vector.shape_cast %12 : vector<16x8xf32> to vector<1x16x8xf32>
    %14 = vector.extract_strided_slice %8 {offsets = [0, 64], sizes = [16, 8], strides = [1, 1]} : vector<16x96xf32> to vector<16x8xf32>
    %15 = vector.shape_cast %14 : vector<16x8xf32> to vector<1x16x8xf32>
    %16 = arith.mulf %11, %11 : vector<1x16x8xf32>
    %cst_8 = arith.constant dense<0.000000e+00> : vector<1x16xf32>
    %17 = vector.multi_reduction <add>, %16, %cst_8 [2] : vector<1x16x8xf32> to vector<1x16xf32>
    %18 = vector.shape_cast %17 : vector<1x16xf32> to vector<1x16x1xf32>
    %cst_9 = arith.constant 1.000000e-24 : f32
    %19 = vector.broadcast %cst_9 : f32 to vector<1x16x1xf32>
    %20 = arith.maximumf %18, %19 : vector<1x16x1xf32>
    %21 = math.rsqrt %20 : vector<1x16x1xf32>
    %c0_10 = arith.constant 0 : index
    %22 = memref.load %arg6[%c0_10] : memref<4xf32, #tpu.memory_space<smem>>
    %23 = vector.broadcast %22 : f32 to vector<1x16x1xf32>
    %24 = arith.mulf %21, %23 : vector<1x16x1xf32>
    %25 = vector.broadcast %24 : vector<1x16x1xf32> to vector<1x16x8xf32>
    %26 = arith.mulf %11, %25 : vector<1x16x8xf32>
    %27 = arith.mulf %13, %13 : vector<1x16x8xf32>
    %cst_11 = arith.constant dense<0.000000e+00> : vector<1x16xf32>
    %28 = vector.multi_reduction <add>, %27, %cst_11 [2] : vector<1x16x8xf32> to vector<1x16xf32>
    %29 = vector.shape_cast %28 : vector<1x16xf32> to vector<1x16x1xf32>
    %cst_12 = arith.constant 1.000000e-24 : f32
    %30 = vector.broadcast %cst_12 : f32 to vector<1x16x1xf32>
    %31 = arith.maximumf %29, %30 : vector<1x16x1xf32>
    %32 = math.rsqrt %31 : vector<1x16x1xf32>
    %33 = vector.broadcast %32 : vector<1x16x1xf32> to vector<1x16x8xf32>
    %34 = arith.mulf %13, %33 : vector<1x16x8xf32>
    "tpu.trace_start"() <{level = 10 : i32, message = "wnd,wmd->wnm"}> : () -> ()
    %cst_13 = arith.constant dense<0.000000e+00> : vector<1x16x16xf32>
    %35 = tpu.matmul %26, %34, %cst_13 {dimension_numbers = #tpu.dot_dimension_numbers<[2], [2], [1], [1], [0, 0, 0, 1, 1, 1], [0], [0]>} : vector<1x16x8xf32>, vector<1x16x8xf32>, vector<1x16x16xf32> -> vector<1x16x16xf32>
    "tpu.trace_stop"() : () -> ()
    %c0_14 = arith.constant 0 : index
    %c0_15 = arith.constant 0 : index
    %c0_16 = arith.constant 0 : index
    %36 = vector.load %arg5[%c0_14, %c0_15, %c0_16] : memref<4x16x16xf32, #tpu.memory_space<vmem>>, vector<1x16x16xf32>
    %37 = vector.shape_cast %36 : vector<1x16x16xf32> to vector<16x16xf32>
    %38 = vector.shape_cast %37 : vector<16x16xf32> to vector<1x16x16xf32>
    %39 = arith.addf %35, %38 : vector<1x16x16xf32>
    %cst_17 = arith.constant dense<0xFF800000> : vector<1x16xf32>
    %40 = vector.multi_reduction <maximumf>, %39, %cst_17 [2] : vector<1x16x16xf32> to vector<1x16xf32>
    %41 = vector.shape_cast %40 : vector<1x16xf32> to vector<1x16x1xf32>
    %42 = vector.broadcast %41 : vector<1x16x1xf32> to vector<1x16x16xf32>
    %43 = arith.subf %39, %42 : vector<1x16x16xf32>
    %44 = math.exp %43 : vector<1x16x16xf32>
    %cst_18 = arith.constant dense<0.000000e+00> : vector<1x16xf32>
    %45 = vector.multi_reduction <add>, %44, %cst_18 [2] : vector<1x16x16xf32> to vector<1x16xf32>
    %46 = vector.shape_cast %45 : vector<1x16xf32> to vector<1x16x1xf32>
    %47 = tpu.reciprocal %46 {approx = true} : vector<1x16x1xf32> -> vector<1x16x1xf32>
    %48 = vector.broadcast %47 : vector<1x16x1xf32> to vector<1x16x16xf32>
    %49 = arith.mulf %44, %48 : vector<1x16x16xf32>
    "tpu.trace_start"() <{level = 10 : i32, message = "wnm,wmd->wnd"}> : () -> ()
    %cst_19 = arith.constant dense<0.000000e+00> : vector<1x16x8xf32>
    %50 = tpu.matmul %49, %15, %cst_19 {dimension_numbers = #tpu.dot_dimension_numbers<[2], [1], [1], [2], [0, 0, 0, 1, 1, 2], [0], [0]>} : vector<1x16x16xf32>, vector<1x16x8xf32>, vector<1x16x8xf32> -> vector<1x16x8xf32>
    "tpu.trace_stop"() : () -> ()
    %51 = vector.shape_cast %50 : vector<1x16x8xf32> to vector<16x8xf32>
    %52 = vector.extract_strided_slice %9 {offsets = [0, 0], sizes = [8, 32], strides = [1, 1]} : vector<32x32xf32> to vector<8x32xf32>
    %cst_20 = arith.constant dense<0.000000e+00> : vector<16x32xf32>
    %53 = tpu.matmul %51, %52, %cst_20 {dimension_numbers = #tpu.dot_dimension_numbers<[1], [0], [0], [1], [0, 0, 1, 1], [], []>} : vector<16x8xf32>, vector<8x32xf32>, vector<16x32xf32> -> vector<16x32xf32>
    %54 = vector.extract_strided_slice %8 {offsets = [0, 8], sizes = [16, 8], strides = [1, 1]} : vector<16x96xf32> to vector<16x8xf32>
    %55 = vector.shape_cast %54 : vector<16x8xf32> to vector<1x16x8xf32>
    %56 = vector.extract_strided_slice %8 {offsets = [0, 40], sizes = [16, 8], strides = [1, 1]} : vector<16x96xf32> to vector<16x8xf32>
    %57 = vector.shape_cast %56 : vector<16x8xf32> to vector<1x16x8xf32>
    %58 = vector.extract_strided_slice %8 {offsets = [0, 72], sizes = [16, 8], strides = [1, 1]} : vector<16x96xf32> to vector<16x8xf32>
    %59 = vector.shape_cast %58 : vector<16x8xf32> to vector<1x16x8xf32>
    %60 = arith.mulf %55, %55 : vector<1x16x8xf32>
    %cst_21 = arith.constant dense<0.000000e+00> : vector<1x16xf32>
    %61 = vector.multi_reduction <add>, %60, %cst_21 [2] : vector<1x16x8xf32> to vector<1x16xf32>
    %62 = vector.shape_cast %61 : vector<1x16xf32> to vector<1x16x1xf32>
    %cst_22 = arith.constant 1.000000e-24 : f32
    %63 = vector.broadcast %cst_22 : f32 to vector<1x16x1xf32>
    %64 = arith.maximumf %62, %63 : vector<1x16x1xf32>
    %65 = math.rsqrt %64 : vector<1x16x1xf32>
    %c1 = arith.constant 1 : index
    %66 = memref.load %arg6[%c1] : memref<4xf32, #tpu.memory_space<smem>>
    %67 = vector.broadcast %66 : f32 to vector<1x16x1xf32>
    %68 = arith.mulf %65, %67 : vector<1x16x1xf32>
    %69 = vector.broadcast %68 : vector<1x16x1xf32> to vector<1x16x8xf32>
    %70 = arith.mulf %55, %69 : vector<1x16x8xf32>
    %71 = arith.mulf %57, %57 : vector<1x16x8xf32>
    %cst_23 = arith.constant dense<0.000000e+00> : vector<1x16xf32>
    %72 = vector.multi_reduction <add>, %71, %cst_23 [2] : vector<1x16x8xf32> to vector<1x16xf32>
    %73 = vector.shape_cast %72 : vector<1x16xf32> to vector<1x16x1xf32>
    %cst_24 = arith.constant 1.000000e-24 : f32
    %74 = vector.broadcast %cst_24 : f32 to vector<1x16x1xf32>
    %75 = arith.maximumf %73, %74 : vector<1x16x1xf32>
    %76 = math.rsqrt %75 : vector<1x16x1xf32>
    %77 = vector.broadcast %76 : vector<1x16x1xf32> to vector<1x16x8xf32>
    %78 = arith.mulf %57, %77 : vector<1x16x8xf32>
    "tpu.trace_start"() <{level = 10 : i32, message = "wnd,wmd->wnm"}> : () -> ()
    %cst_25 = arith.constant dense<0.000000e+00> : vector<1x16x16xf32>
    %79 = tpu.matmul %70, %78, %cst_25 {dimension_numbers = #tpu.dot_dimension_numbers<[2], [2], [1], [1], [0, 0, 0, 1, 1, 1], [0], [0]>} : vector<1x16x8xf32>, vector<1x16x8xf32>, vector<1x16x16xf32> -> vector<1x16x16xf32>
    "tpu.trace_stop"() : () -> ()
    %c1_26 = arith.constant 1 : index
    %c0_27 = arith.constant 0 : index
    %c0_28 = arith.constant 0 : index
    %80 = vector.load %arg5[%c1_26, %c0_27, %c0_28] : memref<4x16x16xf32, #tpu.memory_space<vmem>>, vector<1x16x16xf32>
    %81 = vector.shape_cast %80 : vector<1x16x16xf32> to vector<16x16xf32>
    %82 = vector.shape_cast %81 : vector<16x16xf32> to vector<1x16x16xf32>
    %83 = arith.addf %79, %82 : vector<1x16x16xf32>
    %cst_29 = arith.constant dense<0xFF800000> : vector<1x16xf32>
    %84 = vector.multi_reduction <maximumf>, %83, %cst_29 [2] : vector<1x16x16xf32> to vector<1x16xf32>
    %85 = vector.shape_cast %84 : vector<1x16xf32> to vector<1x16x1xf32>
    %86 = vector.broadcast %85 : vector<1x16x1xf32> to vector<1x16x16xf32>
    %87 = arith.subf %83, %86 : vector<1x16x16xf32>
    %88 = math.exp %87 : vector<1x16x16xf32>
    %cst_30 = arith.constant dense<0.000000e+00> : vector<1x16xf32>
    %89 = vector.multi_reduction <add>, %88, %cst_30 [2] : vector<1x16x16xf32> to vector<1x16xf32>
    %90 = vector.shape_cast %89 : vector<1x16xf32> to vector<1x16x1xf32>
    %91 = tpu.reciprocal %90 {approx = true} : vector<1x16x1xf32> -> vector<1x16x1xf32>
    %92 = vector.broadcast %91 : vector<1x16x1xf32> to vector<1x16x16xf32>
    %93 = arith.mulf %88, %92 : vector<1x16x16xf32>
    "tpu.trace_start"() <{level = 10 : i32, message = "wnm,wmd->wnd"}> : () -> ()
    %cst_31 = arith.constant dense<0.000000e+00> : vector<1x16x8xf32>
    %94 = tpu.matmul %93, %59, %cst_31 {dimension_numbers = #tpu.dot_dimension_numbers<[2], [1], [1], [2], [0, 0, 0, 1, 1, 2], [0], [0]>} : vector<1x16x16xf32>, vector<1x16x8xf32>, vector<1x16x8xf32> -> vector<1x16x8xf32>
    "tpu.trace_stop"() : () -> ()
    %95 = vector.shape_cast %94 : vector<1x16x8xf32> to vector<16x8xf32>
    %96 = vector.extract_strided_slice %9 {offsets = [8, 0], sizes = [8, 32], strides = [1, 1]} : vector<32x32xf32> to vector<8x32xf32>
    %cst_32 = arith.constant dense<0.000000e+00> : vector<16x32xf32>
    %97 = tpu.matmul %95, %96, %cst_32 {dimension_numbers = #tpu.dot_dimension_numbers<[1], [0], [0], [1], [0, 0, 1, 1], [], []>} : vector<16x8xf32>, vector<8x32xf32>, vector<16x32xf32> -> vector<16x32xf32>
    %98 = arith.addf %53, %97 : vector<16x32xf32>
    %99 = vector.extract_strided_slice %8 {offsets = [0, 16], sizes = [16, 8], strides = [1, 1]} : vector<16x96xf32> to vector<16x8xf32>
    %100 = vector.shape_cast %99 : vector<16x8xf32> to vector<1x16x8xf32>
    %101 = vector.extract_strided_slice %8 {offsets = [0, 48], sizes = [16, 8], strides = [1, 1]} : vector<16x96xf32> to vector<16x8xf32>
    %102 = vector.shape_cast %101 : vector<16x8xf32> to vector<1x16x8xf32>
    %103 = vector.extract_strided_slice %8 {offsets = [0, 80], sizes = [16, 8], strides = [1, 1]} : vector<16x96xf32> to vector<16x8xf32>
    %104 = vector.shape_cast %103 : vector<16x8xf32> to vector<1x16x8xf32>
    %105 = arith.mulf %100, %100 : vector<1x16x8xf32>
    %cst_33 = arith.constant dense<0.000000e+00> : vector<1x16xf32>
    %106 = vector.multi_reduction <add>, %105, %cst_33 [2] : vector<1x16x8xf32> to vector<1x16xf32>
    %107 = vector.shape_cast %106 : vector<1x16xf32> to vector<1x16x1xf32>
    %cst_34 = arith.constant 1.000000e-24 : f32
    %108 = vector.broadcast %cst_34 : f32 to vector<1x16x1xf32>
    %109 = arith.maximumf %107, %108 : vector<1x16x1xf32>
    %110 = math.rsqrt %109 : vector<1x16x1xf32>
    %c2 = arith.constant 2 : index
    %111 = memref.load %arg6[%c2] : memref<4xf32, #tpu.memory_space<smem>>
    %112 = vector.broadcast %111 : f32 to vector<1x16x1xf32>
    %113 = arith.mulf %110, %112 : vector<1x16x1xf32>
    %114 = vector.broadcast %113 : vector<1x16x1xf32> to vector<1x16x8xf32>
    %115 = arith.mulf %100, %114 : vector<1x16x8xf32>
    %116 = arith.mulf %102, %102 : vector<1x16x8xf32>
    %cst_35 = arith.constant dense<0.000000e+00> : vector<1x16xf32>
    %117 = vector.multi_reduction <add>, %116, %cst_35 [2] : vector<1x16x8xf32> to vector<1x16xf32>
    %118 = vector.shape_cast %117 : vector<1x16xf32> to vector<1x16x1xf32>
    %cst_36 = arith.constant 1.000000e-24 : f32
    %119 = vector.broadcast %cst_36 : f32 to vector<1x16x1xf32>
    %120 = arith.maximumf %118, %119 : vector<1x16x1xf32>
    %121 = math.rsqrt %120 : vector<1x16x1xf32>
    %122 = vector.broadcast %121 : vector<1x16x1xf32> to vector<1x16x8xf32>
    %123 = arith.mulf %102, %122 : vector<1x16x8xf32>
    "tpu.trace_start"() <{level = 10 : i32, message = "wnd,wmd->wnm"}> : () -> ()
    %cst_37 = arith.constant dense<0.000000e+00> : vector<1x16x16xf32>
    %124 = tpu.matmul %115, %123, %cst_37 {dimension_numbers = #tpu.dot_dimension_numbers<[2], [2], [1], [1], [0, 0, 0, 1, 1, 1], [0], [0]>} : vector<1x16x8xf32>, vector<1x16x8xf32>, vector<1x16x16xf32> -> vector<1x16x16xf32>
    "tpu.trace_stop"() : () -> ()
    %c2_38 = arith.constant 2 : index
    %c0_39 = arith.constant 0 : index
    %c0_40 = arith.constant 0 : index
    %125 = vector.load %arg5[%c2_38, %c0_39, %c0_40] : memref<4x16x16xf32, #tpu.memory_space<vmem>>, vector<1x16x16xf32>
    %126 = vector.shape_cast %125 : vector<1x16x16xf32> to vector<16x16xf32>
    %127 = vector.shape_cast %126 : vector<16x16xf32> to vector<1x16x16xf32>
    %128 = arith.addf %124, %127 : vector<1x16x16xf32>
    %cst_41 = arith.constant dense<0xFF800000> : vector<1x16xf32>
    %129 = vector.multi_reduction <maximumf>, %128, %cst_41 [2] : vector<1x16x16xf32> to vector<1x16xf32>
    %130 = vector.shape_cast %129 : vector<1x16xf32> to vector<1x16x1xf32>
    %131 = vector.broadcast %130 : vector<1x16x1xf32> to vector<1x16x16xf32>
    %132 = arith.subf %128, %131 : vector<1x16x16xf32>
    %133 = math.exp %132 : vector<1x16x16xf32>
    %cst_42 = arith.constant dense<0.000000e+00> : vector<1x16xf32>
    %134 = vector.multi_reduction <add>, %133, %cst_42 [2] : vector<1x16x16xf32> to vector<1x16xf32>
    %135 = vector.shape_cast %134 : vector<1x16xf32> to vector<1x16x1xf32>
    %136 = tpu.reciprocal %135 {approx = true} : vector<1x16x1xf32> -> vector<1x16x1xf32>
    %137 = vector.broadcast %136 : vector<1x16x1xf32> to vector<1x16x16xf32>
    %138 = arith.mulf %133, %137 : vector<1x16x16xf32>
    "tpu.trace_start"() <{level = 10 : i32, message = "wnm,wmd->wnd"}> : () -> ()
    %cst_43 = arith.constant dense<0.000000e+00> : vector<1x16x8xf32>
    %139 = tpu.matmul %138, %104, %cst_43 {dimension_numbers = #tpu.dot_dimension_numbers<[2], [1], [1], [2], [0, 0, 0, 1, 1, 2], [0], [0]>} : vector<1x16x16xf32>, vector<1x16x8xf32>, vector<1x16x8xf32> -> vector<1x16x8xf32>
    "tpu.trace_stop"() : () -> ()
    %140 = vector.shape_cast %139 : vector<1x16x8xf32> to vector<16x8xf32>
    %141 = vector.extract_strided_slice %9 {offsets = [16, 0], sizes = [8, 32], strides = [1, 1]} : vector<32x32xf32> to vector<8x32xf32>
    %cst_44 = arith.constant dense<0.000000e+00> : vector<16x32xf32>
    %142 = tpu.matmul %140, %141, %cst_44 {dimension_numbers = #tpu.dot_dimension_numbers<[1], [0], [0], [1], [0, 0, 1, 1], [], []>} : vector<16x8xf32>, vector<8x32xf32>, vector<16x32xf32> -> vector<16x32xf32>
    %143 = arith.addf %98, %142 : vector<16x32xf32>
    %144 = vector.extract_strided_slice %8 {offsets = [0, 24], sizes = [16, 8], strides = [1, 1]} : vector<16x96xf32> to vector<16x8xf32>
    %145 = vector.shape_cast %144 : vector<16x8xf32> to vector<1x16x8xf32>
    %146 = vector.extract_strided_slice %8 {offsets = [0, 56], sizes = [16, 8], strides = [1, 1]} : vector<16x96xf32> to vector<16x8xf32>
    %147 = vector.shape_cast %146 : vector<16x8xf32> to vector<1x16x8xf32>
    %148 = vector.extract_strided_slice %8 {offsets = [0, 88], sizes = [16, 8], strides = [1, 1]} : vector<16x96xf32> to vector<16x8xf32>
    %149 = vector.shape_cast %148 : vector<16x8xf32> to vector<1x16x8xf32>
    %150 = arith.mulf %145, %145 : vector<1x16x8xf32>
    %cst_45 = arith.constant dense<0.000000e+00> : vector<1x16xf32>
    %151 = vector.multi_reduction <add>, %150, %cst_45 [2] : vector<1x16x8xf32> to vector<1x16xf32>
    %152 = vector.shape_cast %151 : vector<1x16xf32> to vector<1x16x1xf32>
    %cst_46 = arith.constant 1.000000e-24 : f32
    %153 = vector.broadcast %cst_46 : f32 to vector<1x16x1xf32>
    %154 = arith.maximumf %152, %153 : vector<1x16x1xf32>
    %155 = math.rsqrt %154 : vector<1x16x1xf32>
    %c3 = arith.constant 3 : index
    %156 = memref.load %arg6[%c3] : memref<4xf32, #tpu.memory_space<smem>>
    %157 = vector.broadcast %156 : f32 to vector<1x16x1xf32>
    %158 = arith.mulf %155, %157 : vector<1x16x1xf32>
    %159 = vector.broadcast %158 : vector<1x16x1xf32> to vector<1x16x8xf32>
    %160 = arith.mulf %145, %159 : vector<1x16x8xf32>
    %161 = arith.mulf %147, %147 : vector<1x16x8xf32>
    %cst_47 = arith.constant dense<0.000000e+00> : vector<1x16xf32>
    %162 = vector.multi_reduction <add>, %161, %cst_47 [2] : vector<1x16x8xf32> to vector<1x16xf32>
    %163 = vector.shape_cast %162 : vector<1x16xf32> to vector<1x16x1xf32>
    %cst_48 = arith.constant 1.000000e-24 : f32
    %164 = vector.broadcast %cst_48 : f32 to vector<1x16x1xf32>
    %165 = arith.maximumf %163, %164 : vector<1x16x1xf32>
    %166 = math.rsqrt %165 : vector<1x16x1xf32>
    %167 = vector.broadcast %166 : vector<1x16x1xf32> to vector<1x16x8xf32>
    %168 = arith.mulf %147, %167 : vector<1x16x8xf32>
    "tpu.trace_start"() <{level = 10 : i32, message = "wnd,wmd->wnm"}> : () -> ()
    %cst_49 = arith.constant dense<0.000000e+00> : vector<1x16x16xf32>
    %169 = tpu.matmul %160, %168, %cst_49 {dimension_numbers = #tpu.dot_dimension_numbers<[2], [2], [1], [1], [0, 0, 0, 1, 1, 1], [0], [0]>} : vector<1x16x8xf32>, vector<1x16x8xf32>, vector<1x16x16xf32> -> vector<1x16x16xf32>
    "tpu.trace_stop"() : () -> ()
    %c3_50 = arith.constant 3 : index
    %c0_51 = arith.constant 0 : index
    %c0_52 = arith.constant 0 : index
    %170 = vector.load %arg5[%c3_50, %c0_51, %c0_52] : memref<4x16x16xf32, #tpu.memory_space<vmem>>, vector<1x16x16xf32>
    %171 = vector.shape_cast %170 : vector<1x16x16xf32> to vector<16x16xf32>
    %172 = vector.shape_cast %171 : vector<16x16xf32> to vector<1x16x16xf32>
    %173 = arith.addf %169, %172 : vector<1x16x16xf32>
    %cst_53 = arith.constant dense<0xFF800000> : vector<1x16xf32>
    %174 = vector.multi_reduction <maximumf>, %173, %cst_53 [2] : vector<1x16x16xf32> to vector<1x16xf32>
    %175 = vector.shape_cast %174 : vector<1x16xf32> to vector<1x16x1xf32>
    %176 = vector.broadcast %175 : vector<1x16x1xf32> to vector<1x16x16xf32>
    %177 = arith.subf %173, %176 : vector<1x16x16xf32>
    %178 = math.exp %177 : vector<1x16x16xf32>
    %cst_54 = arith.constant dense<0.000000e+00> : vector<1x16xf32>
    %179 = vector.multi_reduction <add>, %178, %cst_54 [2] : vector<1x16x16xf32> to vector<1x16xf32>
    %180 = vector.shape_cast %179 : vector<1x16xf32> to vector<1x16x1xf32>
    %181 = tpu.reciprocal %180 {approx = true} : vector<1x16x1xf32> -> vector<1x16x1xf32>
    %182 = vector.broadcast %181 : vector<1x16x1xf32> to vector<1x16x16xf32>
    %183 = arith.mulf %178, %182 : vector<1x16x16xf32>
    "tpu.trace_start"() <{level = 10 : i32, message = "wnm,wmd->wnd"}> : () -> ()
    %cst_55 = arith.constant dense<0.000000e+00> : vector<1x16x8xf32>
    %184 = tpu.matmul %183, %149, %cst_55 {dimension_numbers = #tpu.dot_dimension_numbers<[2], [1], [1], [2], [0, 0, 0, 1, 1, 2], [0], [0]>} : vector<1x16x16xf32>, vector<1x16x8xf32>, vector<1x16x8xf32> -> vector<1x16x8xf32>
    "tpu.trace_stop"() : () -> ()
    %185 = vector.shape_cast %184 : vector<1x16x8xf32> to vector<16x8xf32>
    %186 = vector.extract_strided_slice %9 {offsets = [24, 0], sizes = [8, 32], strides = [1, 1]} : vector<32x32xf32> to vector<8x32xf32>
    %cst_56 = arith.constant dense<0.000000e+00> : vector<16x32xf32>
    %187 = tpu.matmul %185, %186, %cst_56 {dimension_numbers = #tpu.dot_dimension_numbers<[1], [0], [0], [1], [0, 0, 1, 1], [], []>} : vector<16x8xf32>, vector<8x32xf32>, vector<16x32xf32> -> vector<16x32xf32>
    %188 = arith.addf %143, %187 : vector<16x32xf32>
    %c0_57 = arith.constant 0 : index
    %c0_58 = arith.constant 0 : index
    %189 = vector.load %arg8[%c0_57, %c0_58] : memref<1x32xf32, #tpu.memory_space<vmem>>, vector<1x32xf32>
    %190 = vector.broadcast %189 : vector<1x32xf32> to vector<16x32xf32>
    %191 = arith.addf %188, %190 : vector<16x32xf32>
    %c0_59 = arith.constant 0 : index
    %c0_60 = arith.constant 0 : index
    %192 = vector.load %arg9[%c0_59, %c0_60] : memref<4x32xf32, #tpu.memory_space<vmem>>, vector<1x32xf32>
    %193 = vector.broadcast %1 : f32 to vector<1x32xf32>
    %194 = arith.mulf %193, %192 : vector<1x32xf32>
    %c1_61 = arith.constant 1 : index
    %c0_62 = arith.constant 0 : index
    %195 = vector.load %arg9[%c1_61, %c0_62] : memref<4x32xf32, #tpu.memory_space<vmem>>, vector<1x32xf32>
    %196 = arith.addf %194, %195 : vector<1x32xf32>
    %c2_63 = arith.constant 2 : index
    %c0_64 = arith.constant 0 : index
    %197 = vector.load %arg9[%c2_63, %c0_64] : memref<4x32xf32, #tpu.memory_space<vmem>>, vector<1x32xf32>
    %198 = vector.broadcast %1 : f32 to vector<1x32xf32>
    %199 = arith.mulf %198, %197 : vector<1x32xf32>
    %c3_65 = arith.constant 3 : index
    %c0_66 = arith.constant 0 : index
    %200 = vector.load %arg9[%c3_65, %c0_66] : memref<4x32xf32, #tpu.memory_space<vmem>>, vector<1x32xf32>
    %201 = arith.addf %199, %200 : vector<1x32xf32>
    %cst_67 = arith.constant dense<0.000000e+00> : vector<16xf32>
    %202 = vector.multi_reduction <add>, %191, %cst_67 [1] : vector<16x32xf32> to vector<16xf32>
    %203 = vector.shape_cast %202 : vector<16xf32> to vector<16x1xf32>
    %cst_68 = arith.constant 3.200000e+01 : f32
    %204 = vector.broadcast %cst_68 : f32 to vector<16x1xf32>
    %205 = arith.divf %203, %204 : vector<16x1xf32>
    %206 = arith.mulf %191, %191 : vector<16x32xf32>
    %cst_69 = arith.constant dense<0.000000e+00> : vector<16xf32>
    %207 = vector.multi_reduction <add>, %206, %cst_69 [1] : vector<16x32xf32> to vector<16xf32>
    %208 = vector.shape_cast %207 : vector<16xf32> to vector<16x1xf32>
    %cst_70 = arith.constant 3.200000e+01 : f32
    %209 = vector.broadcast %cst_70 : f32 to vector<16x1xf32>
    %210 = arith.divf %208, %209 : vector<16x1xf32>
    %211 = arith.mulf %205, %205 : vector<16x1xf32>
    %212 = arith.subf %210, %211 : vector<16x1xf32>
    %213 = vector.broadcast %205 : vector<16x1xf32> to vector<16x32xf32>
    %214 = arith.subf %191, %213 : vector<16x32xf32>
    %cst_71 = arith.constant 9.99999974E-6 : f32
    %215 = vector.broadcast %cst_71 : f32 to vector<16x1xf32>
    %216 = arith.addf %212, %215 : vector<16x1xf32>
    %217 = math.rsqrt %216 : vector<16x1xf32>
    %218 = vector.broadcast %217 : vector<16x1xf32> to vector<16x32xf32>
    %219 = arith.mulf %214, %218 : vector<16x32xf32>
    %220 = vector.broadcast %196 : vector<1x32xf32> to vector<16x32xf32>
    %221 = arith.mulf %220, %219 : vector<16x32xf32>
    %222 = arith.addf %3, %221 : vector<16x32xf32>
    %223 = vector.broadcast %201 : vector<1x32xf32> to vector<16x32xf32>
    %224 = arith.addf %222, %223 : vector<16x32xf32>
    %c0_72 = arith.constant 0 : index
    %c0_73 = arith.constant 0 : index
    %225 = vector.load %arg10[%c0_72, %c0_73] : memref<32x64xf32, #tpu.memory_space<vmem>>, vector<32x64xf32>
    %cst_74 = arith.constant dense<0.000000e+00> : vector<16x64xf32>
    %226 = tpu.matmul %224, %225, %cst_74 {dimension_numbers = #tpu.dot_dimension_numbers<[1], [0], [0], [1], [0, 0, 1, 1], [], []>} : vector<16x32xf32>, vector<32x64xf32>, vector<16x64xf32> -> vector<16x64xf32>
    %c0_75 = arith.constant 0 : index
    %c0_76 = arith.constant 0 : index
    %227 = vector.load %arg11[%c0_75, %c0_76] : memref<1x64xf32, #tpu.memory_space<vmem>>, vector<1x64xf32>
    %228 = vector.broadcast %227 : vector<1x64xf32> to vector<16x64xf32>
    %229 = arith.addf %226, %228 : vector<16x64xf32>
    %cst_77 = arith.constant 5.000000e-01 : f32
    %230 = vector.broadcast %cst_77 : f32 to vector<16x64xf32>
    %231 = arith.mulf %230, %229 : vector<16x64xf32>
    %cst_78 = arith.constant 0.707106769 : f32
    %232 = vector.broadcast %cst_78 : f32 to vector<16x64xf32>
    %233 = arith.mulf %229, %232 : vector<16x64xf32>
    %234 = math.erf %233 : vector<16x64xf32>
    %cst_79 = arith.constant 1.000000e+00 : f32
    %235 = vector.broadcast %cst_79 : f32 to vector<16x64xf32>
    %236 = arith.addf %235, %234 : vector<16x64xf32>
    %237 = arith.mulf %231, %236 : vector<16x64xf32>
    %c0_80 = arith.constant 0 : index
    %c0_81 = arith.constant 0 : index
    %238 = vector.load %arg12[%c0_80, %c0_81] : memref<64x32xf32, #tpu.memory_space<vmem>>, vector<64x32xf32>
    %cst_82 = arith.constant dense<0.000000e+00> : vector<16x32xf32>
    %239 = tpu.matmul %237, %238, %cst_82 {dimension_numbers = #tpu.dot_dimension_numbers<[1], [0], [0], [1], [0, 0, 1, 1], [], []>} : vector<16x64xf32>, vector<64x32xf32>, vector<16x32xf32> -> vector<16x32xf32>
    %c0_83 = arith.constant 0 : index
    %c0_84 = arith.constant 0 : index
    %240 = vector.load %arg13[%c0_83, %c0_84] : memref<1x32xf32, #tpu.memory_space<vmem>>, vector<1x32xf32>
    %241 = vector.broadcast %240 : vector<1x32xf32> to vector<16x32xf32>
    %242 = arith.addf %239, %241 : vector<16x32xf32>
    %c0_85 = arith.constant 0 : index
    %c0_86 = arith.constant 0 : index
    %243 = vector.load %arg14[%c0_85, %c0_86] : memref<4x32xf32, #tpu.memory_space<vmem>>, vector<1x32xf32>
    %244 = vector.broadcast %1 : f32 to vector<1x32xf32>
    %245 = arith.mulf %244, %243 : vector<1x32xf32>
    %c1_87 = arith.constant 1 : index
    %c0_88 = arith.constant 0 : index
    %246 = vector.load %arg14[%c1_87, %c0_88] : memref<4x32xf32, #tpu.memory_space<vmem>>, vector<1x32xf32>
    %247 = arith.addf %245, %246 : vector<1x32xf32>
    %c2_89 = arith.constant 2 : index
    %c0_90 = arith.constant 0 : index
    %248 = vector.load %arg14[%c2_89, %c0_90] : memref<4x32xf32, #tpu.memory_space<vmem>>, vector<1x32xf32>
    %249 = vector.broadcast %1 : f32 to vector<1x32xf32>
    %250 = arith.mulf %249, %248 : vector<1x32xf32>
    %c3_91 = arith.constant 3 : index
    %c0_92 = arith.constant 0 : index
    %251 = vector.load %arg14[%c3_91, %c0_92] : memref<4x32xf32, #tpu.memory_space<vmem>>, vector<1x32xf32>
    %252 = arith.addf %250, %251 : vector<1x32xf32>
    %cst_93 = arith.constant dense<0.000000e+00> : vector<16xf32>
    %253 = vector.multi_reduction <add>, %242, %cst_93 [1] : vector<16x32xf32> to vector<16xf32>
    %254 = vector.shape_cast %253 : vector<16xf32> to vector<16x1xf32>
    %cst_94 = arith.constant 3.200000e+01 : f32
    %255 = vector.broadcast %cst_94 : f32 to vector<16x1xf32>
    %256 = arith.divf %254, %255 : vector<16x1xf32>
    %257 = arith.mulf %242, %242 : vector<16x32xf32>
    %cst_95 = arith.constant dense<0.000000e+00> : vector<16xf32>
    %258 = vector.multi_reduction <add>, %257, %cst_95 [1] : vector<16x32xf32> to vector<16xf32>
    %259 = vector.shape_cast %258 : vector<16xf32> to vector<16x1xf32>
    %cst_96 = arith.constant 3.200000e+01 : f32
    %260 = vector.broadcast %cst_96 : f32 to vector<16x1xf32>
    %261 = arith.divf %259, %260 : vector<16x1xf32>
    %262 = arith.mulf %256, %256 : vector<16x1xf32>
    %263 = arith.subf %261, %262 : vector<16x1xf32>
    %264 = vector.broadcast %256 : vector<16x1xf32> to vector<16x32xf32>
    %265 = arith.subf %242, %264 : vector<16x32xf32>
    %cst_97 = arith.constant 9.99999974E-6 : f32
    %266 = vector.broadcast %cst_97 : f32 to vector<16x1xf32>
    %267 = arith.addf %263, %266 : vector<16x1xf32>
    %268 = math.rsqrt %267 : vector<16x1xf32>
    %269 = vector.broadcast %268 : vector<16x1xf32> to vector<16x32xf32>
    %270 = arith.mulf %265, %269 : vector<16x32xf32>
    %271 = vector.broadcast %247 : vector<1x32xf32> to vector<16x32xf32>
    %272 = arith.mulf %271, %270 : vector<16x32xf32>
    %273 = arith.addf %224, %272 : vector<16x32xf32>
    %274 = vector.broadcast %252 : vector<1x32xf32> to vector<16x32xf32>
    %275 = arith.addf %273, %274 : vector<16x32xf32>
    %c0_98 = arith.constant 0 : index
    %c0_99 = arith.constant 0 : index
    %c0_100 = arith.constant 0 : index
    %276 = vector.load %arg15[%c0_98, %c0_99, %c0_100] : memref<1x16x32xf32, #tpu.memory_space<vmem>>, vector<1x16x32xf32>
    %277 = vector.shape_cast %276 : vector<1x16x32xf32> to vector<16x32xf32>
    %278 = vector.shape_cast %275 : vector<16x32xf32> to vector<1x16x32xf32>
    tpu.vector_store %arg15[%c0_98, %c0_99, %c0_100], %278 {strides = array<i32>} : memref<1x16x32xf32, #tpu.memory_space<vmem>>, vector<1x16x32xf32>,
    return
  }
  func.func @transform_0(%arg0: i32) -> i32 {
    %c0_i32 = arith.constant 0 : i32
    %c0_i32_0 = arith.constant 0 : i32
    return %c0_i32 : i32
  }
  func.func @transform_1(%arg0: i32) -> (i32, i32, i32) {
    %c0_i32 = arith.constant 0 : i32
    %c0_i32_0 = arith.constant 0 : i32
    %c0_i32_1 = arith.constant 0 : i32
    return %arg0, %c0_i32, %c0_i32_0 : i32, i32, i32
  }
  func.func @transform_2(%arg0: i32) -> (i32, i32) {
    %c0_i32 = arith.constant 0 : i32
    %c0_i32_0 = arith.constant 0 : i32
    %c0_i32_1 = arith.constant 0 : i32
    return %c0_i32, %c0_i32_0 : i32, i32
  }
  func.func @transform_3(%arg0: i32) -> (i32, i32) {
    %c0_i32 = arith.constant 0 : i32
    %c0_i32_0 = arith.constant 0 : i32
    %c0_i32_1 = arith.constant 0 : i32
    return %c0_i32, %c0_i32_0 : i32, i32
  }
  func.func @transform_4(%arg0: i32) -> (i32, i32, i32) {
    %c0_i32 = arith.constant 0 : i32
    %c0_i32_0 = arith.constant 0 : i32
    %c0_i32_1 = arith.constant 0 : i32
    %c0_i32_2 = arith.constant 0 : i32
    return %c0_i32, %c0_i32_0, %c0_i32_1 : i32, i32, i32
  }
  func.func @transform_5(%arg0: i32) -> i32 {
    %c0_i32 = arith.constant 0 : i32
    %c0_i32_0 = arith.constant 0 : i32
    return %c0_i32 : i32
  }
  func.func @transform_6(%arg0: i32) -> (i32, i32) {
    %c0_i32 = arith.constant 0 : i32
    %c0_i32_0 = arith.constant 0 : i32
    %c0_i32_1 = arith.constant 0 : i32
    return %c0_i32, %c0_i32_0 : i32, i32
  }
  func.func @transform_7(%arg0: i32) -> (i32, i32) {
    %c0_i32 = arith.constant 0 : i32
    %c0_i32_0 = arith.constant 0 : i32
    %c0_i32_1 = arith.constant 0 : i32
    return %c0_i32, %c0_i32_0 : i32, i32
  }
  func.func @transform_8(%arg0: i32) -> (i32, i32) {
    %c0_i32 = arith.constant 0 : i32
    %c0_i32_0 = arith.constant 0 : i32
    %c0_i32_1 = arith.constant 0 : i32
    return %c0_i32, %c0_i32_0 : i32, i32
  }
  func.func @transform_9(%arg0: i32) -> (i32, i32) {
    %c0_i32 = arith.constant 0 : i32
    %c0_i32_0 = arith.constant 0 : i32
    %c0_i32_1 = arith.constant 0 : i32
    return %c0_i32, %c0_i32_0 : i32, i32
  }
  func.func @transform_10(%arg0: i32) -> (i32, i32) {
    %c0_i32 = arith.constant 0 : i32
    %c0_i32_0 = arith.constant 0 : i32
    %c0_i32_1 = arith.constant 0 : i32
    return %c0_i32, %c0_i32_0 : i32, i32
  }
  func.func @transform_11(%arg0: i32) -> (i32, i32) {
    %c0_i32 = arith.constant 0 : i32
    %c0_i32_0 = arith.constant 0 : i32
    %c0_i32_1 = arith.constant 0 : i32
    return %c0_i32, %c0_i32_0 : i32, i32
  }
  func.func @transform_12(%arg0: i32) -> (i32, i32) {
    %c0_i32 = arith.constant 0 : i32
    %c0_i32_0 = arith.constant 0 : i32
    %c0_i32_1 = arith.constant 0 : i32
    return %c0_i32, %c0_i32_0 : i32, i32
  }
  func.func @transform_13(%arg0: i32) -> (i32, i32) {
    %c0_i32 = arith.constant 0 : i32
    %c0_i32_0 = arith.constant 0 : i32
    %c0_i32_1 = arith.constant 0 : i32
    return %c0_i32, %c0_i32_0 : i32, i32
  }
  func.func @transform_14(%arg0: i32) -> (i32, i32, i32) {
    %c0_i32 = arith.constant 0 : i32
    %c0_i32_0 = arith.constant 0 : i32
    %c0_i32_1 = arith.constant 0 : i32
    return %arg0, %c0_i32, %c0_i32_0 : i32, i32, i32
  }
}

module attributes {stable_mosaic.version = 11 : i64} {
  func.func @_patch_unmerge_kernel(%arg0: i32, %arg1: memref<2xf32, #tpu.memory_space<smem>>, %arg2: memref<1x16x32xf32, #tpu.memory_space<vmem>>, %arg3: memref<32x64xf32, #tpu.memory_space<vmem>>, %arg4: memref<4x16xf32, #tpu.memory_space<vmem>>, %arg5: memref<16x16xf32, #tpu.memory_space<vmem>>, %arg6: memref<1x16x64xf32, #tpu.memory_space<vmem>>) attributes {dimension_semantics = [#tpu.dimension_semantics<parallel>], iteration_bounds = array<i64: 2>, scalar_prefetch = 0 : i64, scratch_operands = 0 : i64, tpu.core_type = #tpu.core_type<tc>, window_params = [{transform_indices = @transform_0, window_bounds = array<i64: 2>}, {transform_indices = @transform_1, window_bounds = array<i64: 1, 16, 32>}, {pipeline_mode = #tpu.pipeline_mode<synchronous>, transform_indices = @transform_2, window_bounds = array<i64: 32, 64>}, {pipeline_mode = #tpu.pipeline_mode<synchronous>, transform_indices = @transform_3, window_bounds = array<i64: 4, 16>}, {pipeline_mode = #tpu.pipeline_mode<synchronous>, transform_indices = @transform_4, window_bounds = array<i64: 16, 16>}, {transform_indices = @transform_5, window_bounds = array<i64: 1, 16, 64>}]} {
    %0 = arith.index_cast %arg0 : i32 to index
    %1 = memref.load %arg1[%0] : memref<2xf32, #tpu.memory_space<smem>>
    %c0 = arith.constant 0 : index
    %c0_0 = arith.constant 0 : index
    %c0_1 = arith.constant 0 : index
    %2 = vector.load %arg2[%c0, %c0_0, %c0_1] : memref<1x16x32xf32, #tpu.memory_space<vmem>>, vector<1x16x32xf32>
    %3 = vector.shape_cast %2 : vector<1x16x32xf32> to vector<16x32xf32>
    %c0_2 = arith.constant 0 : index
    %c0_3 = arith.constant 0 : index
    %4 = vector.load %arg3[%c0_2, %c0_3] : memref<32x64xf32, #tpu.memory_space<vmem>>, vector<32x64xf32>
    %cst = arith.constant dense<0.000000e+00> : vector<16x64xf32>
    %5 = tpu.matmul %3, %4, %cst {dimension_numbers = #tpu.dot_dimension_numbers<[1], [0], [0], [1], [0, 0, 1, 1], [], []>} : vector<16x32xf32>, vector<32x64xf32>, vector<16x64xf32> -> vector<16x64xf32>
    %c0_4 = arith.constant 0 : index
    %c0_5 = arith.constant 0 : index
    %6 = vector.load %arg4[%c0_4, %c0_5] : memref<4x16xf32, #tpu.memory_space<vmem>>, vector<1x16xf32>
    %7 = vector.broadcast %1 : f32 to vector<1x16xf32>
    %8 = arith.mulf %7, %6 : vector<1x16xf32>
    %c1 = arith.constant 1 : index
    %c0_6 = arith.constant 0 : index
    %9 = vector.load %arg4[%c1, %c0_6] : memref<4x16xf32, #tpu.memory_space<vmem>>, vector<1x16xf32>
    %10 = arith.addf %8, %9 : vector<1x16xf32>
    %c2 = arith.constant 2 : index
    %c0_7 = arith.constant 0 : index
    %11 = vector.load %arg4[%c2, %c0_7] : memref<4x16xf32, #tpu.memory_space<vmem>>, vector<1x16xf32>
    %12 = vector.broadcast %1 : f32 to vector<1x16xf32>
    %13 = arith.mulf %12, %11 : vector<1x16xf32>
    %c3 = arith.constant 3 : index
    %c0_8 = arith.constant 0 : index
    %14 = vector.load %arg4[%c3, %c0_8] : memref<4x16xf32, #tpu.memory_space<vmem>>, vector<1x16xf32>
    %15 = arith.addf %13, %14 : vector<1x16xf32>
    %c0_9 = arith.constant 0 : index
    %c0_10 = arith.constant 0 : index
    %16 = vector.load %arg5[%c0_9, %c0_10] : memref<16x16xf32, #tpu.memory_space<vmem>>, vector<16x16xf32>
    %17 = vector.extract_strided_slice %5 {offsets = [0, 0], sizes = [16, 16], strides = [1, 1]} : vector<16x64xf32> to vector<16x16xf32>
    %cst_11 = arith.constant dense<0.000000e+00> : vector<16xf32>
    %18 = vector.multi_reduction <add>, %17, %cst_11 [1] : vector<16x16xf32> to vector<16xf32>
    %19 = vector.shape_cast %18 : vector<16xf32> to vector<16x1xf32>
    %cst_12 = arith.constant 1.600000e+01 : f32
    %20 = vector.broadcast %cst_12 : f32 to vector<16x1xf32>
    %21 = arith.divf %19, %20 : vector<16x1xf32>
    %22 = arith.mulf %17, %17 : vector<16x16xf32>
    %cst_13 = arith.constant dense<0.000000e+00> : vector<16xf32>
    %23 = vector.multi_reduction <add>, %22, %cst_13 [1] : vector<16x16xf32> to vector<16xf32>
    %24 = vector.shape_cast %23 : vector<16xf32> to vector<16x1xf32>
    %cst_14 = arith.constant 1.600000e+01 : f32
    %25 = vector.broadcast %cst_14 : f32 to vector<16x1xf32>
    %26 = arith.divf %24, %25 : vector<16x1xf32>
    %27 = arith.mulf %21, %21 : vector<16x1xf32>
    %28 = arith.subf %26, %27 : vector<16x1xf32>
    %29 = vector.broadcast %21 : vector<16x1xf32> to vector<16x16xf32>
    %30 = arith.subf %17, %29 : vector<16x16xf32>
    %cst_15 = arith.constant 9.99999974E-6 : f32
    %31 = vector.broadcast %cst_15 : f32 to vector<16x1xf32>
    %32 = arith.addf %28, %31 : vector<16x1xf32>
    %33 = math.rsqrt %32 : vector<16x1xf32>
    %34 = vector.broadcast %33 : vector<16x1xf32> to vector<16x16xf32>
    %35 = arith.mulf %30, %34 : vector<16x16xf32>
    %36 = vector.broadcast %10 : vector<1x16xf32> to vector<16x16xf32>
    %37 = arith.mulf %36, %35 : vector<16x16xf32>
    %38 = vector.broadcast %15 : vector<1x16xf32> to vector<16x16xf32>
    %39 = arith.addf %37, %38 : vector<16x16xf32>
    %cst_16 = arith.constant dense<0.000000e+00> : vector<16x16xf32>
    %40 = tpu.matmul %39, %16, %cst_16 {dimension_numbers = #tpu.dot_dimension_numbers<[1], [0], [0], [1], [0, 0, 1, 1], [], []>} : vector<16x16xf32>, vector<16x16xf32>, vector<16x16xf32> -> vector<16x16xf32>
    %41 = vector.extract_strided_slice %5 {offsets = [0, 16], sizes = [16, 16], strides = [1, 1]} : vector<16x64xf32> to vector<16x16xf32>
    %cst_17 = arith.constant dense<0.000000e+00> : vector<16xf32>
    %42 = vector.multi_reduction <add>, %41, %cst_17 [1] : vector<16x16xf32> to vector<16xf32>
    %43 = vector.shape_cast %42 : vector<16xf32> to vector<16x1xf32>
    %cst_18 = arith.constant 1.600000e+01 : f32
    %44 = vector.broadcast %cst_18 : f32 to vector<16x1xf32>
    %45 = arith.divf %43, %44 : vector<16x1xf32>
    %46 = arith.mulf %41, %41 : vector<16x16xf32>
    %cst_19 = arith.constant dense<0.000000e+00> : vector<16xf32>
    %47 = vector.multi_reduction <add>, %46, %cst_19 [1] : vector<16x16xf32> to vector<16xf32>
    %48 = vector.shape_cast %47 : vector<16xf32> to vector<16x1xf32>
    %cst_20 = arith.constant 1.600000e+01 : f32
    %49 = vector.broadcast %cst_20 : f32 to vector<16x1xf32>
    %50 = arith.divf %48, %49 : vector<16x1xf32>
    %51 = arith.mulf %45, %45 : vector<16x1xf32>
    %52 = arith.subf %50, %51 : vector<16x1xf32>
    %53 = vector.broadcast %45 : vector<16x1xf32> to vector<16x16xf32>
    %54 = arith.subf %41, %53 : vector<16x16xf32>
    %cst_21 = arith.constant 9.99999974E-6 : f32
    %55 = vector.broadcast %cst_21 : f32 to vector<16x1xf32>
    %56 = arith.addf %52, %55 : vector<16x1xf32>
    %57 = math.rsqrt %56 : vector<16x1xf32>
    %58 = vector.broadcast %57 : vector<16x1xf32> to vector<16x16xf32>
    %59 = arith.mulf %54, %58 : vector<16x16xf32>
    %60 = vector.broadcast %10 : vector<1x16xf32> to vector<16x16xf32>
    %61 = arith.mulf %60, %59 : vector<16x16xf32>
    %62 = vector.broadcast %15 : vector<1x16xf32> to vector<16x16xf32>
    %63 = arith.addf %61, %62 : vector<16x16xf32>
    %cst_22 = arith.constant dense<0.000000e+00> : vector<16x16xf32>
    %64 = tpu.matmul %63, %16, %cst_22 {dimension_numbers = #tpu.dot_dimension_numbers<[1], [0], [0], [1], [0, 0, 1, 1], [], []>} : vector<16x16xf32>, vector<16x16xf32>, vector<16x16xf32> -> vector<16x16xf32>
    %65 = vector.extract_strided_slice %5 {offsets = [0, 32], sizes = [16, 16], strides = [1, 1]} : vector<16x64xf32> to vector<16x16xf32>
    %cst_23 = arith.constant dense<0.000000e+00> : vector<16xf32>
    %66 = vector.multi_reduction <add>, %65, %cst_23 [1] : vector<16x16xf32> to vector<16xf32>
    %67 = vector.shape_cast %66 : vector<16xf32> to vector<16x1xf32>
    %cst_24 = arith.constant 1.600000e+01 : f32
    %68 = vector.broadcast %cst_24 : f32 to vector<16x1xf32>
    %69 = arith.divf %67, %68 : vector<16x1xf32>
    %70 = arith.mulf %65, %65 : vector<16x16xf32>
    %cst_25 = arith.constant dense<0.000000e+00> : vector<16xf32>
    %71 = vector.multi_reduction <add>, %70, %cst_25 [1] : vector<16x16xf32> to vector<16xf32>
    %72 = vector.shape_cast %71 : vector<16xf32> to vector<16x1xf32>
    %cst_26 = arith.constant 1.600000e+01 : f32
    %73 = vector.broadcast %cst_26 : f32 to vector<16x1xf32>
    %74 = arith.divf %72, %73 : vector<16x1xf32>
    %75 = arith.mulf %69, %69 : vector<16x1xf32>
    %76 = arith.subf %74, %75 : vector<16x1xf32>
    %77 = vector.broadcast %69 : vector<16x1xf32> to vector<16x16xf32>
    %78 = arith.subf %65, %77 : vector<16x16xf32>
    %cst_27 = arith.constant 9.99999974E-6 : f32
    %79 = vector.broadcast %cst_27 : f32 to vector<16x1xf32>
    %80 = arith.addf %76, %79 : vector<16x1xf32>
    %81 = math.rsqrt %80 : vector<16x1xf32>
    %82 = vector.broadcast %81 : vector<16x1xf32> to vector<16x16xf32>
    %83 = arith.mulf %78, %82 : vector<16x16xf32>
    %84 = vector.broadcast %10 : vector<1x16xf32> to vector<16x16xf32>
    %85 = arith.mulf %84, %83 : vector<16x16xf32>
    %86 = vector.broadcast %15 : vector<1x16xf32> to vector<16x16xf32>
    %87 = arith.addf %85, %86 : vector<16x16xf32>
    %cst_28 = arith.constant dense<0.000000e+00> : vector<16x16xf32>
    %88 = tpu.matmul %87, %16, %cst_28 {dimension_numbers = #tpu.dot_dimension_numbers<[1], [0], [0], [1], [0, 0, 1, 1], [], []>} : vector<16x16xf32>, vector<16x16xf32>, vector<16x16xf32> -> vector<16x16xf32>
    %89 = vector.extract_strided_slice %5 {offsets = [0, 48], sizes = [16, 16], strides = [1, 1]} : vector<16x64xf32> to vector<16x16xf32>
    %cst_29 = arith.constant dense<0.000000e+00> : vector<16xf32>
    %90 = vector.multi_reduction <add>, %89, %cst_29 [1] : vector<16x16xf32> to vector<16xf32>
    %91 = vector.shape_cast %90 : vector<16xf32> to vector<16x1xf32>
    %cst_30 = arith.constant 1.600000e+01 : f32
    %92 = vector.broadcast %cst_30 : f32 to vector<16x1xf32>
    %93 = arith.divf %91, %92 : vector<16x1xf32>
    %94 = arith.mulf %89, %89 : vector<16x16xf32>
    %cst_31 = arith.constant dense<0.000000e+00> : vector<16xf32>
    %95 = vector.multi_reduction <add>, %94, %cst_31 [1] : vector<16x16xf32> to vector<16xf32>
    %96 = vector.shape_cast %95 : vector<16xf32> to vector<16x1xf32>
    %cst_32 = arith.constant 1.600000e+01 : f32
    %97 = vector.broadcast %cst_32 : f32 to vector<16x1xf32>
    %98 = arith.divf %96, %97 : vector<16x1xf32>
    %99 = arith.mulf %93, %93 : vector<16x1xf32>
    %100 = arith.subf %98, %99 : vector<16x1xf32>
    %101 = vector.broadcast %93 : vector<16x1xf32> to vector<16x16xf32>
    %102 = arith.subf %89, %101 : vector<16x16xf32>
    %cst_33 = arith.constant 9.99999974E-6 : f32
    %103 = vector.broadcast %cst_33 : f32 to vector<16x1xf32>
    %104 = arith.addf %100, %103 : vector<16x1xf32>
    %105 = math.rsqrt %104 : vector<16x1xf32>
    %106 = vector.broadcast %105 : vector<16x1xf32> to vector<16x16xf32>
    %107 = arith.mulf %102, %106 : vector<16x16xf32>
    %108 = vector.broadcast %10 : vector<1x16xf32> to vector<16x16xf32>
    %109 = arith.mulf %108, %107 : vector<16x16xf32>
    %110 = vector.broadcast %15 : vector<1x16xf32> to vector<16x16xf32>
    %111 = arith.addf %109, %110 : vector<16x16xf32>
    %cst_34 = arith.constant dense<0.000000e+00> : vector<16x16xf32>
    %112 = tpu.matmul %111, %16, %cst_34 {dimension_numbers = #tpu.dot_dimension_numbers<[1], [0], [0], [1], [0, 0, 1, 1], [], []>} : vector<16x16xf32>, vector<16x16xf32>, vector<16x16xf32> -> vector<16x16xf32>
    %113 = tpu.concatenate %40, %64, %88, %112 in 1 : vector<16x16xf32>, vector<16x16xf32>, vector<16x16xf32>, vector<16x16xf32> -> vector<16x64xf32>
    %c0_35 = arith.constant 0 : index
    %c0_36 = arith.constant 0 : index
    %c0_37 = arith.constant 0 : index
    %114 = vector.load %arg6[%c0_35, %c0_36, %c0_37] : memref<1x16x64xf32, #tpu.memory_space<vmem>>, vector<1x16x64xf32>
    %115 = vector.shape_cast %114 : vector<1x16x64xf32> to vector<16x64xf32>
    %116 = vector.shape_cast %113 : vector<16x64xf32> to vector<1x16x64xf32>
    tpu.vector_store %arg6[%c0_35, %c0_36, %c0_37], %116 {strides = array<i32>} : memref<1x16x64xf32, #tpu.memory_space<vmem>>, vector<1x16x64xf32>,
    return
  }
  func.func @transform_0(%arg0: i32) -> i32 {
    %c0_i32 = arith.constant 0 : i32
    %c0_i32_0 = arith.constant 0 : i32
    return %c0_i32 : i32
  }
  func.func @transform_1(%arg0: i32) -> (i32, i32, i32) {
    %c0_i32 = arith.constant 0 : i32
    %c0_i32_0 = arith.constant 0 : i32
    %c0_i32_1 = arith.constant 0 : i32
    return %arg0, %c0_i32, %c0_i32_0 : i32, i32, i32
  }
  func.func @transform_2(%arg0: i32) -> (i32, i32) {
    %c0_i32 = arith.constant 0 : i32
    %c0_i32_0 = arith.constant 0 : i32
    %c0_i32_1 = arith.constant 0 : i32
    return %c0_i32, %c0_i32_0 : i32, i32
  }
  func.func @transform_3(%arg0: i32) -> (i32, i32) {
    %c0_i32 = arith.constant 0 : i32
    %c0_i32_0 = arith.constant 0 : i32
    %c0_i32_1 = arith.constant 0 : i32
    return %c0_i32, %c0_i32_0 : i32, i32
  }
  func.func @transform_4(%arg0: i32) -> (i32, i32) {
    %c0_i32 = arith.constant 0 : i32
    %c0_i32_0 = arith.constant 0 : i32
    %c0_i32_1 = arith.constant 0 : i32
    return %c0_i32, %c0_i32_0 : i32, i32
  }
  func.func @transform_5(%arg0: i32) -> (i32, i32, i32) {
    %c0_i32 = arith.constant 0 : i32
    %c0_i32_0 = arith.constant 0 : i32
    %c0_i32_1 = arith.constant 0 : i32
    return %arg0, %c0_i32, %c0_i32_0 : i32, i32, i32
  }
}

module attributes {stable_mosaic.version = 11 : i64} {
  func.func @_fused_block_kernel(%arg0: i32, %arg1: memref<2xf32, #tpu.memory_space<smem>>, %arg2: memref<1x64x16xf32, #tpu.memory_space<vmem>>, %arg3: memref<16x48xf32, #tpu.memory_space<vmem>>, %arg4: memref<1x48xf32, #tpu.memory_space<vmem>>, %arg5: memref<2x16x16xf32, #tpu.memory_space<vmem>>, %arg6: memref<4x16x16xf32, #tpu.memory_space<vmem>>, %arg7: memref<2xf32, #tpu.memory_space<smem>>, %arg8: memref<16x16xf32, #tpu.memory_space<vmem>>, %arg9: memref<1x16xf32, #tpu.memory_space<vmem>>, %arg10: memref<4x16xf32, #tpu.memory_space<vmem>>, %arg11: memref<16x32xf32, #tpu.memory_space<vmem>>, %arg12: memref<1x32xf32, #tpu.memory_space<vmem>>, %arg13: memref<32x16xf32, #tpu.memory_space<vmem>>, %arg14: memref<1x16xf32, #tpu.memory_space<vmem>>, %arg15: memref<4x16xf32, #tpu.memory_space<vmem>>, %arg16: memref<1x64x16xf32, #tpu.memory_space<vmem>>) attributes {dimension_semantics = [#tpu.dimension_semantics<parallel>], iteration_bounds = array<i64: 2>, scalar_prefetch = 0 : i64, scratch_operands = 0 : i64, tpu.core_type = #tpu.core_type<tc>, window_params = [{transform_indices = @transform_0, window_bounds = array<i64: 2>}, {transform_indices = @transform_1, window_bounds = array<i64: 1, 64, 16>}, {pipeline_mode = #tpu.pipeline_mode<synchronous>, transform_indices = @transform_2, window_bounds = array<i64: 16, 48>}, {pipeline_mode = #tpu.pipeline_mode<synchronous>, transform_indices = @transform_3, window_bounds = array<i64: 1, 48>}, {pipeline_mode = #tpu.pipeline_mode<synchronous>, transform_indices = @transform_4, window_bounds = array<i64: 2, 16, 16>}, {pipeline_mode = #tpu.pipeline_mode<synchronous>, transform_indices = @transform_5, window_bounds = array<i64: 4, 16, 16>}, {transform_indices = @transform_6, window_bounds = array<i64: 2>}, {pipeline_mode = #tpu.pipeline_mode<synchronous>, transform_indices = @transform_7, window_bounds = array<i64: 16, 16>}, {pipeline_mode = #tpu.pipeline_mode<synchronous>, transform_indices = @transform_8, window_bounds = array<i64: 1, 16>}, {pipeline_mode = #tpu.pipeline_mode<synchronous>, transform_indices = @transform_9, window_bounds = array<i64: 4, 16>}, {pipeline_mode = #tpu.pipeline_mode<synchronous>, transform_indices = @transform_10, window_bounds = array<i64: 16, 32>}, {pipeline_mode = #tpu.pipeline_mode<synchronous>, transform_indices = @transform_11, window_bounds = array<i64: 1, 32>}, {pipeline_mode = #tpu.pipeline_mode<synchronous>, transform_indices = @transform_12, window_bounds = array<i64: 32, 16>}, {pipeline_mode = #tpu.pipeline_mode<synchronous>, transform_indices = @transform_13, window_bounds = array<i64: 1, 16>}, {pipeline_mode = #tpu.pipeline_mode<synchronous>, transform_indices = @transform_14, window_bounds = array<i64: 4, 16>}, {transform_indices = @transform_15, window_bounds = array<i64: 1, 64, 16>}]} {
    %0 = arith.index_cast %arg0 : i32 to index
    %1 = memref.load %arg1[%0] : memref<2xf32, #tpu.memory_space<smem>>
    %c0 = arith.constant 0 : index
    %c0_0 = arith.constant 0 : index
    %c0_1 = arith.constant 0 : index
    %2 = vector.load %arg2[%c0, %c0_0, %c0_1] : memref<1x64x16xf32, #tpu.memory_space<vmem>>, vector<1x64x16xf32>
    %3 = vector.shape_cast %2 : vector<1x64x16xf32> to vector<64x16xf32>
    %c0_2 = arith.constant 0 : index
    %c0_3 = arith.constant 0 : index
    %4 = vector.load %arg3[%c0_2, %c0_3] : memref<16x48xf32, #tpu.memory_space<vmem>>, vector<16x48xf32>
    %cst = arith.constant dense<0.000000e+00> : vector<64x48xf32>
    %5 = tpu.matmul %3, %4, %cst {dimension_numbers = #tpu.dot_dimension_numbers<[1], [0], [0], [1], [0, 0, 1, 1], [], []>} : vector<64x16xf32>, vector<16x48xf32>, vector<64x48xf32> -> vector<64x48xf32>
    %c0_4 = arith.constant 0 : index
    %c0_5 = arith.constant 0 : index
    %6 = vector.load %arg4[%c0_4, %c0_5] : memref<1x48xf32, #tpu.memory_space<vmem>>, vector<1x48xf32>
    %7 = vector.broadcast %6 : vector<1x48xf32> to vector<64x48xf32>
    %8 = arith.addf %5, %7 : vector<64x48xf32>
    %c0_6 = arith.constant 0 : index
    %c0_7 = arith.constant 0 : index
    %9 = vector.load %arg8[%c0_6, %c0_7] : memref<16x16xf32, #tpu.memory_space<vmem>>, vector<16x16xf32>
    %c0_8 = arith.constant 0 : index
    %c0_9 = arith.constant 0 : index
    %c0_10 = arith.constant 0 : index
    %10 = vector.load %arg6[%c0_8, %c0_9, %c0_10] : memref<4x16x16xf32, #tpu.memory_space<vmem>>, vector<4x16x16xf32>
    %11 = vector.extract_strided_slice %8 {offsets = [0, 0], sizes = [64, 8], strides = [1, 1]} : vector<64x48xf32> to vector<64x8xf32>
    %12 = vector.shape_cast %11 : vector<64x8xf32> to vector<4x16x8xf32>
    %13 = vector.extract_strided_slice %8 {offsets = [0, 16], sizes = [64, 8], strides = [1, 1]} : vector<64x48xf32> to vector<64x8xf32>
    %14 = vector.shape_cast %13 : vector<64x8xf32> to vector<4x16x8xf32>
    %15 = vector.extract_strided_slice %8 {offsets = [0, 32], sizes = [64, 8], strides = [1, 1]} : vector<64x48xf32> to vector<64x8xf32>
    %16 = vector.shape_cast %15 : vector<64x8xf32> to vector<4x16x8xf32>
    %17 = arith.mulf %12, %12 : vector<4x16x8xf32>
    %cst_11 = arith.constant dense<0.000000e+00> : vector<4x16xf32>
    %18 = vector.multi_reduction <add>, %17, %cst_11 [2] : vector<4x16x8xf32> to vector<4x16xf32>
    %19 = vector.shape_cast %18 : vector<4x16xf32> to vector<4x16x1xf32>
    %cst_12 = arith.constant 1.000000e-24 : f32
    %20 = vector.broadcast %cst_12 : f32 to vector<4x16x1xf32>
    %21 = arith.maximumf %19, %20 : vector<4x16x1xf32>
    %22 = math.rsqrt %21 : vector<4x16x1xf32>
    %c0_13 = arith.constant 0 : index
    %23 = memref.load %arg7[%c0_13] : memref<2xf32, #tpu.memory_space<smem>>
    %24 = vector.broadcast %23 : f32 to vector<4x16x1xf32>
    %25 = arith.mulf %22, %24 : vector<4x16x1xf32>
    %26 = vector.broadcast %25 : vector<4x16x1xf32> to vector<4x16x8xf32>
    %27 = arith.mulf %12, %26 : vector<4x16x8xf32>
    %28 = arith.mulf %14, %14 : vector<4x16x8xf32>
    %cst_14 = arith.constant dense<0.000000e+00> : vector<4x16xf32>
    %29 = vector.multi_reduction <add>, %28, %cst_14 [2] : vector<4x16x8xf32> to vector<4x16xf32>
    %30 = vector.shape_cast %29 : vector<4x16xf32> to vector<4x16x1xf32>
    %cst_15 = arith.constant 1.000000e-24 : f32
    %31 = vector.broadcast %cst_15 : f32 to vector<4x16x1xf32>
    %32 = arith.maximumf %30, %31 : vector<4x16x1xf32>
    %33 = math.rsqrt %32 : vector<4x16x1xf32>
    %34 = vector.broadcast %33 : vector<4x16x1xf32> to vector<4x16x8xf32>
    %35 = arith.mulf %14, %34 : vector<4x16x8xf32>
    "tpu.trace_start"() <{level = 10 : i32, message = "wnd,wmd->wnm"}> : () -> ()
    %cst_16 = arith.constant dense<0.000000e+00> : vector<4x16x16xf32>
    %36 = tpu.matmul %27, %35, %cst_16 {dimension_numbers = #tpu.dot_dimension_numbers<[2], [2], [1], [1], [0, 0, 0, 1, 1, 1], [0], [0]>} : vector<4x16x8xf32>, vector<4x16x8xf32>, vector<4x16x16xf32> -> vector<4x16x16xf32>
    "tpu.trace_stop"() : () -> ()
    %c0_17 = arith.constant 0 : index
    %c0_18 = arith.constant 0 : index
    %c0_19 = arith.constant 0 : index
    %37 = vector.load %arg5[%c0_17, %c0_18, %c0_19] : memref<2x16x16xf32, #tpu.memory_space<vmem>>, vector<1x16x16xf32>
    %38 = vector.shape_cast %37 : vector<1x16x16xf32> to vector<16x16xf32>
    %39 = vector.shape_cast %38 : vector<16x16xf32> to vector<1x16x16xf32>
    %40 = vector.broadcast %39 : vector<1x16x16xf32> to vector<4x16x16xf32>
    %41 = arith.addf %36, %40 : vector<4x16x16xf32>
    %42 = arith.addf %41, %10 : vector<4x16x16xf32>
    %cst_20 = arith.constant dense<0xFF800000> : vector<4x16xf32>
    %43 = vector.multi_reduction <maximumf>, %42, %cst_20 [2] : vector<4x16x16xf32> to vector<4x16xf32>
    %44 = vector.shape_cast %43 : vector<4x16xf32> to vector<4x16x1xf32>
    %45 = vector.broadcast %44 : vector<4x16x1xf32> to vector<4x16x16xf32>
    %46 = arith.subf %42, %45 : vector<4x16x16xf32>
    %47 = math.exp %46 : vector<4x16x16xf32>
    %cst_21 = arith.constant dense<0.000000e+00> : vector<4x16xf32>
    %48 = vector.multi_reduction <add>, %47, %cst_21 [2] : vector<4x16x16xf32> to vector<4x16xf32>
    %49 = vector.shape_cast %48 : vector<4x16xf32> to vector<4x16x1xf32>
    %50 = tpu.reciprocal %49 {approx = true} : vector<4x16x1xf32> -> vector<4x16x1xf32>
    %51 = vector.broadcast %50 : vector<4x16x1xf32> to vector<4x16x16xf32>
    %52 = arith.mulf %47, %51 : vector<4x16x16xf32>
    "tpu.trace_start"() <{level = 10 : i32, message = "wnm,wmd->wnd"}> : () -> ()
    %cst_22 = arith.constant dense<0.000000e+00> : vector<4x16x8xf32>
    %53 = tpu.matmul %52, %16, %cst_22 {dimension_numbers = #tpu.dot_dimension_numbers<[2], [1], [1], [2], [0, 0, 0, 1, 1, 2], [0], [0]>} : vector<4x16x16xf32>, vector<4x16x8xf32>, vector<4x16x8xf32> -> vector<4x16x8xf32>
    "tpu.trace_stop"() : () -> ()
    %54 = vector.shape_cast %53 : vector<4x16x8xf32> to vector<64x8xf32>
    %55 = vector.extract_strided_slice %9 {offsets = [0, 0], sizes = [8, 16], strides = [1, 1]} : vector<16x16xf32> to vector<8x16xf32>
    %cst_23 = arith.constant dense<0.000000e+00> : vector<64x16xf32>
    %56 = tpu.matmul %54, %55, %cst_23 {dimension_numbers = #tpu.dot_dimension_numbers<[1], [0], [0], [1], [0, 0, 1, 1], [], []>} : vector<64x8xf32>, vector<8x16xf32>, vector<64x16xf32> -> vector<64x16xf32>
    %57 = vector.extract_strided_slice %8 {offsets = [0, 8], sizes = [64, 8], strides = [1, 1]} : vector<64x48xf32> to vector<64x8xf32>
    %58 = vector.shape_cast %57 : vector<64x8xf32> to vector<4x16x8xf32>
    %59 = vector.extract_strided_slice %8 {offsets = [0, 24], sizes = [64, 8], strides = [1, 1]} : vector<64x48xf32> to vector<64x8xf32>
    %60 = vector.shape_cast %59 : vector<64x8xf32> to vector<4x16x8xf32>
    %61 = vector.extract_strided_slice %8 {offsets = [0, 40], sizes = [64, 8], strides = [1, 1]} : vector<64x48xf32> to vector<64x8xf32>
    %62 = vector.shape_cast %61 : vector<64x8xf32> to vector<4x16x8xf32>
    %63 = arith.mulf %58, %58 : vector<4x16x8xf32>
    %cst_24 = arith.constant dense<0.000000e+00> : vector<4x16xf32>
    %64 = vector.multi_reduction <add>, %63, %cst_24 [2] : vector<4x16x8xf32> to vector<4x16xf32>
    %65 = vector.shape_cast %64 : vector<4x16xf32> to vector<4x16x1xf32>
    %cst_25 = arith.constant 1.000000e-24 : f32
    %66 = vector.broadcast %cst_25 : f32 to vector<4x16x1xf32>
    %67 = arith.maximumf %65, %66 : vector<4x16x1xf32>
    %68 = math.rsqrt %67 : vector<4x16x1xf32>
    %c1 = arith.constant 1 : index
    %69 = memref.load %arg7[%c1] : memref<2xf32, #tpu.memory_space<smem>>
    %70 = vector.broadcast %69 : f32 to vector<4x16x1xf32>
    %71 = arith.mulf %68, %70 : vector<4x16x1xf32>
    %72 = vector.broadcast %71 : vector<4x16x1xf32> to vector<4x16x8xf32>
    %73 = arith.mulf %58, %72 : vector<4x16x8xf32>
    %74 = arith.mulf %60, %60 : vector<4x16x8xf32>
    %cst_26 = arith.constant dense<0.000000e+00> : vector<4x16xf32>
    %75 = vector.multi_reduction <add>, %74, %cst_26 [2] : vector<4x16x8xf32> to vector<4x16xf32>
    %76 = vector.shape_cast %75 : vector<4x16xf32> to vector<4x16x1xf32>
    %cst_27 = arith.constant 1.000000e-24 : f32
    %77 = vector.broadcast %cst_27 : f32 to vector<4x16x1xf32>
    %78 = arith.maximumf %76, %77 : vector<4x16x1xf32>
    %79 = math.rsqrt %78 : vector<4x16x1xf32>
    %80 = vector.broadcast %79 : vector<4x16x1xf32> to vector<4x16x8xf32>
    %81 = arith.mulf %60, %80 : vector<4x16x8xf32>
    "tpu.trace_start"() <{level = 10 : i32, message = "wnd,wmd->wnm"}> : () -> ()
    %cst_28 = arith.constant dense<0.000000e+00> : vector<4x16x16xf32>
    %82 = tpu.matmul %73, %81, %cst_28 {dimension_numbers = #tpu.dot_dimension_numbers<[2], [2], [1], [1], [0, 0, 0, 1, 1, 1], [0], [0]>} : vector<4x16x8xf32>, vector<4x16x8xf32>, vector<4x16x16xf32> -> vector<4x16x16xf32>
    "tpu.trace_stop"() : () -> ()
    %c1_29 = arith.constant 1 : index
    %c0_30 = arith.constant 0 : index
    %c0_31 = arith.constant 0 : index
    %83 = vector.load %arg5[%c1_29, %c0_30, %c0_31] : memref<2x16x16xf32, #tpu.memory_space<vmem>>, vector<1x16x16xf32>
    %84 = vector.shape_cast %83 : vector<1x16x16xf32> to vector<16x16xf32>
    %85 = vector.shape_cast %84 : vector<16x16xf32> to vector<1x16x16xf32>
    %86 = vector.broadcast %85 : vector<1x16x16xf32> to vector<4x16x16xf32>
    %87 = arith.addf %82, %86 : vector<4x16x16xf32>
    %88 = arith.addf %87, %10 : vector<4x16x16xf32>
    %cst_32 = arith.constant dense<0xFF800000> : vector<4x16xf32>
    %89 = vector.multi_reduction <maximumf>, %88, %cst_32 [2] : vector<4x16x16xf32> to vector<4x16xf32>
    %90 = vector.shape_cast %89 : vector<4x16xf32> to vector<4x16x1xf32>
    %91 = vector.broadcast %90 : vector<4x16x1xf32> to vector<4x16x16xf32>
    %92 = arith.subf %88, %91 : vector<4x16x16xf32>
    %93 = math.exp %92 : vector<4x16x16xf32>
    %cst_33 = arith.constant dense<0.000000e+00> : vector<4x16xf32>
    %94 = vector.multi_reduction <add>, %93, %cst_33 [2] : vector<4x16x16xf32> to vector<4x16xf32>
    %95 = vector.shape_cast %94 : vector<4x16xf32> to vector<4x16x1xf32>
    %96 = tpu.reciprocal %95 {approx = true} : vector<4x16x1xf32> -> vector<4x16x1xf32>
    %97 = vector.broadcast %96 : vector<4x16x1xf32> to vector<4x16x16xf32>
    %98 = arith.mulf %93, %97 : vector<4x16x16xf32>
    "tpu.trace_start"() <{level = 10 : i32, message = "wnm,wmd->wnd"}> : () -> ()
    %cst_34 = arith.constant dense<0.000000e+00> : vector<4x16x8xf32>
    %99 = tpu.matmul %98, %62, %cst_34 {dimension_numbers = #tpu.dot_dimension_numbers<[2], [1], [1], [2], [0, 0, 0, 1, 1, 2], [0], [0]>} : vector<4x16x16xf32>, vector<4x16x8xf32>, vector<4x16x8xf32> -> vector<4x16x8xf32>
    "tpu.trace_stop"() : () -> ()
    %100 = vector.shape_cast %99 : vector<4x16x8xf32> to vector<64x8xf32>
    %101 = vector.extract_strided_slice %9 {offsets = [8, 0], sizes = [8, 16], strides = [1, 1]} : vector<16x16xf32> to vector<8x16xf32>
    %cst_35 = arith.constant dense<0.000000e+00> : vector<64x16xf32>
    %102 = tpu.matmul %100, %101, %cst_35 {dimension_numbers = #tpu.dot_dimension_numbers<[1], [0], [0], [1], [0, 0, 1, 1], [], []>} : vector<64x8xf32>, vector<8x16xf32>, vector<64x16xf32> -> vector<64x16xf32>
    %103 = arith.addf %56, %102 : vector<64x16xf32>
    %c0_36 = arith.constant 0 : index
    %c0_37 = arith.constant 0 : index
    %104 = vector.load %arg9[%c0_36, %c0_37] : memref<1x16xf32, #tpu.memory_space<vmem>>, vector<1x16xf32>
    %105 = vector.broadcast %104 : vector<1x16xf32> to vector<64x16xf32>
    %106 = arith.addf %103, %105 : vector<64x16xf32>
    %c0_38 = arith.constant 0 : index
    %c0_39 = arith.constant 0 : index
    %107 = vector.load %arg10[%c0_38, %c0_39] : memref<4x16xf32, #tpu.memory_space<vmem>>, vector<1x16xf32>
    %108 = vector.broadcast %1 : f32 to vector<1x16xf32>
    %109 = arith.mulf %108, %107 : vector<1x16xf32>
    %c1_40 = arith.constant 1 : index
    %c0_41 = arith.constant 0 : index
    %110 = vector.load %arg10[%c1_40, %c0_41] : memref<4x16xf32, #tpu.memory_space<vmem>>, vector<1x16xf32>
    %111 = arith.addf %109, %110 : vector<1x16xf32>
    %c2 = arith.constant 2 : index
    %c0_42 = arith.constant 0 : index
    %112 = vector.load %arg10[%c2, %c0_42] : memref<4x16xf32, #tpu.memory_space<vmem>>, vector<1x16xf32>
    %113 = vector.broadcast %1 : f32 to vector<1x16xf32>
    %114 = arith.mulf %113, %112 : vector<1x16xf32>
    %c3 = arith.constant 3 : index
    %c0_43 = arith.constant 0 : index
    %115 = vector.load %arg10[%c3, %c0_43] : memref<4x16xf32, #tpu.memory_space<vmem>>, vector<1x16xf32>
    %116 = arith.addf %114, %115 : vector<1x16xf32>
    %cst_44 = arith.constant dense<0.000000e+00> : vector<64xf32>
    %117 = vector.multi_reduction <add>, %106, %cst_44 [1] : vector<64x16xf32> to vector<64xf32>
    %118 = vector.shape_cast %117 : vector<64xf32> to vector<64x1xf32>
    %cst_45 = arith.constant 1.600000e+01 : f32
    %119 = vector.broadcast %cst_45 : f32 to vector<64x1xf32>
    %120 = arith.divf %118, %119 : vector<64x1xf32>
    %121 = arith.mulf %106, %106 : vector<64x16xf32>
    %cst_46 = arith.constant dense<0.000000e+00> : vector<64xf32>
    %122 = vector.multi_reduction <add>, %121, %cst_46 [1] : vector<64x16xf32> to vector<64xf32>
    %123 = vector.shape_cast %122 : vector<64xf32> to vector<64x1xf32>
    %cst_47 = arith.constant 1.600000e+01 : f32
    %124 = vector.broadcast %cst_47 : f32 to vector<64x1xf32>
    %125 = arith.divf %123, %124 : vector<64x1xf32>
    %126 = arith.mulf %120, %120 : vector<64x1xf32>
    %127 = arith.subf %125, %126 : vector<64x1xf32>
    %128 = vector.broadcast %120 : vector<64x1xf32> to vector<64x16xf32>
    %129 = arith.subf %106, %128 : vector<64x16xf32>
    %cst_48 = arith.constant 9.99999974E-6 : f32
    %130 = vector.broadcast %cst_48 : f32 to vector<64x1xf32>
    %131 = arith.addf %127, %130 : vector<64x1xf32>
    %132 = math.rsqrt %131 : vector<64x1xf32>
    %133 = vector.broadcast %132 : vector<64x1xf32> to vector<64x16xf32>
    %134 = arith.mulf %129, %133 : vector<64x16xf32>
    %135 = vector.broadcast %111 : vector<1x16xf32> to vector<64x16xf32>
    %136 = arith.mulf %135, %134 : vector<64x16xf32>
    %137 = arith.addf %3, %136 : vector<64x16xf32>
    %138 = vector.broadcast %116 : vector<1x16xf32> to vector<64x16xf32>
    %139 = arith.addf %137, %138 : vector<64x16xf32>
    %c0_49 = arith.constant 0 : index
    %c0_50 = arith.constant 0 : index
    %140 = vector.load %arg11[%c0_49, %c0_50] : memref<16x32xf32, #tpu.memory_space<vmem>>, vector<16x32xf32>
    %cst_51 = arith.constant dense<0.000000e+00> : vector<64x32xf32>
    %141 = tpu.matmul %139, %140, %cst_51 {dimension_numbers = #tpu.dot_dimension_numbers<[1], [0], [0], [1], [0, 0, 1, 1], [], []>} : vector<64x16xf32>, vector<16x32xf32>, vector<64x32xf32> -> vector<64x32xf32>
    %c0_52 = arith.constant 0 : index
    %c0_53 = arith.constant 0 : index
    %142 = vector.load %arg12[%c0_52, %c0_53] : memref<1x32xf32, #tpu.memory_space<vmem>>, vector<1x32xf32>
    %143 = vector.broadcast %142 : vector<1x32xf32> to vector<64x32xf32>
    %144 = arith.addf %141, %143 : vector<64x32xf32>
    %cst_54 = arith.constant 5.000000e-01 : f32
    %145 = vector.broadcast %cst_54 : f32 to vector<64x32xf32>
    %146 = arith.mulf %145, %144 : vector<64x32xf32>
    %cst_55 = arith.constant 0.707106769 : f32
    %147 = vector.broadcast %cst_55 : f32 to vector<64x32xf32>
    %148 = arith.mulf %144, %147 : vector<64x32xf32>
    %149 = math.erf %148 : vector<64x32xf32>
    %cst_56 = arith.constant 1.000000e+00 : f32
    %150 = vector.broadcast %cst_56 : f32 to vector<64x32xf32>
    %151 = arith.addf %150, %149 : vector<64x32xf32>
    %152 = arith.mulf %146, %151 : vector<64x32xf32>
    %c0_57 = arith.constant 0 : index
    %c0_58 = arith.constant 0 : index
    %153 = vector.load %arg13[%c0_57, %c0_58] : memref<32x16xf32, #tpu.memory_space<vmem>>, vector<32x16xf32>
    %cst_59 = arith.constant dense<0.000000e+00> : vector<64x16xf32>
    %154 = tpu.matmul %152, %153, %cst_59 {dimension_numbers = #tpu.dot_dimension_numbers<[1], [0], [0], [1], [0, 0, 1, 1], [], []>} : vector<64x32xf32>, vector<32x16xf32>, vector<64x16xf32> -> vector<64x16xf32>
    %c0_60 = arith.constant 0 : index
    %c0_61 = arith.constant 0 : index
    %155 = vector.load %arg14[%c0_60, %c0_61] : memref<1x16xf32, #tpu.memory_space<vmem>>, vector<1x16xf32>
    %156 = vector.broadcast %155 : vector<1x16xf32> to vector<64x16xf32>
    %157 = arith.addf %154, %156 : vector<64x16xf32>
    %c0_62 = arith.constant 0 : index
    %c0_63 = arith.constant 0 : index
    %158 = vector.load %arg15[%c0_62, %c0_63] : memref<4x16xf32, #tpu.memory_space<vmem>>, vector<1x16xf32>
    %159 = vector.broadcast %1 : f32 to vector<1x16xf32>
    %160 = arith.mulf %159, %158 : vector<1x16xf32>
    %c1_64 = arith.constant 1 : index
    %c0_65 = arith.constant 0 : index
    %161 = vector.load %arg15[%c1_64, %c0_65] : memref<4x16xf32, #tpu.memory_space<vmem>>, vector<1x16xf32>
    %162 = arith.addf %160, %161 : vector<1x16xf32>
    %c2_66 = arith.constant 2 : index
    %c0_67 = arith.constant 0 : index
    %163 = vector.load %arg15[%c2_66, %c0_67] : memref<4x16xf32, #tpu.memory_space<vmem>>, vector<1x16xf32>
    %164 = vector.broadcast %1 : f32 to vector<1x16xf32>
    %165 = arith.mulf %164, %163 : vector<1x16xf32>
    %c3_68 = arith.constant 3 : index
    %c0_69 = arith.constant 0 : index
    %166 = vector.load %arg15[%c3_68, %c0_69] : memref<4x16xf32, #tpu.memory_space<vmem>>, vector<1x16xf32>
    %167 = arith.addf %165, %166 : vector<1x16xf32>
    %cst_70 = arith.constant dense<0.000000e+00> : vector<64xf32>
    %168 = vector.multi_reduction <add>, %157, %cst_70 [1] : vector<64x16xf32> to vector<64xf32>
    %169 = vector.shape_cast %168 : vector<64xf32> to vector<64x1xf32>
    %cst_71 = arith.constant 1.600000e+01 : f32
    %170 = vector.broadcast %cst_71 : f32 to vector<64x1xf32>
    %171 = arith.divf %169, %170 : vector<64x1xf32>
    %172 = arith.mulf %157, %157 : vector<64x16xf32>
    %cst_72 = arith.constant dense<0.000000e+00> : vector<64xf32>
    %173 = vector.multi_reduction <add>, %172, %cst_72 [1] : vector<64x16xf32> to vector<64xf32>
    %174 = vector.shape_cast %173 : vector<64xf32> to vector<64x1xf32>
    %cst_73 = arith.constant 1.600000e+01 : f32
    %175 = vector.broadcast %cst_73 : f32 to vector<64x1xf32>
    %176 = arith.divf %174, %175 : vector<64x1xf32>
    %177 = arith.mulf %171, %171 : vector<64x1xf32>
    %178 = arith.subf %176, %177 : vector<64x1xf32>
    %179 = vector.broadcast %171 : vector<64x1xf32> to vector<64x16xf32>
    %180 = arith.subf %157, %179 : vector<64x16xf32>
    %cst_74 = arith.constant 9.99999974E-6 : f32
    %181 = vector.broadcast %cst_74 : f32 to vector<64x1xf32>
    %182 = arith.addf %178, %181 : vector<64x1xf32>
    %183 = math.rsqrt %182 : vector<64x1xf32>
    %184 = vector.broadcast %183 : vector<64x1xf32> to vector<64x16xf32>
    %185 = arith.mulf %180, %184 : vector<64x16xf32>
    %186 = vector.broadcast %162 : vector<1x16xf32> to vector<64x16xf32>
    %187 = arith.mulf %186, %185 : vector<64x16xf32>
    %188 = arith.addf %139, %187 : vector<64x16xf32>
    %189 = vector.broadcast %167 : vector<1x16xf32> to vector<64x16xf32>
    %190 = arith.addf %188, %189 : vector<64x16xf32>
    %c0_75 = arith.constant 0 : index
    %c0_76 = arith.constant 0 : index
    %c0_77 = arith.constant 0 : index
    %191 = vector.load %arg16[%c0_75, %c0_76, %c0_77] : memref<1x64x16xf32, #tpu.memory_space<vmem>>, vector<1x64x16xf32>
    %192 = vector.shape_cast %191 : vector<1x64x16xf32> to vector<64x16xf32>
    %193 = vector.shape_cast %190 : vector<64x16xf32> to vector<1x64x16xf32>
    tpu.vector_store %arg16[%c0_75, %c0_76, %c0_77], %193 {strides = array<i32>} : memref<1x64x16xf32, #tpu.memory_space<vmem>>, vector<1x64x16xf32>,
    return
  }
  func.func @transform_0(%arg0: i32) -> i32 {
    %c0_i32 = arith.constant 0 : i32
    %c0_i32_0 = arith.constant 0 : i32
    return %c0_i32 : i32
  }
  func.func @transform_1(%arg0: i32) -> (i32, i32, i32) {
    %c0_i32 = arith.constant 0 : i32
    %c0_i32_0 = arith.constant 0 : i32
    %c0_i32_1 = arith.constant 0 : i32
    return %arg0, %c0_i32, %c0_i32_0 : i32, i32, i32
  }
  func.func @transform_2(%arg0: i32) -> (i32, i32) {
    %c0_i32 = arith.constant 0 : i32
    %c0_i32_0 = arith.constant 0 : i32
    %c0_i32_1 = arith.constant 0 : i32
    return %c0_i32, %c0_i32_0 : i32, i32
  }
  func.func @transform_3(%arg0: i32) -> (i32, i32) {
    %c0_i32 = arith.constant 0 : i32
    %c0_i32_0 = arith.constant 0 : i32
    %c0_i32_1 = arith.constant 0 : i32
    return %c0_i32, %c0_i32_0 : i32, i32
  }
  func.func @transform_4(%arg0: i32) -> (i32, i32, i32) {
    %c0_i32 = arith.constant 0 : i32
    %c0_i32_0 = arith.constant 0 : i32
    %c0_i32_1 = arith.constant 0 : i32
    %c0_i32_2 = arith.constant 0 : i32
    return %c0_i32, %c0_i32_0, %c0_i32_1 : i32, i32, i32
  }
  func.func @transform_5(%arg0: i32) -> (i32, i32, i32) {
    %c0_i32 = arith.constant 0 : i32
    %c0_i32_0 = arith.constant 0 : i32
    %c0_i32_1 = arith.constant 0 : i32
    %c0_i32_2 = arith.constant 0 : i32
    return %c0_i32, %c0_i32_0, %c0_i32_1 : i32, i32, i32
  }
  func.func @transform_6(%arg0: i32) -> i32 {
    %c0_i32 = arith.constant 0 : i32
    %c0_i32_0 = arith.constant 0 : i32
    return %c0_i32 : i32
  }
  func.func @transform_7(%arg0: i32) -> (i32, i32) {
    %c0_i32 = arith.constant 0 : i32
    %c0_i32_0 = arith.constant 0 : i32
    %c0_i32_1 = arith.constant 0 : i32
    return %c0_i32, %c0_i32_0 : i32, i32
  }
  func.func @transform_8(%arg0: i32) -> (i32, i32) {
    %c0_i32 = arith.constant 0 : i32
    %c0_i32_0 = arith.constant 0 : i32
    %c0_i32_1 = arith.constant 0 : i32
    return %c0_i32, %c0_i32_0 : i32, i32
  }
  func.func @transform_9(%arg0: i32) -> (i32, i32) {
    %c0_i32 = arith.constant 0 : i32
    %c0_i32_0 = arith.constant 0 : i32
    %c0_i32_1 = arith.constant 0 : i32
    return %c0_i32, %c0_i32_0 : i32, i32
  }
  func.func @transform_10(%arg0: i32) -> (i32, i32) {
    %c0_i32 = arith.constant 0 : i32
    %c0_i32_0 = arith.constant 0 : i32
    %c0_i32_1 = arith.constant 0 : i32
    return %c0_i32, %c0_i32_0 : i32, i32
  }
  func.func @transform_11(%arg0: i32) -> (i32, i32) {
    %c0_i32 = arith.constant 0 : i32
    %c0_i32_0 = arith.constant 0 : i32
    %c0_i32_1 = arith.constant 0 : i32
    return %c0_i32, %c0_i32_0 : i32, i32
  }
  func.func @transform_12(%arg0: i32) -> (i32, i32) {
    %c0_i32 = arith.constant 0 : i32
    %c0_i32_0 = arith.constant 0 : i32
    %c0_i32_1 = arith.constant 0 : i32
    return %c0_i32, %c0_i32_0 : i32, i32
  }
  func.func @transform_13(%arg0: i32) -> (i32, i32) {
    %c0_i32 = arith.constant 0 : i32
    %c0_i32_0 = arith.constant 0 : i32
    %c0_i32_1 = arith.constant 0 : i32
    return %c0_i32, %c0_i32_0 : i32, i32
  }
  func.func @transform_14(%arg0: i32) -> (i32, i32) {
    %c0_i32 = arith.constant 0 : i32
    %c0_i32_0 = arith.constant 0 : i32
    %c0_i32_1 = arith.constant 0 : i32
    return %c0_i32, %c0_i32_0 : i32, i32
  }
  func.func @transform_15(%arg0: i32) -> (i32, i32, i32) {
    %c0_i32 = arith.constant 0 : i32
    %c0_i32_0 = arith.constant 0 : i32
    %c0_i32_1 = arith.constant 0 : i32
    return %arg0, %c0_i32, %c0_i32_0 : i32, i32, i32
  }
}

module attributes {stable_mosaic.version = 11 : i64} {
  func.func @_fused_block_kernel(%arg0: i32, %arg1: memref<2xf32, #tpu.memory_space<smem>>, %arg2: memref<1x64x16xf32, #tpu.memory_space<vmem>>, %arg3: memref<16x48xf32, #tpu.memory_space<vmem>>, %arg4: memref<1x48xf32, #tpu.memory_space<vmem>>, %arg5: memref<2x16x16xf32, #tpu.memory_space<vmem>>, %arg6: memref<2xf32, #tpu.memory_space<smem>>, %arg7: memref<16x16xf32, #tpu.memory_space<vmem>>, %arg8: memref<1x16xf32, #tpu.memory_space<vmem>>, %arg9: memref<4x16xf32, #tpu.memory_space<vmem>>, %arg10: memref<16x32xf32, #tpu.memory_space<vmem>>, %arg11: memref<1x32xf32, #tpu.memory_space<vmem>>, %arg12: memref<32x16xf32, #tpu.memory_space<vmem>>, %arg13: memref<1x16xf32, #tpu.memory_space<vmem>>, %arg14: memref<4x16xf32, #tpu.memory_space<vmem>>, %arg15: memref<1x64x16xf32, #tpu.memory_space<vmem>>) attributes {dimension_semantics = [#tpu.dimension_semantics<parallel>], iteration_bounds = array<i64: 2>, scalar_prefetch = 0 : i64, scratch_operands = 0 : i64, tpu.core_type = #tpu.core_type<tc>, window_params = [{transform_indices = @transform_0, window_bounds = array<i64: 2>}, {transform_indices = @transform_1, window_bounds = array<i64: 1, 64, 16>}, {pipeline_mode = #tpu.pipeline_mode<synchronous>, transform_indices = @transform_2, window_bounds = array<i64: 16, 48>}, {pipeline_mode = #tpu.pipeline_mode<synchronous>, transform_indices = @transform_3, window_bounds = array<i64: 1, 48>}, {pipeline_mode = #tpu.pipeline_mode<synchronous>, transform_indices = @transform_4, window_bounds = array<i64: 2, 16, 16>}, {transform_indices = @transform_5, window_bounds = array<i64: 2>}, {pipeline_mode = #tpu.pipeline_mode<synchronous>, transform_indices = @transform_6, window_bounds = array<i64: 16, 16>}, {pipeline_mode = #tpu.pipeline_mode<synchronous>, transform_indices = @transform_7, window_bounds = array<i64: 1, 16>}, {pipeline_mode = #tpu.pipeline_mode<synchronous>, transform_indices = @transform_8, window_bounds = array<i64: 4, 16>}, {pipeline_mode = #tpu.pipeline_mode<synchronous>, transform_indices = @transform_9, window_bounds = array<i64: 16, 32>}, {pipeline_mode = #tpu.pipeline_mode<synchronous>, transform_indices = @transform_10, window_bounds = array<i64: 1, 32>}, {pipeline_mode = #tpu.pipeline_mode<synchronous>, transform_indices = @transform_11, window_bounds = array<i64: 32, 16>}, {pipeline_mode = #tpu.pipeline_mode<synchronous>, transform_indices = @transform_12, window_bounds = array<i64: 1, 16>}, {pipeline_mode = #tpu.pipeline_mode<synchronous>, transform_indices = @transform_13, window_bounds = array<i64: 4, 16>}, {transform_indices = @transform_14, window_bounds = array<i64: 1, 64, 16>}]} {
    %0 = arith.index_cast %arg0 : i32 to index
    %1 = memref.load %arg1[%0] : memref<2xf32, #tpu.memory_space<smem>>
    %c0 = arith.constant 0 : index
    %c0_0 = arith.constant 0 : index
    %c0_1 = arith.constant 0 : index
    %2 = vector.load %arg2[%c0, %c0_0, %c0_1] : memref<1x64x16xf32, #tpu.memory_space<vmem>>, vector<1x64x16xf32>
    %3 = vector.shape_cast %2 : vector<1x64x16xf32> to vector<64x16xf32>
    %c0_2 = arith.constant 0 : index
    %c0_3 = arith.constant 0 : index
    %4 = vector.load %arg3[%c0_2, %c0_3] : memref<16x48xf32, #tpu.memory_space<vmem>>, vector<16x48xf32>
    %cst = arith.constant dense<0.000000e+00> : vector<64x48xf32>
    %5 = tpu.matmul %3, %4, %cst {dimension_numbers = #tpu.dot_dimension_numbers<[1], [0], [0], [1], [0, 0, 1, 1], [], []>} : vector<64x16xf32>, vector<16x48xf32>, vector<64x48xf32> -> vector<64x48xf32>
    %c0_4 = arith.constant 0 : index
    %c0_5 = arith.constant 0 : index
    %6 = vector.load %arg4[%c0_4, %c0_5] : memref<1x48xf32, #tpu.memory_space<vmem>>, vector<1x48xf32>
    %7 = vector.broadcast %6 : vector<1x48xf32> to vector<64x48xf32>
    %8 = arith.addf %5, %7 : vector<64x48xf32>
    %c0_6 = arith.constant 0 : index
    %c0_7 = arith.constant 0 : index
    %9 = vector.load %arg7[%c0_6, %c0_7] : memref<16x16xf32, #tpu.memory_space<vmem>>, vector<16x16xf32>
    %10 = vector.extract_strided_slice %8 {offsets = [0, 0], sizes = [64, 8], strides = [1, 1]} : vector<64x48xf32> to vector<64x8xf32>
    %11 = vector.shape_cast %10 : vector<64x8xf32> to vector<4x16x8xf32>
    %12 = vector.extract_strided_slice %8 {offsets = [0, 16], sizes = [64, 8], strides = [1, 1]} : vector<64x48xf32> to vector<64x8xf32>
    %13 = vector.shape_cast %12 : vector<64x8xf32> to vector<4x16x8xf32>
    %14 = vector.extract_strided_slice %8 {offsets = [0, 32], sizes = [64, 8], strides = [1, 1]} : vector<64x48xf32> to vector<64x8xf32>
    %15 = vector.shape_cast %14 : vector<64x8xf32> to vector<4x16x8xf32>
    %16 = arith.mulf %11, %11 : vector<4x16x8xf32>
    %cst_8 = arith.constant dense<0.000000e+00> : vector<4x16xf32>
    %17 = vector.multi_reduction <add>, %16, %cst_8 [2] : vector<4x16x8xf32> to vector<4x16xf32>
    %18 = vector.shape_cast %17 : vector<4x16xf32> to vector<4x16x1xf32>
    %cst_9 = arith.constant 1.000000e-24 : f32
    %19 = vector.broadcast %cst_9 : f32 to vector<4x16x1xf32>
    %20 = arith.maximumf %18, %19 : vector<4x16x1xf32>
    %21 = math.rsqrt %20 : vector<4x16x1xf32>
    %c0_10 = arith.constant 0 : index
    %22 = memref.load %arg6[%c0_10] : memref<2xf32, #tpu.memory_space<smem>>
    %23 = vector.broadcast %22 : f32 to vector<4x16x1xf32>
    %24 = arith.mulf %21, %23 : vector<4x16x1xf32>
    %25 = vector.broadcast %24 : vector<4x16x1xf32> to vector<4x16x8xf32>
    %26 = arith.mulf %11, %25 : vector<4x16x8xf32>
    %27 = arith.mulf %13, %13 : vector<4x16x8xf32>
    %cst_11 = arith.constant dense<0.000000e+00> : vector<4x16xf32>
    %28 = vector.multi_reduction <add>, %27, %cst_11 [2] : vector<4x16x8xf32> to vector<4x16xf32>
    %29 = vector.shape_cast %28 : vector<4x16xf32> to vector<4x16x1xf32>
    %cst_12 = arith.constant 1.000000e-24 : f32
    %30 = vector.broadcast %cst_12 : f32 to vector<4x16x1xf32>
    %31 = arith.maximumf %29, %30 : vector<4x16x1xf32>
    %32 = math.rsqrt %31 : vector<4x16x1xf32>
    %33 = vector.broadcast %32 : vector<4x16x1xf32> to vector<4x16x8xf32>
    %34 = arith.mulf %13, %33 : vector<4x16x8xf32>
    "tpu.trace_start"() <{level = 10 : i32, message = "wnd,wmd->wnm"}> : () -> ()
    %cst_13 = arith.constant dense<0.000000e+00> : vector<4x16x16xf32>
    %35 = tpu.matmul %26, %34, %cst_13 {dimension_numbers = #tpu.dot_dimension_numbers<[2], [2], [1], [1], [0, 0, 0, 1, 1, 1], [0], [0]>} : vector<4x16x8xf32>, vector<4x16x8xf32>, vector<4x16x16xf32> -> vector<4x16x16xf32>
    "tpu.trace_stop"() : () -> ()
    %c0_14 = arith.constant 0 : index
    %c0_15 = arith.constant 0 : index
    %c0_16 = arith.constant 0 : index
    %36 = vector.load %arg5[%c0_14, %c0_15, %c0_16] : memref<2x16x16xf32, #tpu.memory_space<vmem>>, vector<1x16x16xf32>
    %37 = vector.shape_cast %36 : vector<1x16x16xf32> to vector<16x16xf32>
    %38 = vector.shape_cast %37 : vector<16x16xf32> to vector<1x16x16xf32>
    %39 = vector.broadcast %38 : vector<1x16x16xf32> to vector<4x16x16xf32>
    %40 = arith.addf %35, %39 : vector<4x16x16xf32>
    %cst_17 = arith.constant dense<0xFF800000> : vector<4x16xf32>
    %41 = vector.multi_reduction <maximumf>, %40, %cst_17 [2] : vector<4x16x16xf32> to vector<4x16xf32>
    %42 = vector.shape_cast %41 : vector<4x16xf32> to vector<4x16x1xf32>
    %43 = vector.broadcast %42 : vector<4x16x1xf32> to vector<4x16x16xf32>
    %44 = arith.subf %40, %43 : vector<4x16x16xf32>
    %45 = math.exp %44 : vector<4x16x16xf32>
    %cst_18 = arith.constant dense<0.000000e+00> : vector<4x16xf32>
    %46 = vector.multi_reduction <add>, %45, %cst_18 [2] : vector<4x16x16xf32> to vector<4x16xf32>
    %47 = vector.shape_cast %46 : vector<4x16xf32> to vector<4x16x1xf32>
    %48 = tpu.reciprocal %47 {approx = true} : vector<4x16x1xf32> -> vector<4x16x1xf32>
    %49 = vector.broadcast %48 : vector<4x16x1xf32> to vector<4x16x16xf32>
    %50 = arith.mulf %45, %49 : vector<4x16x16xf32>
    "tpu.trace_start"() <{level = 10 : i32, message = "wnm,wmd->wnd"}> : () -> ()
    %cst_19 = arith.constant dense<0.000000e+00> : vector<4x16x8xf32>
    %51 = tpu.matmul %50, %15, %cst_19 {dimension_numbers = #tpu.dot_dimension_numbers<[2], [1], [1], [2], [0, 0, 0, 1, 1, 2], [0], [0]>} : vector<4x16x16xf32>, vector<4x16x8xf32>, vector<4x16x8xf32> -> vector<4x16x8xf32>
    "tpu.trace_stop"() : () -> ()
    %52 = vector.shape_cast %51 : vector<4x16x8xf32> to vector<64x8xf32>
    %53 = vector.extract_strided_slice %9 {offsets = [0, 0], sizes = [8, 16], strides = [1, 1]} : vector<16x16xf32> to vector<8x16xf32>
    %cst_20 = arith.constant dense<0.000000e+00> : vector<64x16xf32>
    %54 = tpu.matmul %52, %53, %cst_20 {dimension_numbers = #tpu.dot_dimension_numbers<[1], [0], [0], [1], [0, 0, 1, 1], [], []>} : vector<64x8xf32>, vector<8x16xf32>, vector<64x16xf32> -> vector<64x16xf32>
    %55 = vector.extract_strided_slice %8 {offsets = [0, 8], sizes = [64, 8], strides = [1, 1]} : vector<64x48xf32> to vector<64x8xf32>
    %56 = vector.shape_cast %55 : vector<64x8xf32> to vector<4x16x8xf32>
    %57 = vector.extract_strided_slice %8 {offsets = [0, 24], sizes = [64, 8], strides = [1, 1]} : vector<64x48xf32> to vector<64x8xf32>
    %58 = vector.shape_cast %57 : vector<64x8xf32> to vector<4x16x8xf32>
    %59 = vector.extract_strided_slice %8 {offsets = [0, 40], sizes = [64, 8], strides = [1, 1]} : vector<64x48xf32> to vector<64x8xf32>
    %60 = vector.shape_cast %59 : vector<64x8xf32> to vector<4x16x8xf32>
    %61 = arith.mulf %56, %56 : vector<4x16x8xf32>
    %cst_21 = arith.constant dense<0.000000e+00> : vector<4x16xf32>
    %62 = vector.multi_reduction <add>, %61, %cst_21 [2] : vector<4x16x8xf32> to vector<4x16xf32>
    %63 = vector.shape_cast %62 : vector<4x16xf32> to vector<4x16x1xf32>
    %cst_22 = arith.constant 1.000000e-24 : f32
    %64 = vector.broadcast %cst_22 : f32 to vector<4x16x1xf32>
    %65 = arith.maximumf %63, %64 : vector<4x16x1xf32>
    %66 = math.rsqrt %65 : vector<4x16x1xf32>
    %c1 = arith.constant 1 : index
    %67 = memref.load %arg6[%c1] : memref<2xf32, #tpu.memory_space<smem>>
    %68 = vector.broadcast %67 : f32 to vector<4x16x1xf32>
    %69 = arith.mulf %66, %68 : vector<4x16x1xf32>
    %70 = vector.broadcast %69 : vector<4x16x1xf32> to vector<4x16x8xf32>
    %71 = arith.mulf %56, %70 : vector<4x16x8xf32>
    %72 = arith.mulf %58, %58 : vector<4x16x8xf32>
    %cst_23 = arith.constant dense<0.000000e+00> : vector<4x16xf32>
    %73 = vector.multi_reduction <add>, %72, %cst_23 [2] : vector<4x16x8xf32> to vector<4x16xf32>
    %74 = vector.shape_cast %73 : vector<4x16xf32> to vector<4x16x1xf32>
    %cst_24 = arith.constant 1.000000e-24 : f32
    %75 = vector.broadcast %cst_24 : f32 to vector<4x16x1xf32>
    %76 = arith.maximumf %74, %75 : vector<4x16x1xf32>
    %77 = math.rsqrt %76 : vector<4x16x1xf32>
    %78 = vector.broadcast %77 : vector<4x16x1xf32> to vector<4x16x8xf32>
    %79 = arith.mulf %58, %78 : vector<4x16x8xf32>
    "tpu.trace_start"() <{level = 10 : i32, message = "wnd,wmd->wnm"}> : () -> ()
    %cst_25 = arith.constant dense<0.000000e+00> : vector<4x16x16xf32>
    %80 = tpu.matmul %71, %79, %cst_25 {dimension_numbers = #tpu.dot_dimension_numbers<[2], [2], [1], [1], [0, 0, 0, 1, 1, 1], [0], [0]>} : vector<4x16x8xf32>, vector<4x16x8xf32>, vector<4x16x16xf32> -> vector<4x16x16xf32>
    "tpu.trace_stop"() : () -> ()
    %c1_26 = arith.constant 1 : index
    %c0_27 = arith.constant 0 : index
    %c0_28 = arith.constant 0 : index
    %81 = vector.load %arg5[%c1_26, %c0_27, %c0_28] : memref<2x16x16xf32, #tpu.memory_space<vmem>>, vector<1x16x16xf32>
    %82 = vector.shape_cast %81 : vector<1x16x16xf32> to vector<16x16xf32>
    %83 = vector.shape_cast %82 : vector<16x16xf32> to vector<1x16x16xf32>
    %84 = vector.broadcast %83 : vector<1x16x16xf32> to vector<4x16x16xf32>
    %85 = arith.addf %80, %84 : vector<4x16x16xf32>
    %cst_29 = arith.constant dense<0xFF800000> : vector<4x16xf32>
    %86 = vector.multi_reduction <maximumf>, %85, %cst_29 [2] : vector<4x16x16xf32> to vector<4x16xf32>
    %87 = vector.shape_cast %86 : vector<4x16xf32> to vector<4x16x1xf32>
    %88 = vector.broadcast %87 : vector<4x16x1xf32> to vector<4x16x16xf32>
    %89 = arith.subf %85, %88 : vector<4x16x16xf32>
    %90 = math.exp %89 : vector<4x16x16xf32>
    %cst_30 = arith.constant dense<0.000000e+00> : vector<4x16xf32>
    %91 = vector.multi_reduction <add>, %90, %cst_30 [2] : vector<4x16x16xf32> to vector<4x16xf32>
    %92 = vector.shape_cast %91 : vector<4x16xf32> to vector<4x16x1xf32>
    %93 = tpu.reciprocal %92 {approx = true} : vector<4x16x1xf32> -> vector<4x16x1xf32>
    %94 = vector.broadcast %93 : vector<4x16x1xf32> to vector<4x16x16xf32>
    %95 = arith.mulf %90, %94 : vector<4x16x16xf32>
    "tpu.trace_start"() <{level = 10 : i32, message = "wnm,wmd->wnd"}> : () -> ()
    %cst_31 = arith.constant dense<0.000000e+00> : vector<4x16x8xf32>
    %96 = tpu.matmul %95, %60, %cst_31 {dimension_numbers = #tpu.dot_dimension_numbers<[2], [1], [1], [2], [0, 0, 0, 1, 1, 2], [0], [0]>} : vector<4x16x16xf32>, vector<4x16x8xf32>, vector<4x16x8xf32> -> vector<4x16x8xf32>
    "tpu.trace_stop"() : () -> ()
    %97 = vector.shape_cast %96 : vector<4x16x8xf32> to vector<64x8xf32>
    %98 = vector.extract_strided_slice %9 {offsets = [8, 0], sizes = [8, 16], strides = [1, 1]} : vector<16x16xf32> to vector<8x16xf32>
    %cst_32 = arith.constant dense<0.000000e+00> : vector<64x16xf32>
    %99 = tpu.matmul %97, %98, %cst_32 {dimension_numbers = #tpu.dot_dimension_numbers<[1], [0], [0], [1], [0, 0, 1, 1], [], []>} : vector<64x8xf32>, vector<8x16xf32>, vector<64x16xf32> -> vector<64x16xf32>
    %100 = arith.addf %54, %99 : vector<64x16xf32>
    %c0_33 = arith.constant 0 : index
    %c0_34 = arith.constant 0 : index
    %101 = vector.load %arg8[%c0_33, %c0_34] : memref<1x16xf32, #tpu.memory_space<vmem>>, vector<1x16xf32>
    %102 = vector.broadcast %101 : vector<1x16xf32> to vector<64x16xf32>
    %103 = arith.addf %100, %102 : vector<64x16xf32>
    %c0_35 = arith.constant 0 : index
    %c0_36 = arith.constant 0 : index
    %104 = vector.load %arg9[%c0_35, %c0_36] : memref<4x16xf32, #tpu.memory_space<vmem>>, vector<1x16xf32>
    %105 = vector.broadcast %1 : f32 to vector<1x16xf32>
    %106 = arith.mulf %105, %104 : vector<1x16xf32>
    %c1_37 = arith.constant 1 : index
    %c0_38 = arith.constant 0 : index
    %107 = vector.load %arg9[%c1_37, %c0_38] : memref<4x16xf32, #tpu.memory_space<vmem>>, vector<1x16xf32>
    %108 = arith.addf %106, %107 : vector<1x16xf32>
    %c2 = arith.constant 2 : index
    %c0_39 = arith.constant 0 : index
    %109 = vector.load %arg9[%c2, %c0_39] : memref<4x16xf32, #tpu.memory_space<vmem>>, vector<1x16xf32>
    %110 = vector.broadcast %1 : f32 to vector<1x16xf32>
    %111 = arith.mulf %110, %109 : vector<1x16xf32>
    %c3 = arith.constant 3 : index
    %c0_40 = arith.constant 0 : index
    %112 = vector.load %arg9[%c3, %c0_40] : memref<4x16xf32, #tpu.memory_space<vmem>>, vector<1x16xf32>
    %113 = arith.addf %111, %112 : vector<1x16xf32>
    %cst_41 = arith.constant dense<0.000000e+00> : vector<64xf32>
    %114 = vector.multi_reduction <add>, %103, %cst_41 [1] : vector<64x16xf32> to vector<64xf32>
    %115 = vector.shape_cast %114 : vector<64xf32> to vector<64x1xf32>
    %cst_42 = arith.constant 1.600000e+01 : f32
    %116 = vector.broadcast %cst_42 : f32 to vector<64x1xf32>
    %117 = arith.divf %115, %116 : vector<64x1xf32>
    %118 = arith.mulf %103, %103 : vector<64x16xf32>
    %cst_43 = arith.constant dense<0.000000e+00> : vector<64xf32>
    %119 = vector.multi_reduction <add>, %118, %cst_43 [1] : vector<64x16xf32> to vector<64xf32>
    %120 = vector.shape_cast %119 : vector<64xf32> to vector<64x1xf32>
    %cst_44 = arith.constant 1.600000e+01 : f32
    %121 = vector.broadcast %cst_44 : f32 to vector<64x1xf32>
    %122 = arith.divf %120, %121 : vector<64x1xf32>
    %123 = arith.mulf %117, %117 : vector<64x1xf32>
    %124 = arith.subf %122, %123 : vector<64x1xf32>
    %125 = vector.broadcast %117 : vector<64x1xf32> to vector<64x16xf32>
    %126 = arith.subf %103, %125 : vector<64x16xf32>
    %cst_45 = arith.constant 9.99999974E-6 : f32
    %127 = vector.broadcast %cst_45 : f32 to vector<64x1xf32>
    %128 = arith.addf %124, %127 : vector<64x1xf32>
    %129 = math.rsqrt %128 : vector<64x1xf32>
    %130 = vector.broadcast %129 : vector<64x1xf32> to vector<64x16xf32>
    %131 = arith.mulf %126, %130 : vector<64x16xf32>
    %132 = vector.broadcast %108 : vector<1x16xf32> to vector<64x16xf32>
    %133 = arith.mulf %132, %131 : vector<64x16xf32>
    %134 = arith.addf %3, %133 : vector<64x16xf32>
    %135 = vector.broadcast %113 : vector<1x16xf32> to vector<64x16xf32>
    %136 = arith.addf %134, %135 : vector<64x16xf32>
    %c0_46 = arith.constant 0 : index
    %c0_47 = arith.constant 0 : index
    %137 = vector.load %arg10[%c0_46, %c0_47] : memref<16x32xf32, #tpu.memory_space<vmem>>, vector<16x32xf32>
    %cst_48 = arith.constant dense<0.000000e+00> : vector<64x32xf32>
    %138 = tpu.matmul %136, %137, %cst_48 {dimension_numbers = #tpu.dot_dimension_numbers<[1], [0], [0], [1], [0, 0, 1, 1], [], []>} : vector<64x16xf32>, vector<16x32xf32>, vector<64x32xf32> -> vector<64x32xf32>
    %c0_49 = arith.constant 0 : index
    %c0_50 = arith.constant 0 : index
    %139 = vector.load %arg11[%c0_49, %c0_50] : memref<1x32xf32, #tpu.memory_space<vmem>>, vector<1x32xf32>
    %140 = vector.broadcast %139 : vector<1x32xf32> to vector<64x32xf32>
    %141 = arith.addf %138, %140 : vector<64x32xf32>
    %cst_51 = arith.constant 5.000000e-01 : f32
    %142 = vector.broadcast %cst_51 : f32 to vector<64x32xf32>
    %143 = arith.mulf %142, %141 : vector<64x32xf32>
    %cst_52 = arith.constant 0.707106769 : f32
    %144 = vector.broadcast %cst_52 : f32 to vector<64x32xf32>
    %145 = arith.mulf %141, %144 : vector<64x32xf32>
    %146 = math.erf %145 : vector<64x32xf32>
    %cst_53 = arith.constant 1.000000e+00 : f32
    %147 = vector.broadcast %cst_53 : f32 to vector<64x32xf32>
    %148 = arith.addf %147, %146 : vector<64x32xf32>
    %149 = arith.mulf %143, %148 : vector<64x32xf32>
    %c0_54 = arith.constant 0 : index
    %c0_55 = arith.constant 0 : index
    %150 = vector.load %arg12[%c0_54, %c0_55] : memref<32x16xf32, #tpu.memory_space<vmem>>, vector<32x16xf32>
    %cst_56 = arith.constant dense<0.000000e+00> : vector<64x16xf32>
    %151 = tpu.matmul %149, %150, %cst_56 {dimension_numbers = #tpu.dot_dimension_numbers<[1], [0], [0], [1], [0, 0, 1, 1], [], []>} : vector<64x32xf32>, vector<32x16xf32>, vector<64x16xf32> -> vector<64x16xf32>
    %c0_57 = arith.constant 0 : index
    %c0_58 = arith.constant 0 : index
    %152 = vector.load %arg13[%c0_57, %c0_58] : memref<1x16xf32, #tpu.memory_space<vmem>>, vector<1x16xf32>
    %153 = vector.broadcast %152 : vector<1x16xf32> to vector<64x16xf32>
    %154 = arith.addf %151, %153 : vector<64x16xf32>
    %c0_59 = arith.constant 0 : index
    %c0_60 = arith.constant 0 : index
    %155 = vector.load %arg14[%c0_59, %c0_60] : memref<4x16xf32, #tpu.memory_space<vmem>>, vector<1x16xf32>
    %156 = vector.broadcast %1 : f32 to vector<1x16xf32>
    %157 = arith.mulf %156, %155 : vector<1x16xf32>
    %c1_61 = arith.constant 1 : index
    %c0_62 = arith.constant 0 : index
    %158 = vector.load %arg14[%c1_61, %c0_62] : memref<4x16xf32, #tpu.memory_space<vmem>>, vector<1x16xf32>
    %159 = arith.addf %157, %158 : vector<1x16xf32>
    %c2_63 = arith.constant 2 : index
    %c0_64 = arith.constant 0 : index
    %160 = vector.load %arg14[%c2_63, %c0_64] : memref<4x16xf32, #tpu.memory_space<vmem>>, vector<1x16xf32>
    %161 = vector.broadcast %1 : f32 to vector<1x16xf32>
    %162 = arith.mulf %161, %160 : vector<1x16xf32>
    %c3_65 = arith.constant 3 : index
    %c0_66 = arith.constant 0 : index
    %163 = vector.load %arg14[%c3_65, %c0_66] : memref<4x16xf32, #tpu.memory_space<vmem>>, vector<1x16xf32>
    %164 = arith.addf %162, %163 : vector<1x16xf32>
    %cst_67 = arith.constant dense<0.000000e+00> : vector<64xf32>
    %165 = vector.multi_reduction <add>, %154, %cst_67 [1] : vector<64x16xf32> to vector<64xf32>
    %166 = vector.shape_cast %165 : vector<64xf32> to vector<64x1xf32>
    %cst_68 = arith.constant 1.600000e+01 : f32
    %167 = vector.broadcast %cst_68 : f32 to vector<64x1xf32>
    %168 = arith.divf %166, %167 : vector<64x1xf32>
    %169 = arith.mulf %154, %154 : vector<64x16xf32>
    %cst_69 = arith.constant dense<0.000000e+00> : vector<64xf32>
    %170 = vector.multi_reduction <add>, %169, %cst_69 [1] : vector<64x16xf32> to vector<64xf32>
    %171 = vector.shape_cast %170 : vector<64xf32> to vector<64x1xf32>
    %cst_70 = arith.constant 1.600000e+01 : f32
    %172 = vector.broadcast %cst_70 : f32 to vector<64x1xf32>
    %173 = arith.divf %171, %172 : vector<64x1xf32>
    %174 = arith.mulf %168, %168 : vector<64x1xf32>
    %175 = arith.subf %173, %174 : vector<64x1xf32>
    %176 = vector.broadcast %168 : vector<64x1xf32> to vector<64x16xf32>
    %177 = arith.subf %154, %176 : vector<64x16xf32>
    %cst_71 = arith.constant 9.99999974E-6 : f32
    %178 = vector.broadcast %cst_71 : f32 to vector<64x1xf32>
    %179 = arith.addf %175, %178 : vector<64x1xf32>
    %180 = math.rsqrt %179 : vector<64x1xf32>
    %181 = vector.broadcast %180 : vector<64x1xf32> to vector<64x16xf32>
    %182 = arith.mulf %177, %181 : vector<64x16xf32>
    %183 = vector.broadcast %159 : vector<1x16xf32> to vector<64x16xf32>
    %184 = arith.mulf %183, %182 : vector<64x16xf32>
    %185 = arith.addf %136, %184 : vector<64x16xf32>
    %186 = vector.broadcast %164 : vector<1x16xf32> to vector<64x16xf32>
    %187 = arith.addf %185, %186 : vector<64x16xf32>
    %c0_72 = arith.constant 0 : index
    %c0_73 = arith.constant 0 : index
    %c0_74 = arith.constant 0 : index
    %188 = vector.load %arg15[%c0_72, %c0_73, %c0_74] : memref<1x64x16xf32, #tpu.memory_space<vmem>>, vector<1x64x16xf32>
    %189 = vector.shape_cast %188 : vector<1x64x16xf32> to vector<64x16xf32>
    %190 = vector.shape_cast %187 : vector<64x16xf32> to vector<1x64x16xf32>
    tpu.vector_store %arg15[%c0_72, %c0_73, %c0_74], %190 {strides = array<i32>} : memref<1x64x16xf32, #tpu.memory_space<vmem>>, vector<1x64x16xf32>,
    return
  }
  func.func @transform_0(%arg0: i32) -> i32 {
    %c0_i32 = arith.constant 0 : i32
    %c0_i32_0 = arith.constant 0 : i32
    return %c0_i32 : i32
  }
  func.func @transform_1(%arg0: i32) -> (i32, i32, i32) {
    %c0_i32 = arith.constant 0 : i32
    %c0_i32_0 = arith.constant 0 : i32
    %c0_i32_1 = arith.constant 0 : i32
    return %arg0, %c0_i32, %c0_i32_0 : i32, i32, i32
  }
  func.func @transform_2(%arg0: i32) -> (i32, i32) {
    %c0_i32 = arith.constant 0 : i32
    %c0_i32_0 = arith.constant 0 : i32
    %c0_i32_1 = arith.constant 0 : i32
    return %c0_i32, %c0_i32_0 : i32, i32
  }
  func.func @transform_3(%arg0: i32) -> (i32, i32) {
    %c0_i32 = arith.constant 0 : i32
    %c0_i32_0 = arith.constant 0 : i32
    %c0_i32_1 = arith.constant 0 : i32
    return %c0_i32, %c0_i32_0 : i32, i32
  }
  func.func @transform_4(%arg0: i32) -> (i32, i32, i32) {
    %c0_i32 = arith.constant 0 : i32
    %c0_i32_0 = arith.constant 0 : i32
    %c0_i32_1 = arith.constant 0 : i32
    %c0_i32_2 = arith.constant 0 : i32
    return %c0_i32, %c0_i32_0, %c0_i32_1 : i32, i32, i32
  }
  func.func @transform_5(%arg0: i32) -> i32 {
    %c0_i32 = arith.constant 0 : i32
    %c0_i32_0 = arith.constant 0 : i32
    return %c0_i32 : i32
  }
  func.func @transform_6(%arg0: i32) -> (i32, i32) {
    %c0_i32 = arith.constant 0 : i32
    %c0_i32_0 = arith.constant 0 : i32
    %c0_i32_1 = arith.constant 0 : i32
    return %c0_i32, %c0_i32_0 : i32, i32
  }
  func.func @transform_7(%arg0: i32) -> (i32, i32) {
    %c0_i32 = arith.constant 0 : i32
    %c0_i32_0 = arith.constant 0 : i32
    %c0_i32_1 = arith.constant 0 : i32
    return %c0_i32, %c0_i32_0 : i32, i32
  }
  func.func @transform_8(%arg0: i32) -> (i32, i32) {
    %c0_i32 = arith.constant 0 : i32
    %c0_i32_0 = arith.constant 0 : i32
    %c0_i32_1 = arith.constant 0 : i32
    return %c0_i32, %c0_i32_0 : i32, i32
  }
  func.func @transform_9(%arg0: i32) -> (i32, i32) {
    %c0_i32 = arith.constant 0 : i32
    %c0_i32_0 = arith.constant 0 : i32
    %c0_i32_1 = arith.constant 0 : i32
    return %c0_i32, %c0_i32_0 : i32, i32
  }
  func.func @transform_10(%arg0: i32) -> (i32, i32) {
    %c0_i32 = arith.constant 0 : i32
    %c0_i32_0 = arith.constant 0 : i32
    %c0_i32_1 = arith.constant 0 : i32
    return %c0_i32, %c0_i32_0 : i32, i32
  }
  func.func @transform_11(%arg0: i32) -> (i32, i32) {
    %c0_i32 = arith.constant 0 : i32
    %c0_i32_0 = arith.constant 0 : i32
    %c0_i32_1 = arith.constant 0 : i32
    return %c0_i32, %c0_i32_0 : i32, i32
  }
  func.func @transform_12(%arg0: i32) -> (i32, i32) {
    %c0_i32 = arith.constant 0 : i32
    %c0_i32_0 = arith.constant 0 : i32
    %c0_i32_1 = arith.constant 0 : i32
    return %c0_i32, %c0_i32_0 : i32, i32
  }
  func.func @transform_13(%arg0: i32) -> (i32, i32) {
    %c0_i32 = arith.constant 0 : i32
    %c0_i32_0 = arith.constant 0 : i32
    %c0_i32_1 = arith.constant 0 : i32
    return %c0_i32, %c0_i32_0 : i32, i32
  }
  func.func @transform_14(%arg0: i32) -> (i32, i32, i32) {
    %c0_i32 = arith.constant 0 : i32
    %c0_i32_0 = arith.constant 0 : i32
    %c0_i32_1 = arith.constant 0 : i32
    return %arg0, %c0_i32, %c0_i32_0 : i32, i32, i32
  }
}

</mosaic_0001>

<bundles_post_ra>
// kernel: scot_decoder_forward.7
= control target key start
LH: loop header
LB: loop body
LE: loop exit
PB: predicated region body
PF: predicated region fallthrough
CT: control target
= control target key end

     0   :  { %10 = vsyncpa [#allocation3], 0  ;;  %s1183_s18 = smov 0   ;;  %s1370_s0 = inlined_call_operand.vmem [shape: f32[2], index: 0, kind: input, shape index: {}]   ;;  %s1371_s1 = inlined_call_operand.vmem [shape: f32[2,16,32], index: 1, kind: input, shape index: {}]   ;;  %s1372_s2 = inlined_call_operand.vmem [shape: f32[32,64], index: 2, kind: input, shape index: {}]   ;;  %s1373_s3 = inlined_call_operand.vmem [shape: f32[4,16], index: 3, kind: input, shape index: {}]   ;;  %s1374_s4 = inlined_call_operand.vmem [shape: f32[16,16], index: 4, kind: input, shape index: {}]   ;;  %s1375_s5 = inlined_call_operand.vmem [shape: f32[2,16,64], index: 5, kind: output, shape index: {}]  }
   0x1 LB: > { %s1189_s19 = sadd.s32 4294967295, %s1144_s18   ;;  %p970_p0 = scmp.ge.s32.totalorder %s1144_s18, 1  ;;  %s1144_s18 = sphi %s1183_s18, %s16_s18  }
   0x2   : > { %p157_p1 = scmp.lt.s32.totalorder %s1144_s18, 3  ;;  %s170_s22 = sshll.u32 %s1370_s0, 4  ;;  %s171_s22 = int_to_ptr.vmem [resolvable:$true] %s170_s22 }
   0x3   : > { %p1086_p3 = scmp.eq.s32.totalorder %s1189_s19, 0  ;;  %s1119_s24 = scalar_lea.vmem %s171_s22, 16 }
   0x4   : > { %p1196_p2 = pnand %p970_p0, %p157_p1  ;;  %p1120_p6 = scmp.ne.s32.totalorder %s171_s22, %s1119_s24 }
   0x5   : > { %p1127_p10 = scmp.lt.s32.totalorder %s171_s22, %s171_s22  ;;  %p1128_p11 = scmp.lt.s32.totalorder %s1119_s24, %s1119_s24 }
   0x6   : > { %p1082_p4 = pneg %p1196_p2 }
   0x7   : > { %p1129_p12 = por %p1128_p11, %p1127_p10 }
   0x8   : > { %p1083_p5 = pnand %p1086_p3, %p1082_p4 }
   0xa   : > { %p1121_p7 = pneg %p1083_p5 }
   0xc   : > { %p1122_p8 = pnand %p1121_p7, %p1120_p6 }
   0xe   : > { %p1123_p9 = pneg %p1122_p8 }
  0x10   : > { %p1130_p13 = pnand %p1129_p12, %p1123_p9 }
  0x12   : > { %1133 = shalt.err (!%p1130_p13)
}
  0x13   : > { %s1146_s25 = smov [#allocation2]   ;;  %200 = sbr.rel (%p1196_p2) target bundleno = 1007 (0x3ef), region = 40 }
  0x14   : > { %1085 = dma.vmem_to_smem (!%p1083_p5), %s171_s22, 16, %s1146_s25, [#allocation3]  }
  0x1a   : > { %1139 = dma.done.wait (%p1086_p3), [#allocation3], 16  }
  0x1b   : > { %1141 = vsyncadd (%p1086_p3), [#allocation3], 4294967280 }
  0x1c   : > { %206 = sfence }
  0x1d   : > { %v242_v0 = vld [vmem:[%s1372_s2] sm:$0xff]  ;;  %v243_v1 = vld [vmem:[%s1372_s2 + $0x8] sm:$0xff]  ;;  %v244_v2 = vld [vmem:[%s1372_s2 + $0x10] sm:$0xff]  ;;  %p229_p0 = scmp.lt.s32.totalorder %s1189_s19, 1  ;;  %vm246_vm0 = vcmask 261120   ;;  %s1147_s14 = smov 96  }
  0x1e   : > { %v1054_v3 = vpack.c.bf16 %v243_v1, %v242_v0  ;;  %v245_v4 = vld [vmem:[%s1372_s2 + $0x18] sm:$0xff]  ;;  %s1148_s15 = smov 112   ;;  %s1149_s16 = smov 80   ;;  %vm339_vm1 = vcmask 130048   ;;  %v337_v40 = vld [vmem:[%s1374_s4] sm:$0xff]  ;;  %v338_v41 = vld [vmem:[%s1374_s4 + $0x8] sm:$0xff] }
  0x1f   : > { %v1058_v5 = vpack.c.bf16 %v245_v4, %v244_v2  ;;  %s1225_s9 = scalar_select %p229_p0, %s1189_s19, 1  ;;  %v1285_v42 = vpack.c.bf16 %v338_v41, %v337_v40  ;;  %vm895_vm2 = vcmask 392192   ;;  %vm898_vm3 = vcmask 523264  }
  0x20   : > { %1055 = vmatprep.subr.bf16.mxu0 %v1054_v3  ;;  %s1307_s23 = sld [smem:[#allocation2 + %s1189_s19]]  ;;  %s1150_s6 = smov 16  }
  0x21   : > { %1057 = vmatpush3.bf16.msra.mxu0 %v1054_v3  ;;  %s991_s10 = sshll.u32 %s1225_s9, 4  ;;  %1063 = vmatprep.subr.bf16.mxu1 %v1285_v42  ;;  %s1151_s7 = smov 32  }
  0x22   : > { %1059 = vmatprep.subr.bf16.mxu0 %v1058_v5  ;;  %s233_s13 = scalar_lea.vmem %s1371_s1, %s991_s10  ;;  %1065 = vmatpush3.bf16.msra.mxu1 %v1285_v42  ;;  %s1152_s8 = smov 48  }
  0x23   : > { %v240_v6 = vld [vmem:[%s233_s13] sm:$0xff]  ;;  %v241_v7 = vld [vmem:[%s233_s13 + $0x8] sm:$0xff]  ;;  %1067 = vmatprep.subr.bf16.mxu1 %v1285_v42  ;;  %s238_s13 = scalar_lea.vmem %s1375_s5, %s991_s10 }
  0x24   : > { %1023 = vmatprep.mubr.msk.f32.mxu0 %vm246_vm0, %v240_v6 }
  0x25   : > { %1061 = vmatpush3.bf16.msra.mxu0 %v1058_v5 }
  0x26   : > { %1071 = vmatprep.subr.bf16.mxu0 %v1285_v42 }
  0x28   : > { %1024 = vmatmul.mubr.msk.f32.vlgmr.msra.gmra.mrb[0].mxu0 %vm246_vm0, %v241_v7 }
  0x29   : > { %1073 = vmatpush3.bf16.msra.mxu0 %v1285_v42 }
  0xfb   : > { %v1235_v8 = vpop.f32.mrb[0].mxu0 }
  0xfc   : > { %603 = vrot.lane.b32.xlu1 %v1235_v8, %s1147_s14  ;;  %468 = vrot.lane.b32.xlu0 %v1235_v8, %s1148_s15  ;;  %v1241_v9 = vpop.f32.mrb[1].mxu0  ;;  %v350_v10 = vmul.f32 %v1235_v8, %v1235_v8  ;;  %v343_v38 = vsel %vm339_vm1, %v1235_v8, 0.0 }
  0xfd   : > { %v349_v11 = vmul.f32 %v1241_v9, %v1241_v9  ;;  %v340_v34 = vsel %vm339_vm1, %v1241_v9, 0.0 }
  0xfe   : > { %v354_v39 = vsel %vm339_vm1, %v350_v10, 0.0 }
  0xff   : > { %v351_v37 = vsel %vm339_vm1, %v349_v11, 0.0 }
 0x100   : > { %736 = vrot.lane.b32.xlu0 %v1235_v8, %s1149_s16  ;;  %484 = vrot.lane.b32.xlu1 %v350_v10, %s1148_s15 }
 0x104   : > { %617 = vrot.lane.b32.xlu1 %v350_v10, %s1147_s14  ;;  %466 = vrot.lane.b32.xlu0 %v1241_v9, %s1148_s15 }
 0x108   : > { %601 = vrot.lane.b32.xlu0 %v1241_v9, %s1147_s14  ;;  %482 = vrot.lane.b32.xlu1 %v349_v11, %s1148_s15 }
 0x10c   : > { %734 = vrot.lane.b32.xlu0 %v1241_v9, %s1149_s16  ;;  %615 = vrot.lane.b32.xlu1 %v349_v11, %s1147_s14 }
 0x110   : > { %748 = vrot.lane.b32.xlu0 %v349_v11, %s1149_s16  ;;  %750 = vrot.lane.b32.xlu1 %v350_v10, %s1149_s16 }
 0x16e   : > { %v604_v12 = vpop.permute.xlu1 %603  ;;  %v469_v13 = vpop.permute.xlu0 %468 }
 0x16f   : > { %v610_v14 = vsel %vm339_vm1, %v604_v12, 0.0  ;;  %v475_v15 = vsel %vm339_vm1, %v469_v13, 0.0 }
 0x170   : > { %611 = vadd.xlane.f32.xlu0 %v610_v14  ;;  %476 = vadd.xlane.f32.xlu1 %v475_v15 }
 0x172   : > { %v737_v16 = vpop.permute.xlu0 %736  ;;  %v485_v17 = vpop.permute.xlu1 %484 }
 0x173   : > { %v743_v18 = vsel %vm339_vm1, %v737_v16, 0.0  ;;  %v491_v23 = vsel %vm339_vm1, %v485_v17, 0.0 }
 0x174   : > { %744 = vadd.xlane.f32.xlu1 %v743_v18 }
 0x176   : > { %v618_v19 = vpop.permute.xlu1 %617  ;;  %v467_v20 = vpop.permute.xlu0 %466 }
 0x177   : > { %v472_v21 = vsel %vm339_vm1, %v467_v20, 0.0  ;;  %v624_v27 = vsel %vm339_vm1, %v618_v19, 0.0 }
 0x178   : > { %473 = vadd.xlane.f32.xlu0 %v472_v21 }
 0x17a   : > { %v602_v22 = vpop.permute.xlu0 %601  ;;  %v483_v25 = vpop.permute.xlu1 %482 }
 0x17b   : > { %v607_v24 = vsel %vm339_vm1, %v602_v22, 0.0  ;;  %v488_v32 = vsel %vm339_vm1, %v483_v25, 0.0 }
 0x17c   : > { %492 = vadd.xlane.f32.xlu0 %v491_v23  ;;  %608 = vadd.xlane.f32.xlu1 %v607_v24 }
 0x17e   : > { %v735_v26 = vpop.permute.xlu0 %734  ;;  %v616_v29 = vpop.permute.xlu1 %615 }
 0x17f   : > { %v740_v28 = vsel %vm339_vm1, %v735_v26, 0.0  ;;  %v621_v33 = vsel %vm339_vm1, %v616_v29, 0.0 }
 0x180   : > { %625 = vadd.xlane.f32.xlu0 %v624_v27  ;;  %741 = vadd.xlane.f32.xlu1 %v740_v28 }
 0x182   : > { %v749_v30 = vpop.permute.xlu0 %748  ;;  %v751_v35 = vpop.permute.xlu1 %750 }
 0x183   : > { %v754_v31 = vsel %vm339_vm1, %v749_v30, 0.0  ;;  %v757_v36 = vsel %vm339_vm1, %v751_v35, 0.0 }
 0x184   : > { %755 = vadd.xlane.f32.xlu1 %v754_v31  ;;  %489 = vadd.xlane.f32.xlu0 %v488_v32 }
 0x188   : > { %622 = vadd.xlane.f32.xlu0 %v621_v33  ;;  %341 = vadd.xlane.f32.xlu1 %v340_v34  ;;  %v328_v33 = vld [vmem:[%s1373_s3] sm:$0x1]  ;;  %v371_v34 = vlaneseq }
 0x18c   : > { %758 = vadd.xlane.f32.xlu0 %v757_v36  ;;  %352 = vadd.xlane.f32.xlu1 %v351_v37 }
 0x190   : > { %344 = vadd.xlane.f32.xlu0 %v343_v38 }
 0x194   : > { %355 = vadd.xlane.f32.xlu0 %v354_v39  ;;  %v329_v39 = vstv %s1307_s23 }
 0x1fd   : > { %v477_v43 = vpop.xlane.xlu1 %476  ;;  %v612_v44 = vpop.xlane.xlu0 %611 }
 0x1fe   : > { %v479_v47 = vmul.f32 0.0625, %v477_v43  ;;  %v614_v50 = vmul.f32 0.0625, %v612_v44  ;;  %v330_v44 = vmul.f32 %v329_v39, %v328_v33 }
 0x200   : > { %v497_v51 = vmul.f32 %v479_v47, %v479_v47  ;;  %v630_v57 = vmul.f32 %v614_v50, %v614_v50  ;;  %v501_v19 = vsub.f32 %v1235_v8, %v479_v47  ;;  %v634_v31 = vsub.f32 %v1235_v8, %v614_v50 }
 0x201   : > { %v745_v45 = vpop.xlane.xlu1 %744  ;;  %v372_v50 = vshrl.u32 %v371_v34, 7 }
 0x202   : > { %v1302_v10 = vmul.f32 0.0625, %v745_v45  ;;  %v333_v45 = vld [vmem:[%s1373_s3 + $0x2] sm:$0x1] }
 0x204   : > { %v763_v20 = vmul.f32 %v1302_v10, %v1302_v10 }
 0x205   : > { %v474_v46 = vpop.xlane.xlu0 %473 }
 0x206   : > { %v1292_v54 = vmul.f32 0.0625, %v474_v46 }
 0x208   : > { %v496_v62 = vmul.f32 %v1292_v54, %v1292_v54  ;;  %v500_v41 = vsub.f32 %v1241_v9, %v1292_v54 }
 0x209   : > { %v493_v48 = vpop.xlane.xlu0 %492  ;;  %v609_v49 = vpop.xlane.xlu1 %608 }
 0x20a   : > { %v495_v52 = vmul.f32 0.0625, %v493_v48  ;;  %v1298_v63 = vmul.f32 0.0625, %v609_v49 }
 0x20c   : > { %v499_v53 = vsub.f32 %v495_v52, %v497_v51  ;;  %v629_v11 = vmul.f32 %v1298_v63, %v1298_v63 }
 0x20d   : > { %v626_v55 = vpop.xlane.xlu0 %625  ;;  %v742_v56 = vpop.xlane.xlu1 %741 }
 0x20e   : > { %v503_v58 = vadd.f32 1e-05, %v499_v53  ;;  %v628_v59 = vmul.f32 0.0625, %v626_v55  ;;  %v1294_v60 = vmul.f32 0.0625, %v742_v56  ;;  %v331_v53 = vld [vmem:[%s1373_s3 + $0x1] sm:$0x1]  ;;  %v334_v56 = vmul.f32 %v333_v45, %v329_v39 }
 0x210   : > { %1103 = vrsqrt.f32 %v503_v58  ;;  %v632_v61 = vsub.f32 %v628_v59, %v630_v57  ;;  %v762_v3 = vmul.f32 %v1294_v60, %v1294_v60  ;;  %v766_v47 = vsub.f32 %v1241_v9, %v1294_v60  ;;  %v335_v58 = vld [vmem:[%s1373_s3 + $0x3] sm:$0x1] }
 0x211   : > { %v490_v0 = vpop.xlane.xlu0 %489  ;;  %v756_v1 = vpop.xlane.xlu1 %755  ;;  %v633_v57 = vsub.f32 %v1241_v9, %v1298_v63 }
 0x212   : > { %v636_v2 = vadd.f32 1e-05, %v632_v61  ;;  %v494_v4 = vmul.f32 0.0625, %v490_v0  ;;  %v760_v5 = vmul.f32 0.0625, %v756_v1  ;;  %v332_v61 = vadd.f32 %v331_v53, %v330_v44 }
 0x213   : > { %v336_v1 = vadd.f32 %v335_v58, %v334_v56 }
 0x214   : > { %1105 = vrsqrt.f32 %v636_v2  ;;  %v498_v6 = vsub.f32 %v494_v4, %v496_v62  ;;  %v764_v7 = vsub.f32 %v760_v5, %v762_v3  ;;  %v373_v62 = vsub.s32 0, %v372_v50 }
 0x215   : > { %v623_v12 = vpop.xlane.xlu0 %622  ;;  %v342_v13 = vpop.xlane.xlu1 %341  ;;  %v767_v2 = vsub.f32 %v1235_v8, %v1302_v10 }
 0x216   : > { %v502_v14 = vadd.f32 1e-05, %v498_v6  ;;  %v768_v15 = vadd.f32 1e-05, %v764_v7  ;;  %v627_v16 = vmul.f32 0.0625, %v623_v12  ;;  %v1309_v17 = vmul.f32 0.0625, %v342_v13 }
 0x217   : > { %v374_v4 = vrot.slane %v332_v61, %v373_v62 }
 0x218   : > { %1107 = vrsqrt.f32 %v502_v14  ;;  %v631_v18 = vsub.f32 %v627_v16, %v629_v11  ;;  %v359_v25 = vmul.f32 %v1309_v17, %v1309_v17  ;;  %v363_v3 = vsub.f32 %v1241_v9, %v1309_v17 }
 0x219   : > { %1109 = vrsqrt.f32 %v768_v15  ;;  %v759_v21 = vpop.xlane.xlu0 %758  ;;  %v353_v22 = vpop.xlane.xlu1 %352  ;;  %v380_v11 = vrot.slane %v336_v1, %v373_v62 }
 0x21a   : > { %v1104_v23 = vpop.eup %1103  ;;  %v635_v24 = vadd.f32 1e-05, %v631_v18  ;;  %v761_v26 = vmul.f32 0.0625, %v759_v21  ;;  %v357_v27 = vmul.f32 0.0625, %v353_v22 }
 0x21b   : > { %v507_v28 = vmul.f32 %v1104_v23, %v501_v19 }
 0x21c   : > { %1111 = vrsqrt.f32 %v635_v24  ;;  %v765_v29 = vsub.f32 %v761_v26, %v763_v20  ;;  %v361_v30 = vsub.f32 %v357_v27, %v359_v25 }
 0x21d   : > { %v345_v32 = vpop.xlane.xlu0 %344  ;;  %512 = vrot.lane.b32.xlu0 %v507_v28, %s1148_s15 }
 0x21e   : > { %v1106_v35 = vpop.eup %1105  ;;  %v769_v36 = vadd.f32 1e-05, %v765_v29  ;;  %v365_v37 = vadd.f32 1e-05, %v361_v30  ;;  %v348_v38 = vmul.f32 0.0625, %v345_v32 }
 0x21f   : > { %v640_v40 = vmul.f32 %v1106_v35, %v634_v31 }
 0x220   : > { %1113 = vrsqrt.f32 %v769_v36  ;;  %v360_v48 = vmul.f32 %v348_v38, %v348_v38  ;;  %v364_v14 = vsub.f32 %v1235_v8, %v348_v38 }
 0x221   : > { %1115 = vrsqrt.f32 %v365_v37  ;;  %v356_v43 = vpop.xlane.xlu0 %355  ;;  %645 = vrot.lane.b32.xlu1 %v640_v40, %s1147_s14 }
 0x222   : > { %v1108_v46 = vpop.eup %1107  ;;  %v358_v49 = vmul.f32 0.0625, %v356_v43 }
 0x223   : > { %v1110_v51 = vpop.eup %1109  ;;  %v506_v52 = vmul.f32 %v1108_v46, %v500_v41 }
 0x224   : > { %v362_v54 = vsub.f32 %v358_v49, %v360_v48  ;;  %v772_v55 = vmul.f32 %v1110_v51, %v766_v47 }
 0x225   : > { %510 = vrot.lane.b32.xlu1 %v506_v52, %s1148_s15 }
 0x226   : > { %v1112_v59 = vpop.eup %1111  ;;  %v366_v60 = vadd.f32 1e-05, %v362_v54  ;;  %776 = vrot.lane.b32.xlu0 %v772_v55, %s1149_s16 }
 0x227   : > { %v639_v0 = vmul.f32 %v1112_v59, %v633_v57 }
 0x228   : > { %1117 = vrsqrt.f32 %v366_v60 }
 0x229   : > { %643 = vrot.lane.b32.xlu1 %v639_v0, %s1147_s14 }
 0x22a   : > { %v1114_v63 = vpop.eup %1113 }
 0x22b   : > { %v1116_v5 = vpop.eup %1115  ;;  %v773_v6 = vmul.f32 %v1114_v63, %v767_v2 }
 0x22c   : > { %v369_v7 = vmul.f32 %v1116_v5, %v363_v3 }
 0x22d   : > { %778 = vrot.lane.b32.xlu1 %v773_v6, %s1149_s16 }
 0x22e   : > { %v375_v12 = vmul.f32 %v374_v4, %v369_v7 }
 0x230   : > { %v381_v13 = vadd.f32 %v380_v11, %v375_v12 }
 0x232   : > { %v1118_v15 = vpop.eup %1117  ;;  %1030 = vmatprep.mubr.msk.f32.mxu1 %vm339_vm1, %v381_v13 }
 0x233   : > { %v370_v10 = vmul.f32 %v1118_v15, %v364_v14 }
 0x235   : > { %v376_v16 = vmul.f32 %v374_v4, %v370_v10 }
 0x237   : > { %v382_v18 = vadd.f32 %v380_v11, %v376_v16 }
 0x239   : > { %1031 = vmatmul.mubr.msk.f32.vlgmr.msra.gmra.mrb[0].mxu1 %vm339_vm1, %v382_v18 }
 0x23a   : > { %1069 = vmatpush3.bf16.msra.mxu1 %v1285_v42 }
 0x23b   : > { %1075 = vmatprep.subr.bf16.mxu1 %v1285_v42 }
 0x28f   : > { %v513_v17 = vpop.permute.xlu0 %512 }
 0x290   : > { %v517_v19 = vmul.f32 %v513_v17, %v374_v4 }
 0x292   : > { %v519_v24 = vadd.f32 %v517_v19, %v380_v11 }
 0x293   : > { %v646_v9 = vpop.permute.xlu1 %645 }
 0x294   : > { %v650_v25 = vmul.f32 %v646_v9, %v374_v4 }
 0x296   : > { %v652_v30 = vadd.f32 %v650_v25, %v380_v11 }
 0x297   : > { %v511_v20 = vpop.permute.xlu1 %510 }
 0x298   : > { %v777_v21 = vpop.permute.xlu0 %776  ;;  %v516_v22 = vmul.f32 %v511_v20, %v374_v4 }
 0x299   : > { %v782_v23 = vmul.f32 %v777_v21, %v374_v4 }
 0x29a   : > { %v518_v8 = vadd.f32 %v516_v22, %v380_v11 }
 0x29b   : > { %v644_v26 = vpop.permute.xlu1 %643  ;;  %v784_v27 = vadd.f32 %v782_v23, %v380_v11 }
 0x29c   : > { %v649_v28 = vmul.f32 %v644_v26, %v374_v4  ;;  %1037 = vmatprep.mubr.msk.f32.mxu1 %vm339_vm1, %v518_v8 }
 0x29d   : > { %1038 = vmatmul.mubr.msk.f32.vlgmr.msra.gmra.mrb[2].mxu1 %vm339_vm1, %v519_v24 }
 0x29e   : > { %v651_v29 = vadd.f32 %v649_v28, %v380_v11  ;;  %1051 = vmatprep.mubr.msk.f32.mxu1 %vm339_vm1, %v784_v27  ;;  %1077 = vmatpush3.bf16.msra.mxu1 %v1285_v42 }
 0x29f   : > { %v779_v31 = vpop.permute.xlu1 %778 }
 0x2a0   : > { %v783_v32 = vmul.f32 %v779_v31, %v374_v4  ;;  %1044 = vmatprep.mubr.msk.f32.mxu0 %vm339_vm1, %v651_v29 }
 0x2a1   : > { %1045 = vmatmul.mubr.msk.f32.vlgmr.msra.gmra.mrb[2].mxu0 %vm339_vm1, %v652_v30 }
 0x2a2   : > { %v785_v33 = vadd.f32 %v783_v32, %v380_v11 }
 0x2a4   : > { %1052 = vmatmul.mubr.msk.f32.vlgmr.msra.gmra.mrb[4].mxu1 %vm339_vm1, %v785_v33 }
 0x30c   : > { %v1032_v34 = vpop.f32.mrb[0].mxu1 }
 0x30d   : > { %v455_v35 = vpop.f32.mrb[1].mxu1 }
 0x370   : > { %v1039_v36 = vpop.f32.mrb[2].mxu1 }
 0x371   : > { %871 = vrot.lane.b32.xlu1 %v1039_v36, %s1150_s6  ;;  %v592_v37 = vpop.f32.mrb[3].mxu1 }
 0x372   : > { %869 = vrot.lane.b32.xlu0 %v592_v37, %s1150_s6 }
 0x374   : > { %v1046_v38 = vpop.f32.mrb[2].mxu0 }
 0x375   : > { %879 = vrot.lane.b32.xlu1 %v1046_v38, %s1151_s7  ;;  %v725_v42 = vpop.f32.mrb[3].mxu0 }
 0x376   : > { %877 = vrot.lane.b32.xlu0 %v725_v42, %s1151_s7 }
 0x377   : > { %v1053_v39 = vpop.f32.mrb[4].mxu1 }
 0x378   : > { %v858_v40 = vpop.f32.mrb[5].mxu1 }
 0x379   : > { %887 = vrot.lane.b32.xlu1 %v1053_v39, %s1152_s8 }
 0x37a   : > { %885 = vrot.lane.b32.xlu0 %v858_v40, %s1152_s8 }
 0x3e3   : > { %v872_v41 = vpop.permute.xlu1 %871 }
 0x3e4   : > { %v870_v43 = vpop.permute.xlu0 %869  ;;  %v892_v46 = vsel %vm339_vm1, %v1032_v34, %v872_v41 }
 0x3e5   : > { %v891_v47 = vsel %vm339_vm1, %v455_v35, %v870_v43 }
 0x3e7   : > { %v880_v44 = vpop.permute.xlu1 %879 }
 0x3e8   : > { %v878_v45 = vpop.permute.xlu0 %877  ;;  %v894_v48 = vsel %vm246_vm0, %v892_v46, %v880_v44 }
 0x3e9   : > { %v893_v50 = vsel %vm246_vm0, %v891_v47, %v878_v45 }
 0x3eb   : > { %v888_v49 = vpop.permute.xlu1 %887 }
 0x3ec   : > { %v897_v51 = vsel %vm895_vm2, %v894_v48, %v888_v49  ;;  %v886_v52 = vpop.permute.xlu0 %885 }
 0x3ed   : > { %900 = vst.msk [vmem:[%s238_s13 + $0x8] sm:$0xff] %vm898_vm3, %v897_v51  ;;  %v896_v53 = vsel %vm895_vm2, %v893_v50, %v886_v52 }
 0x3ee   : > { %899 = vst.msk [vmem:[%s238_s13] sm:$0xff] %vm898_vm3, %v896_v53 }
 0x3ef PF: > { %s16_s18 = sadd.s32 1, %s1144_s18  }
 0x3f0   : > { %p13_p1 = scmp.ge.s32.totalorder %s16_s18, 4  }
 0x3f2   :  { %15 = sbr.rel (!%p13_p1) target bundleno = 1 (0x1), region = 75 }
 0x3f9   :  { %922 = vsyncpa [#allocation3], 1 }
 0x3fa   :  { %924 = vsyncpa [#allocation3 + $0x1], 1 }

// kernel: scot_decoder_forward.5
= control target key start
LH: loop header
LB: loop body
LE: loop exit
PB: predicated region body
PF: predicated region fallthrough
CT: control target
= control target key end

     0   :  { %19 = vsyncpa [#allocation3], 0  ;;  %s3315_s0 = inlined_call_operand.vmem [shape: f32[2], index: 0, kind: input, shape index: {}]   ;;  %s3316_s1 = inlined_call_operand.vmem [shape: f32[2,16,32], index: 1, kind: input, shape index: {}]   ;;  %s3317_s2 = inlined_call_operand.vmem [shape: f32[32,96], index: 2, kind: input, shape index: {}]   ;;  %s3318_s3 = inlined_call_operand.vmem [shape: f32[1,96], index: 3, kind: input, shape index: {}]   ;;  %s3319_s4 = inlined_call_operand.vmem [shape: f32[4,16,16], index: 4, kind: input, shape index: {}]   ;;  %s3320_s5 = inlined_call_operand.vmem [shape: f32[4], index: 5, kind: input, shape index: {}]   ;;  %s3321_s6 = inlined_call_operand.vmem [shape: f32[32,32], index: 6, kind: input, shape index: {}]   ;;  %s3322_s7 = inlined_call_operand.vmem [shape: f32[1,32], index: 7, kind: input, shape index: {}]   ;;  %s3323_s8 = inlined_call_operand.vmem [shape: f32[4,32], index: 8, kind: input, shape index: {}]   ;;  %s3324_s9 = inlined_call_operand.vmem [shape: f32[32,64], index: 9, kind: input, shape index: {}]   ;;  %s3325_s10 = inlined_call_operand.vmem [shape: f32[1,64], index: 10, kind: input, shape index: {}]   ;;  %s3326_s11 = inlined_call_operand.vmem [shape: f32[64,32], index: 11, kind: input, shape index: {}]   ;;  %s3327_s12 = inlined_call_operand.vmem [shape: f32[1,32], index: 12, kind: input, shape index: {}]   ;;  %s3328_s13 = inlined_call_operand.vmem [shape: f32[4,32], index: 13, kind: input, shape index: {}]   ;;  %s3329_s14 = inlined_call_operand.vmem [shape: f32[2,16,32], index: 14, kind: output, shape index: {}]  }
   0x1   :  { %20 = vsyncpa [#allocation5], 0  ;;  %s2920_s29 = smov 0  }
   0x2 LB: > { %s2926_s30 = sadd.s32 4294967295, %s2830_s29   ;;  %p2303_p0 = scmp.ge.s32.totalorder %s2830_s29, 1  ;;  %s2830_s29 = sphi %s2920_s29, %s26_s29  }
   0x3   : > { %p356_p1 = scmp.lt.s32.totalorder %s2830_s29, 3  ;;  %s369_s17 = sshll.u32 %s3315_s0, 4  ;;  %s370_s17 = int_to_ptr.vmem [resolvable:$true] %s369_s17 }
   0x4   : > { %p3330_p3 = scmp.eq.s32.totalorder %s2926_s30, 0  ;;  %s389_s21 = sshll.u32 %s3320_s5, 4  ;;  %s390_s21 = int_to_ptr.vmem [resolvable:$true] %s389_s21 }
   0x5   : > { %p2933_p2 = pnand %p2303_p0, %p356_p1  ;;  %s2786_s23 = scalar_lea.vmem %s370_s17, 16 }
   0x6   : > { %p2787_p6 = scmp.ne.s32.totalorder %s370_s17, %s2786_s23  ;;  %p2794_p10 = scmp.lt.s32.totalorder %s370_s17, %s370_s17 }
   0x7   : > { %s3332_s18 = scalar_select %p2933_p2, 1, 0 }
   0x8   : > { %p2638_p4 = pneg %p2933_p2  ;;  %p2795_p11 = scmp.lt.s32.totalorder %s2786_s23, %s2786_s23 }
   0xa   : > { %p2945_p5 = pnand %p3330_p3, %p2638_p4  ;;  %p2796_p12 = por %p2795_p11, %p2794_p10 }
   0xc   : > { %p2788_p7 = pneg %p2945_p5 }
   0xe   : > { %p2789_p8 = pnand %p2788_p7, %p2787_p6 }
  0x10   : > { %p2790_p9 = pneg %p2789_p8 }
  0x12   : > { %p2797_p13 = pnand %p2796_p12, %p2790_p9 }
  0x14   : > { %2800 = shalt.err (!%p2797_p13)
}
  0x15   : > { %s2832_s24 = smov [#allocation2]   ;;  %s2801_s25 = scalar_lea.vmem %s390_s21, 16 }
  0x16   : > { %2641 = dma.vmem_to_smem (!%p2945_p5), %s370_s17, 16, %s2832_s24, [#allocation3]  }
  0x17   : > { %p2802_p0 = scmp.ne.s32.totalorder %s390_s21, %s2801_s25  ;;  %p2809_p3 = scmp.lt.s32.totalorder %s390_s21, %s390_s21 }
  0x18   : > { %p2810_p2 = scmp.lt.s32.totalorder %s2801_s25, %s2801_s25 }
  0x19   : > { %p2804_p1 = pnand %p2802_p0, %p2788_p7 }
  0x1a   : > { %p2811_p6 = por %p2810_p2, %p2809_p3 }
  0x1b   : > { %p2805_p4 = pneg %p2804_p1 }
  0x1d   : > { %p2812_p8 = pnand %p2811_p6, %p2805_p4 }
  0x1f   : > { %2815 = shalt.err (!%p2812_p8)
}
  0x20   : > { %s2833_s26 = smov [#allocation4]   ;;  %p3334_p9 = scmp.ne.s32.totalorder %s3332_s18, 0 }
  0x21   : > { %2644 = dma.vmem_to_smem (!%p2945_p5), %s390_s21, 16, %s2833_s26, [#allocation5]  }
  0x22   : > { %434 = sbr.rel (%p3334_p9) target bundleno = 3093 (0xc15), region = 76  ;;  %p3335_p10 = scmp.eq.s32.totalorder (!%p3334_p9), %s2926_s30, 0 }
  0x29   : > { %2821 = dma.done.wait (%p3335_p10), [#allocation3], 16   ;;  %p3336_p11 = pmov %p3335_p10 }
  0x2a   : > { %p3337_p7 = pmov %p3335_p10 }
  0x2b   : > { %2823 = vsyncadd (%p3336_p11), [#allocation3], 4294967280 }
  0x2c   : > { %2825 = dma.done.wait (%p3337_p7), [#allocation5], 16   ;;  %p3338_p2 = pmov %p3337_p7 }
  0x2e   : > { %2827 = vsyncadd (%p3338_p2), [#allocation5], 4294967280 }
  0x2f   : > { %444 = sfence }
  0x30   : > { %v498_v0 = vld [vmem:[%s3317_s2] sm:$0xff]  ;;  %v499_v1 = vld [vmem:[%s3317_s2 + $0x8] sm:$0xff]  ;;  %v500_v2 = vld [vmem:[%s3317_s2 + $0x10] sm:$0xff]  ;;  %p485_p3 = scmp.lt.s32.totalorder %s2926_s30, 1  ;;  %vm509_vm0 = vcmask 261120   ;;  %s2834_s28 = smov 88  }
  0x31   : > { %v2552_v3 = vpack.c.bf16 %v499_v1, %v498_v0  ;;  %v501_v4 = vld [vmem:[%s3317_s2 + $0x18] sm:$0xff]  ;;  %v2314_v8 = vld [vmem:[%s3318_s3] ss:$0 sm:$0xff]  ;;  %s2835_s15 = smov 96   ;;  %s2836_s16 = smov 120   ;;  %vm597_vm1 = vcmask 64512  }
  0x32   : > { %v2556_v5 = vpack.c.bf16 %v501_v4, %v500_v2  ;;  %s2979_s21 = scalar_select %p485_p3, %s2926_s30, 1  ;;  %vm3057_vm2 = vmpackc.low %vm597_vm1, %vm597_vm1  ;;  %vm727_vm3 = vcmask 130048   ;;  %vm2088_vm4 = vcmask 523264  }
  0x33   : > { %2553 = vmatprep.subr.bf16.mxu1 %v2552_v3  ;;  %s2323_s17 = sld [smem:[#allocation4 + $0x1]]  ;;  %s3032_s18 = sld [smem:[#allocation4]] }
  0x34   : > { %2555 = vmatpush3.bf16.msra.mxu1 %v2552_v3  ;;  %s2367_s22 = sshll.u32 %s2979_s21, 4  ;;  %s2837_s19 = smov 80  }
  0x35   : > { %2557 = vmatprep.subr.bf16.mxu1 %v2556_v5  ;;  %s489_s25 = scalar_lea.vmem %s3316_s1, %s2367_s22  ;;  %s2838_s20 = smov 112  }
  0x36   : > { %v2987_v6 = vld [vmem:[%s489_s25] sm:$0xff]  ;;  %v2991_v7 = vld [vmem:[%s489_s25 + $0x8] sm:$0xff]  ;;  %s2336_s23 = sld [smem:[#allocation4 + $0x2]]  ;;  %s2839_s24 = smov 72  }
  0x37   : > { %2443 = vmatprep.mubr.msk.f32.mxu1 %vm509_vm0, %v2987_v6  ;;  %s2347_s25 = sld [smem:[#allocation4 + $0x3]] }
  0x38   : > { %2559 = vmatpush3.bf16.msra.mxu1 %v2556_v5  ;;  %v591_v5 = vld [vmem:[%s3321_s6] sm:$0xff] }
  0x39   : > { %v856_v47 = vstv %s2323_s17  ;;  %v609_v56 = vstv %s3032_s18 }
  0x3b   : > { %2444 = vmatmul.mubr.msk.f32.vlgmr.msra.gmra.mrb[0].mxu1 %vm509_vm0, %v2991_v7 }
 0x10e   : > { %v2445_v9 = vpop.f32.mrb[0].mxu1 }
 0x10f   : > { %v582_v10 = vpop.f32.mrb[1].mxu1  ;;  %v3000_v12 = vadd.f32 %v2445_v9, %v2314_v8 }
 0x110   : > { %v2998_v11 = vadd.f32 %v2314_v8, %v582_v10 }
 0x111   : > { %v3012_v14 = vmul.f32 %v3000_v12, %v3000_v12 }
 0x112   : > { %v3004_v13 = vmul.f32 %v2998_v11, %v2998_v11 }
 0x113   : > { %v601_v28 = vsel %vm597_vm1, %v3012_v14, 0.0 }
 0x114   : > { %861 = vrot.lane.b32.xlu1 %v3004_v13, %s2834_s28  ;;  %616 = vrot.lane.b32.xlu0 %v3004_v13, %s2835_s15  ;;  %v598_v27 = vsel %vm597_vm1, %v3004_v13, 0.0 }
 0x118   : > { %863 = vrot.lane.b32.xlu1 %v3012_v14, %s2834_s28  ;;  %618 = vrot.lane.b32.xlu0 %v3012_v14, %s2835_s15 }
 0x11c   : > { %841 = vrot.lane.b32.xlu1 %v3012_v14, %s2836_s16  ;;  %839 = vrot.lane.b32.xlu0 %v3004_v13, %s2836_s16 }
 0x186   : > { %v862_v15 = vpop.permute.xlu1 %861  ;;  %v617_v16 = vpop.permute.xlu0 %616 }
 0x187   : > { %v622_v17 = vsel %vm597_vm1, %v617_v16, 0.0  ;;  %v867_v20 = vsel %vm597_vm1, %v862_v15, 0.0 }
 0x188   : > { %623 = vadd.xlane.f32.xlu0 %v622_v17 }
 0x18a   : > { %v864_v18 = vpop.permute.xlu1 %863  ;;  %v619_v19 = vpop.permute.xlu0 %618 }
 0x18b   : > { %v625_v21 = vsel %vm597_vm1, %v619_v19, 0.0  ;;  %v870_v23 = vsel %vm597_vm1, %v864_v18, 0.0 }
 0x18c   : > { %868 = vadd.xlane.f32.xlu0 %v867_v20  ;;  %626 = vadd.xlane.f32.xlu1 %v625_v21 }
 0x18e   : > { %v840_v22 = vpop.permute.xlu0 %839  ;;  %v842_v25 = vpop.permute.xlu1 %841 }
 0x18f   : > { %v845_v24 = vsel %vm597_vm1, %v840_v22, 0.0  ;;  %v848_v26 = vsel %vm597_vm1, %v842_v25, 0.0 }
 0x190   : > { %871 = vadd.xlane.f32.xlu0 %v870_v23  ;;  %846 = vadd.xlane.f32.xlu1 %v845_v24 }
 0x194   : > { %849 = vadd.xlane.f32.xlu0 %v848_v26  ;;  %599 = vadd.xlane.f32.xlu1 %v598_v27 }
 0x198   : > { %602 = vadd.xlane.f32.xlu0 %v601_v28 }
 0x215   : > { %v624_v29 = vpop.xlane.xlu0 %623 }
 0x216   : > { %v628_v30 = vmax.f32 %v624_v29, 1e-24 }
 0x218   : > { %2710 = vrsqrt.f32 %v628_v30 }
 0x219   : > { %v627_v31 = vpop.xlane.xlu1 %626  ;;  %v869_v32 = vpop.xlane.xlu0 %868 }
 0x21a   : > { %v629_v33 = vmax.f32 %v627_v31, 1e-24  ;;  %v873_v34 = vmax.f32 %v869_v32, 1e-24 }
 0x21c   : > { %2712 = vrsqrt.f32 %v629_v33 }
 0x21d   : > { %v847_v35 = vpop.xlane.xlu1 %846  ;;  %v872_v36 = vpop.xlane.xlu0 %871  ;;  %2714 = vrsqrt.f32 %v873_v34 }
 0x21e   : > { %v851_v37 = vmax.f32 %v847_v35, 1e-24  ;;  %v874_v38 = vmax.f32 %v872_v36, 1e-24 }
 0x220   : > { %2716 = vrsqrt.f32 %v851_v37 }
 0x221   : > { %2718 = vrsqrt.f32 %v874_v38  ;;  %v850_v39 = vpop.xlane.xlu0 %849  ;;  %v600_v40 = vpop.xlane.xlu1 %599 }
 0x222   : > { %v852_v41 = vmax.f32 %v850_v39, 1e-24  ;;  %v604_v42 = vmax.f32 %v600_v40, 1e-24  ;;  %v2711_v43 = vpop.eup %2710  ;;  %v1265_v39 = vstv %s2336_s23  ;;  %s2842_s23 = smov 64  }
 0x223   : > { %v632_v45 = vmul.f32 %v2711_v43, %v2998_v11 }
 0x224   : > { %2720 = vrsqrt.f32 %v852_v41 }
 0x225   : > { %2722 = vrsqrt.f32 %v604_v42  ;;  %v603_v0 = vpop.xlane.xlu0 %602 }
 0x226   : > { %v2713_v44 = vpop.eup %2712  ;;  %v605_v1 = vmax.f32 %v603_v0, 1e-24 }
 0x227   : > { %v633_v46 = vmul.f32 %v2713_v44, %v3000_v12  ;;  %v2715_v48 = vpop.eup %2714 }
 0x228   : > { %v877_v53 = vmul.f32 %v2715_v48, %v2998_v11  ;;  %2724 = vrsqrt.f32 %v605_v1 }
 0x229   : > { %v2670_v49 = vpack.i.bf16 %v633_v46, %v632_v45 }
 0x22a   : > { %v2717_v50 = vpop.eup %2716 }
 0x22b   : > { %v2719_v51 = vpop.eup %2718  ;;  %2671 = vrot.lane.b32.xlu1 %v2670_v49, %s2835_s15  ;;  %v857_v52 = vmul.f32 %v2717_v50, %v856_v47  ;;  %v635_v50 = vld [vmem:[%s3319_s4 + $0x8] sm:$0xff]  ;;  %s2843_s15 = smov 48  }
 0x22c   : > { %v878_v54 = vmul.f32 %v2719_v51, %v3000_v12  ;;  %v634_v51 = vld [vmem:[%s3319_s4] sm:$0xff] }
 0x22d   : > { %v859_v55 = vmul.f32 %v857_v52, %v2998_v11 }
 0x22e   : > { %v2721_v57 = vpop.eup %2720  ;;  %v2675_v58 = vpack.i.bf16 %v878_v54, %v877_v53 }
 0x22f   : > { %v2723_v59 = vpop.eup %2722  ;;  %884 = vrot.lane.b32.xlu1 %v859_v55, %s2836_s16  ;;  %v858_v60 = vmul.f32 %v2721_v57, %v856_v47 }
 0x230   : > { %2676 = vrot.lane.b32.xlu0 %v2675_v58, %s2834_s28  ;;  %v610_v61 = vmul.f32 %v2723_v59, %v609_v56  ;;  %v2325_v58 = vld [vmem:[%s3319_s4 + $0x18] sm:$0xff]  ;;  %v2324_v59 = vld [vmem:[%s3319_s4 + $0x10] sm:$0xff] }
 0x231   : > { %v860_v62 = vmul.f32 %v858_v60, %v3000_v12 }
 0x232   : > { %v612_v63 = vmul.f32 %v610_v61, %v2998_v11  ;;  %v2725_v9 = vpop.eup %2724 }
 0x233   : > { %886 = vrot.lane.b32.xlu1 %v860_v62, %s2836_s16  ;;  %v611_v18 = vmul.f32 %v2725_v9, %v609_v56  ;;  %s2844_s16 = smov 40  }
 0x234   : > { %1270 = vrot.lane.b32.xlu0 %v3004_v13, %s2837_s19  ;;  %2450 = vmatprep.mubr.msk.f32.mxu1 %vm597_vm1, %v612_v63 }
 0x235   : > { %v613_v23 = vmul.f32 %v611_v18, %v3000_v12 }
 0x237   : > { %1272 = vrot.lane.b32.xlu1 %v3012_v14, %s2837_s19 }
 0x238   : > { %1248 = vrot.lane.b32.xlu0 %v3004_v13, %s2838_s20 }
 0x23b   : > { %1250 = vrot.lane.b32.xlu1 %v3012_v14, %s2838_s20 }
 0x29d   : > { %v2672_v2 = vpop.permute.xlu1 %2671 }
 0x29e   : > { %v2674_v3 = vunpack.i.h.bf16 %v2672_v2  ;;  %v2673_v4 = vunpack.i.l.bf16 %v2672_v2 }
 0x2a0   : > { %v2560_v8 = vpack.c.bf16 %v2674_v3, %v2673_v4 }
 0x2a1   : > { %v885_v10 = vpop.permute.xlu1 %884 }
 0x2a2   : > { %v2677_v15 = vpop.permute.xlu0 %2676  ;;  %2562 = vmatprep.subr.msk.bf16.mxu1 %vm3057_vm2, %v2560_v8 }
 0x2a3   : > { %v2679_v16 = vunpack.i.h.bf16 %v2677_v15  ;;  %v2678_v17 = vunpack.i.l.bf16 %v2677_v15  ;;  %2565 = vmatpush3.bf16.xpose.msk.msra.mxu1 %vm3057_vm2, %v2560_v8 }
 0x2a5   : > { %v2570_v19 = vpack.c.bf16 %v2679_v16, %v2678_v17  ;;  %v887_v20 = vpop.permute.xlu1 %886 }
 0x2a6   : > { %v1271_v21 = vpop.permute.xlu0 %1270 }
 0x2a7   : > { %2572 = vmatprep.subr.msk.bf16.mxu1 %vm3057_vm2, %v2570_v19  ;;  %v1276_v22 = vsel %vm597_vm1, %v1271_v21, 0.0 }
 0x2a8   : > { %1277 = vadd.xlane.f32.xlu0 %v1276_v22 }
 0x2a9   : > { %v1273_v24 = vpop.permute.xlu1 %1272 }
 0x2aa   : > { %v1249_v25 = vpop.permute.xlu0 %1248  ;;  %2451 = vmatmul.mubr.msk.f32.vlgmr.msra.gmra.mrb[2].mxu1 %vm597_vm1, %v613_v23  ;;  %v1279_v26 = vsel %vm597_vm1, %v1273_v24, 0.0 }
 0x2ab   : > { %v1254_v27 = vsel %vm597_vm1, %v1249_v25, 0.0  ;;  %1280 = vadd.xlane.f32.xlu1 %v1279_v26  ;;  %2575 = vmatpush3.bf16.xpose.msk.msra.mxu1 %vm3057_vm2, %v2570_v19 }
 0x2ac   : > { %1255 = vadd.xlane.f32.xlu0 %v1254_v27  ;;  %2464 = vmatprep.mubr.msk.f32.mxu1 %vm597_vm1, %v885_v10 }
 0x2ad   : > { %v1251_v28 = vpop.permute.xlu1 %1250 }
 0x2ae   : > { %v1257_v29 = vsel %vm597_vm1, %v1251_v28, 0.0 }
 0x2b0   : > { %1258 = vadd.xlane.f32.xlu0 %v1257_v29 }
 0x2b2   : > { %2465 = vmatmul.mubr.msk.f32.vlgmr.msra.gmra.mrb[4].mxu1 %vm597_vm1, %v887_v20 }
 0x335   : > { %v1278_v30 = vpop.xlane.xlu0 %1277 }
 0x336   : > { %v1282_v31 = vmax.f32 %v1278_v30, 1e-24 }
 0x338   : > { %v1281_v32 = vpop.xlane.xlu1 %1280  ;;  %2726 = vrsqrt.f32 %v1282_v31 }
 0x339   : > { %v1256_v33 = vpop.xlane.xlu0 %1255  ;;  %v1283_v34 = vmax.f32 %v1281_v32, 1e-24 }
 0x33a   : > { %v1260_v35 = vmax.f32 %v1256_v33, 1e-24 }
 0x33b   : > { %2728 = vrsqrt.f32 %v1283_v34 }
 0x33c   : > { %2730 = vrsqrt.f32 %v1260_v35 }
 0x33d   : > { %v1259_v36 = vpop.xlane.xlu0 %1258 }
 0x33e   : > { %v1261_v37 = vmax.f32 %v1259_v36, 1e-24 }
 0x340   : > { %2732 = vrsqrt.f32 %v1261_v37 }
 0x342   : > { %v2727_v38 = vpop.eup %2726 }
 0x343   : > { %v1286_v42 = vmul.f32 %v2727_v38, %v2998_v11 }
 0x345   : > { %v2729_v40 = vpop.eup %2728 }
 0x346   : > { %v2731_v41 = vpop.eup %2730  ;;  %v1287_v43 = vmul.f32 %v2729_v40, %v3000_v12 }
 0x347   : > { %v1266_v44 = vmul.f32 %v2731_v41, %v1265_v39  ;;  %v3133_v41 = vpack.i.bf16 %v3000_v12, %v2998_v11 }
 0x348   : > { %v2680_v45 = vpack.i.bf16 %v1287_v43, %v1286_v42 }
 0x349   : > { %v1268_v46 = vmul.f32 %v1266_v44, %v2998_v11 }
 0x34a   : > { %v2733_v47 = vpop.eup %2732  ;;  %2681 = vrot.lane.b32.xlu1 %v2680_v45, %s2837_s19  ;;  %s2840_s19 = smov 104  }
 0x34b   : > { %1293 = vrot.lane.b32.xlu0 %v1268_v46, %s2838_s20  ;;  %v1267_v48 = vmul.f32 %v2733_v47, %v1265_v39 }
 0x34d   : > { %v1269_v49 = vmul.f32 %v1267_v48, %v3000_v12 }
 0x34f   : > { %1600 = vrot.lane.b32.xlu0 %v3004_v13, %s2839_s24  ;;  %1295 = vrot.lane.b32.xlu1 %v1269_v49, %s2838_s20  ;;  %s2841_s20 = smov 56  }
 0x353   : > { %1602 = vrot.lane.b32.xlu1 %v3012_v14, %s2839_s24 }
 0x37d   : > { %v2452_v52 = vpop.f32.mrb[2].mxu1 }
 0x37e   : > { %v724_v53 = vadd.f32 %v2452_v52, %v635_v50  ;;  %v718_v54 = vpop.f32.mrb[3].mxu1 }
 0x37f   : > { %v719_v55 = vadd.f32 %v718_v54, %v634_v51 }
 0x380   : > { %v731_v56 = vsel %vm727_vm3, %v724_v53, -inf }
 0x381   : > { %732 = vmax.xlane.f32.xlu0 %v731_v56  ;;  %v728_v57 = vsel %vm727_vm3, %v719_v55, -inf }
 0x382   : > { %729 = vmax.xlane.f32.xlu1 %v728_v57 }
 0x385   : > { %v2466_v60 = vpop.f32.mrb[4].mxu1 }
 0x386   : > { %v974_v61 = vadd.f32 %v2466_v60, %v2325_v58  ;;  %v968_v62 = vpop.f32.mrb[5].mxu1  ;;  %v1595_v60 = vstv %s2347_s25 }
 0x387   : > { %v969_v63 = vadd.f32 %v2324_v59, %v968_v62 }
 0x388   : > { %v980_v0 = vsel %vm727_vm3, %v974_v61, -inf }
 0x389   : > { %981 = vmax.xlane.f32.xlu1 %v980_v0  ;;  %v977_v1 = vsel %vm727_vm3, %v969_v63, -inf }
 0x38a   : > { %978 = vmax.xlane.f32.xlu0 %v977_v1 }
 0x39a   : > { %1578 = vrot.lane.b32.xlu1 %v3004_v13, %s2840_s19 }
 0x3a0   : > { %1580 = vrot.lane.b32.xlu0 %v3012_v14, %s2840_s19 }
 0x3bc   : > { %v2682_v2 = vpop.permute.xlu1 %2681 }
 0x3bd   : > { %v1294_v3 = vpop.permute.xlu0 %1293  ;;  %v2684_v4 = vunpack.i.h.bf16 %v2682_v2  ;;  %v2683_v8 = vunpack.i.l.bf16 %v2682_v2 }
 0x3be   : > { %2488 = vmatprep.mubr.msk.f32.mxu1 %vm597_vm1, %v1294_v3 }
 0x3bf   : > { %v2580_v9 = vpack.c.bf16 %v2684_v4, %v2683_v8 }
 0x3c1   : > { %v1601_v10 = vpop.permute.xlu0 %1600  ;;  %v1296_v15 = vpop.permute.xlu1 %1295  ;;  %2582 = vmatprep.subr.msk.bf16.mxu1 %vm3057_vm2, %v2580_v9 }
 0x3c2   : > { %2585 = vmatpush3.bf16.xpose.msk.msra.mxu1 %vm3057_vm2, %v2580_v9  ;;  %v1606_v13 = vsel %vm597_vm1, %v1601_v10, 0.0 }
 0x3c3   : > { %1607 = vadd.xlane.f32.xlu1 %v1606_v13 }
 0x3c5   : > { %v1603_v16 = vpop.permute.xlu1 %1602 }
 0x3c6   : > { %v1609_v14 = vsel %vm597_vm1, %v1603_v16, 0.0 }
 0x3c7   : > { %1610 = vadd.xlane.f32.xlu0 %v1609_v14 }
 0x3c9   : > { %2489 = vmatmul.mubr.msk.f32.vlgmr.msra.gmra.mrb[6].mxu1 %vm597_vm1, %v1296_v15 }
 0x40e   : > { %v733_v17 = vpop.xlane.xlu0 %732 }
 0x40f   : > { %v735_v18 = vsub.f32 %v724_v53, %v733_v17  ;;  %v730_v19 = vpop.xlane.xlu1 %729 }
 0x410   : > { %v734_v20 = vsub.f32 %v719_v55, %v730_v19 }
 0x411   : > { %v738_v21 = vmul.f32 1.442695, %v735_v18 }
 0x412   : > { %v736_v22 = vmul.f32 1.442695, %v734_v20 }
 0x413   : > { %2734 = vpow2.f32 %v738_v21 }
 0x414   : > { %2736 = vpow2.f32 %v736_v22 }
 0x416   : > { %v982_v23 = vpop.xlane.xlu1 %981 }
 0x417   : > { %v984_v24 = vsub.f32 %v974_v61, %v982_v23  ;;  %v979_v25 = vpop.xlane.xlu0 %978  ;;  %v2337_v23 = vld [vmem:[%s3319_s4 + $0x20] sm:$0xff] }
 0x418   : > { %v983_v26 = vsub.f32 %v969_v63, %v979_v25  ;;  %v2338_v25 = vld [vmem:[%s3319_s4 + $0x28] sm:$0xff] }
 0x419   : > { %v987_v27 = vmul.f32 1.442695, %v984_v24 }
 0x41a   : > { %v985_v28 = vmul.f32 1.442695, %v983_v26  ;;  %v1579_v29 = vpop.permute.xlu1 %1578 }
 0x41b   : > { %2738 = vpow2.f32 %v987_v27  ;;  %v1581_v30 = vpop.permute.xlu0 %1580  ;;  %v1584_v31 = vsel %vm597_vm1, %v1579_v29, 0.0 }
 0x41c   : > { %2740 = vpow2.f32 %v985_v28  ;;  %1585 = vadd.xlane.f32.xlu0 %v1584_v31  ;;  %v1587_v32 = vsel %vm597_vm1, %v1581_v30, 0.0 }
 0x41d   : > { %v3118_v33 = vpop.eup %2734  ;;  %1588 = vadd.xlane.f32.xlu1 %v1587_v32 }
 0x41e   : > { %v2737_v34 = vpop.eup %2736  ;;  %v743_v36 = vsel %vm727_vm3, %v3118_v33, 0.0 }
 0x41f   : > { %v740_v35 = vsel %vm727_vm3, %v2737_v34, 0.0 }
 0x420   : > { %741 = vadd.xlane.f32.xlu0 %v740_v35 }
 0x421   : > { %744 = vadd.xlane.f32.xlu1 %v743_v36 }
 0x425   : > { %v3123_v37 = vpop.eup %2738 }
 0x426   : > { %v3125_v38 = vpop.eup %2740  ;;  %v992_v39 = vsel %vm727_vm3, %v3123_v37, 0.0 }
 0x427   : > { %993 = vadd.xlane.f32.xlu1 %v992_v39  ;;  %v989_v40 = vsel %vm727_vm3, %v3125_v38, 0.0 }
 0x428   : > { %990 = vadd.xlane.f32.xlu0 %v989_v40 }
 0x438   : > { %2691 = vrot.lane.b32.xlu1 %v3133_v41, %s2841_s20 }
 0x43e   : > { %2686 = vrot.lane.b32.xlu0 %v3133_v41, %s2842_s23 }
 0x450   : > { %v1608_v42 = vpop.xlane.xlu1 %1607 }
 0x451   : > { %v1612_v43 = vmax.f32 %v1608_v42, 1e-24 }
 0x453   : > { %2742 = vrsqrt.f32 %v1612_v43 }
 0x454   : > { %v1611_v44 = vpop.xlane.xlu0 %1610 }
 0x455   : > { %v1613_v45 = vmax.f32 %v1611_v44, 1e-24 }
 0x457   : > { %2744 = vrsqrt.f32 %v1613_v45 }
 0x45d   : > { %v2743_v46 = vpop.eup %2742 }
 0x45e   : > { %v1616_v48 = vmul.f32 %v2743_v46, %v2998_v11 }
 0x461   : > { %v2745_v47 = vpop.eup %2744 }
 0x462   : > { %v1617_v49 = vmul.f32 %v2745_v47, %v3000_v12 }
 0x464   : > { %v2695_v50 = vpack.i.bf16 %v1617_v49, %v1616_v48 }
 0x466   : > { %2696 = vrot.lane.b32.xlu1 %v2695_v50, %s2839_s24 }
 0x49c   : > { %v2490_v51 = vpop.f32.mrb[6].mxu1 }
 0x49d   : > { %v1377_v52 = vpop.f32.mrb[7].mxu1  ;;  %v1383_v30 = vadd.f32 %v2490_v51, %v2338_v25 }
 0x49e   : > { %v1378_v24 = vadd.f32 %v2337_v23, %v1377_v52 }
 0x49f   : > { %v1389_v32 = vsel %vm727_vm3, %v1383_v30, -inf }
 0x4a0   : > { %v1386_v29 = vsel %vm727_vm3, %v1378_v24, -inf }
 0x4a9   : > { %v1586_v53 = vpop.xlane.xlu0 %1585 }
 0x4aa   : > { %v1590_v54 = vmax.f32 %v1586_v53, 1e-24  ;;  %v1589_v55 = vpop.xlane.xlu1 %1588 }
 0x4ab   : > { %v1591_v56 = vmax.f32 %v1589_v55, 1e-24  ;;  %v2348_v55 = vld [vmem:[%s3319_s4 + $0x30] sm:$0xff] }
 0x4ac   : > { %2746 = vrsqrt.f32 %v1590_v54  ;;  %v593_v54 = vld [vmem:[%s3321_s6 + $0x10] sm:$0xff] }
 0x4ad   : > { %2748 = vrsqrt.f32 %v1591_v56  ;;  %v742_v57 = vpop.xlane.xlu0 %741 }
 0x4ae   : > { %2750 = vrcp.f32 %v742_v57  ;;  %v745_v58 = vpop.xlane.xlu1 %744  ;;  %v2349_v57 = vld [vmem:[%s3319_s4 + $0x38] sm:$0xff] }
 0x4af   : > { %2752 = vrcp.f32 %v745_v58 }
 0x4b4   : > { %v994_v59 = vpop.xlane.xlu1 %993 }
 0x4b5   : > { %v991_v61 = vpop.xlane.xlu0 %990 }
 0x4b6   : > { %v2747_v62 = vpop.eup %2746  ;;  %2754 = vrcp.f32 %v991_v61 }
 0x4b7   : > { %v2749_v63 = vpop.eup %2748  ;;  %2756 = vrcp.f32 %v994_v59  ;;  %v1596_v0 = vmul.f32 %v2747_v62, %v1595_v60 }
 0x4b8   : > { %v2751_v1 = vpop.eup %2750  ;;  %v2692_v2 = vpop.permute.xlu1 %2691  ;;  %v1597_v3 = vmul.f32 %v2749_v63, %v1595_v60 }
 0x4b9   : > { %v2694_v4 = vunpack.i.h.bf16 %v2692_v2  ;;  %v2687_v8 = vpop.permute.xlu0 %2686  ;;  %v1598_v9 = vmul.f32 %v1596_v0, %v2998_v11  ;;  %v748_v10 = vmul.f32 %v2751_v1, %v2737_v34  ;;  %v2693_v15 = vunpack.i.l.bf16 %v2692_v2  ;;  %v2753_v18 = vpop.eup %2752 }
 0x4ba   : > { %v2689_v13 = vunpack.i.h.bf16 %v2687_v8  ;;  %v2688_v16 = vunpack.i.l.bf16 %v2687_v8  ;;  %v1599_v14 = vmul.f32 %v1597_v3, %v3000_v12  ;;  %v749_v11 = vmul.f32 %v2753_v18, %v3118_v33  ;;  %v592_v33 = vld [vmem:[%s3321_s6 + $0x8] sm:$0xff] }
 0x4bb   : > { %1623 = vrot.lane.b32.xlu0 %v1598_v9, %s2840_s19  ;;  %2457 = vmatprep.mubr.msk.f32.mxu0 %vm727_vm3, %v748_v10  ;;  %v2576_v19 = vpack.c.bf16 %v2694_v4, %v2693_v15 }
 0x4bc   : > { %1625 = vrot.lane.b32.xlu1 %v1599_v14, %s2840_s19  ;;  %v2566_v17 = vpack.c.bf16 %v2689_v13, %v2688_v16 }
 0x4be   : > { %2567 = vmatprep.subr.bf16.mxu0 %v2566_v17 }
 0x4bf   : > { %2569 = vmatpush3.bf16.msra.mxu0 %v2566_v17 }
 0x4c0   : > { %v2755_v20 = vpop.eup %2754  ;;  %2577 = vmatprep.subr.bf16.mxu0 %v2576_v19 }
 0x4c1   : > { %v2757_v21 = vpop.eup %2756  ;;  %v997_v22 = vmul.f32 %v2755_v20, %v3125_v38 }
 0x4c2   : > { %2458 = vmatmul.mubr.msk.f32.vlgmr.msra.gmra.mrb[0].mxu0 %vm727_vm3, %v749_v11  ;;  %v998_v12 = vmul.f32 %v2757_v21, %v3123_v37 }
 0x4c3   : > { %2579 = vmatpush3.bf16.msra.mxu0 %v2576_v19  ;;  %2471 = vmatprep.mubr.msk.f32.mxu0 %vm727_vm3, %v997_v22 }
 0x4c4   : > { %2474 = vmatprep.subr.mxu0 %v592_v33 }
 0x4c6   : > { %2472 = vmatmul.mubr.msk.f32.vlgmr.msra.gmra.mrb[2].mxu0 %vm727_vm3, %v998_v12 }
 0x4c7   : > { %2475 = vmatpush3.msra.mxu0 %v592_v33  ;;  %v2358_v33 = vld [vmem:[%s3322_s7] ss:$0 sm:$0xff] }
 0x4c8   : > { %2479 = vmatprep.subr.mxu0 %v591_v5 }
 0x4d8   : > { %v2697_v26 = vpop.permute.xlu1 %2696 }
 0x4d9   : > { %v2699_v27 = vunpack.i.h.bf16 %v2697_v26  ;;  %v2698_v28 = vunpack.i.l.bf16 %v2697_v26 }
 0x4da   : > { %1387 = vmax.xlane.f32.xlu0 %v1386_v29 }
 0x4db   : > { %v2590_v31 = vpack.c.bf16 %v2699_v27, %v2698_v28 }
 0x4dd   : > { %2592 = vmatprep.subr.msk.bf16.mxu1 %vm3057_vm2, %v2590_v31 }
 0x4de   : > { %2595 = vmatpush3.bf16.xpose.msk.msra.mxu1 %vm3057_vm2, %v2590_v31 }
 0x4e0   : > { %1390 = vmax.xlane.f32.xlu1 %v1389_v32 }
 0x4f1   : > { %2701 = vrot.lane.b32.xlu1 %v3133_v41, %s2843_s15  ;;  %s495_s15 = sld [smem:[#allocation2 + %s2926_s30]] }
 0x4f5   : > { %2706 = vrot.lane.b32.xlu1 %v3133_v41, %s2844_s16 }
 0x52d   : > { %v1624_v34 = vpop.permute.xlu0 %1623 }
 0x52e   : > { %2507 = vmatprep.mubr.msk.f32.mxu1 %vm597_vm1, %v1624_v34  ;;  %v1626_v35 = vpop.permute.xlu1 %1625 }
 0x52f   : > { %2508 = vmatmul.mubr.msk.f32.vlgmr.msra.gmra.mrb[8].mxu1 %vm597_vm1, %v1626_v35 }
 0x567   : > { %v1388_v36 = vpop.xlane.xlu0 %1387 }
 0x568   : > { %v1392_v37 = vsub.f32 %v1378_v24, %v1388_v36  ;;  %v594_v24 = vld [vmem:[%s3321_s6 + $0x18] sm:$0xff] }
 0x56a   : > { %v1394_v38 = vmul.f32 1.442695, %v1392_v37 }
 0x56c   : > { %2758 = vpow2.f32 %v1394_v38 }
 0x56d   : > { %v1391_v39 = vpop.xlane.xlu1 %1390 }
 0x56e   : > { %v1393_v40 = vsub.f32 %v1383_v30, %v1391_v39 }
 0x570   : > { %v1396_v41 = vmul.f32 1.442695, %v1393_v40 }
 0x571   : > { %v2702_v46 = vpop.permute.xlu1 %2701 }
 0x572   : > { %2760 = vpow2.f32 %v1396_v41  ;;  %v2704_v49 = vunpack.i.h.bf16 %v2702_v46  ;;  %v2703_v50 = vunpack.i.l.bf16 %v2702_v46  ;;  %v1973_v46 = vld [vmem:[%s3324_s9 + $0x10] sm:$0xff] }
 0x574   : > { %v2586_v53 = vpack.c.bf16 %v2704_v49, %v2703_v50 }
 0x575   : > { %v2707_v3 = vpop.permute.xlu1 %2706 }
 0x576   : > { %v2759_v42 = vpop.eup %2758  ;;  %v2709_v4 = vunpack.i.h.bf16 %v2707_v3  ;;  %v2708_v8 = vunpack.i.l.bf16 %v2707_v3 }
 0x577   : > { %v1398_v43 = vsel %vm727_vm3, %v2759_v42, 0.0 }
 0x578   : > { %1399 = vadd.xlane.f32.xlu0 %v1398_v43  ;;  %v2596_v15 = vpack.c.bf16 %v2709_v4, %v2708_v8  ;;  %v1971_v43 = vld [vmem:[%s3324_s9] sm:$0xff] }
 0x579   : > { %v1920_v4 = vld [vmem:[%s3323_s8 + $0x1] sm:$0x1]  ;;  %v1922_v8 = vld [vmem:[%s3323_s8 + $0x2] sm:$0x1] }
 0x57c   : > { %v2761_v44 = vpop.eup %2760 }
 0x57d   : > { %v1401_v45 = vsel %vm727_vm3, %v2761_v44, 0.0 }
 0x57e   : > { %1402 = vadd.xlane.f32.xlu0 %v1401_v45 }
 0x595   : > { %v2459_v47 = vpop.f32.mrb[0].mxu0 }
 0x596   : > { %v830_v48 = vpop.f32.mrb[1].mxu0 }
 0x599   : > { %v2473_v51 = vpop.f32.mrb[2].mxu0 }
 0x59a   : > { %v1077_v52 = vpop.f32.mrb[3].mxu0 }
 0x59b   : > { %2476 = vmatprep.mubr.msk.f32.mxu0 %vm597_vm1, %v1077_v52 }
 0x59c   : > { %2477 = vmatmul.mubr.msk.f32.vlgmr.msra.gmra.mrb[4].mxu0 %vm597_vm1, %v2473_v51 }
 0x59d   : > { %2480 = vmatpush3.msra.mxu0 %v591_v5  ;;  %2481 = vmatprep.mubr.msk.f32.mxu0 %vm597_vm1, %v830_v48 }
 0x59e   : > { %2587 = vmatprep.subr.bf16.mxu0 %v2586_v53 }
 0x5a4   : > { %2482 = vmatmul.mubr.msk.f32.vlgmr.msra.gmra.mrb[4].mxu0 %vm597_vm1, %v2459_v47  ;;  %v1974_v47 = vld [vmem:[%s3324_s9 + $0x18] sm:$0xff] }
 0x5a5   : > { %2589 = vmatpush3.bf16.msra.mxu0 %v2586_v53  ;;  %v2604_v48 = vpack.c.bf16 %v1974_v47, %v1973_v46 }
 0x5a6   : > { %2498 = vmatprep.subr.mxu0 %v593_v54 }
 0x602   : > { %v2509_v56 = vpop.f32.mrb[8].mxu1 }
 0x603   : > { %v1707_v58 = vpop.f32.mrb[9].mxu1  ;;  %v1713_v61 = vadd.f32 %v2509_v56, %v2349_v57 }
 0x604   : > { %v1708_v59 = vadd.f32 %v2348_v55, %v1707_v58  ;;  %v1957_v58 = vlaneseq }
 0x605   : > { %v1400_v60 = vpop.xlane.xlu0 %1399  ;;  %v1719_v63 = vsel %vm727_vm3, %v1713_v61, -inf }
 0x606   : > { %2762 = vrcp.f32 %v1400_v60  ;;  %v1716_v62 = vsel %vm727_vm3, %v1708_v59, -inf }
 0x607   : > { %1717 = vmax.xlane.f32.xlu0 %v1716_v62  ;;  %v1917_v62 = vld [vmem:[%s3323_s8] sm:$0x1] }
 0x60b   : > { %v1403_v0 = vpop.xlane.xlu0 %1402  ;;  %1720 = vmax.xlane.f32.xlu0 %v1719_v63  ;;  %v3226_v63 = vstv %s495_s15  ;;  %s494_s15 = scalar_lea.vmem %s3329_s14, %s2367_s22 }
 0x60c   : > { %2764 = vrcp.f32 %v1403_v0 }
 0x610   : > { %v2763_v1 = vpop.eup %2762 }
 0x611   : > { %v1406_v2 = vmul.f32 %v2763_v1, %v2759_v42  ;;  %v1919_v1 = vmul.f32 %v3226_v63, %v1917_v62 }
 0x613   : > { %2495 = vmatprep.mubr.msk.f32.mxu0 %vm727_vm3, %v1406_v2  ;;  %v1958_v2 = vshrl.u32 %v1957_v58, 7 }
 0x616   : > { %v2765_v9 = vpop.eup %2764 }
 0x617   : > { %v1407_v10 = vmul.f32 %v2765_v9, %v2761_v44  ;;  %v1972_v44 = vld [vmem:[%s3324_s9 + $0x8] sm:$0xff]  ;;  %v1921_v9 = vadd.f32 %v1920_v4, %v1919_v1 }
 0x618   : > { %v2600_v45 = vpack.c.bf16 %v1972_v44, %v1971_v43 }
 0x619   : > { %2496 = vmatmul.mubr.msk.f32.vlgmr.msra.gmra.mrb[6].mxu0 %vm727_vm3, %v1407_v10  ;;  %v1923_v10 = vmul.f32 %v1922_v8, %v3226_v63 }
 0x61a   : > { %2499 = vmatpush3.msra.mxu0 %v593_v54  ;;  %2601 = vmatprep.subr.bf16.mxu1 %v2600_v45 }
 0x61b   : > { %2597 = vmatprep.subr.bf16.mxu0 %v2596_v15  ;;  %2603 = vmatpush3.bf16.msra.mxu1 %v2600_v45 }
 0x61c   : > { %2605 = vmatprep.subr.bf16.mxu1 %v2604_v48 }
 0x61f   : > { %2607 = vmatpush3.bf16.msra.mxu1 %v2604_v48 }
 0x694   : > { %v1718_v13 = vpop.xlane.xlu0 %1717 }
 0x695   : > { %v1722_v16 = vsub.f32 %v1708_v59, %v1718_v13  ;;  %v1924_v13 = vld [vmem:[%s3323_s8 + $0x3] sm:$0x1] }
 0x697   : > { %v1724_v14 = vmul.f32 1.442695, %v1722_v16 }
 0x698   : > { %v1721_v17 = vpop.xlane.xlu0 %1720 }
 0x699   : > { %2766 = vpow2.f32 %v1724_v14  ;;  %v1723_v18 = vsub.f32 %v1713_v61, %v1721_v17  ;;  %v1925_v14 = vadd.f32 %v1924_v13, %v1923_v10 }
 0x69b   : > { %v1726_v19 = vmul.f32 1.442695, %v1723_v18 }
 0x69d   : > { %2768 = vpow2.f32 %v1726_v19 }
 0x6a3   : > { %v2767_v20 = vpop.eup %2766 }
 0x6a4   : > { %v1728_v11 = vsel %vm727_vm3, %v2767_v20, 0.0 }
 0x6a5   : > { %1729 = vadd.xlane.f32.xlu0 %v1728_v11 }
 0x6a7   : > { %v2769_v21 = vpop.eup %2768 }
 0x6a8   : > { %v1731_v22 = vsel %vm727_vm3, %v2769_v21, 0.0 }
 0x6a9   : > { %1732 = vadd.xlane.f32.xlu0 %v1731_v22 }
 0x6ec   : > { %v2497_v12 = vpop.f32.mrb[6].mxu0 }
 0x6ed   : > { %v1486_v23 = vpop.f32.mrb[7].mxu0 }
 0x6ee   : > { %2500 = vmatprep.mubr.msk.f32.mxu0 %vm597_vm1, %v1486_v23 }
 0x6ef   : > { %2501 = vmatmul.mubr.msk.f32.vlgmr.msra.gmra.mrb[4].mxu0 %vm597_vm1, %v2497_v12 }
 0x6f0   : > { %2599 = vmatpush3.bf16.msra.mxu0 %v2596_v15  ;;  %v3236_v15 = vsub.s32 0, %v1958_v2 }
 0x6f1   : > { %2517 = vmatprep.subr.mxu0 %v594_v24 }
 0x6f2   : > { %v1960_v17 = vrot.slane %v1921_v9, %v3236_v15 }
 0x732   : > { %v1730_v25 = vpop.xlane.xlu0 %1729 }
 0x733   : > { %2770 = vrcp.f32 %v1730_v25 }
 0x736   : > { %v1733_v26 = vpop.xlane.xlu0 %1732 }
 0x737   : > { %2772 = vrcp.f32 %v1733_v26 }
 0x73d   : > { %v2771_v27 = vpop.eup %2770 }
 0x73e   : > { %v1736_v28 = vmul.f32 %v2771_v27, %v2767_v20 }
 0x740   : > { %2514 = vmatprep.mubr.msk.f32.mxu0 %vm727_vm3, %v1736_v28  ;;  %v2073_v28 = vld [vmem:[%s3326_s11] sm:$0xff] }
 0x741   : > { %v2773_v29 = vpop.eup %2772 }
 0x742   : > { %v1737_v30 = vmul.f32 %v2773_v29, %v2769_v21  ;;  %v1968_v21 = vrot.slane %v1925_v14, %v3236_v15 }
 0x744   : > { %2515 = vmatmul.mubr.msk.f32.vlgmr.msra.gmra.mrb[8].mxu0 %vm727_vm3, %v1737_v30  ;;  %v2076_v30 = vld [vmem:[%s3326_s11 + $0x18] sm:$0xff] }
 0x745   : > { %2518 = vmatpush3.msra.mxu0 %v594_v24 }
 0x817   : > { %v2516_v31 = vpop.f32.mrb[8].mxu0 }
 0x818   : > { %v1816_v32 = vpop.f32.mrb[9].mxu0 }
 0x819   : > { %2519 = vmatprep.mubr.msk.f32.mxu0 %vm597_vm1, %v1816_v32  ;;  %v2077_v32 = vld [vmem:[%s3326_s11 + $0x20] sm:$0xff] }
 0x81a   : > { %2520 = vmatmul.mubr.msk.f32.vlgmr.msra.gmra.mrb[4].mxu0 %vm597_vm1, %v2516_v31 }
 0x8ed   : > { %v2521_v5 = vpop.f32.mrb[4].mxu0 }
 0x8ee   : > { %v1916_v34 = vadd.f32 %v2521_v5, %v2358_v33  ;;  %v1897_v35 = vpop.f32.mrb[5].mxu0 }
 0x8ef   : > { %v1915_v36 = vadd.f32 %v2358_v33, %v1897_v35  ;;  %v2078_v33 = vld [vmem:[%s3326_s11 + $0x28] sm:$0xff]  ;;  %v2080_v35 = vld [vmem:[%s3326_s11 + $0x38] sm:$0xff] }
 0x8f0   : > { %v1929_v37 = vsel %vm509_vm0, %v1916_v34, 0.0  ;;  %v1936_v41 = vmul.f32 %v1916_v34, %v1916_v34  ;;  %v2616_v5 = vpack.c.bf16 %v2078_v33, %v2077_v32 }
 0x8f1   : > { %1930 = vadd.xlane.f32.xlu1 %v1929_v37  ;;  %v1926_v38 = vsel %vm509_vm0, %v1915_v36, 0.0  ;;  %v1935_v39 = vmul.f32 %v1915_v36, %v1915_v36  ;;  %v2359_v37 = vld [vmem:[%s3325_s10] ss:$0 sm:$0xff] }
 0x8f2   : > { %1927 = vadd.xlane.f32.xlu0 %v1926_v38  ;;  %v1940_v42 = vsel %vm509_vm0, %v1936_v41, 0.0 }
 0x8f3   : > { %v1937_v40 = vsel %vm509_vm0, %v1935_v39, 0.0 }
 0x8f6   : > { %1938 = vadd.xlane.f32.xlu0 %v1937_v40 }
 0x8fa   : > { %1941 = vadd.xlane.f32.xlu0 %v1940_v42 }
 0x97e   : > { %v1931_v51 = vpop.xlane.xlu1 %1930 }
 0x97f   : > { %v1928_v49 = vpop.xlane.xlu0 %1927  ;;  %v1934_v53 = vmul.f32 0.03125, %v1931_v51 }
 0x980   : > { %v1933_v50 = vmul.f32 0.03125, %v1928_v49 }
 0x981   : > { %v1946_v59 = vmul.f32 %v1934_v53, %v1934_v53  ;;  %v1950_v20 = vsub.f32 %v1916_v34, %v1934_v53  ;;  %v2079_v34 = vld [vmem:[%s3326_s11 + $0x30] sm:$0xff] }
 0x982   : > { %v1945_v54 = vmul.f32 %v1933_v50, %v1933_v50  ;;  %v1949_v16 = vsub.f32 %v1915_v36, %v1933_v50  ;;  %v2620_v36 = vpack.c.bf16 %v2080_v35, %v2079_v34 }
 0x983   : > { %v1939_v52 = vpop.xlane.xlu0 %1938 }
 0x984   : > { %v1943_v55 = vmul.f32 0.03125, %v1939_v52  ;;  %v2362_v52 = vld [vmem:[%s3327_s12] ss:$0 sm:$0xff] }
 0x986   : > { %v1947_v56 = vsub.f32 %v1943_v55, %v1945_v54 }
 0x987   : > { %v1942_v57 = vpop.xlane.xlu0 %1941 }
 0x988   : > { %v1951_v60 = vadd.f32 1e-05, %v1947_v56  ;;  %v1944_v61 = vmul.f32 0.03125, %v1942_v57 }
 0x98a   : > { %2774 = vrsqrt.f32 %v1951_v60  ;;  %v1948_v0 = vsub.f32 %v1944_v61, %v1946_v59 }
 0x98c   : > { %v1952_v3 = vadd.f32 1e-05, %v1948_v0 }
 0x98e   : > { %2776 = vrsqrt.f32 %v1952_v3 }
 0x994   : > { %v2775_v18 = vpop.eup %2774 }
 0x995   : > { %v1955_v19 = vmul.f32 %v2775_v18, %v1949_v16  ;;  %v2170_v16 = vld [vmem:[%s3328_s13] sm:$0x1] }
 0x997   : > { %v1961_v11 = vmul.f32 %v1960_v17, %v1955_v19 }
 0x998   : > { %v2777_v22 = vpop.eup %2776 }
 0x999   : > { %v1956_v12 = vmul.f32 %v2777_v22, %v1950_v20  ;;  %v1963_v23 = vadd.f32 %v1961_v11, %v2987_v6  ;;  %v2074_v6 = vld [vmem:[%s3326_s11 + $0x8] sm:$0xff]  ;;  %v2171_v20 = vmul.f32 %v2170_v16, %v3226_v63  ;;  %v2174_v11 = vld [vmem:[%s3328_s13 + $0x2] sm:$0x1] }
 0x99a   : > { %v2608_v29 = vpack.c.bf16 %v2074_v6, %v2073_v28 }
 0x99b   : > { %v1962_v24 = vmul.f32 %v1960_v17, %v1956_v12  ;;  %v3244_v25 = vadd.f32 %v1968_v21, %v1963_v23  ;;  %v2175_v12 = vmul.f32 %v2174_v11, %v3226_v63 }
 0x99c   : > { %2609 = vmatprep.subr.bf16.mxu0 %v2608_v29 }
 0x99d   : > { %v1964_v26 = vadd.f32 %v1962_v24, %v2991_v7  ;;  %2530 = vmatprep.mubr.msk.f32.mxu1 %vm509_vm0, %v3244_v25  ;;  %2611 = vmatpush3.bf16.msra.mxu0 %v2608_v29  ;;  %v2075_v7 = vld [vmem:[%s3326_s11 + $0x10] sm:$0xff]  ;;  %v2176_v24 = vld [vmem:[%s3328_s13 + $0x3] sm:$0x1] }
 0x99e   : > { %v2612_v31 = vpack.c.bf16 %v2076_v30, %v2075_v7 }
 0x99f   : > { %v3249_v27 = vadd.f32 %v1968_v21, %v1964_v26  ;;  %v2172_v21 = vld [vmem:[%s3328_s13 + $0x1] sm:$0x1]  ;;  %v2177_v26 = vadd.f32 %v2176_v24, %v2175_v12 }
 0x9a0   : > { %2613 = vmatprep.subr.bf16.mxu0 %v2612_v31  ;;  %v2173_v23 = vadd.f32 %v2172_v21, %v2171_v20 }
 0x9a1   : > { %2531 = vmatmul.mubr.msk.f32.vlgmr.msra.gmra.mrb[10].mxu1 %vm509_vm0, %v3249_v27  ;;  %2615 = vmatpush3.bf16.msra.mxu0 %v2612_v31  ;;  %v2219_v31 = vrot.slane %v2177_v26, %v3236_v15 }
 0x9a2   : > { %2617 = vmatprep.subr.bf16.mxu0 %v2616_v5  ;;  %v2211_v6 = vrot.slane %v2173_v23, %v3236_v15 }
 0x9a5   : > { %2619 = vmatpush3.bf16.msra.mxu0 %v2616_v5 }
 0x9a6   : > { %2621 = vmatprep.subr.bf16.mxu0 %v2620_v36 }
 0x9a9   : > { %2623 = vmatpush3.bf16.msra.mxu0 %v2620_v36 }
 0xa74   : > { %v2532_v38 = vpop.f32.mrb[10].mxu1 }
 0xa75   : > { %v2060_v39 = vadd.f32 %v2532_v38, %v2359_v37  ;;  %v2054_v40 = vpop.f32.mrb[11].mxu1 }
 0xa76   : > { %v2055_v41 = vadd.f32 %v2359_v37, %v2054_v40 }
 0xa77   : > { %v2066_v42 = vmul.f32 0.70710677, %v2060_v39  ;;  %v2064_v49 = vmul.f32 0.5, %v2060_v39 }
 0xa78   : > { %v2065_v43 = vmul.f32 0.70710677, %v2055_v41  ;;  %v2063_v47 = vmul.f32 0.5, %v2055_v41 }
 0xa79   : > { %2778 = verf.f32 %v2066_v42 }
 0xa7a   : > { %2780 = verf.f32 %v2065_v43 }
 0xa83   : > { %v2779_v44 = vpop.eup %2778 }
 0xa84   : > { %v2781_v45 = vpop.eup %2780  ;;  %v2070_v46 = vadd.f32 1.0, %v2779_v44 }
 0xa85   : > { %v2069_v48 = vadd.f32 1.0, %v2781_v45 }
 0xa86   : > { %v2072_v51 = vmul.f32 %v2070_v46, %v2064_v49 }
 0xa87   : > { %v2071_v50 = vmul.f32 %v2069_v48, %v2063_v47 }
 0xa89   : > { %2549 = vmatprep.mubr.msk.f32.mxu0 %vm2088_vm4, %v2071_v50 }
 0xa8a   : > { %2550 = vmatmul.mubr.msk.f32.vlgmr.msra.gmra.mrb[10].mxu0 %vm2088_vm4, %v2072_v51 }
 0xb5d   : > { %v2551_v53 = vpop.f32.mrb[10].mxu0 }
 0xb5e   : > { %v2167_v54 = vadd.f32 %v2551_v53, %v2362_v52  ;;  %v2161_v55 = vpop.f32.mrb[11].mxu0 }
 0xb5f   : > { %v2162_v56 = vadd.f32 %v2362_v52, %v2161_v55 }
 0xb60   : > { %v2181_v57 = vsel %vm509_vm0, %v2167_v54, 0.0  ;;  %v2187_v61 = vmul.f32 %v2167_v54, %v2167_v54 }
 0xb61   : > { %2182 = vadd.xlane.f32.xlu0 %v2181_v57  ;;  %v2178_v58 = vsel %vm509_vm0, %v2162_v56, 0.0  ;;  %v2186_v59 = vmul.f32 %v2162_v56, %v2162_v56 }
 0xb62   : > { %v2191_v62 = vsel %vm509_vm0, %v2187_v61, 0.0 }
 0xb63   : > { %v2188_v60 = vsel %vm509_vm0, %v2186_v59, 0.0 }
 0xb65   : > { %2179 = vadd.xlane.f32.xlu0 %v2178_v58 }
 0xb69   : > { %2189 = vadd.xlane.f32.xlu0 %v2188_v60 }
 0xb6d   : > { %2192 = vadd.xlane.f32.xlu0 %v2191_v62 }
 0xbee   : > { %v2183_v0 = vpop.xlane.xlu0 %2182 }
 0xbef   : > { %v2185_v4 = vmul.f32 0.03125, %v2183_v0 }
 0xbf1   : > { %v2197_v14 = vmul.f32 %v2185_v4, %v2185_v4  ;;  %v2201_v30 = vsub.f32 %v2167_v54, %v2185_v4 }
 0xbf2   : > { %v2180_v1 = vpop.xlane.xlu0 %2179 }
 0xbf3   : > { %v2184_v2 = vmul.f32 0.03125, %v2180_v1 }
 0xbf5   : > { %v2196_v8 = vmul.f32 %v2184_v2, %v2184_v2  ;;  %v2200_v28 = vsub.f32 %v2162_v56, %v2184_v2 }
 0xbf6   : > { %v2190_v3 = vpop.xlane.xlu0 %2189 }
 0xbf7   : > { %v2194_v9 = vmul.f32 0.03125, %v2190_v3 }
 0xbf9   : > { %v2198_v10 = vsub.f32 %v2194_v9, %v2196_v8 }
 0xbfa   : > { %v2193_v13 = vpop.xlane.xlu0 %2192 }
 0xbfb   : > { %v2202_v17 = vadd.f32 1e-05, %v2198_v10  ;;  %v2195_v18 = vmul.f32 0.03125, %v2193_v13 }
 0xbfd   : > { %2782 = vrsqrt.f32 %v2202_v17  ;;  %v2199_v19 = vsub.f32 %v2195_v18, %v2197_v14 }
 0xbff   : > { %v2203_v22 = vadd.f32 1e-05, %v2199_v19 }
 0xc01   : > { %2784 = vrsqrt.f32 %v2203_v22 }
 0xc07   : > { %v2783_v29 = vpop.eup %2782 }
 0xc08   : > { %v2206_v7 = vmul.f32 %v2783_v29, %v2200_v28 }
 0xc0a   : > { %v2212_v32 = vmul.f32 %v2211_v6, %v2206_v7 }
 0xc0b   : > { %v2785_v33 = vpop.eup %2784 }
 0xc0c   : > { %v2214_v5 = vadd.f32 %v2212_v32, %v3244_v25  ;;  %v2207_v34 = vmul.f32 %v2785_v33, %v2201_v30 }
 0xc0e   : > { %v2220_v63 = vadd.f32 %v2219_v31, %v2214_v5  ;;  %v2213_v35 = vmul.f32 %v2211_v6, %v2207_v34 }
 0xc10   : > { %2222 = vst.msk [vmem:[%s494_s15] sm:$0xff] %vm509_vm0, %v2220_v63  ;;  %v2215_v36 = vadd.f32 %v2213_v35, %v3249_v27 }
 0xc12   : > { %v2221_v37 = vadd.f32 %v2219_v31, %v2215_v36 }
 0xc14   : > { %2223 = vst.msk [vmem:[%s494_s15 + $0x8] sm:$0xff] %vm509_vm0, %v2221_v37 }
 0xc15 PF: > { %s26_s29 = sadd.s32 1, %s2830_s29  }
 0xc16   : > { %p23_p5 = scmp.ge.s32.totalorder %s26_s29, 4  }
 0xc18   :  { %25 = sbr.rel (!%p23_p5) target bundleno = 2 (0x2), region = 118 }
 0xc1f   :  { %2245 = vsyncpa [#allocation3], 1 }
 0xc20   :  { %2247 = vsyncpa [#allocation3 + $0x1], 1 }
 0xc21   :  { %2248 = vsyncpa [#allocation5], 1 }

// kernel: scot_decoder_forward.8
= control target key start
LH: loop header
LB: loop body
LE: loop exit
PB: predicated region body
PF: predicated region fallthrough
CT: control target
= control target key end

     0   :  { %20 = vsyncpa [#allocation3], 0  ;;  %s5597_s0 = inlined_call_operand.vmem [shape: f32[2], index: 0, kind: input, shape index: {}]   ;;  %s5598_s1 = inlined_call_operand.vmem [shape: f32[2,64,16], index: 1, kind: input, shape index: {}]   ;;  %s5599_s2 = inlined_call_operand.vmem [shape: f32[16,48], index: 2, kind: input, shape index: {}]   ;;  %s5600_s3 = inlined_call_operand.vmem [shape: f32[1,48], index: 3, kind: input, shape index: {}]   ;;  %s5601_s4 = inlined_call_operand.vmem [shape: f32[2,16,16], index: 4, kind: input, shape index: {}]   ;;  %s5602_s5 = inlined_call_operand.vmem [shape: f32[4,16,16], index: 5, kind: input, shape index: {}]   ;;  %s5603_s6 = inlined_call_operand.vmem [shape: f32[2], index: 6, kind: input, shape index: {}]   ;;  %s5604_s7 = inlined_call_operand.vmem [shape: f32[16,16], index: 7, kind: input, shape index: {}]   ;;  %s5605_s8 = inlined_call_operand.vmem [shape: f32[1,16], index: 8, kind: input, shape index: {}]   ;;  %s5606_s9 = inlined_call_operand.vmem [shape: f32[4,16], index: 9, kind: input, shape index: {}]   ;;  %s5607_s10 = inlined_call_operand.vmem [shape: f32[16,32], index: 10, kind: input, shape index: {}]   ;;  %s5608_s11 = inlined_call_operand.vmem [shape: f32[1,32], index: 11, kind: input, shape index: {}]   ;;  %s5609_s12 = inlined_call_operand.vmem [shape: f32[32,16], index: 12, kind: input, shape index: {}]   ;;  %s5610_s13 = inlined_call_operand.vmem [shape: f32[1,16], index: 13, kind: input, shape index: {}]   ;;  %s5611_s14 = inlined_call_operand.vmem [shape: f32[4,16], index: 14, kind: input, shape index: {}]   ;;  %s5612_s15 = inlined_call_operand.vmem [shape: f32[2,64,16], index: 15, kind: output, shape index: {}]  }
   0x1   :  { %21 = vsyncpa [#allocation5], 0  ;;  %s4578_s18 = smov 0  }
   0x2 LB: > { %s4584_s19 = sadd.s32 4294967295, %s4489_s18   ;;  %p3627_p0 = scmp.ge.s32.totalorder %s4489_s18, 1  ;;  %s4489_s18 = sphi %s4578_s18, %s27_s18  }
   0x3   : > { %p378_p1 = scmp.lt.s32.totalorder %s4489_s18, 3  ;;  %s391_s22 = sshll.u32 %s5597_s0, 4  ;;  %s392_s22 = int_to_ptr.vmem [resolvable:$true] %s391_s22 }
   0x4   : > { %p5613_p3 = scmp.eq.s32.totalorder %s4584_s19, 0  ;;  %s414_s26 = sshll.u32 %s5603_s6, 4  ;;  %s415_s26 = int_to_ptr.vmem [resolvable:$true] %s414_s26 }
   0x5   : > { %p4591_p2 = pnand %p3627_p0, %p378_p1  ;;  %s4445_s28 = scalar_lea.vmem %s392_s22, 16 }
   0x6   : > { %p4446_p6 = scmp.ne.s32.totalorder %s392_s22, %s4445_s28  ;;  %p4453_p10 = scmp.lt.s32.totalorder %s392_s22, %s392_s22 }
   0x7   : > { %s5615_s23 = scalar_select %p4591_p2, 1, 0 }
   0x8   : > { %p4155_p4 = pneg %p4591_p2  ;;  %p4454_p11 = scmp.lt.s32.totalorder %s4445_s28, %s4445_s28 }
   0xa   : > { %p4603_p5 = pnand %p5613_p3, %p4155_p4  ;;  %p4455_p12 = por %p4454_p11, %p4453_p10 }
   0xc   : > { %p4447_p7 = pneg %p4603_p5 }
   0xe   : > { %p4448_p8 = pnand %p4447_p7, %p4446_p6 }
  0x10   : > { %p4449_p9 = pneg %p4448_p8 }
  0x12   : > { %p4456_p13 = pnand %p4455_p12, %p4449_p9 }
  0x14   : > { %4459 = shalt.err (!%p4456_p13)
}
  0x15   : > { %s4491_s29 = smov [#allocation2]   ;;  %s4460_s30 = scalar_lea.vmem %s415_s26, 16 }
  0x16   : > { %4158 = dma.vmem_to_smem (!%p4603_p5), %s392_s22, 16, %s4491_s29, [#allocation3]  }
  0x17   : > { %p4461_p0 = scmp.ne.s32.totalorder %s415_s26, %s4460_s30  ;;  %p4468_p3 = scmp.lt.s32.totalorder %s415_s26, %s415_s26 }
  0x18   : > { %p4469_p2 = scmp.lt.s32.totalorder %s4460_s30, %s4460_s30 }
  0x19   : > { %p4463_p1 = pnand %p4461_p0, %p4447_p7 }
  0x1a   : > { %p4470_p6 = por %p4469_p2, %p4468_p3 }
  0x1b   : > { %p4464_p4 = pneg %p4463_p1 }
  0x1d   : > { %p4471_p8 = pnand %p4470_p6, %p4464_p4 }
  0x1f   : > { %4474 = shalt.err (!%p4471_p8)
}
  0x20   : > { %s4492_s16 = smov [#allocation4]   ;;  %p5617_p9 = scmp.ne.s32.totalorder %s5615_s23, 0 }
  0x21   : > { %4161 = dma.vmem_to_smem (!%p4603_p5), %s415_s26, 16, %s4492_s16, [#allocation5]  }
  0x22   : > { %459 = sbr.rel (%p5617_p9) target bundleno = 3146 (0xc4a), region = 80  ;;  %p5618_p10 = scmp.eq.s32.totalorder (!%p5617_p9), %s4584_s19, 0 }
  0x29   : > { %4480 = dma.done.wait (%p5618_p10), [#allocation3], 16   ;;  %p5619_p11 = pmov %p5618_p10 }
  0x2a   : > { %p5620_p7 = pmov %p5618_p10 }
  0x2b   : > { %4482 = vsyncadd (%p5619_p11), [#allocation3], 4294967280 }
  0x2c   : > { %4484 = dma.done.wait (%p5620_p7), [#allocation5], 16   ;;  %p5621_p2 = pmov %p5620_p7 }
  0x2e   : > { %4486 = vsyncadd (%p5621_p2), [#allocation5], 4294967280 }
  0x2f   : > { %469 = sfence }
  0x30   : > { %v531_v0 = vld [vmem:[%s5599_s2] sm:$0xff]  ;;  %v532_v1 = vld [vmem:[%s5599_s2 + $0x8] sm:$0xff]  ;;  %p512_p3 = scmp.lt.s32.totalorder %s4584_s19, 1  ;;  %vm540_vm0 = vcmask 130048   ;;  %s4493_s30 = smov 112   ;;  %vm688_vm1 = vcmask 64512  }
  0x31   : > { %v4043_v2 = vpack.c.bf16 %v532_v1, %v531_v0  ;;  %v3638_v11 = vld [vmem:[%s5600_s3] ss:$0 sm:$0xff]  ;;  %s729_s16 = sld [smem:[#allocation4]]  ;;  %s4494_s17 = smov 104   ;;  %vm4802_vm2 = vmpackc.low %vm688_vm1, %vm688_vm1  ;;  %vm3250_vm3 = vcmask 261120  }
  0x32   : > { %s4631_s23 = scalar_select %p512_p3, %s4584_s19, 1 }
  0x33   : > { %4044 = vmatprep.subr.bf16.mxu0 %v4043_v2  ;;  %s4495_s20 = smov 120   ;;  %s4496_s25 = smov 96  }
  0x34   : > { %4046 = vmatpush3.bf16.msra.mxu0 %v4043_v2  ;;  %s3735_s24 = sshll.u32 %s4631_s23, 6  ;;  %s3671_s29 = sld [smem:[#allocation4 + $0x1]] }
  0x35   : > { %s4639_s27 = scalar_lea.vmem %s5598_s1, %s3735_s24  ;;  %s4497_s21 = smov 88  }
  0x36   : > { %v523_v3 = vld [vmem:[%s4639_s27] sm:$0xff]  ;;  %v524_v4 = vld [vmem:[%s4639_s27 + $0x8] sm:$0xff]  ;;  %v525_v5 = vld [vmem:[%s4639_s27 + $0x10] sm:$0xff]  ;;  %s522_s22 = sld [smem:[#allocation2 + %s4584_s19]] }
  0x37   : > { %3855 = vmatprep.mubr.msk.f32.mxu0 %vm540_vm0, %v523_v3  ;;  %v526_v6 = vld [vmem:[%s4639_s27 + $0x18] sm:$0xff]  ;;  %v527_v7 = vld [vmem:[%s4639_s27 + $0x20] sm:$0xff]  ;;  %v528_v8 = vld [vmem:[%s4639_s27 + $0x28] sm:$0xff] }
  0x38   : > { %3856 = vmatmul.mubr.msk.f32.vlgmr.msra.gmra.mrb[0].mxu0 %vm540_vm0, %v524_v4  ;;  %v529_v9 = vld [vmem:[%s4639_s27 + $0x30] sm:$0xff]  ;;  %v530_v10 = vld [vmem:[%s4639_s27 + $0x38] sm:$0xff] }
  0x39   : > { %3858 = vmatprep.mubr.msk.f32.mxu0 %vm540_vm0, %v525_v5 }
  0x3c   : > { %3859 = vmatmul.mubr.msk.f32.gmra.mrb[2].mxu0 %vm540_vm0, %v526_v6 }
  0x3d   : > { %3861 = vmatprep.mubr.msk.f32.mxu0 %vm540_vm0, %v527_v7 }
  0x40   : > { %3862 = vmatmul.mubr.msk.f32.gmra.mrb[4].mxu0 %vm540_vm0, %v528_v8 }
  0x41   : > { %3864 = vmatprep.mubr.msk.f32.mxu0 %vm540_vm0, %v529_v9 }
  0x44   : > { %3865 = vmatmul.mubr.msk.f32.gmra.mrb[6].mxu0 %vm540_vm0, %v530_v10 }
 0x10b   : > { %v3857_v12 = vpop.f32.mrb[0].mxu0 }
 0x10c   : > { %v631_v13 = vpop.f32.mrb[1].mxu0  ;;  %v4662_v15 = vadd.f32 %v3857_v12, %v3638_v11 }
 0x10d   : > { %v4660_v14 = vadd.f32 %v3638_v11, %v631_v13 }
 0x10e   : > { %v4680_v23 = vmul.f32 %v4662_v15, %v4662_v15 }
 0x10f   : > { %v3860_v16 = vpop.f32.mrb[2].mxu0  ;;  %v4666_v17 = vmul.f32 %v4660_v14, %v4660_v14 }
 0x110   : > { %v641_v18 = vpop.f32.mrb[3].mxu0  ;;  %v4672_v20 = vadd.f32 %v3860_v16, %v3638_v11  ;;  %v692_v53 = vsel %vm688_vm1, %v4680_v23, 0.0 }
 0x111   : > { %v4668_v19 = vadd.f32 %v3638_v11, %v641_v18  ;;  %755 = vrot.lane.b32.xlu0 %v4666_v17, %s4493_s30  ;;  %v689_v52 = vsel %vm688_vm1, %v4666_v17, 0.0 }
 0x112   : > { %v4692_v28 = vmul.f32 %v4672_v20, %v4672_v20 }
 0x113   : > { %v3863_v21 = vpop.f32.mrb[4].mxu0  ;;  %v4676_v22 = vmul.f32 %v4668_v19, %v4668_v19 }
 0x114   : > { %v651_v24 = vpop.f32.mrb[5].mxu0  ;;  %v4682_v25 = vadd.f32 %v3863_v21, %v3638_v11  ;;  %v698_v55 = vsel %vm688_vm1, %v4692_v28, 0.0 }
 0x115   : > { %v4684_v26 = vadd.f32 %v3638_v11, %v651_v24  ;;  %759 = vrot.lane.b32.xlu1 %v4676_v22, %s4493_s30  ;;  %757 = vrot.lane.b32.xlu0 %v4680_v23, %s4493_s30  ;;  %v695_v54 = vsel %vm688_vm1, %v4676_v22, 0.0 }
 0x116   : > { %v4708_v33 = vmul.f32 %v4682_v25, %v4682_v25 }
 0x117   : > { %v3866_v27 = vpop.f32.mrb[6].mxu0  ;;  %v4696_v29 = vmul.f32 %v4684_v26, %v4684_v26 }
 0x118   : > { %v661_v30 = vpop.f32.mrb[7].mxu0  ;;  %v4698_v31 = vadd.f32 %v3866_v27, %v3638_v11  ;;  %v704_v57 = vsel %vm688_vm1, %v4708_v33, 0.0 }
 0x119   : > { %v4700_v32 = vadd.f32 %v3638_v11, %v661_v30  ;;  %761 = vrot.lane.b32.xlu1 %v4692_v28, %s4493_s30  ;;  %763 = vrot.lane.b32.xlu0 %v4696_v29, %s4493_s30  ;;  %v701_v56 = vsel %vm688_vm1, %v4696_v29, 0.0 }
 0x11a   : > { %v4720_v35 = vmul.f32 %v4698_v31, %v4698_v31 }
 0x11b   : > { %v4712_v34 = vmul.f32 %v4700_v32, %v4700_v32 }
 0x11c   : > { %v710_v59 = vsel %vm688_vm1, %v4720_v35, 0.0 }
 0x11d   : > { %765 = vrot.lane.b32.xlu1 %v4708_v33, %s4493_s30  ;;  %767 = vrot.lane.b32.xlu0 %v4712_v34, %s4493_s30  ;;  %v707_v58 = vsel %vm688_vm1, %v4712_v34, 0.0 }
 0x121   : > { %769 = vrot.lane.b32.xlu1 %v4720_v35, %s4493_s30 }
 0x183   : > { %v756_v36 = vpop.permute.xlu0 %755 }
 0x184   : > { %v779_v37 = vsel %vm688_vm1, %v756_v36, 0.0 }
 0x185   : > { %780 = vadd.xlane.f32.xlu0 %v779_v37 }
 0x187   : > { %v760_v38 = vpop.permute.xlu1 %759  ;;  %v758_v39 = vpop.permute.xlu0 %757 }
 0x188   : > { %v785_v40 = vsel %vm688_vm1, %v760_v38, 0.0  ;;  %v782_v41 = vsel %vm688_vm1, %v758_v39, 0.0 }
 0x189   : > { %786 = vadd.xlane.f32.xlu0 %v785_v40  ;;  %783 = vadd.xlane.f32.xlu1 %v782_v41 }
 0x18b   : > { %v762_v42 = vpop.permute.xlu1 %761  ;;  %v764_v43 = vpop.permute.xlu0 %763 }
 0x18c   : > { %v788_v44 = vsel %vm688_vm1, %v762_v42, 0.0  ;;  %v791_v45 = vsel %vm688_vm1, %v764_v43, 0.0 }
 0x18d   : > { %789 = vadd.xlane.f32.xlu0 %v788_v44  ;;  %792 = vadd.xlane.f32.xlu1 %v791_v45 }
 0x18f   : > { %v766_v46 = vpop.permute.xlu1 %765  ;;  %v768_v47 = vpop.permute.xlu0 %767 }
 0x190   : > { %v794_v48 = vsel %vm688_vm1, %v766_v46, 0.0  ;;  %v797_v49 = vsel %vm688_vm1, %v768_v47, 0.0 }
 0x191   : > { %795 = vadd.xlane.f32.xlu0 %v794_v48  ;;  %798 = vadd.xlane.f32.xlu1 %v797_v49  ;;  %v4756_v48 = vstv %s729_s16 }
 0x193   : > { %v770_v50 = vpop.permute.xlu1 %769 }
 0x194   : > { %v800_v51 = vsel %vm688_vm1, %v770_v50, 0.0 }
 0x195   : > { %801 = vadd.xlane.f32.xlu0 %v800_v51  ;;  %690 = vadd.xlane.f32.xlu1 %v689_v52 }
 0x199   : > { %693 = vadd.xlane.f32.xlu0 %v692_v53  ;;  %696 = vadd.xlane.f32.xlu1 %v695_v54 }
 0x19d   : > { %699 = vadd.xlane.f32.xlu0 %v698_v55  ;;  %702 = vadd.xlane.f32.xlu1 %v701_v56 }
 0x1a1   : > { %705 = vadd.xlane.f32.xlu0 %v704_v57  ;;  %708 = vadd.xlane.f32.xlu1 %v707_v58 }
 0x1a5   : > { %711 = vadd.xlane.f32.xlu0 %v710_v59 }
 0x212   : > { %v781_v60 = vpop.xlane.xlu0 %780 }
 0x213   : > { %v803_v61 = vmax.f32 %v781_v60, 1e-24 }
 0x215   : > { %4261 = vrsqrt.f32 %v803_v61 }
 0x216   : > { %v784_v62 = vpop.xlane.xlu1 %783  ;;  %v787_v63 = vpop.xlane.xlu0 %786 }
 0x217   : > { %v804_v0 = vmax.f32 %v784_v62, 1e-24  ;;  %v805_v1 = vmax.f32 %v787_v63, 1e-24 }
 0x219   : > { %4263 = vrsqrt.f32 %v804_v0 }
 0x21a   : > { %v793_v2 = vpop.xlane.xlu1 %792  ;;  %v790_v3 = vpop.xlane.xlu0 %789  ;;  %4265 = vrsqrt.f32 %v805_v1 }
 0x21b   : > { %v806_v4 = vmax.f32 %v790_v3, 1e-24  ;;  %v807_v5 = vmax.f32 %v793_v2, 1e-24 }
 0x21d   : > { %4267 = vrsqrt.f32 %v806_v4 }
 0x21e   : > { %v799_v6 = vpop.xlane.xlu1 %798  ;;  %v796_v7 = vpop.xlane.xlu0 %795  ;;  %4269 = vrsqrt.f32 %v807_v5 }
 0x21f   : > { %v809_v8 = vmax.f32 %v799_v6, 1e-24  ;;  %v808_v9 = vmax.f32 %v796_v7, 1e-24  ;;  %v4262_v10 = vpop.eup %4261 }
 0x220   : > { %v819_v21 = vmul.f32 %v4262_v10, %v4660_v14 }
 0x221   : > { %4271 = vrsqrt.f32 %v808_v9 }
 0x222   : > { %v802_v11 = vpop.xlane.xlu0 %801  ;;  %v691_v12 = vpop.xlane.xlu1 %690  ;;  %4273 = vrsqrt.f32 %v809_v8 }
 0x223   : > { %v4264_v13 = vpop.eup %4263  ;;  %v810_v16 = vmax.f32 %v802_v11, 1e-24  ;;  %v713_v18 = vmax.f32 %v691_v12, 1e-24 }
 0x224   : > { %v820_v24 = vmul.f32 %v4264_v13, %v4662_v15  ;;  %v4266_v27 = vpop.eup %4265 }
 0x225   : > { %4275 = vrsqrt.f32 %v810_v16  ;;  %v821_v38 = vmul.f32 %v4266_v27, %v4668_v19 }
 0x226   : > { %4277 = vrsqrt.f32 %v713_v18  ;;  %v697_v30 = vpop.xlane.xlu1 %696  ;;  %v4181_v36 = vpack.i.bf16 %v820_v24, %v819_v21 }
 0x227   : > { %v4268_v37 = vpop.eup %4267  ;;  %v715_v60 = vmax.f32 %v697_v30, 1e-24 }
 0x228   : > { %4182 = vrot.lane.b32.xlu1 %v4181_v36, %s4493_s30  ;;  %v822_v39 = vmul.f32 %v4268_v37, %v4672_v20  ;;  %v4270_v40 = vpop.eup %4269 }
 0x229   : > { %v823_v46 = vmul.f32 %v4270_v40, %v4684_v26 }
 0x22a   : > { %v703_v41 = vpop.xlane.xlu1 %702  ;;  %v4186_v43 = vpack.i.bf16 %v822_v39, %v821_v38 }
 0x22b   : > { %v717_v42 = vmax.f32 %v703_v41, 1e-24  ;;  %v4272_v44 = vpop.eup %4271 }
 0x22c   : > { %v4274_v45 = vpop.eup %4273  ;;  %4187 = vrot.lane.b32.xlu0 %v4186_v43, %s4493_s30  ;;  %v824_v47 = vmul.f32 %v4272_v44, %v4682_v25 }
 0x22d   : > { %4279 = vrsqrt.f32 %v717_v42  ;;  %v825_v52 = vmul.f32 %v4274_v45, %v4700_v32 }
 0x22e   : > { %v4191_v50 = vpack.i.bf16 %v824_v47, %v823_v46 }
 0x22f   : > { %v4276_v49 = vpop.eup %4275 }
 0x230   : > { %v4278_v51 = vpop.eup %4277  ;;  %v826_v53 = vmul.f32 %v4276_v49, %v4698_v31  ;;  %1727 = vrot.lane.b32.xlu0 %v4666_v17, %s4494_s17  ;;  %4192 = vrot.lane.b32.xlu1 %v4191_v50, %s4493_s30 }
 0x231   : > { %v731_v54 = vmul.f32 %v4278_v51, %v4756_v48 }
 0x232   : > { %v4196_v55 = vpack.i.bf16 %v826_v53, %v825_v52 }
 0x233   : > { %v739_v56 = vmul.f32 %v731_v54, %v4660_v14 }
 0x234   : > { %1731 = vrot.lane.b32.xlu0 %v4676_v22, %s4494_s17  ;;  %4197 = vrot.lane.b32.xlu1 %v4196_v55, %s4493_s30 }
 0x235   : > { %3871 = vmatprep.mubr.msk.f32.mxu1 %vm688_vm1, %v739_v56 }
 0x237   : > { %v4280_v57 = vpop.eup %4279 }
 0x238   : > { %1645 = vrot.lane.b32.xlu0 %v4666_v17, %s4495_s20  ;;  %1729 = vrot.lane.b32.xlu1 %v4680_v23, %s4494_s17  ;;  %v735_v58 = vmul.f32 %v4280_v57, %v4756_v48  ;;  %v694_v17 = vpop.xlane.xlu0 %693 }
 0x23a   : > { %v743_v59 = vmul.f32 %v735_v58, %v4684_v26 }
 0x23c   : > { %1735 = vrot.lane.b32.xlu0 %v4696_v29, %s4494_s17  ;;  %1733 = vrot.lane.b32.xlu1 %v4692_v28, %s4494_s17 }
 0x23d   : > { %3885 = vmatprep.mubr.msk.f32.mxu0 %vm688_vm1, %v743_v59 }
 0x240   : > { %1649 = vrot.lane.b32.xlu0 %v4676_v22, %s4495_s20  ;;  %1647 = vrot.lane.b32.xlu1 %v4680_v23, %s4495_s20  ;;  %v700_v22 = vpop.xlane.xlu0 %699  ;;  %v714_v23 = vmax.f32 %v694_v17, 1e-24 }
 0x241   : > { %v716_v61 = vmax.f32 %v700_v22, 1e-24 }
 0x242   : > { %4281 = vrsqrt.f32 %v714_v23 }
 0x243   : > { %4283 = vrsqrt.f32 %v715_v60 }
 0x244   : > { %1739 = vrot.lane.b32.xlu0 %v4712_v34, %s4494_s17  ;;  %1737 = vrot.lane.b32.xlu1 %v4708_v33, %s4494_s17  ;;  %4285 = vrsqrt.f32 %v716_v61 }
 0x248   : > { %1653 = vrot.lane.b32.xlu0 %v4696_v29, %s4495_s20  ;;  %1651 = vrot.lane.b32.xlu1 %v4692_v28, %s4495_s20  ;;  %v706_v29 = vpop.xlane.xlu0 %705  ;;  %v709_v28 = vpop.xlane.xlu1 %708 }
 0x249   : > { %v719_v62 = vmax.f32 %v709_v28, 1e-24  ;;  %v828_v28 = vld [vmem:[%s5601_s4 + $0x8] sm:$0xff] }
 0x24b   : > { %4287 = vrsqrt.f32 %v719_v62 }
 0x24c   : > { %1657 = vrot.lane.b32.xlu0 %v4712_v34, %s4495_s20  ;;  %1741 = vrot.lane.b32.xlu1 %v4720_v35, %s4494_s17  ;;  %v718_v34 = vmax.f32 %v706_v29, 1e-24  ;;  %v712_v0 = vpop.xlane.xlu0 %711  ;;  %v4282_v3 = vpop.eup %4281 }
 0x24d   : > { %v4284_v5 = vpop.eup %4283  ;;  %v720_v6 = vmax.f32 %v712_v0, 1e-24  ;;  %v732_v9 = vmul.f32 %v4282_v3, %v4756_v48 }
 0x24e   : > { %4289 = vrsqrt.f32 %v718_v34  ;;  %v733_v13 = vmul.f32 %v4284_v5, %v4756_v48  ;;  %v4286_v27 = vpop.eup %4285  ;;  %v4856_v34 = vld [vmem:[%s5602_s5 + $0x8] sm:$0xff] }
 0x24f   : > { %4291 = vrsqrt.f32 %v720_v6  ;;  %v740_v24 = vmul.f32 %v732_v9, %v4662_v15  ;;  %v734_v44 = vmul.f32 %v4286_v27, %v4756_v48  ;;  %v4876_v9 = vld [vmem:[%s5602_s5 + $0x18] sm:$0xff] }
 0x250   : > { %1655 = vrot.lane.b32.xlu1 %v4708_v33, %s4495_s20  ;;  %v741_v39 = vmul.f32 %v733_v13, %v4668_v19  ;;  %v3673_v33 = vld [vmem:[%s5601_s4 + $0x18] sm:$0xff] }
 0x251   : > { %v742_v53 = vmul.f32 %v734_v44, %v4672_v20 }
 0x254   : > { %1659 = vrot.lane.b32.xlu1 %v4720_v35, %s4495_s20 }
 0x255   : > { %v4288_v36 = vpop.eup %4287 }
 0x256   : > { %v737_v46 = vmul.f32 %v4288_v36, %v4756_v48 }
 0x258   : > { %v4290_v40 = vpop.eup %4289  ;;  %v745_v55 = vmul.f32 %v737_v46, %v4700_v32 }
 0x259   : > { %v736_v47 = vmul.f32 %v4290_v40, %v4756_v48  ;;  %v4292_v54 = vpop.eup %4291 }
 0x25a   : > { %v738_v22 = vmul.f32 %v4292_v54, %v4756_v48  ;;  %v827_v48 = vld [vmem:[%s5601_s4] sm:$0xff] }
 0x25b   : > { %v744_v56 = vmul.f32 %v736_v47, %v4682_v25 }
 0x25c   : > { %v746_v29 = vmul.f32 %v738_v22, %v4698_v31 }
 0x29a   : > { %v4183_v63 = vpop.permute.xlu1 %4182 }
 0x29b   : > { %v4185_v1 = vunpack.i.h.bf16 %v4183_v63  ;;  %v4184_v2 = vunpack.i.l.bf16 %v4183_v63 }
 0x29d   : > { %v4047_v35 = vpack.c.bf16 %v4185_v1, %v4184_v2  ;;  %v4861_v1 = vld [vmem:[%s5602_s5] sm:$0xff] }
 0x29e   : > { %v4188_v4 = vpop.permute.xlu0 %4187 }
 0x29f   : > { %4049 = vmatprep.subr.msk.bf16.mxu1 %vm4802_vm2, %v4047_v35  ;;  %v4190_v7 = vunpack.i.h.bf16 %v4188_v4  ;;  %v4189_v8 = vunpack.i.l.bf16 %v4188_v4 }
 0x2a0   : > { %4052 = vmatpush3.bf16.xpose.msk.msra.mxu1 %vm4802_vm2, %v4047_v35 }
 0x2a1   : > { %v4053_v10 = vpack.c.bf16 %v4190_v7, %v4189_v8 }
 0x2a2   : > { %v1728_v11 = vpop.permute.xlu0 %1727  ;;  %v4193_v12 = vpop.permute.xlu1 %4192 }
 0x2a3   : > { %v4195_v16 = vunpack.i.h.bf16 %v4193_v12  ;;  %v4194_v18 = vunpack.i.l.bf16 %v4193_v12  ;;  %4055 = vmatprep.subr.msk.bf16.mxu1 %vm4802_vm2, %v4053_v10  ;;  %v1751_v21 = vsel %vm688_vm1, %v1728_v11, 0.0 }
 0x2a4   : > { %1752 = vadd.xlane.f32.xlu1 %v1751_v21 }
 0x2a5   : > { %v4059_v30 = vpack.c.bf16 %v4195_v16, %v4194_v18  ;;  %v4882_v18 = vld [vmem:[%s5602_s5 + $0x28] sm:$0xff] }
 0x2a6   : > { %v1732_v37 = vpop.permute.xlu0 %1731  ;;  %v4198_v38 = vpop.permute.xlu1 %4197 }
 0x2a7   : > { %3872 = vmatmul.mubr.msk.f32.vlgmr.msra.gmra.mrb[0].mxu1 %vm688_vm1, %v740_v24  ;;  %v4200_v41 = vunpack.i.h.bf16 %v4198_v38  ;;  %v4199_v42 = vunpack.i.l.bf16 %v4198_v38  ;;  %4061 = vmatprep.subr.msk.bf16.mxu0 %vm4802_vm2, %v4059_v30  ;;  %v1757_v43 = vsel %vm688_vm1, %v1732_v37, 0.0 }
 0x2a8   : > { %4058 = vmatpush3.bf16.xpose.msk.msra.mxu1 %vm4802_vm2, %v4053_v10  ;;  %1758 = vadd.xlane.f32.xlu1 %v1757_v43 }
 0x2a9   : > { %3878 = vmatprep.mubr.msk.f32.mxu1 %vm688_vm1, %v741_v39  ;;  %v4065_v45 = vpack.c.bf16 %v4200_v41, %v4199_v42  ;;  %4064 = vmatpush3.bf16.xpose.msk.msra.mxu0 %vm4802_vm2, %v4059_v30  ;;  %v4890_v30 = vld [vmem:[%s5602_s5 + $0x20] sm:$0xff]  ;;  %v4903_v42 = vld [vmem:[%s5602_s5 + $0x10] sm:$0xff] }
 0x2aa   : > { %v1646_v49 = vpop.permute.xlu0 %1645  ;;  %v1730_v50 = vpop.permute.xlu1 %1729 }
 0x2ab   : > { %4067 = vmatprep.subr.msk.bf16.mxu1 %vm4802_vm2, %v4065_v45  ;;  %v1669_v51 = vsel %vm688_vm1, %v1646_v49, 0.0  ;;  %v1754_v52 = vsel %vm688_vm1, %v1730_v50, 0.0 }
 0x2ac   : > { %1670 = vadd.xlane.f32.xlu1 %v1669_v51  ;;  %1755 = vadd.xlane.f32.xlu0 %v1754_v52 }
 0x2ae   : > { %v1736_v57 = vpop.permute.xlu0 %1735  ;;  %v1734_v58 = vpop.permute.xlu1 %1733 }
 0x2af   : > { %3879 = vmatmul.mubr.msk.f32.vlgmr.msra.gmra.mrb[2].mxu1 %vm688_vm1, %v742_v53  ;;  %v1763_v59 = vsel %vm688_vm1, %v1736_v57, 0.0  ;;  %v1760_v17 = vsel %vm688_vm1, %v1734_v58, 0.0 }
 0x2b0   : > { %4070 = vmatpush3.bf16.xpose.msk.msra.mxu1 %vm4802_vm2, %v4065_v45  ;;  %3892 = vmatprep.mubr.msk.f32.mxu1 %vm688_vm1, %v745_v55 }
 0x2b1   : > { %3886 = vmatmul.mubr.msk.f32.vlgmr.msra.gmra.mrb[8].mxu0 %vm688_vm1, %v744_v56  ;;  %1764 = vadd.xlane.f32.xlu1 %v1763_v59  ;;  %v4920_v56 = vld [vmem:[%s5602_s5 + $0x38] sm:$0xff] }
 0x2b2   : > { %1761 = vadd.xlane.f32.xlu0 %v1760_v17  ;;  %v1648_v23 = vpop.permute.xlu1 %1647  ;;  %v1650_v3 = vpop.permute.xlu0 %1649 }
 0x2b3   : > { %v1672_v60 = vsel %vm688_vm1, %v1648_v23, 0.0  ;;  %v1675_v12 = vsel %vm688_vm1, %v1650_v3, 0.0  ;;  %v4935_v3 = vpack.i.bf16 %v4662_v15, %v4660_v14 }
 0x2b6   : > { %1673 = vadd.xlane.f32.xlu0 %v1672_v60  ;;  %v1738_v61 = vpop.permute.xlu1 %1737  ;;  %v1740_v13 = vpop.permute.xlu0 %1739 }
 0x2b7   : > { %3893 = vmatmul.mubr.msk.f32.vlgmr.msra.gmra.mrb[4].mxu1 %vm688_vm1, %v746_v29  ;;  %v1769_v52 = vsel %vm688_vm1, %v1740_v13, 0.0  ;;  %v1766_v59 = vsel %vm688_vm1, %v1738_v61, 0.0 }
 0x2ba   : > { %v1652_v6 = vpop.permute.xlu1 %1651  ;;  %v1654_v43 = vpop.permute.xlu0 %1653 }
 0x2bb   : > { %v1681_v58 = vsel %vm688_vm1, %v1654_v43, 0.0 }
 0x2be   : > { %v1742_v36 = vpop.permute.xlu1 %1741  ;;  %v1658_v55 = vpop.permute.xlu0 %1657 }
 0x2bf   : > { %v1687_v60 = vsel %vm688_vm1, %v1658_v55, 0.0 }
 0x2c2   : > { %v1656_v50 = vpop.permute.xlu1 %1655 }
 0x2c6   : > { %v1660_v57 = vpop.permute.xlu1 %1659 }
 0x331   : > { %v1753_v23 = vpop.xlane.xlu1 %1752 }
 0x339   : > { %v1756_v22 = vpop.xlane.xlu0 %1755 }
 0x37a   : > { %v3873_v62 = vpop.f32.mrb[0].mxu1 }
 0x37b   : > { %v917_v63 = vadd.f32 %v3873_v62, %v828_v28  ;;  %v911_v0 = vpop.f32.mrb[1].mxu1  ;;  %v1759_v62 = vpop.xlane.xlu1 %1758 }
 0x37c   : > { %v912_v2 = vadd.f32 %v911_v0, %v827_v48  ;;  %v1777_v61 = vmax.f32 %v1759_v62, 1e-24  ;;  %v1772_v0 = vsel %vm688_vm1, %v1742_v36, 0.0 }
 0x37d   : > { %v4864_v35 = vadd.f32 %v917_v63, %v4856_v34 }
 0x37e   : > { %v4867_v4 = vadd.f32 %v912_v2, %v4861_v1  ;;  %v1684_v2 = vsel %vm688_vm1, %v1656_v50, 0.0 }
 0x37f   : > { %v1204_v5 = vsel %vm540_vm0, %v4864_v35, -inf }
 0x380   : > { %1205 = vmax.xlane.f32.xlu1 %v1204_v5  ;;  %v1201_v7 = vsel %vm540_vm0, %v4867_v4, -inf  ;;  %v1690_v5 = vsel %vm688_vm1, %v1660_v57, 0.0 }
 0x381   : > { %1202 = vmax.xlane.f32.xlu0 %v1201_v7 }
 0x382   : > { %v3880_v8 = vpop.f32.mrb[2].mxu1 }
 0x383   : > { %v1008_v10 = vadd.f32 %v3880_v8, %v828_v28  ;;  %v1002_v11 = vpop.f32.mrb[3].mxu1  ;;  %v1776_v8 = vmax.f32 %v1756_v22, 1e-24 }
 0x384   : > { %v3887_v16 = vpop.f32.mrb[8].mxu0  ;;  %1676 = vadd.xlane.f32.xlu1 %v1675_v12  ;;  %v1003_v38 = vadd.f32 %v1002_v11, %v827_v48  ;;  %v1775_v11 = vmax.f32 %v1753_v23, 1e-24  ;;  %v4946_v12 = vpack.i.bf16 %v4698_v31, %v4700_v32 }
 0x385   : > { %v1099_v21 = vadd.f32 %v3887_v16, %v828_v28  ;;  %v1093_v24 = vpop.f32.mrb[9].mxu0  ;;  %v4885_v27 = vadd.f32 %v1008_v10, %v4876_v9 }
 0x386   : > { %v1094_v37 = vadd.f32 %v1093_v24, %v827_v48  ;;  %v4910_v49 = vadd.f32 %v1003_v38, %v4903_v42 }
 0x387   : > { %v1210_v39 = vsel %vm540_vm0, %v4885_v27, -inf  ;;  %v4895_v40 = vadd.f32 %v1099_v21, %v4882_v18 }
 0x388   : > { %1211 = vmax.xlane.f32.xlu0 %v1210_v39  ;;  %v4898_v41 = vadd.f32 %v1094_v37, %v4890_v30  ;;  %v1207_v54 = vsel %vm540_vm0, %v4910_v49, -inf  ;;  %v4954_v37 = vpack.i.bf16 %v4672_v20, %v4668_v19 }
 0x389   : > { %v1216_v47 = vsel %vm540_vm0, %v4895_v40, -inf }
 0x38a   : > { %v1213_v44 = vsel %vm540_vm0, %v4898_v41, -inf  ;;  %v3894_v45 = vpop.f32.mrb[4].mxu1 }
 0x38b   : > { %1214 = vmax.xlane.f32.xlu1 %v1213_v44  ;;  %v1184_v46 = vpop.f32.mrb[5].mxu1  ;;  %v1190_v53 = vadd.f32 %v3894_v45, %v828_v28  ;;  %v1762_v28 = vpop.xlane.xlu0 %1761  ;;  %v4963_v45 = vld [vmem:[%s5602_s5 + $0x30] sm:$0xff] }
 0x38c   : > { %v4912_v51 = vadd.f32 %v1184_v46, %v827_v48  ;;  %1217 = vmax.xlane.f32.xlu0 %v1216_v47  ;;  %v1678_v48 = vsel %vm688_vm1, %v1652_v6, 0.0  ;;  %v1778_v63 = vmax.f32 %v1762_v28, 1e-24  ;;  %v4941_v6 = vpack.i.bf16 %v4682_v25, %v4684_v26  ;;  %v1671_v44 = vpop.xlane.xlu1 %1670 }
 0x38d   : > { %v4925_v17 = vadd.f32 %v1190_v53, %v4920_v56  ;;  %v1693_v46 = vmax.f32 %v1671_v44, 1e-24  ;;  %v4971_v53 = vstv %s3671_s29 }
 0x38e   : > { %4293 = vrsqrt.f32 %v1778_v63  ;;  %v4967_v47 = vadd.f32 %v4912_v51, %v4963_v45 }
 0x38f   : > { %1770 = vadd.xlane.f32.xlu1 %v1769_v52  ;;  %v1222_v29 = vsel %vm540_vm0, %v4925_v17, -inf  ;;  %4295 = vrsqrt.f32 %v1777_v61 }
 0x390   : > { %1208 = vmax.xlane.f32.xlu0 %v1207_v54  ;;  %4297 = vrsqrt.f32 %v1776_v8  ;;  %v1219_v50 = vsel %vm540_vm0, %v4967_v47, -inf  ;;  %v1765_v57 = vpop.xlane.xlu1 %1764 }
 0x391   : > { %4299 = vrsqrt.f32 %v1775_v11  ;;  %v1779_v61 = vmax.f32 %v1765_v57, 1e-24 }
 0x392   : > { %4301 = vrsqrt.f32 %v1693_v46 }
 0x393   : > { %1682 = vadd.xlane.f32.xlu1 %v1681_v58  ;;  %v4976_v58 = vpop.xlane.xlu0 %1673 }
 0x394   : > { %1767 = vadd.xlane.f32.xlu0 %v1766_v59 }
 0x397   : > { %1688 = vadd.xlane.f32.xlu1 %v1687_v60 }
 0x398   : > { %1223 = vmax.xlane.f32.xlu0 %v1222_v29  ;;  %v4294_v7 = vpop.eup %4293 }
 0x399   : > { %v4296_v10 = vpop.eup %4295  ;;  %v1794_v13 = vmul.f32 %v4294_v7, %v4672_v20 }
 0x39a   : > { %v1793_v16 = vmul.f32 %v4296_v10, %v4668_v19  ;;  %v4298_v24 = vpop.eup %4297 }
 0x39b   : > { %v4300_v36 = vpop.eup %4299  ;;  %v1792_v38 = vmul.f32 %v4298_v24, %v4662_v15 }
 0x39c   : > { %1679 = vadd.xlane.f32.xlu0 %v1678_v48  ;;  %v4226_v21 = vpack.i.bf16 %v1794_v13, %v1793_v16  ;;  %v1791_v39 = vmul.f32 %v4300_v36, %v4660_v14  ;;  %v4302_v52 = vpop.eup %4301 }
 0x39d   : > { %v1711_v54 = vmul.f32 %v4302_v52, %v4971_v53 }
 0x39e   : > { %v4221_v43 = vpack.i.bf16 %v1792_v38, %v1791_v39 }
 0x39f   : > { %v1719_v55 = vmul.f32 %v1711_v54, %v4660_v14 }
 0x3a0   : > { %1773 = vadd.xlane.f32.xlu0 %v1772_v0 }
 0x3a4   : > { %1685 = vadd.xlane.f32.xlu0 %v1684_v2 }
 0x3a8   : > { %4202 = vrot.lane.b32.xlu1 %v4935_v3, %s4496_s25  ;;  %1691 = vadd.xlane.f32.xlu0 %v1690_v5 }
 0x3ac   : > { %4212 = vrot.lane.b32.xlu1 %v4941_v6, %s4496_s25 }
 0x3b0   : > { %4217 = vrot.lane.b32.xlu1 %v4946_v12, %s4496_s25 }
 0x3b4   : > { %4227 = vrot.lane.b32.xlu1 %v4226_v21, %s4494_s17 }
 0x3be   : > { %4207 = vrot.lane.b32.xlu0 %v4954_v37, %s4496_s25 }
 0x3c2   : > { %4222 = vrot.lane.b32.xlu0 %v4221_v43, %s4494_s17 }
 0x3d8   : > { %1220 = vmax.xlane.f32.xlu1 %v1219_v50 }
 0x3e9   : > { %1804 = vrot.lane.b32.xlu1 %v1719_v55, %s4495_s20 }
 0x40d   : > { %v4978_v51 = vpop.xlane.xlu1 %1205 }
 0x40e   : > { %v1203_v59 = vpop.xlane.xlu0 %1202 }
 0x40f   : > { %v1225_v22 = vsub.f32 %v4867_v4, %v1203_v59 }
 0x411   : > { %v1233_v23 = vmul.f32 1.442695, %v1225_v22  ;;  %v4981_v60 = vpop.xlane.xlu1 %1676 }
 0x413   : > { %4303 = vpow2.f32 %v1233_v23 }
 0x414   : > { %4305 = vrsqrt.f32 %v1779_v61 }
 0x415   : > { %v4983_v29 = vpop.xlane.xlu0 %1211 }
 0x418   : > { %v1215_v28 = vpop.xlane.xlu1 %1214 }
 0x419   : > { %v4985_v48 = vpop.xlane.xlu0 %1217  ;;  %v1229_v14 = vsub.f32 %v4898_v41, %v1215_v28 }
 0x41b   : > { %v1241_v5 = vmul.f32 1.442695, %v1229_v14 }
 0x41c   : > { %v1771_v62 = vpop.xlane.xlu1 %1770 }
 0x41d   : > { %v4988_v63 = vpop.eup %4303  ;;  %v1209_v0 = vpop.xlane.xlu0 %1208  ;;  %v1781_v57 = vmax.f32 %v1771_v62, 1e-24 }
 0x41e   : > { %v1227_v2 = vsub.f32 %v4910_v49, %v1209_v0  ;;  %v1249_v4 = vsel %vm540_vm0, %v4988_v63, 0.0  ;;  %v4306_v36 = vpop.eup %4305 }
 0x41f   : > { %1250 = vadd.xlane.f32.xlu1 %v1249_v4  ;;  %v1795_v23 = vmul.f32 %v4306_v36, %v4684_v26 }
 0x420   : > { %v1237_v7 = vmul.f32 1.442695, %v1227_v2  ;;  %v4993_v8 = vpop.xlane.xlu1 %1682 }
 0x421   : > { %v1768_v10 = vpop.xlane.xlu0 %1767 }
 0x422   : > { %4307 = vpow2.f32 %v1237_v7  ;;  %v1780_v11 = vmax.f32 %v1768_v10, 1e-24 }
 0x423   : > { %4309 = vpow2.f32 %v1241_v5 }
 0x424   : > { %4311 = vrsqrt.f32 %v1780_v11  ;;  %v4995_v41 = vpop.xlane.xlu1 %1688  ;;  %v1226_v11 = vsub.f32 %v4864_v35, %v4978_v51  ;;  %v1230_v51 = vsub.f32 %v4895_v40, %v4985_v48 }
 0x425   : > { %v1224_v13 = vpop.xlane.xlu0 %1223 }
 0x428   : > { %v4203_v16 = vpop.permute.xlu1 %4202 }
 0x429   : > { %v4205_v21 = vunpack.i.h.bf16 %v4203_v16  ;;  %v4204_v49 = vunpack.i.l.bf16 %v4203_v16  ;;  %v4997_v24 = vpop.xlane.xlu0 %1679 }
 0x42b   : > { %v4071_v38 = vpack.c.bf16 %v4205_v21, %v4204_v49 }
 0x42c   : > { %v4999_v39 = vpop.eup %4307  ;;  %v4213_v43 = vpop.permute.xlu1 %4212 }
 0x42d   : > { %v5001_v44 = vpop.eup %4309  ;;  %v4215_v46 = vunpack.i.h.bf16 %v4213_v43  ;;  %v4214_v50 = vunpack.i.l.bf16 %v4213_v43  ;;  %4072 = vmatprep.subr.bf16.mxu0 %v4071_v38  ;;  %v1774_v52 = vpop.xlane.xlu0 %1773  ;;  %v1255_v54 = vsel %vm540_vm0, %v4999_v39, 0.0 }
 0x42e   : > { %v4312_v55 = vpop.eup %4311  ;;  %4074 = vmatpush3.bf16.msra.mxu0 %v4071_v38  ;;  %v1782_v59 = vmax.f32 %v1774_v52, 1e-24  ;;  %1256 = vadd.xlane.f32.xlu1 %v1255_v54  ;;  %v1261_v61 = vsel %vm540_vm0, %v5001_v44, 0.0 }
 0x42f   : > { %v4079_v22 = vpack.c.bf16 %v4215_v46, %v4214_v50  ;;  %v1796_v28 = vmul.f32 %v4312_v55, %v4682_v25  ;;  %v1235_v46 = vmul.f32 1.442695, %v1226_v11  ;;  %v1228_v50 = vsub.f32 %v4885_v27, %v4983_v29 }
 0x430   : > { %4313 = vrsqrt.f32 %v1782_v59  ;;  %v1243_v55 = vmul.f32 1.442695, %v1230_v51  ;;  %v5046_v48 = vpop.permute.xlu1 %4217  ;;  %v1699_v11 = vmax.f32 %v4995_v41, 1e-24 }
 0x431   : > { %4080 = vmatprep.subr.bf16.mxu1 %v4079_v22  ;;  %v5007_v14 = vpop.xlane.xlu0 %1685  ;;  %v4231_v0 = vpack.i.bf16 %v1796_v28, %v1795_v23  ;;  %4315 = vrsqrt.f32 %v1781_v57  ;;  %v1239_v35 = vmul.f32 1.442695, %v1228_v50  ;;  %v1232_v57 = vsub.f32 %v4925_v17, %v1224_v13 }
 0x432   : > { %4082 = vmatpush3.bf16.msra.mxu1 %v4079_v22  ;;  %1262 = vadd.xlane.f32.xlu1 %v1261_v61  ;;  %4317 = vpow2.f32 %v1235_v46  ;;  %v1694_v13 = vmax.f32 %v4976_v58, 1e-24 }
 0x433   : > { %4232 = vrot.lane.b32.xlu0 %v4231_v0, %s4494_s17  ;;  %4319 = vpow2.f32 %v1239_v35  ;;  %v1247_v27 = vmul.f32 1.442695, %v1232_v57  ;;  %v1695_v0 = vmax.f32 %v4981_v60, 1e-24  ;;  %v1696_v60 = vmax.f32 %v4997_v24, 1e-24 }
 0x434   : > { %4321 = vpow2.f32 %v1243_v55 }
 0x435   : > { %v5012_v62 = vpop.xlane.xlu0 %1691  ;;  %4323 = vpow2.f32 %v1247_v27 }
 0x436   : > { %4325 = vrsqrt.f32 %v1694_v13 }
 0x437   : > { %4327 = vrsqrt.f32 %v1695_v0 }
 0x439   : > { %v4208_v2 = vpop.permute.xlu0 %4207 }
 0x43a   : > { %v4314_v4 = vpop.eup %4313  ;;  %v4210_v5 = vunpack.i.h.bf16 %v4208_v2  ;;  %v4209_v7 = vunpack.i.l.bf16 %v4208_v2  ;;  %v5052_v2 = vpop.permute.xlu1 %4227 }
 0x43b   : > { %v4316_v10 = vpop.eup %4315  ;;  %v1798_v49 = vmul.f32 %v4314_v4, %v4698_v31  ;;  %v1697_v4 = vmax.f32 %v4993_v8, 1e-24 }
 0x43c   : > { %v5016_v16 = vpack.c.bf16 %v4210_v5, %v4209_v7  ;;  %v1797_v43 = vmul.f32 %v4316_v10, %v4700_v32  ;;  %v5032_v29 = vpop.eup %4317 }
 0x43d   : > { %v4223_v21 = vpop.permute.xlu0 %4222  ;;  %v1252_v59 = vsel %vm540_vm0, %v5032_v29, 0.0  ;;  %v5036_v22 = vpop.eup %4319  ;;  %4329 = vrsqrt.f32 %v1697_v4 }
 0x43e   : > { %v4225_v36 = vunpack.i.h.bf16 %v4223_v21  ;;  %v4224_v38 = vunpack.i.l.bf16 %v4223_v21  ;;  %4076 = vmatprep.subr.bf16.mxu0 %v5016_v16  ;;  %v4236_v54 = vpack.i.bf16 %v1798_v49, %v1797_v43  ;;  %v1258_v23 = vsel %vm540_vm0, %v5036_v22, 0.0  ;;  %v5040_v28 = vpop.eup %4321 }
 0x43f   : > { %v1264_v40 = vsel %vm540_vm0, %v5040_v28, 0.0  ;;  %v5044_v17 = vpop.eup %4323 }
 0x440   : > { %v5023_v52 = vpack.c.bf16 %v4225_v36, %v4224_v38  ;;  %v1270_v61 = vsel %vm540_vm0, %v5044_v17, 0.0  ;;  %v4326_v58 = vpop.eup %4325 }
 0x441   : > { %v1712_v21 = vmul.f32 %v4326_v58, %v4971_v53  ;;  %v4328_v49 = vpop.eup %4327 }
 0x442   : > { %4089 = vmatprep.subr.msk.bf16.mxu1 %vm4802_vm2, %v5023_v52  ;;  %v1713_v38 = vmul.f32 %v4328_v49, %v4971_v53 }
 0x443   : > { %4237 = vrot.lane.b32.xlu1 %v4236_v54, %s4494_s17  ;;  %v1720_v36 = vmul.f32 %v1712_v21, %v4662_v15  ;;  %v1700_v15 = vmax.f32 %v5012_v62, 1e-24 }
 0x444   : > { %v1721_v46 = vmul.f32 %v1713_v38, %v4668_v19  ;;  %v4229_v38 = vunpack.i.l.bf16 %v5052_v2 }
 0x447   : > { %v4330_v8 = vpop.eup %4329 }
 0x448   : > { %v1715_v24 = vmul.f32 %v4330_v8, %v4971_v53 }
 0x44a   : > { %v1723_v54 = vmul.f32 %v1715_v24, %v4684_v26 }
 0x452   : > { %1253 = vadd.xlane.f32.xlu0 %v1252_v59 }
 0x456   : > { %1259 = vadd.xlane.f32.xlu0 %v1258_v23 }
 0x45a   : > { %1265 = vadd.xlane.f32.xlu0 %v1264_v40 }
 0x45e   : > { %1271 = vadd.xlane.f32.xlu0 %v1270_v61 }
 0x465   : > { %v1221_v5 = vpop.xlane.xlu1 %1220 }
 0x466   : > { %v1231_v7 = vsub.f32 %v4967_v47, %v1221_v5  ;;  %v1698_v47 = vmax.f32 %v5007_v14, 1e-24 }
 0x468   : > { %v1245_v10 = vmul.f32 1.442695, %v1231_v7 }
 0x469   : > { %v1805_v23 = vpop.permute.xlu1 %1804 }
 0x46a   : > { %4331 = vpow2.f32 %v1245_v10 }
 0x46b   : > { %4333 = vrsqrt.f32 %v1699_v11  ;;  %v4219_v11 = vunpack.i.l.bf16 %v5046_v48 }
 0x46c   : > { %4335 = vrsqrt.f32 %v1696_v60 }
 0x46d   : > { %4337 = vrsqrt.f32 %v1698_v47 }
 0x46e   : > { %4339 = vrsqrt.f32 %v1700_v15 }
 0x474   : > { %v5061_v43 = vpop.eup %4331  ;;  %1806 = vrot.lane.b32.xlu0 %v1720_v36, %s4495_s20  ;;  %v4230_v36 = vunpack.i.h.bf16 %v5052_v2 }
 0x475   : > { %v1267_v41 = vsel %vm540_vm0, %v5061_v43, 0.0  ;;  %v4334_v50 = vpop.eup %4333 }
 0x476   : > { %1268 = vadd.xlane.f32.xlu1 %v1267_v41  ;;  %v1717_v14 = vmul.f32 %v4334_v50, %v4971_v53  ;;  %v4336_v35 = vpop.eup %4335  ;;  %v4093_v47 = vpack.c.bf16 %v4230_v36, %v4229_v38 }
 0x477   : > { %v1714_v19 = vmul.f32 %v4336_v35, %v4971_v53  ;;  %v4338_v55 = vpop.eup %4337 }
 0x478   : > { %1899 = vrot.lane.b32.xlu0 %v1721_v46, %s4495_s20  ;;  %v1725_v51 = vmul.f32 %v1717_v14, %v4700_v32  ;;  %v1716_v62 = vmul.f32 %v4338_v55, %v4971_v53  ;;  %v4340_v27 = vpop.eup %4339 }
 0x479   : > { %v1722_v57 = vmul.f32 %v1714_v19, %v4672_v20  ;;  %v1718_v59 = vmul.f32 %v4340_v27, %v4971_v53 }
 0x47a   : > { %v1724_v26 = vmul.f32 %v1716_v62, %v4682_v25 }
 0x47b   : > { %v1726_v32 = vmul.f32 %v1718_v59, %v4698_v31 }
 0x47c   : > { %1994 = vrot.lane.b32.xlu0 %v1723_v54, %s4495_s20 }
 0x480   : > { %2089 = vrot.lane.b32.xlu0 %v1725_v51, %s4495_s20 }
 0x487   : > { %1901 = vrot.lane.b32.xlu1 %v1722_v57, %s4495_s20 }
 0x48b   : > { %1996 = vrot.lane.b32.xlu1 %v1724_v26, %s4495_s20 }
 0x48f   : > { %2091 = vrot.lane.b32.xlu1 %v1726_v32, %s4495_s20  ;;  %s5545_s20 = scalar_lea.vmem %s5612_s15, %s3735_s24 }
 0x4a5   : > { %v4233_v4 = vpop.permute.xlu0 %4232 }
 0x4a6   : > { %v4234_v41 = vunpack.i.l.bf16 %v4233_v4 }
 0x4ac   : > { %v1251_v40 = vpop.xlane.xlu1 %1250 }
 0x4ad   : > { %4341 = vrcp.f32 %v1251_v40  ;;  %v3672_v40 = vld [vmem:[%s5601_s4 + $0x10] sm:$0xff] }
 0x4b7   : > { %v4342_v13 = vpop.eup %4341 }
 0x4b8   : > { %v1281_v20 = vmul.f32 %v4342_v13, %v4988_v63  ;;  %v4220_v63 = vunpack.i.h.bf16 %v5046_v48 }
 0x4ba   : > { %3899 = vmatprep.mubr.msk.f32.mxu0 %vm540_vm0, %v1281_v20  ;;  %v4083_v60 = vpack.c.bf16 %v4220_v63, %v4219_v11 }
 0x4bb   : > { %v1257_v61 = vpop.xlane.xlu1 %1256 }
 0x4bf   : > { %v1263_v0 = vpop.xlane.xlu1 %1262 }
 0x4c0   : > { %4343 = vrcp.f32 %v1263_v0 }
 0x4c1   : > { %4345 = vrcp.f32 %v1257_v61 }
 0x4ca   : > { %v4344_v25 = vpop.eup %4343 }
 0x4cb   : > { %v1285_v53 = vmul.f32 %v4344_v25, %v5001_v44  ;;  %v4346_v10 = vpop.eup %4345 }
 0x4cc   : > { %v1283_v44 = vmul.f32 %v4346_v10, %v4999_v39 }
 0x4cd   : > { %3913 = vmatprep.mubr.msk.f32.mxu1 %vm540_vm0, %v1285_v53 }
 0x4df   : > { %v1254_v31 = vpop.xlane.xlu0 %1253 }
 0x4e0   : > { %4347 = vrcp.f32 %v1254_v31 }
 0x4e3   : > { %v1260_v5 = vpop.xlane.xlu0 %1259 }
 0x4e4   : > { %4349 = vrcp.f32 %v1260_v5 }
 0x4e7   : > { %v1266_v7 = vpop.xlane.xlu0 %1265 }
 0x4e8   : > { %4351 = vrcp.f32 %v1266_v7 }
 0x4ea   : > { %v4348_v58 = vpop.eup %4347 }
 0x4eb   : > { %v1282_v21 = vmul.f32 %v4348_v58, %v5032_v29  ;;  %v1272_v49 = vpop.xlane.xlu0 %1271  ;;  %v4235_v29 = vunpack.i.h.bf16 %v4233_v4 }
 0x4ec   : > { %4353 = vrcp.f32 %v1272_v49 }
 0x4ed   : > { %3900 = vmatmul.mubr.msk.f32.vlgmr.msra.gmra.mrb[10].mxu0 %vm540_vm0, %v1282_v21  ;;  %v4099_v24 = vpack.c.bf16 %v4235_v29, %v4234_v41 }
 0x4ee   : > { %v4350_v8 = vpop.eup %4349  ;;  %4078 = vmatpush3.bf16.msra.mxu0 %v5016_v16  ;;  %3906 = vmatprep.mubr.msk.f32.mxu0 %vm540_vm0, %v1283_v44 }
 0x4ef   : > { %v1284_v48 = vmul.f32 %v4350_v8, %v5036_v22  ;;  %4084 = vmatprep.subr.bf16.mxu0 %v4083_v60  ;;  %v1807_v46 = vpop.permute.xlu0 %1806 }
 0x4f1   : > { %3907 = vmatmul.mubr.msk.f32.vlgmr.msra.gmra.mrb[12].mxu0 %vm540_vm0, %v1284_v48 }
 0x4f2   : > { %v4352_v39 = vpop.eup %4351  ;;  %4086 = vmatpush3.bf16.msra.mxu0 %v4083_v60 }
 0x4f3   : > { %v1286_v2 = vmul.f32 %v4352_v39, %v5040_v28  ;;  %4095 = vmatprep.subr.msk.bf16.mxu0 %vm4802_vm2, %v4093_v47  ;;  %v1900_v16 = vpop.permute.xlu0 %1899  ;;  %v4238_v28 = vpop.permute.xlu1 %4237 }
 0x4f4   : > { %v4240_v35 = vunpack.i.h.bf16 %v4238_v28  ;;  %v4239_v51 = vunpack.i.l.bf16 %v4238_v28 }
 0x4f5   : > { %3914 = vmatmul.mubr.msk.f32.vlgmr.msra.gmra.mrb[6].mxu1 %vm540_vm0, %v1286_v2 }
 0x4f6   : > { %4092 = vmatpush3.bf16.xpose.msk.msra.mxu1 %vm4802_vm2, %v5023_v52  ;;  %3927 = vmatprep.mubr.msk.f32.mxu1 %vm688_vm1, %v1805_v23  ;;  %v4354_v54 = vpop.eup %4353  ;;  %v4105_v57 = vpack.c.bf16 %v4240_v35, %v4239_v51 }
 0x4f7   : > { %4101 = vmatprep.subr.msk.bf16.mxu1 %vm4802_vm2, %v4099_v24  ;;  %v1995_v22 = vpop.permute.xlu0 %1994  ;;  %v1288_v55 = vmul.f32 %v4354_v54, %v5044_v17 }
 0x4fb   : > { %v2090_v62 = vpop.permute.xlu0 %2089 }
 0x4fd   : > { %3928 = vmatmul.mubr.msk.f32.vlgmr.msra.gmra.mrb[8].mxu1 %vm688_vm1, %v1807_v46 }
 0x4fe   : > { %4104 = vmatpush3.bf16.xpose.msk.msra.mxu1 %vm4802_vm2, %v4099_v24  ;;  %3941 = vmatprep.mubr.msk.f32.mxu1 %vm688_vm1, %v1995_v22 }
 0x503   : > { %v1269_v50 = vpop.xlane.xlu1 %1268 }
 0x504   : > { %4355 = vrcp.f32 %v1269_v50 }
 0x507   : > { %v1902_v15 = vpop.permute.xlu1 %1901 }
 0x50b   : > { %v1997_v52 = vpop.permute.xlu1 %1996 }
 0x50c   : > { %3942 = vmatmul.mubr.msk.f32.vlgmr.msra.gmra.mrb[10].mxu1 %vm688_vm1, %v1997_v52 }
 0x50e   : > { %v4356_v14 = vpop.eup %4355 }
 0x50f   : > { %v1287_v19 = vmul.f32 %v4356_v14, %v5061_v43  ;;  %v2092_v17 = vpop.permute.xlu1 %2091 }
 0x511   : > { %3920 = vmatprep.mubr.msk.f32.mxu0 %vm540_vm0, %v1287_v19 }
 0x512   : > { %3921 = vmatmul.mubr.msk.f32.vlgmr.msra.gmra.mrb[14].mxu0 %vm540_vm0, %v1288_v55 }
 0x513   : > { %4098 = vmatpush3.bf16.xpose.msk.msra.mxu0 %vm4802_vm2, %v4093_v47  ;;  %3934 = vmatprep.mubr.msk.f32.mxu0 %vm688_vm1, %v1900_v16 }
 0x514   : > { %4107 = vmatprep.subr.msk.bf16.mxu0 %vm4802_vm2, %v4105_v57 }
 0x51a   : > { %3935 = vmatmul.mubr.msk.f32.vlgmr.msra.gmra.mrb[16].mxu0 %vm688_vm1, %v1902_v15 }
 0x51b   : > { %4110 = vmatpush3.bf16.xpose.msk.msra.mxu0 %vm4802_vm2, %v4105_v57  ;;  %3948 = vmatprep.mubr.msk.f32.mxu0 %vm688_vm1, %v2090_v62 }
 0x522   : > { %3949 = vmatmul.mubr.msk.f32.vlgmr.msra.gmra.mrb[18].mxu0 %vm688_vm1, %v2092_v17 }
 0x5c0   : > { %v5129_v43 = vpop.f32.mrb[10].mxu0 }
 0x5c1   : > { %v5131_v27 = vpop.f32.mrb[11].mxu0 }
 0x5c4   : > { %v5133_v26 = vpop.f32.mrb[12].mxu0 }
 0x5c5   : > { %v5135_v59 = vpop.f32.mrb[13].mxu0 }
 0x5c8   : > { %v5137_v32 = vpop.f32.mrb[6].mxu1 }
 0x5c9   : > { %v5139_v23 = vpop.f32.mrb[7].mxu1 }
 0x5d0   : > { %v3929_v13 = vpop.f32.mrb[8].mxu1 }
 0x5d1   : > { %v1894_v20 = vadd.f32 %v3929_v13, %v3673_v33  ;;  %v1888_v61 = vpop.f32.mrb[9].mxu1 }
 0x5d2   : > { %v1889_v0 = vadd.f32 %v3672_v40, %v1888_v61 }
 0x5d3   : > { %v2183_v25 = vadd.f32 %v1894_v20, %v4856_v34 }
 0x5d4   : > { %v2182_v53 = vadd.f32 %v1889_v0, %v4861_v1 }
 0x5d5   : > { %v2193_v4 = vsel %vm540_vm0, %v2183_v25, -inf }
 0x5d6   : > { %2194 = vmax.xlane.f32.xlu1 %v2193_v4  ;;  %v2190_v31 = vsel %vm540_vm0, %v2182_v53, -inf }
 0x5d7   : > { %2191 = vmax.xlane.f32.xlu0 %v2190_v31 }
 0x5df   : > { %v3943_v5 = vpop.f32.mrb[10].mxu1 }
 0x5e0   : > { %v2078_v7 = vpop.f32.mrb[11].mxu1  ;;  %v2084_v36 = vadd.f32 %v3943_v5, %v3673_v33 }
 0x5e1   : > { %v2079_v10 = vadd.f32 %v3672_v40, %v2078_v7 }
 0x5e2   : > { %v2187_v47 = vadd.f32 %v2084_v36, %v4882_v18 }
 0x5e3   : > { %v2186_v63 = vadd.f32 %v2079_v10, %v4890_v30 }
 0x5e5   : > { %v5152_v11 = vpop.f32.mrb[14].mxu0  ;;  %v2202_v58 = vsel %vm540_vm0, %v2186_v63, -inf }
 0x5e6   : > { %2203 = vmax.xlane.f32.xlu1 %v2202_v58  ;;  %v5155_v21 = vpop.f32.mrb[15].mxu0 }
 0x5ed   : > { %v3936_v34 = vpop.f32.mrb[16].mxu0 }
 0x5ee   : > { %v1983_v1 = vpop.f32.mrb[17].mxu0  ;;  %v1989_v49 = vadd.f32 %v3936_v34, %v3673_v33 }
 0x5ef   : > { %v1984_v44 = vadd.f32 %v3672_v40, %v1983_v1 }
 0x5f0   : > { %v2185_v8 = vadd.f32 %v1989_v49, %v4876_v9  ;;  %v2205_v9 = vsel %vm540_vm0, %v2187_v47, -inf }
 0x5f1   : > { %v2184_v60 = vadd.f32 %v1984_v44, %v4903_v42 }
 0x5f2   : > { %v2199_v46 = vsel %vm540_vm0, %v2185_v8, -inf }
 0x5f3   : > { %v2196_v38 = vsel %vm540_vm0, %v2184_v60, -inf }
 0x5f4   : > { %2197 = vmax.xlane.f32.xlu0 %v2196_v38 }
 0x5f5   : > { %v3950_v30 = vpop.f32.mrb[18].mxu0 }
 0x5f6   : > { %v2173_v48 = vpop.f32.mrb[19].mxu0  ;;  %v2179_v29 = vadd.f32 %v3950_v30, %v3673_v33 }
 0x5f7   : > { %v2174_v41 = vadd.f32 %v3672_v40, %v2173_v48 }
 0x5f8   : > { %2200 = vmax.xlane.f32.xlu0 %v2199_v46  ;;  %v2189_v42 = vadd.f32 %v2179_v29, %v4920_v56 }
 0x5f9   : > { %v5163_v39 = vadd.f32 %v2174_v41, %v4963_v45 }
 0x5fa   : > { %v2211_v24 = vsel %vm540_vm0, %v2189_v42, -inf }
 0x5fb   : > { %v2208_v2 = vsel %vm540_vm0, %v5163_v39, -inf }
 0x5fc   : > { %2209 = vmax.xlane.f32.xlu1 %v2208_v2  ;;  %2206 = vmax.xlane.f32.xlu0 %v2205_v9 }
 0x600   : > { %2212 = vmax.xlane.f32.xlu0 %v2211_v24 }
 0x60d   : > { %4242 = vrot.lane.b32.xlu1 %v4935_v3, %s4497_s21 }
 0x663   : > { %v2195_v18 = vpop.xlane.xlu1 %2194 }
 0x664   : > { %v2215_v16 = vsub.f32 %v2183_v25, %v2195_v18  ;;  %v2192_v45 = vpop.xlane.xlu0 %2191 }
 0x665   : > { %v2214_v22 = vsub.f32 %v2182_v53, %v2192_v45 }
 0x666   : > { %v2224_v28 = vmul.f32 1.442695, %v2215_v16 }
 0x667   : > { %v2222_v56 = vmul.f32 1.442695, %v2214_v22 }
 0x668   : > { %4357 = vpow2.f32 %v2224_v28 }
 0x669   : > { %4359 = vpow2.f32 %v2222_v56 }
 0x672   : > { %v5172_v50 = vpop.eup %4357 }
 0x673   : > { %v4360_v15 = vpop.eup %4359  ;;  %v2204_v52 = vpop.xlane.xlu1 %2203  ;;  %v2241_v54 = vsel %vm540_vm0, %v5172_v50, 0.0 }
 0x674   : > { %v2218_v14 = vsub.f32 %v2186_v63, %v2204_v52  ;;  %2242 = vadd.xlane.f32.xlu0 %v2241_v54  ;;  %v2238_v35 = vsel %vm540_vm0, %v4360_v15, 0.0 }
 0x675   : > { %2239 = vadd.xlane.f32.xlu1 %v2238_v35 }
 0x676   : > { %v2230_v3 = vmul.f32 1.442695, %v2218_v14 }
 0x678   : > { %4361 = vpow2.f32 %v2230_v3 }
 0x681   : > { %v2198_v51 = vpop.xlane.xlu0 %2197 }
 0x682   : > { %v4362_v19 = vpop.eup %4361  ;;  %v2216_v55 = vsub.f32 %v2184_v60, %v2198_v51 }
 0x683   : > { %v2250_v57 = vsel %vm540_vm0, %v4362_v19, 0.0 }
 0x684   : > { %v2226_v62 = vmul.f32 1.442695, %v2216_v55  ;;  %2251 = vadd.xlane.f32.xlu1 %v2250_v57 }
 0x685   : > { %v2201_v17 = vpop.xlane.xlu0 %2200 }
 0x686   : > { %4363 = vpow2.f32 %v2226_v62  ;;  %v2217_v33 = vsub.f32 %v2185_v8, %v2201_v17 }
 0x688   : > { %v2228_v0 = vmul.f32 1.442695, %v2217_v33 }
 0x689   : > { %v2210_v40 = vpop.xlane.xlu1 %2209  ;;  %v2207_v13 = vpop.xlane.xlu0 %2206 }
 0x68a   : > { %v2219_v20 = vsub.f32 %v2187_v47, %v2207_v13  ;;  %v2220_v38 = vsub.f32 %v5163_v39, %v2210_v40 }
 0x68c   : > { %v2232_v61 = vmul.f32 1.442695, %v2219_v20  ;;  %v2234_v8 = vmul.f32 1.442695, %v2220_v38 }
 0x68d   : > { %v4243_v25 = vpop.permute.xlu1 %4242  ;;  %v2213_v53 = vpop.xlane.xlu0 %2212 }
 0x68e   : > { %v4245_v4 = vunpack.i.h.bf16 %v4243_v25  ;;  %v4244_v31 = vunpack.i.l.bf16 %v4243_v25  ;;  %v2221_v5 = vsub.f32 %v2189_v42, %v2213_v53  ;;  %4365 = vpow2.f32 %v2232_v61  ;;  %v670_v25 = vld [vmem:[%s5604_s7] sm:$0xff] }
 0x68f   : > { %4367 = vpow2.f32 %v2228_v0  ;;  %v671_v0 = vld [vmem:[%s5604_s7 + $0x8] sm:$0xff] }
 0x690   : > { %v4364_v7 = vpop.eup %4363  ;;  %v4111_v10 = vpack.c.bf16 %v4245_v4, %v4244_v31  ;;  %v2236_v63 = vmul.f32 1.442695, %v2221_v5 }
 0x691   : > { %v2244_v58 = vsel %vm540_vm0, %v4364_v7, 0.0 }
 0x692   : > { %4112 = vmatprep.subr.bf16.mxu1 %v4111_v10  ;;  %2245 = vadd.xlane.f32.xlu1 %v2244_v58  ;;  %4369 = vpow2.f32 %v2236_v63 }
 0x693   : > { %4114 = vmatpush3.bf16.msra.mxu1 %v4111_v10  ;;  %4371 = vpow2.f32 %v2234_v8 }
 0x698   : > { %v4366_v34 = vpop.eup %4365 }
 0x699   : > { %v2253_v1 = vsel %vm540_vm0, %v4366_v34, 0.0  ;;  %v4368_v49 = vpop.eup %4367 }
 0x69a   : > { %2254 = vadd.xlane.f32.xlu0 %v2253_v1  ;;  %v2247_v44 = vsel %vm540_vm0, %v4368_v49, 0.0 }
 0x69c   : > { %v5181_v60 = vpop.eup %4369 }
 0x69d   : > { %v2259_v36 = vsel %vm540_vm0, %v5181_v60, 0.0  ;;  %v4372_v30 = vpop.eup %4371 }
 0x69e   : > { %2248 = vadd.xlane.f32.xlu0 %v2247_v44  ;;  %v2256_v48 = vsel %vm540_vm0, %v4372_v30, 0.0 }
 0x6a2   : > { %2260 = vadd.xlane.f32.xlu0 %v2259_v36 }
 0x6a3   : > { %4252 = vrot.lane.b32.xlu1 %v4941_v6, %s4497_s21 }
 0x6b8   : > { %4247 = vrot.lane.b32.xlu0 %v4954_v37, %s4497_s21 }
 0x6c7   : > { %2257 = vadd.xlane.f32.xlu1 %v2256_v48 }
 0x6d8   : > { %4257 = vrot.lane.b32.xlu1 %v4946_v12, %s4497_s21 }
 0x701   : > { %v2243_v47 = vpop.xlane.xlu0 %2242 }
 0x702   : > { %4373 = vrcp.f32 %v2243_v47  ;;  %v2240_v29 = vpop.xlane.xlu1 %2239 }
 0x703   : > { %4375 = vrcp.f32 %v2240_v29 }
 0x70c   : > { %v4374_v41 = vpop.eup %4373 }
 0x70d   : > { %v4376_v6 = vpop.eup %4375  ;;  %v2271_v39 = vmul.f32 %v4374_v41, %v5172_v50 }
 0x70e   : > { %v2270_v46 = vmul.f32 %v4376_v6, %v4360_v15 }
 0x710   : > { %3955 = vmatprep.mubr.msk.f32.mxu1 %vm540_vm0, %v2270_v46 }
 0x711   : > { %v2252_v42 = vpop.xlane.xlu1 %2251  ;;  %3956 = vmatmul.mubr.msk.f32.vlgmr.msra.gmra.mrb[12].mxu1 %vm540_vm0, %v2271_v39 }
 0x712   : > { %4377 = vrcp.f32 %v2252_v42 }
 0x71c   : > { %v4378_v37 = vpop.eup %4377 }
 0x71d   : > { %v2274_v2 = vmul.f32 %v4378_v37, %v4362_v19 }
 0x71f   : > { %v2246_v9 = vpop.xlane.xlu1 %2245  ;;  %3969 = vmatprep.mubr.msk.f32.mxu1 %vm540_vm0, %v2274_v2 }
 0x720   : > { %4379 = vrcp.f32 %v2246_v9 }
 0x723   : > { %v4253_v12 = vpop.permute.xlu1 %4252 }
 0x724   : > { %v4255_v24 = vunpack.i.h.bf16 %v4253_v12  ;;  %v4254_v18 = vunpack.i.l.bf16 %v4253_v12 }
 0x726   : > { %v4119_v16 = vpack.c.bf16 %v4255_v24, %v4254_v18 }
 0x727   : > { %v2255_v45 = vpop.xlane.xlu0 %2254 }
 0x728   : > { %4120 = vmatprep.subr.bf16.mxu1 %v4119_v16  ;;  %4381 = vrcp.f32 %v2255_v45 }
 0x729   : > { %4122 = vmatpush3.bf16.msra.mxu1 %v4119_v16 }
 0x72a   : > { %v4380_v22 = vpop.eup %4379  ;;  %3979 = vmatprep.subr.mxu1 %v671_v0 }
 0x72b   : > { %v2272_v28 = vmul.f32 %v4380_v22, %v4364_v7  ;;  %v2249_v56 = vpop.xlane.xlu0 %2248 }
 0x72c   : > { %4383 = vrcp.f32 %v2249_v56 }
 0x72d   : > { %3962 = vmatprep.mubr.msk.f32.mxu0 %vm540_vm0, %v2272_v28 }
 0x72f   : > { %v2261_v50 = vpop.xlane.xlu0 %2260 }
 0x730   : > { %4385 = vrcp.f32 %v2261_v50 }
 0x732   : > { %v4382_v15 = vpop.eup %4381 }
 0x733   : > { %v2275_v52 = vmul.f32 %v4382_v15, %v4366_v34  ;;  %v4248_v54 = vpop.permute.xlu0 %4247 }
 0x734   : > { %v4250_v14 = vunpack.i.h.bf16 %v4248_v54  ;;  %v4249_v35 = vunpack.i.l.bf16 %v4248_v54 }
 0x735   : > { %3970 = vmatmul.mubr.msk.f32.vlgmr.msra.gmra.mrb[14].mxu1 %vm540_vm0, %v2275_v52 }
 0x736   : > { %v4115_v3 = vpack.c.bf16 %v4250_v14, %v4249_v35  ;;  %v4384_v51 = vpop.eup %4383  ;;  %3980 = vmatpush3.msra.mxu1 %v671_v0  ;;  %v3061_v35 = vld [vmem:[%s5607_s10] sm:$0xff] }
 0x737   : > { %v2273_v19 = vmul.f32 %v4384_v51, %v4368_v49  ;;  %3993 = vmatprep.subr.mxu1 %v670_v25 }
 0x738   : > { %4116 = vmatprep.subr.bf16.mxu0 %v4115_v3 }
 0x739   : > { %4118 = vmatpush3.bf16.msra.mxu0 %v4115_v3  ;;  %v3062_v3 = vld [vmem:[%s5607_s10 + $0x8] sm:$0xff] }
 0x73a   : > { %v4386_v40 = vpop.eup %4385  ;;  %v4127_v51 = vpack.c.bf16 %v3062_v3, %v3061_v35 }
 0x73b   : > { %v2277_v61 = vmul.f32 %v4386_v40, %v5181_v60 }
 0x73c   : > { %3963 = vmatmul.mubr.msk.f32.vlgmr.msra.gmra.mrb[20].mxu0 %vm540_vm0, %v2273_v19 }
 0x754   : > { %v2258_v55 = vpop.xlane.xlu1 %2257 }
 0x755   : > { %4387 = vrcp.f32 %v2258_v55 }
 0x758   : > { %v4258_v57 = vpop.permute.xlu1 %4257 }
 0x759   : > { %v4260_v62 = vunpack.i.h.bf16 %v4258_v57  ;;  %v4259_v17 = vunpack.i.l.bf16 %v4258_v57 }
 0x75b   : > { %v4123_v33 = vpack.c.bf16 %v4260_v62, %v4259_v17 }
 0x75d   : > { %4124 = vmatprep.subr.bf16.mxu0 %v4123_v33 }
 0x75e   : > { %4126 = vmatpush3.bf16.msra.mxu0 %v4123_v33 }
 0x75f   : > { %v4388_v13 = vpop.eup %4387  ;;  %4128 = vmatprep.subr.bf16.mxu0 %v4127_v51 }
 0x760   : > { %v2276_v20 = vmul.f32 %v4388_v13, %v4372_v30 }
 0x762   : > { %3976 = vmatprep.mubr.msk.f32.mxu0 %vm540_vm0, %v2276_v20 }
 0x763   : > { %3977 = vmatmul.mubr.msk.f32.vlgmr.msra.gmra.mrb[22].mxu0 %vm540_vm0, %v2277_v61 }
 0x764   : > { %4130 = vmatpush3.bf16.msra.mxu0 %v4127_v51 }
 0x7e4   : > { %v3957_v53 = vpop.f32.mrb[12].mxu1 }
 0x7e5   : > { %v2356_v4 = vpop.f32.mrb[13].mxu1 }
 0x7e6   : > { %3981 = vmatprep.mubr.msk.f32.mxu1 %vm688_vm1, %v2356_v4  ;;  %v5305_v4 = vstv %s522_s22 }
 0x7e7   : > { %3982 = vmatmul.mubr.msk.f32.vlgmr.msra.gmra.mrb[16].mxu1 %vm688_vm1, %v3957_v53 }
 0x7e8   : > { %3994 = vmatpush3.msra.mxu1 %v670_v25 }
 0x808   : > { %v3971_v31 = vpop.f32.mrb[14].mxu1 }
 0x809   : > { %v2530_v5 = vpop.f32.mrb[15].mxu1 }
 0x80f   : > { %v3964_v7 = vpop.f32.mrb[20].mxu0 }
 0x810   : > { %v2443_v10 = vpop.f32.mrb[21].mxu0 }
 0x811   : > { %3984 = vmatprep.mubr.msk.f32.mxu1 %vm688_vm1, %v2443_v10 }
 0x812   : > { %3985 = vmatmul.mubr.msk.f32.gmra.mrb[18].mxu1 %vm688_vm1, %v3964_v7 }
 0x813   : > { %3987 = vmatprep.mubr.msk.f32.mxu1 %vm688_vm1, %v2530_v5 }
 0x816   : > { %3988 = vmatmul.mubr.msk.f32.gmra.mrb[20].mxu1 %vm688_vm1, %v3971_v31  ;;  %v3029_v31 = vlaneseq }
 0x836   : > { %v3978_v63 = vpop.f32.mrb[22].mxu0 }
 0x837   : > { %v2617_v58 = vpop.f32.mrb[23].mxu0 }
 0x838   : > { %3990 = vmatprep.mubr.msk.f32.mxu1 %vm688_vm1, %v2617_v58  ;;  %v2899_v58 = vld [vmem:[%s5606_s9] sm:$0x1] }
 0x839   : > { %3991 = vmatmul.mubr.msk.f32.gmra.mrb[22].mxu1 %vm688_vm1, %v3978_v63 }
 0x83a   : > { %3995 = vmatprep.mubr.msk.f32.mxu1 %vm688_vm1, %v5131_v27 }
 0x83d   : > { %3996 = vmatmul.mubr.msk.f32.vlgmr.msra.gmra.mrb[16].mxu1 %vm688_vm1, %v5129_v43  ;;  %v3714_v43 = vld [vmem:[%s5605_s8] ss:$0 sm:$0xff] }
 0x83e   : > { %3998 = vmatprep.mubr.msk.f32.mxu1 %vm688_vm1, %v5135_v59 }
 0x841   : > { %3999 = vmatmul.mubr.msk.f32.gmra.mrb[18].mxu1 %vm688_vm1, %v5133_v26 }
 0x842   : > { %4001 = vmatprep.mubr.msk.f32.mxu1 %vm688_vm1, %v5139_v23 }
 0x845   : > { %4002 = vmatmul.mubr.msk.f32.gmra.mrb[20].mxu1 %vm688_vm1, %v5137_v32 }
 0x846   : > { %4004 = vmatprep.mubr.msk.f32.mxu1 %vm688_vm1, %v5155_v21 }
 0x849   : > { %4005 = vmatmul.mubr.msk.f32.gmra.mrb[22].mxu1 %vm688_vm1, %v5152_v11 }
 0x910   : > { %v3997_v27 = vpop.f32.mrb[16].mxu1 }
 0x911   : > { %v5236_v59 = vadd.f32 %v3997_v27, %v3714_v43  ;;  %v2845_v26 = vpop.f32.mrb[17].mxu1 }
 0x912   : > { %v5238_v34 = vadd.f32 %v3714_v43, %v2845_v26 }
 0x913   : > { %v2911_v23 = vsel %vm540_vm0, %v5236_v59, 0.0  ;;  %v2942_v11 = vmul.f32 %v5236_v59, %v5236_v59 }
 0x914   : > { %2912 = vadd.xlane.f32.xlu1 %v2911_v23  ;;  %v4000_v32 = vpop.f32.mrb[18].mxu1  ;;  %v2908_v21 = vsel %vm540_vm0, %v5238_v34, 0.0  ;;  %v2941_v38 = vmul.f32 %v5238_v34, %v5238_v34 }
 0x915   : > { %2909 = vadd.xlane.f32.xlu0 %v2908_v21  ;;  %v2855_v1 = vpop.f32.mrb[19].mxu1  ;;  %v2952_v60 = vsel %vm540_vm0, %v2942_v11, 0.0  ;;  %v5255_v48 = vadd.f32 %v4000_v32, %v3714_v43  ;;  %v2901_v32 = vmul.f32 %v5305_v4, %v2899_v58  ;;  %v2902_v21 = vld [vmem:[%s5606_s9 + $0x1] sm:$0x1]  ;;  %v3030_v11 = vshrl.u32 %v3029_v31, 7 }
 0x916   : > { %v5246_v49 = vadd.f32 %v3714_v43, %v2855_v1  ;;  %v2949_v41 = vsel %vm540_vm0, %v2941_v38, 0.0 }
 0x917   : > { %v2917_v39 = vsel %vm540_vm0, %v5255_v48, 0.0  ;;  %v2944_v37 = vmul.f32 %v5255_v48, %v5255_v48 }
 0x918   : > { %v4003_v44 = vpop.f32.mrb[20].mxu1  ;;  %v2914_v36 = vsel %vm540_vm0, %v5246_v49, 0.0  ;;  %v2943_v8 = vmul.f32 %v5246_v49, %v5246_v49 }
 0x919   : > { %2953 = vadd.xlane.f32.xlu0 %v2952_v60  ;;  %2915 = vadd.xlane.f32.xlu1 %v2914_v36  ;;  %v2865_v30 = vpop.f32.mrb[21].mxu1  ;;  %v5269_v9 = vadd.f32 %v4003_v44, %v3714_v43  ;;  %v2958_v24 = vsel %vm540_vm0, %v2944_v37, 0.0 }
 0x91a   : > { %v5257_v47 = vadd.f32 %v3714_v43, %v2865_v30  ;;  %v2955_v6 = vsel %vm540_vm0, %v2943_v8, 0.0  ;;  %v2903_v30 = vadd.f32 %v2902_v21, %v2901_v32 }
 0x91b   : > { %v2923_v16 = vsel %vm540_vm0, %v5269_v9, 0.0  ;;  %v2946_v22 = vmul.f32 %v5269_v9, %v5269_v9 }
 0x91c   : > { %v4006_v29 = vpop.f32.mrb[22].mxu1  ;;  %v2920_v42 = vsel %vm540_vm0, %v5257_v47, 0.0  ;;  %v2945_v2 = vmul.f32 %v5257_v47, %v5257_v47 }
 0x91d   : > { %2950 = vadd.xlane.f32.xlu0 %v2949_v41  ;;  %2956 = vadd.xlane.f32.xlu1 %v2955_v6  ;;  %v2875_v46 = vpop.f32.mrb[23].mxu1  ;;  %v5283_v56 = vadd.f32 %v4006_v29, %v3714_v43  ;;  %v2964_v50 = vsel %vm540_vm0, %v2946_v22, 0.0  ;;  %v2904_v29 = vld [vmem:[%s5606_s9 + $0x2] sm:$0x1]  ;;  %v5323_v41 = vsub.s32 0, %v3030_v11 }
 0x91e   : > { %v5271_v12 = vadd.f32 %v3714_v43, %v2875_v46  ;;  %v2961_v18 = vsel %vm540_vm0, %v2945_v2, 0.0  ;;  %v2906_v22 = vld [vmem:[%s5606_s9 + $0x3] sm:$0x1] }
 0x91f   : > { %v2929_v52 = vsel %vm540_vm0, %v5283_v56, 0.0  ;;  %v2948_v54 = vmul.f32 %v5283_v56, %v5283_v56 }
 0x920   : > { %v2926_v45 = vsel %vm540_vm0, %v5271_v12, 0.0  ;;  %v2947_v28 = vmul.f32 %v5271_v12, %v5271_v12 }
 0x921   : > { %2918 = vadd.xlane.f32.xlu0 %v2917_v39  ;;  %2921 = vadd.xlane.f32.xlu1 %v2920_v42  ;;  %v2970_v14 = vsel %vm540_vm0, %v2948_v54, 0.0 }
 0x922   : > { %v2967_v15 = vsel %vm540_vm0, %v2947_v28, 0.0  ;;  %v5335_v28 = vrot.slane %v2903_v30, %v5323_v41 }
 0x925   : > { %2959 = vadd.xlane.f32.xlu0 %v2958_v24  ;;  %2962 = vadd.xlane.f32.xlu1 %v2961_v18  ;;  %v2905_v24 = vmul.f32 %v2904_v29, %v5305_v4 }
 0x927   : > { %v2907_v3 = vadd.f32 %v2906_v22, %v2905_v24  ;;  %v4441_v24 = vld [vmem:[%s4639_s27 + $0x20] sm:$0xff] }
 0x929   : > { %2924 = vadd.xlane.f32.xlu0 %v2923_v16  ;;  %2927 = vadd.xlane.f32.xlu1 %v2926_v45  ;;  %v5352_v31 = vrot.slane %v2907_v3, %v5323_v41 }
 0x92d   : > { %2965 = vadd.xlane.f32.xlu0 %v2964_v50  ;;  %2968 = vadd.xlane.f32.xlu1 %v2967_v15 }
 0x931   : > { %2930 = vadd.xlane.f32.xlu0 %v2929_v52 }
 0x935   : > { %2971 = vadd.xlane.f32.xlu0 %v2970_v14 }
 0x9a1   : > { %v2913_v19 = vpop.xlane.xlu1 %2912 }
 0x9a2   : > { %v2910_v55 = vpop.xlane.xlu0 %2909  ;;  %v2934_v57 = vmul.f32 0.0625, %v2913_v19 }
 0x9a3   : > { %v5299_v62 = vmul.f32 0.0625, %v2910_v55 }
 0x9a4   : > { %v2982_v40 = vmul.f32 %v2934_v57, %v2934_v57  ;;  %v2998_v18 = vsub.f32 %v5236_v59, %v2934_v57 }
 0x9a5   : > { %v2981_v0 = vmul.f32 %v5299_v62, %v5299_v62  ;;  %v2997_v59 = vsub.f32 %v5238_v34, %v5299_v62 }
 0x9a6   : > { %v2954_v17 = vpop.xlane.xlu0 %2953  ;;  %v2916_v33 = vpop.xlane.xlu1 %2915 }
 0x9a7   : > { %v2974_v13 = vmul.f32 0.0625, %v2954_v17  ;;  %v5301_v20 = vmul.f32 0.0625, %v2916_v33 }
 0x9a9   : > { %v2990_v61 = vsub.f32 %v2974_v13, %v2982_v40  ;;  %v2983_v7 = vmul.f32 %v5301_v20, %v5301_v20  ;;  %v2999_v51 = vsub.f32 %v5246_v49, %v5301_v20 }
 0x9aa   : > { %v2951_v25 = vpop.xlane.xlu0 %2950  ;;  %v2957_v53 = vpop.xlane.xlu1 %2956 }
 0x9ab   : > { %v3006_v5 = vadd.f32 1e-05, %v2990_v61  ;;  %v2973_v10 = vmul.f32 0.0625, %v2951_v25  ;;  %v2975_v63 = vmul.f32 0.0625, %v2957_v53 }
 0x9ad   : > { %4389 = vrsqrt.f32 %v3006_v5  ;;  %v2989_v43 = vsub.f32 %v2973_v10, %v2981_v0  ;;  %v2991_v27 = vsub.f32 %v2975_v63, %v2983_v7  ;;  %v4437_v5 = vld [vmem:[%s4639_s27 + $0x8] sm:$0xff] }
 0x9ae   : > { %v2919_v26 = vpop.xlane.xlu0 %2918  ;;  %v2922_v23 = vpop.xlane.xlu1 %2921 }
 0x9af   : > { %v3005_v1 = vadd.f32 1e-05, %v2989_v43  ;;  %v3007_v44 = vadd.f32 1e-05, %v2991_v27  ;;  %v5316_v60 = vmul.f32 0.0625, %v2919_v26  ;;  %v5318_v36 = vmul.f32 0.0625, %v2922_v23 }
 0x9b0   : > { %v4438_v27 = vld [vmem:[%s4639_s27] sm:$0xff]  ;;  %v4439_v23 = vld [vmem:[%s4639_s27 + $0x10] sm:$0xff] }
 0x9b1   : > { %4391 = vrsqrt.f32 %v3005_v1  ;;  %v2984_v6 = vmul.f32 %v5316_v60, %v5316_v60  ;;  %v2985_v46 = vmul.f32 %v5318_v36, %v5318_v36  ;;  %v3000_v21 = vsub.f32 %v5255_v48, %v5316_v60 }
 0x9b2   : > { %4393 = vrsqrt.f32 %v3007_v44  ;;  %v2960_v38 = vpop.xlane.xlu0 %2959  ;;  %v2963_v8 = vpop.xlane.xlu1 %2962 }
 0x9b3   : > { %v2976_v39 = vmul.f32 0.0625, %v2960_v38  ;;  %v2977_v42 = vmul.f32 0.0625, %v2963_v8  ;;  %v3001_v38 = vsub.f32 %v5257_v47, %v5318_v36 }
 0x9b5   : > { %v2992_v37 = vsub.f32 %v2976_v39, %v2984_v6  ;;  %v2993_v2 = vsub.f32 %v2977_v42, %v2985_v46 }
 0x9b6   : > { %v2925_v16 = vpop.xlane.xlu0 %2924  ;;  %v2928_v45 = vpop.xlane.xlu1 %2927 }
 0x9b7   : > { %v4390_v50 = vpop.eup %4389  ;;  %v3008_v15 = vadd.f32 1e-05, %v2992_v37  ;;  %v3009_v52 = vadd.f32 1e-05, %v2993_v2  ;;  %v5337_v54 = vmul.f32 0.0625, %v2925_v16  ;;  %v5339_v14 = vmul.f32 0.0625, %v2928_v45 }
 0x9b8   : > { %v3022_v35 = vmul.f32 %v4390_v50, %v2998_v18  ;;  %v4440_v37 = vld [vmem:[%s4639_s27 + $0x18] sm:$0xff] }
 0x9b9   : > { %4395 = vrsqrt.f32 %v3008_v15  ;;  %v2986_v33 = vmul.f32 %v5337_v54, %v5337_v54  ;;  %v2987_v40 = vmul.f32 %v5339_v14, %v5339_v14  ;;  %v3002_v16 = vsub.f32 %v5269_v9, %v5337_v54 }
 0x9ba   : > { %4397 = vrsqrt.f32 %v3009_v52  ;;  %v2966_v19 = vpop.xlane.xlu0 %2965  ;;  %v2969_v55 = vpop.xlane.xlu1 %2968  ;;  %v3034_v57 = vmul.f32 %v5335_v28, %v3022_v35  ;;  %v3003_v50 = vsub.f32 %v5271_v12, %v5339_v14  ;;  %v4443_v12 = vld [vmem:[%s4639_s27 + $0x30] sm:$0xff] }
 0x9bb   : > { %v4392_v17 = vpop.eup %4391  ;;  %v2978_v13 = vmul.f32 0.0625, %v2966_v19  ;;  %v2979_v61 = vmul.f32 0.0625, %v2969_v55 }
 0x9bc   : > { %v4394_v34 = vpop.eup %4393  ;;  %v3021_v62 = vmul.f32 %v4392_v17, %v2997_v59  ;;  %v3042_v7 = vadd.f32 %v4437_v5, %v3034_v57  ;;  %v4442_v59 = vld [vmem:[%s4639_s27 + $0x28] sm:$0xff] }
 0x9bd   : > { %v2994_v49 = vsub.f32 %v2978_v13, %v2986_v33  ;;  %v2995_v20 = vsub.f32 %v2979_v61, %v2987_v40  ;;  %v3023_v0 = vmul.f32 %v4394_v34, %v2999_v51  ;;  %v4444_v13 = vld [vmem:[%s4639_s27 + $0x38] sm:$0xff]  ;;  %v3239_v34 = vld [vmem:[%s5609_s12] sm:$0xff] }
 0x9be   : > { %v2931_v25 = vpop.xlane.xlu0 %2930  ;;  %v3033_v53 = vmul.f32 %v5335_v28, %v3021_v62  ;;  %v5366_v29 = vadd.f32 %v5352_v31, %v3042_v7  ;;  %v3240_v62 = vld [vmem:[%s5609_s12 + $0x8] sm:$0xff] }
 0x9bf   : > { %v3010_v10 = vadd.f32 1e-05, %v2994_v49  ;;  %v3011_v63 = vadd.f32 1e-05, %v2995_v20  ;;  %v2940_v58 = vmul.f32 0.0625, %v2931_v25  ;;  %v3035_v43 = vmul.f32 %v5335_v28, %v3023_v0  ;;  %v3242_v20 = vld [vmem:[%s5609_s12 + $0x18] sm:$0xff] }
 0x9c0   : > { %v3041_v26 = vadd.f32 %v4438_v27, %v3033_v53  ;;  %v4131_v49 = vpack.c.bf16 %v3240_v62, %v3239_v34  ;;  %v3715_v25 = vld [vmem:[%s5608_s11] ss:$0 sm:$0xff] }
 0x9c1   : > { %4399 = vrsqrt.f32 %v3010_v10  ;;  %v3043_v32 = vadd.f32 %v4439_v23, %v3035_v43  ;;  %v2988_v8 = vmul.f32 %v2940_v58, %v2940_v58  ;;  %v3004_v19 = vsub.f32 %v5283_v56, %v2940_v58 }
 0x9c2   : > { %4401 = vrsqrt.f32 %v3011_v63  ;;  %v2972_v11 = vpop.xlane.xlu0 %2971  ;;  %v5361_v1 = vadd.f32 %v5352_v31, %v3041_v26  ;;  %4132 = vmatprep.subr.bf16.mxu0 %v4131_v49 }
 0x9c3   : > { %v4396_v44 = vpop.eup %4395  ;;  %v2980_v30 = vmul.f32 0.0625, %v2972_v11  ;;  %v5371_v48 = vadd.f32 %v5352_v31, %v3043_v32 }
 0x9c4   : > { %v4398_v6 = vpop.eup %4397  ;;  %4011 = vmatprep.mubr.msk.f32.mxu0 %vm540_vm0, %v5361_v1  ;;  %v3024_v60 = vmul.f32 %v4396_v44, %v3000_v21 }
 0x9c5   : > { %v2996_v46 = vsub.f32 %v2980_v30, %v2988_v8  ;;  %4012 = vmatmul.mubr.msk.f32.vlgmr.msra.gmra.mrb[24].mxu0 %vm540_vm0, %v5366_v29  ;;  %v3025_v39 = vmul.f32 %v4398_v6, %v3001_v38 }
 0x9c6   : > { %4014 = vmatprep.mubr.msk.f32.mxu0 %vm540_vm0, %v5371_v48  ;;  %v3036_v47 = vmul.f32 %v5335_v28, %v3024_v60  ;;  %4134 = vmatpush3.bf16.msra.mxu0 %v4131_v49 }
 0x9c7   : > { %v3012_v36 = vadd.f32 1e-05, %v2996_v46  ;;  %v3037_v42 = vmul.f32 %v5335_v28, %v3025_v39 }
 0x9c8   : > { %v3044_v2 = vadd.f32 %v4440_v37, %v3036_v47 }
 0x9c9   : > { %4403 = vrsqrt.f32 %v3012_v36  ;;  %v3045_v18 = vadd.f32 %v4441_v24, %v3037_v42 }
 0x9ca   : > { %v5384_v45 = vadd.f32 %v5352_v31, %v3044_v2 }
 0x9cb   : > { %v4400_v22 = vpop.eup %4399  ;;  %v5389_v15 = vadd.f32 %v5352_v31, %v3045_v18 }
 0x9cc   : > { %v4402_v52 = vpop.eup %4401  ;;  %4015 = vmatmul.mubr.msk.f32.gmra.mrb[26].mxu0 %vm540_vm0, %v5384_v45  ;;  %v3026_v35 = vmul.f32 %v4400_v22, %v3002_v16 }
 0x9cd   : > { %4017 = vmatprep.mubr.msk.f32.mxu0 %vm540_vm0, %v5389_v15  ;;  %v3027_v9 = vmul.f32 %v4402_v52, %v3003_v50 }
 0x9ce   : > { %v3038_v54 = vmul.f32 %v5335_v28, %v3026_v35 }
 0x9cf   : > { %v3039_v3 = vmul.f32 %v5335_v28, %v3027_v9 }
 0x9d0   : > { %v3046_v51 = vadd.f32 %v4442_v59, %v3038_v54 }
 0x9d1   : > { %v3047_v14 = vadd.f32 %v4443_v12, %v3039_v3 }
 0x9d2   : > { %v5401_v55 = vadd.f32 %v5352_v31, %v3046_v51 }
 0x9d3   : > { %v4404_v57 = vpop.eup %4403  ;;  %v5404_v17 = vadd.f32 %v5352_v31, %v3047_v14 }
 0x9d4   : > { %4018 = vmatmul.mubr.msk.f32.gmra.mrb[28].mxu0 %vm540_vm0, %v5401_v55  ;;  %v3028_v33 = vmul.f32 %v4404_v57, %v3004_v19 }
 0x9d5   : > { %4020 = vmatprep.mubr.msk.f32.mxu0 %vm540_vm0, %v5404_v17 }
 0x9d6   : > { %v3040_v40 = vmul.f32 %v5335_v28, %v3028_v33  ;;  %v3241_v28 = vld [vmem:[%s5609_s12 + $0x10] sm:$0xff] }
 0x9d7   : > { %v4135_v0 = vpack.c.bf16 %v3242_v20, %v3241_v28 }
 0x9d8   : > { %v3048_v61 = vadd.f32 %v4444_v13, %v3040_v40 }
 0x9d9   : > { %4136 = vmatprep.subr.bf16.mxu0 %v4135_v0 }
 0x9da   : > { %v5413_v56 = vadd.f32 %v5352_v31, %v3048_v61  ;;  %4138 = vmatpush3.bf16.msra.mxu0 %v4135_v0 }
 0x9dc   : > { %4021 = vmatmul.mubr.msk.f32.gmra.mrb[30].mxu0 %vm540_vm0, %v5413_v56 }
 0xa98   : > { %v4013_v53 = vpop.f32.mrb[24].mxu0 }
 0xa99   : > { %v3166_v31 = vadd.f32 %v4013_v53, %v3715_v25  ;;  %v3160_v5 = vpop.f32.mrb[25].mxu0 }
 0xa9a   : > { %v3161_v7 = vadd.f32 %v3715_v25, %v3160_v5  ;;  %v3724_v5 = vld [vmem:[%s5610_s13] ss:$0 sm:$0xff] }
 0xa9b   : > { %v3208_v10 = vmul.f32 0.70710677, %v3166_v31  ;;  %v3200_v39 = vmul.f32 0.5, %v3166_v31 }
 0xa9c   : > { %v3207_v63 = vmul.f32 0.70710677, %v3161_v7  ;;  %v3199_v6 = vmul.f32 0.5, %v3161_v7 }
 0xa9d   : > { %4405 = verf.f32 %v3208_v10 }
 0xa9e   : > { %4407 = verf.f32 %v3207_v63 }
 0xa9f   : > { %v4016_v58 = vpop.f32.mrb[26].mxu0 }
 0xaa0   : > { %v3176_v43 = vadd.f32 %v4016_v58, %v3715_v25  ;;  %v3170_v27 = vpop.f32.mrb[27].mxu0 }
 0xaa1   : > { %v3171_v26 = vadd.f32 %v3715_v25, %v3170_v27 }
 0xaa2   : > { %v3210_v23 = vmul.f32 0.70710677, %v3176_v43  ;;  %v3202_v9 = vmul.f32 0.5, %v3176_v43 }
 0xaa3   : > { %v3209_v32 = vmul.f32 0.70710677, %v3171_v26  ;;  %v3201_v22 = vmul.f32 0.5, %v3171_v26 }
 0xaa4   : > { %4409 = verf.f32 %v3210_v23 }
 0xaa5   : > { %4411 = verf.f32 %v3209_v32 }
 0xaa7   : > { %v4406_v21 = vpop.eup %4405  ;;  %v4019_v11 = vpop.f32.mrb[28].mxu0 }
 0xaa8   : > { %v4408_v44 = vpop.eup %4407  ;;  %v3224_v38 = vadd.f32 1.0, %v4406_v21  ;;  %v3186_v8 = vadd.f32 %v4019_v11, %v3715_v25  ;;  %v3180_v30 = vpop.f32.mrb[29].mxu0 }
 0xaa9   : > { %v3223_v60 = vadd.f32 1.0, %v4408_v44  ;;  %v3181_v46 = vadd.f32 %v3715_v25, %v3180_v30 }
 0xaaa   : > { %v3212_v47 = vmul.f32 0.70710677, %v3186_v8  ;;  %v3232_v37 = vmul.f32 %v3224_v38, %v3200_v39  ;;  %v3204_v13 = vmul.f32 0.5, %v3186_v8 }
 0xaab   : > { %v3231_v36 = vmul.f32 %v3223_v60, %v3199_v6  ;;  %v3211_v42 = vmul.f32 0.70710677, %v3181_v46  ;;  %v3203_v33 = vmul.f32 0.5, %v3181_v46 }
 0xaac   : > { %4413 = verf.f32 %v3212_v47 }
 0xaad   : > { %4415 = verf.f32 %v3211_v42  ;;  %4031 = vmatprep.mubr.msk.f32.mxu0 %vm3250_vm3, %v3231_v36 }
 0xaae   : > { %v4410_v2 = vpop.eup %4409  ;;  %4032 = vmatmul.mubr.msk.f32.vlgmr.msra.gmra.mrb[32].mxu0 %vm3250_vm3, %v3232_v37 }
 0xaaf   : > { %v4412_v24 = vpop.eup %4411  ;;  %v3226_v18 = vadd.f32 1.0, %v4410_v2  ;;  %v4022_v16 = vpop.f32.mrb[30].mxu0 }
 0xab0   : > { %v3225_v50 = vadd.f32 1.0, %v4412_v24  ;;  %v3196_v52 = vadd.f32 %v4022_v16, %v3715_v25  ;;  %v3190_v35 = vpop.f32.mrb[31].mxu0 }
 0xab1   : > { %v3191_v54 = vadd.f32 %v3715_v25, %v3190_v35  ;;  %v3234_v51 = vmul.f32 %v3226_v18, %v3202_v9 }
 0xab2   : > { %v3233_v3 = vmul.f32 %v3225_v50, %v3201_v22  ;;  %v3214_v59 = vmul.f32 0.70710677, %v3196_v52  ;;  %v3206_v25 = vmul.f32 0.5, %v3196_v52 }
 0xab3   : > { %v3213_v12 = vmul.f32 0.70710677, %v3191_v54  ;;  %v3205_v20 = vmul.f32 0.5, %v3191_v54 }
 0xab4   : > { %4417 = verf.f32 %v3214_v59  ;;  %4034 = vmatprep.mubr.msk.f32.mxu0 %vm3250_vm3, %v3233_v3 }
 0xab5   : > { %4419 = verf.f32 %v3213_v12  ;;  %4035 = vmatmul.mubr.msk.f32.gmra.mrb[34].mxu0 %vm3250_vm3, %v3234_v51 }
 0xab6   : > { %v4414_v14 = vpop.eup %4413 }
 0xab7   : > { %v4416_v19 = vpop.eup %4415  ;;  %v3228_v57 = vadd.f32 1.0, %v4414_v14 }
 0xab8   : > { %v3227_v40 = vadd.f32 1.0, %v4416_v19 }
 0xab9   : > { %v3236_v34 = vmul.f32 %v3228_v57, %v3204_v13 }
 0xaba   : > { %v3235_v61 = vmul.f32 %v3227_v40, %v3203_v33 }
 0xabc   : > { %4037 = vmatprep.mubr.msk.f32.mxu0 %vm3250_vm3, %v3235_v61 }
 0xabd   : > { %4038 = vmatmul.mubr.msk.f32.gmra.mrb[36].mxu0 %vm3250_vm3, %v3236_v34 }
 0xabe   : > { %v4418_v62 = vpop.eup %4417 }
 0xabf   : > { %v4420_v49 = vpop.eup %4419  ;;  %v3230_v28 = vadd.f32 1.0, %v4418_v62 }
 0xac0   : > { %v3229_v0 = vadd.f32 1.0, %v4420_v49 }
 0xac1   : > { %v3238_v31 = vmul.f32 %v3230_v28, %v3206_v25 }
 0xac2   : > { %v3237_v53 = vmul.f32 %v3229_v0, %v3205_v20 }
 0xac4   : > { %4040 = vmatprep.mubr.msk.f32.mxu0 %vm3250_vm3, %v3237_v53 }
 0xac5   : > { %4041 = vmatmul.mubr.msk.f32.gmra.mrb[38].mxu0 %vm3250_vm3, %v3238_v31 }
 0xb81   : > { %v4033_v7 = vpop.f32.mrb[32].mxu0 }
 0xb82   : > { %v5443_v10 = vadd.f32 %v4033_v7, %v3724_v5  ;;  %v3341_v63 = vpop.f32.mrb[33].mxu0 }
 0xb83   : > { %v5445_v58 = vadd.f32 %v3724_v5, %v3341_v63 }
 0xb84   : > { %v3391_v43 = vsel %vm540_vm0, %v5443_v10, 0.0  ;;  %v3421_v27 = vmul.f32 %v5443_v10, %v5443_v10 }
 0xb85   : > { %3392 = vadd.xlane.f32.xlu0 %v3391_v43  ;;  %v3388_v26 = vsel %vm540_vm0, %v5445_v58, 0.0  ;;  %v3420_v23 = vmul.f32 %v5445_v58, %v5445_v58 }
 0xb86   : > { %3389 = vadd.xlane.f32.xlu1 %v3388_v26  ;;  %v3431_v21 = vsel %vm540_vm0, %v3421_v27, 0.0 }
 0xb87   : > { %v3428_v38 = vsel %vm540_vm0, %v3420_v23, 0.0 }
 0xb88   : > { %v4036_v32 = vpop.f32.mrb[34].mxu0 }
 0xb89   : > { %v5456_v11 = vadd.f32 %v4036_v32, %v3724_v5  ;;  %3432 = vadd.xlane.f32.xlu0 %v3431_v21  ;;  %v3351_v44 = vpop.f32.mrb[35].mxu0  ;;  %v3384_v21 = vld [vmem:[%s5611_s14 + $0x2] sm:$0x1] }
 0xb8a   : > { %v5459_v8 = vadd.f32 %v3724_v5, %v3351_v44  ;;  %3429 = vadd.xlane.f32.xlu1 %v3428_v38  ;;  %v3382_v44 = vld [vmem:[%s5611_s14 + $0x1] sm:$0x1] }
 0xb8b   : > { %v3397_v30 = vsel %vm540_vm0, %v5456_v11, 0.0  ;;  %v3423_v60 = vmul.f32 %v5456_v11, %v5456_v11 }
 0xb8c   : > { %v3394_v6 = vsel %vm540_vm0, %v5459_v8, 0.0  ;;  %v3422_v46 = vmul.f32 %v5459_v8, %v5459_v8 }
 0xb8d   : > { %3398 = vadd.xlane.f32.xlu0 %v3397_v30  ;;  %v3437_v47 = vsel %vm540_vm0, %v3423_v60, 0.0 }
 0xb8e   : > { %3395 = vadd.xlane.f32.xlu1 %v3394_v6  ;;  %v3434_v37 = vsel %vm540_vm0, %v3422_v46, 0.0 }
 0xb90   : > { %v4039_v39 = vpop.f32.mrb[36].mxu0 }
 0xb91   : > { %v5470_v36 = vadd.f32 %v4039_v39, %v3724_v5  ;;  %3438 = vadd.xlane.f32.xlu0 %v3437_v47  ;;  %v3361_v42 = vpop.f32.mrb[37].mxu0  ;;  %v3385_v47 = vmul.f32 %v3384_v21, %v5305_v4 }
 0xb92   : > { %v5473_v2 = vadd.f32 %v3724_v5, %v3361_v42  ;;  %3435 = vadd.xlane.f32.xlu1 %v3434_v37 }
 0xb93   : > { %v3403_v24 = vsel %vm540_vm0, %v5470_v36, 0.0  ;;  %v3425_v16 = vmul.f32 %v5470_v36, %v5470_v36 }
 0xb94   : > { %v3400_v18 = vsel %vm540_vm0, %v5473_v2, 0.0  ;;  %v3424_v22 = vmul.f32 %v5473_v2, %v5473_v2 }
 0xb95   : > { %3404 = vadd.xlane.f32.xlu0 %v3403_v24  ;;  %v3443_v52 = vsel %vm540_vm0, %v3425_v16, 0.0 }
 0xb96   : > { %3401 = vadd.xlane.f32.xlu1 %v3400_v18  ;;  %v3440_v54 = vsel %vm540_vm0, %v3424_v22, 0.0  ;;  %v3386_v18 = vld [vmem:[%s5611_s14 + $0x3] sm:$0x1] }
 0xb98   : > { %v4042_v50 = vpop.f32.mrb[38].mxu0 }
 0xb99   : > { %v5484_v35 = vadd.f32 %v4042_v50, %v3724_v5  ;;  %3444 = vadd.xlane.f32.xlu0 %v3443_v52  ;;  %v3371_v9 = vpop.f32.mrb[39].mxu0 }
 0xb9a   : > { %v5487_v3 = vadd.f32 %v3724_v5, %v3371_v9  ;;  %3441 = vadd.xlane.f32.xlu1 %v3440_v54  ;;  %v3380_v5 = vld [vmem:[%s5611_s14] sm:$0x1]  ;;  %v3387_v54 = vadd.f32 %v3386_v18, %v3385_v47 }
 0xb9b   : > { %v3409_v59 = vsel %vm540_vm0, %v5484_v35, 0.0  ;;  %v3427_v12 = vmul.f32 %v5484_v35, %v5484_v35  ;;  %v3381_v23 = vmul.f32 %v3380_v5, %v5305_v4 }
 0xb9c   : > { %v3406_v51 = vsel %vm540_vm0, %v5487_v3, 0.0  ;;  %v3426_v14 = vmul.f32 %v5487_v3, %v5487_v3 }
 0xb9d   : > { %3410 = vadd.xlane.f32.xlu0 %v3409_v59  ;;  %v3449_v19 = vsel %vm540_vm0, %v3427_v12, 0.0  ;;  %v3383_v42 = vadd.f32 %v3382_v44, %v3381_v23 }
 0xb9e   : > { %3407 = vadd.xlane.f32.xlu1 %v3406_v51  ;;  %v3446_v57 = vsel %vm540_vm0, %v3426_v14, 0.0 }
 0xb9f   : > { %v5527_v4 = vrot.slane %v3383_v42, %v5323_v41 }
 0xba1   : > { %3450 = vadd.xlane.f32.xlu0 %v3449_v19 }
 0xba2   : > { %3447 = vadd.xlane.f32.xlu1 %v3446_v57 }
 0xc12   : > { %v3393_v33 = vpop.xlane.xlu0 %3392 }
 0xc13   : > { %v3413_v40 = vmul.f32 0.0625, %v3393_v33  ;;  %v3390_v13 = vpop.xlane.xlu1 %3389 }
 0xc14   : > { %v3412_v61 = vmul.f32 0.0625, %v3390_v13 }
 0xc15   : > { %v3461_v62 = vmul.f32 %v3413_v40, %v3413_v40  ;;  %v3477_v59 = vsub.f32 %v5443_v10, %v3413_v40 }
 0xc16   : > { %v3433_v34 = vpop.xlane.xlu0 %3432  ;;  %v3460_v20 = vmul.f32 %v3412_v61, %v3412_v61  ;;  %v3476_v14 = vsub.f32 %v5445_v58, %v3412_v61 }
 0xc17   : > { %v3453_v49 = vmul.f32 0.0625, %v3433_v34  ;;  %v3430_v28 = vpop.xlane.xlu1 %3429 }
 0xc18   : > { %v3452_v0 = vmul.f32 0.0625, %v3430_v28  ;;  %v5535_v28 = vrot.slane %v3387_v54, %v5323_v41 }
 0xc19   : > { %v3469_v25 = vsub.f32 %v3453_v49, %v3461_v62 }
 0xc1a   : > { %v3468_v53 = vsub.f32 %v3452_v0, %v3460_v20  ;;  %v3399_v31 = vpop.xlane.xlu0 %3398 }
 0xc1b   : > { %v3485_v7 = vadd.f32 1e-05, %v3469_v25  ;;  %v5502_v63 = vmul.f32 0.0625, %v3399_v31  ;;  %v3396_v43 = vpop.xlane.xlu1 %3395 }
 0xc1c   : > { %v3484_v27 = vadd.f32 1e-05, %v3468_v53  ;;  %v5504_v26 = vmul.f32 0.0625, %v3396_v43 }
 0xc1d   : > { %4421 = vrsqrt.f32 %v3485_v7  ;;  %v3463_v38 = vmul.f32 %v5502_v63, %v5502_v63  ;;  %v3479_v23 = vsub.f32 %v5456_v11, %v5502_v63 }
 0xc1e   : > { %4423 = vrsqrt.f32 %v3484_v27  ;;  %v3439_v32 = vpop.xlane.xlu0 %3438  ;;  %v3462_v60 = vmul.f32 %v5504_v26, %v5504_v26  ;;  %v3478_v44 = vsub.f32 %v5459_v8, %v5504_v26 }
 0xc1f   : > { %v3455_v30 = vmul.f32 0.0625, %v3439_v32  ;;  %v3436_v6 = vpop.xlane.xlu1 %3435 }
 0xc20   : > { %v3454_v46 = vmul.f32 0.0625, %v3436_v6 }
 0xc21   : > { %v3471_v39 = vsub.f32 %v3455_v30, %v3463_v38 }
 0xc22   : > { %v3470_v37 = vsub.f32 %v3454_v46, %v3462_v60  ;;  %v3405_v24 = vpop.xlane.xlu0 %3404 }
 0xc23   : > { %v3487_v16 = vadd.f32 1e-05, %v3471_v39  ;;  %v5521_v22 = vmul.f32 0.0625, %v3405_v24  ;;  %v3402_v50 = vpop.xlane.xlu1 %3401 }
 0xc24   : > { %v3486_v52 = vadd.f32 1e-05, %v3470_v37  ;;  %v5523_v9 = vmul.f32 0.0625, %v3402_v50 }
 0xc25   : > { %4425 = vrsqrt.f32 %v3487_v16  ;;  %v3465_v19 = vmul.f32 %v5521_v22, %v5521_v22  ;;  %v3481_v50 = vsub.f32 %v5470_v36, %v5521_v22 }
 0xc26   : > { %4427 = vrsqrt.f32 %v3486_v52  ;;  %v3445_v51 = vpop.xlane.xlu0 %3444  ;;  %v3464_v62 = vmul.f32 %v5523_v9, %v5523_v9 }
 0xc27   : > { %v4422_v12 = vpop.eup %4421  ;;  %v3457_v57 = vmul.f32 0.0625, %v3445_v51  ;;  %v3442_v33 = vpop.xlane.xlu1 %3441 }
 0xc28   : > { %v4424_v13 = vpop.eup %4423  ;;  %v3501_v34 = vmul.f32 %v4422_v12, %v3477_v59  ;;  %v3456_v10 = vmul.f32 0.0625, %v3442_v33  ;;  %v3480_v59 = vsub.f32 %v5473_v2, %v5523_v9 }
 0xc29   : > { %v3500_v40 = vmul.f32 %v4424_v13, %v3476_v14  ;;  %v3473_v49 = vsub.f32 %v3457_v57, %v3465_v19 }
 0xc2a   : > { %v3513_v20 = vmul.f32 %v5527_v4, %v3501_v34  ;;  %v3472_v58 = vsub.f32 %v3456_v10, %v3464_v62  ;;  %v3411_v61 = vpop.xlane.xlu0 %3410 }
 0xc2b   : > { %v3512_v0 = vmul.f32 %v5527_v4, %v3500_v40  ;;  %v3489_v25 = vadd.f32 1e-05, %v3473_v49  ;;  %v3419_v53 = vmul.f32 0.0625, %v3411_v61  ;;  %v3408_v31 = vpop.xlane.xlu1 %3407 }
 0xc2c   : > { %v3521_v5 = vadd.f32 %v3513_v20, %v5366_v29  ;;  %v3488_v7 = vadd.f32 1e-05, %v3472_v58  ;;  %v3418_v43 = vmul.f32 0.0625, %v3408_v31 }
 0xc2d   : > { %v3520_v41 = vadd.f32 %v3512_v0, %v5361_v1  ;;  %4429 = vrsqrt.f32 %v3489_v25  ;;  %v3467_v38 = vmul.f32 %v3419_v53, %v3419_v53  ;;  %v3483_v2 = vsub.f32 %v5484_v35, %v3419_v53 }
 0xc2e   : > { %v3533_v27 = vadd.f32 %v5535_v28, %v3521_v5  ;;  %4431 = vrsqrt.f32 %v3488_v7  ;;  %v3451_v29 = vpop.xlane.xlu0 %3450  ;;  %v3466_v46 = vmul.f32 %v3418_v43, %v3418_v43  ;;  %v3482_v33 = vsub.f32 %v5487_v3, %v3418_v43 }
 0xc2f   : > { %v4426_v32 = vpop.eup %4425  ;;  %v3532_v21 = vadd.f32 %v5535_v28, %v3520_v41  ;;  %v3459_v30 = vmul.f32 0.0625, %v3451_v29  ;;  %v3448_v6 = vpop.xlane.xlu1 %3447 }
 0xc30   : > { %v4428_v60 = vpop.eup %4427  ;;  %3541 = vst.msk [vmem:[%s5545_s20 + $0x8] sm:$0xff] %vm540_vm0, %v3533_v27  ;;  %v3503_v1 = vmul.f32 %v4426_v32, %v3479_v23  ;;  %v3458_v39 = vmul.f32 0.0625, %v3448_v6 }
 0xc31   : > { %3540 = vst.msk [vmem:[%s5545_s20] sm:$0xff] %vm540_vm0, %v3532_v21  ;;  %v3502_v11 = vmul.f32 %v4428_v60, %v3478_v44  ;;  %v3475_v63 = vsub.f32 %v3459_v30, %v3467_v38 }
 0xc32   : > { %v3515_v47 = vmul.f32 %v5527_v4, %v3503_v1  ;;  %v3474_v42 = vsub.f32 %v3458_v39, %v3466_v46 }
 0xc33   : > { %v3514_v8 = vmul.f32 %v5527_v4, %v3502_v11  ;;  %v3491_v26 = vadd.f32 1e-05, %v3475_v63 }
 0xc34   : > { %v3523_v37 = vadd.f32 %v3515_v47, %v5384_v45  ;;  %v3490_v24 = vadd.f32 1e-05, %v3474_v42 }
 0xc35   : > { %v3522_v18 = vadd.f32 %v3514_v8, %v5371_v48  ;;  %4433 = vrsqrt.f32 %v3491_v26 }
 0xc36   : > { %v3535_v16 = vadd.f32 %v5535_v28, %v3523_v37  ;;  %4435 = vrsqrt.f32 %v3490_v24 }
 0xc37   : > { %v4430_v52 = vpop.eup %4429  ;;  %v3534_v54 = vadd.f32 %v5535_v28, %v3522_v18 }
 0xc38   : > { %v4432_v51 = vpop.eup %4431  ;;  %3543 = vst.msk [vmem:[%s5545_s20 + $0x18] sm:$0xff] %vm540_vm0, %v3535_v16  ;;  %v3505_v45 = vmul.f32 %v4430_v52, %v3481_v50 }
 0xc39   : > { %3542 = vst.msk [vmem:[%s5545_s20 + $0x10] sm:$0xff] %vm540_vm0, %v3534_v54  ;;  %v3504_v48 = vmul.f32 %v4432_v51, %v3480_v59 }
 0xc3a   : > { %v3517_v12 = vmul.f32 %v5527_v4, %v3505_v45 }
 0xc3b   : > { %v3516_v36 = vmul.f32 %v5527_v4, %v3504_v48 }
 0xc3c   : > { %v3525_v22 = vadd.f32 %v3517_v12, %v5401_v55 }
 0xc3d   : > { %v3524_v14 = vadd.f32 %v3516_v36, %v5389_v15 }
 0xc3e   : > { %v3537_v19 = vadd.f32 %v5535_v28, %v3525_v22 }
 0xc3f   : > { %v4434_v9 = vpop.eup %4433  ;;  %v3536_v57 = vadd.f32 %v5535_v28, %v3524_v14 }
 0xc40   : > { %v4436_v13 = vpop.eup %4435  ;;  %3545 = vst.msk [vmem:[%s5545_s20 + $0x28] sm:$0xff] %vm540_vm0, %v3537_v19  ;;  %v3507_v34 = vmul.f32 %v4434_v9, %v3483_v2 }
 0xc41   : > { %3544 = vst.msk [vmem:[%s5545_s20 + $0x20] sm:$0xff] %vm540_vm0, %v3536_v57  ;;  %v3506_v55 = vmul.f32 %v4436_v13, %v3482_v33 }
 0xc42   : > { %v3519_v15 = vmul.f32 %v5527_v4, %v3507_v34 }
 0xc43   : > { %v3518_v62 = vmul.f32 %v5527_v4, %v3506_v55 }
 0xc44   : > { %v3527_v10 = vadd.f32 %v3519_v15, %v5413_v56 }
 0xc45   : > { %v3526_v35 = vadd.f32 %v3518_v62, %v5404_v17 }
 0xc46   : > { %v3539_v40 = vadd.f32 %v5535_v28, %v3527_v10 }
 0xc47   : > { %v3538_v49 = vadd.f32 %v5535_v28, %v3526_v35 }
 0xc48   : > { %3547 = vst.msk [vmem:[%s5545_s20 + $0x38] sm:$0xff] %vm540_vm0, %v3539_v40 }
 0xc49   : > { %3546 = vst.msk [vmem:[%s5545_s20 + $0x30] sm:$0xff] %vm540_vm0, %v3538_v49 }
 0xc4a PF: > { %s27_s18 = sadd.s32 1, %s4489_s18  }
 0xc4b   : > { %p24_p5 = scmp.ge.s32.totalorder %s27_s18, 4  }
 0xc4d   :  { %26 = sbr.rel (!%p24_p5) target bundleno = 2 (0x2), region = 120 }
 0xc54   :  { %3569 = vsyncpa [#allocation3], 1 }
 0xc55   :  { %3571 = vsyncpa [#allocation3 + $0x1], 1 }
 0xc56   :  { %3572 = vsyncpa [#allocation5], 1 }

// kernel: scot_decoder_forward.9
= control target key start
LH: loop header
LB: loop body
LE: loop exit
PB: predicated region body
PF: predicated region fallthrough
CT: control target
= control target key end

     0   :  { %19 = vsyncpa [#allocation3], 0  ;;  %s5482_s0 = inlined_call_operand.vmem [shape: f32[2], index: 0, kind: input, shape index: {}]   ;;  %s5483_s1 = inlined_call_operand.vmem [shape: f32[2,64,16], index: 1, kind: input, shape index: {}]   ;;  %s5484_s2 = inlined_call_operand.vmem [shape: f32[16,48], index: 2, kind: input, shape index: {}]   ;;  %s5485_s3 = inlined_call_operand.vmem [shape: f32[1,48], index: 3, kind: input, shape index: {}]   ;;  %s5486_s4 = inlined_call_operand.vmem [shape: f32[2,16,16], index: 4, kind: input, shape index: {}]   ;;  %s5487_s5 = inlined_call_operand.vmem [shape: f32[2], index: 5, kind: input, shape index: {}]   ;;  %s5488_s6 = inlined_call_operand.vmem [shape: f32[16,16], index: 6, kind: input, shape index: {}]   ;;  %s5489_s7 = inlined_call_operand.vmem [shape: f32[1,16], index: 7, kind: input, shape index: {}]   ;;  %s5490_s8 = inlined_call_operand.vmem [shape: f32[4,16], index: 8, kind: input, shape index: {}]   ;;  %s5491_s9 = inlined_call_operand.vmem [shape: f32[16,32], index: 9, kind: input, shape index: {}]   ;;  %s5492_s10 = inlined_call_operand.vmem [shape: f32[1,32], index: 10, kind: input, shape index: {}]   ;;  %s5493_s11 = inlined_call_operand.vmem [shape: f32[32,16], index: 11, kind: input, shape index: {}]   ;;  %s5494_s12 = inlined_call_operand.vmem [shape: f32[1,16], index: 12, kind: input, shape index: {}]   ;;  %s5495_s13 = inlined_call_operand.vmem [shape: f32[4,16], index: 13, kind: input, shape index: {}]   ;;  %s5496_s14 = inlined_call_operand.vmem [shape: f32[2,64,16], index: 14, kind: output, shape index: {}]  }
   0x1   :  { %20 = vsyncpa [#allocation5], 0  ;;  %s4522_s29 = smov 0  }
   0x2 LB: > { %s4528_s30 = sadd.s32 4294967295, %s4438_s29   ;;  %p3576_p0 = scmp.ge.s32.totalorder %s4438_s29, 1  ;;  %s4438_s29 = sphi %s4522_s29, %s26_s29  }
   0x3   : > { %p356_p1 = scmp.lt.s32.totalorder %s4438_s29, 3  ;;  %s369_s17 = sshll.u32 %s5482_s0, 4  ;;  %s370_s17 = int_to_ptr.vmem [resolvable:$true] %s369_s17 }
   0x4   : > { %p5497_p3 = scmp.eq.s32.totalorder %s4528_s30, 0  ;;  %s389_s21 = sshll.u32 %s5487_s5, 4  ;;  %s390_s21 = int_to_ptr.vmem [resolvable:$true] %s389_s21 }
   0x5   : > { %p4535_p2 = pnand %p3576_p0, %p356_p1  ;;  %s4394_s23 = scalar_lea.vmem %s370_s17, 16 }
   0x6   : > { %p4395_p6 = scmp.ne.s32.totalorder %s370_s17, %s4394_s23  ;;  %p4402_p10 = scmp.lt.s32.totalorder %s370_s17, %s370_s17 }
   0x7   : > { %s5499_s18 = scalar_select %p4535_p2, 1, 0 }
   0x8   : > { %p4104_p4 = pneg %p4535_p2  ;;  %p4403_p11 = scmp.lt.s32.totalorder %s4394_s23, %s4394_s23 }
   0xa   : > { %p4547_p5 = pnand %p5497_p3, %p4104_p4  ;;  %p4404_p12 = por %p4403_p11, %p4402_p10 }
   0xc   : > { %p4396_p7 = pneg %p4547_p5 }
   0xe   : > { %p4397_p8 = pnand %p4396_p7, %p4395_p6 }
  0x10   : > { %p4398_p9 = pneg %p4397_p8 }
  0x12   : > { %p4405_p13 = pnand %p4404_p12, %p4398_p9 }
  0x14   : > { %4408 = shalt.err (!%p4405_p13)
}
  0x15   : > { %s4440_s24 = smov [#allocation2]   ;;  %s4409_s25 = scalar_lea.vmem %s390_s21, 16 }
  0x16   : > { %4107 = dma.vmem_to_smem (!%p4547_p5), %s370_s17, 16, %s4440_s24, [#allocation3]  }
  0x17   : > { %p4410_p0 = scmp.ne.s32.totalorder %s390_s21, %s4409_s25  ;;  %p4417_p3 = scmp.lt.s32.totalorder %s390_s21, %s390_s21 }
  0x18   : > { %p4418_p2 = scmp.lt.s32.totalorder %s4409_s25, %s4409_s25 }
  0x19   : > { %p4412_p1 = pnand %p4410_p0, %p4396_p7 }
  0x1a   : > { %p4419_p6 = por %p4418_p2, %p4417_p3 }
  0x1b   : > { %p4413_p4 = pneg %p4412_p1 }
  0x1d   : > { %p4420_p8 = pnand %p4419_p6, %p4413_p4 }
  0x1f   : > { %4423 = shalt.err (!%p4420_p8)
}
  0x20   : > { %s4441_s26 = smov [#allocation4]   ;;  %p5501_p9 = scmp.ne.s32.totalorder %s5499_s18, 0 }
  0x21   : > { %4110 = dma.vmem_to_smem (!%p4547_p5), %s390_s21, 16, %s4441_s26, [#allocation5]  }
  0x22   : > { %434 = sbr.rel (%p5501_p9) target bundleno = 3142 (0xc46), region = 76  ;;  %p5502_p10 = scmp.eq.s32.totalorder (!%p5501_p9), %s4528_s30, 0 }
  0x29   : > { %4429 = dma.done.wait (%p5502_p10), [#allocation3], 16   ;;  %p5503_p11 = pmov %p5502_p10 }
  0x2a   : > { %p5504_p7 = pmov %p5502_p10 }
  0x2b   : > { %4431 = vsyncadd (%p5503_p11), [#allocation3], 4294967280 }
  0x2c   : > { %4433 = dma.done.wait (%p5504_p7), [#allocation5], 16   ;;  %p5505_p2 = pmov %p5504_p7 }
  0x2e   : > { %4435 = vsyncadd (%p5505_p2), [#allocation5], 4294967280 }
  0x2f   : > { %444 = sfence }
  0x30   : > { %v504_v0 = vld [vmem:[%s5484_s2] sm:$0xff]  ;;  %v505_v1 = vld [vmem:[%s5484_s2 + $0x8] sm:$0xff]  ;;  %p485_p3 = scmp.lt.s32.totalorder %s4528_s30, 1  ;;  %vm513_vm0 = vcmask 130048   ;;  %s4442_s24 = smov 112   ;;  %vm653_vm1 = vcmask 64512  }
  0x31   : > { %v3992_v2 = vpack.c.bf16 %v505_v1, %v504_v0  ;;  %v3587_v11 = vld [vmem:[%s5485_s3] ss:$0 sm:$0xff]  ;;  %s694_s25 = sld [smem:[#allocation4]]  ;;  %s4443_s26 = smov 104   ;;  %vm4746_vm2 = vmpackc.low %vm653_vm1, %vm653_vm1  ;;  %vm3199_vm3 = vcmask 261120  }
  0x32   : > { %s4575_s17 = scalar_select %p485_p3, %s4528_s30, 1 }
  0x33   : > { %3993 = vmatprep.subr.bf16.mxu0 %v3992_v2  ;;  %s4444_s27 = smov 120   ;;  %s4445_s20 = smov 96  }
  0x34   : > { %3995 = vmatpush3.bf16.msra.mxu0 %v3992_v2  ;;  %s3684_s18 = sshll.u32 %s4575_s17, 6  ;;  %s3620_s22 = sld [smem:[#allocation4 + $0x1]] }
  0x35   : > { %s4583_s21 = scalar_lea.vmem %s5483_s1, %s3684_s18  ;;  %s5430_s19 = scalar_lea.vmem %s5496_s14, %s3684_s18 }
  0x36   : > { %v496_v3 = vld [vmem:[%s4583_s21] sm:$0xff]  ;;  %v497_v4 = vld [vmem:[%s4583_s21 + $0x8] sm:$0xff]  ;;  %v498_v5 = vld [vmem:[%s4583_s21 + $0x10] sm:$0xff] }
  0x37   : > { %3804 = vmatprep.mubr.msk.f32.mxu0 %vm513_vm0, %v496_v3  ;;  %v499_v6 = vld [vmem:[%s4583_s21 + $0x18] sm:$0xff]  ;;  %v500_v7 = vld [vmem:[%s4583_s21 + $0x20] sm:$0xff]  ;;  %v501_v8 = vld [vmem:[%s4583_s21 + $0x28] sm:$0xff] }
  0x38   : > { %3805 = vmatmul.mubr.msk.f32.vlgmr.msra.gmra.mrb[0].mxu0 %vm513_vm0, %v497_v4  ;;  %v502_v9 = vld [vmem:[%s4583_s21 + $0x30] sm:$0xff]  ;;  %v503_v10 = vld [vmem:[%s4583_s21 + $0x38] sm:$0xff] }
  0x39   : > { %3807 = vmatprep.mubr.msk.f32.mxu0 %vm513_vm0, %v498_v5 }
  0x3c   : > { %3808 = vmatmul.mubr.msk.f32.gmra.mrb[2].mxu0 %vm513_vm0, %v499_v6 }
  0x3d   : > { %3810 = vmatprep.mubr.msk.f32.mxu0 %vm513_vm0, %v500_v7 }
  0x40   : > { %3811 = vmatmul.mubr.msk.f32.gmra.mrb[4].mxu0 %vm513_vm0, %v501_v8 }
  0x41   : > { %3813 = vmatprep.mubr.msk.f32.mxu0 %vm513_vm0, %v502_v9 }
  0x44   : > { %3814 = vmatmul.mubr.msk.f32.gmra.mrb[6].mxu0 %vm513_vm0, %v503_v10 }
 0x10b   : > { %v3806_v12 = vpop.f32.mrb[0].mxu0 }
 0x10c   : > { %v604_v13 = vpop.f32.mrb[1].mxu0  ;;  %v4606_v15 = vadd.f32 %v3806_v12, %v3587_v11 }
 0x10d   : > { %v4604_v14 = vadd.f32 %v3587_v11, %v604_v13 }
 0x10e   : > { %v4624_v23 = vmul.f32 %v4606_v15, %v4606_v15 }
 0x10f   : > { %v3809_v16 = vpop.f32.mrb[2].mxu0  ;;  %v4610_v17 = vmul.f32 %v4604_v14, %v4604_v14 }
 0x110   : > { %v614_v18 = vpop.f32.mrb[3].mxu0  ;;  %v4616_v20 = vadd.f32 %v3809_v16, %v3587_v11  ;;  %v657_v53 = vsel %vm653_vm1, %v4624_v23, 0.0 }
 0x111   : > { %v4612_v19 = vadd.f32 %v3587_v11, %v614_v18  ;;  %720 = vrot.lane.b32.xlu0 %v4610_v17, %s4442_s24  ;;  %v654_v52 = vsel %vm653_vm1, %v4610_v17, 0.0 }
 0x112   : > { %v4636_v28 = vmul.f32 %v4616_v20, %v4616_v20 }
 0x113   : > { %v3812_v21 = vpop.f32.mrb[4].mxu0  ;;  %v4620_v22 = vmul.f32 %v4612_v19, %v4612_v19 }
 0x114   : > { %v624_v24 = vpop.f32.mrb[5].mxu0  ;;  %v4626_v25 = vadd.f32 %v3812_v21, %v3587_v11  ;;  %v663_v55 = vsel %vm653_vm1, %v4636_v28, 0.0 }
 0x115   : > { %v4628_v26 = vadd.f32 %v3587_v11, %v624_v24  ;;  %724 = vrot.lane.b32.xlu1 %v4620_v22, %s4442_s24  ;;  %722 = vrot.lane.b32.xlu0 %v4624_v23, %s4442_s24  ;;  %v660_v54 = vsel %vm653_vm1, %v4620_v22, 0.0 }
 0x116   : > { %v4652_v33 = vmul.f32 %v4626_v25, %v4626_v25 }
 0x117   : > { %v3815_v27 = vpop.f32.mrb[6].mxu0  ;;  %v4640_v29 = vmul.f32 %v4628_v26, %v4628_v26 }
 0x118   : > { %v634_v30 = vpop.f32.mrb[7].mxu0  ;;  %v4642_v31 = vadd.f32 %v3815_v27, %v3587_v11  ;;  %v669_v57 = vsel %vm653_vm1, %v4652_v33, 0.0 }
 0x119   : > { %v4644_v32 = vadd.f32 %v3587_v11, %v634_v30  ;;  %726 = vrot.lane.b32.xlu1 %v4636_v28, %s4442_s24  ;;  %728 = vrot.lane.b32.xlu0 %v4640_v29, %s4442_s24  ;;  %v666_v56 = vsel %vm653_vm1, %v4640_v29, 0.0 }
 0x11a   : > { %v4664_v35 = vmul.f32 %v4642_v31, %v4642_v31 }
 0x11b   : > { %v4656_v34 = vmul.f32 %v4644_v32, %v4644_v32 }
 0x11c   : > { %v675_v59 = vsel %vm653_vm1, %v4664_v35, 0.0 }
 0x11d   : > { %730 = vrot.lane.b32.xlu1 %v4652_v33, %s4442_s24  ;;  %732 = vrot.lane.b32.xlu0 %v4656_v34, %s4442_s24  ;;  %v672_v58 = vsel %vm653_vm1, %v4656_v34, 0.0 }
 0x121   : > { %734 = vrot.lane.b32.xlu1 %v4664_v35, %s4442_s24 }
 0x183   : > { %v721_v36 = vpop.permute.xlu0 %720 }
 0x184   : > { %v744_v37 = vsel %vm653_vm1, %v721_v36, 0.0 }
 0x185   : > { %745 = vadd.xlane.f32.xlu0 %v744_v37 }
 0x187   : > { %v725_v38 = vpop.permute.xlu1 %724  ;;  %v723_v39 = vpop.permute.xlu0 %722 }
 0x188   : > { %v750_v40 = vsel %vm653_vm1, %v725_v38, 0.0  ;;  %v747_v41 = vsel %vm653_vm1, %v723_v39, 0.0 }
 0x189   : > { %751 = vadd.xlane.f32.xlu0 %v750_v40  ;;  %748 = vadd.xlane.f32.xlu1 %v747_v41 }
 0x18b   : > { %v727_v42 = vpop.permute.xlu1 %726  ;;  %v729_v43 = vpop.permute.xlu0 %728 }
 0x18c   : > { %v753_v44 = vsel %vm653_vm1, %v727_v42, 0.0  ;;  %v756_v45 = vsel %vm653_vm1, %v729_v43, 0.0 }
 0x18d   : > { %754 = vadd.xlane.f32.xlu0 %v753_v44  ;;  %757 = vadd.xlane.f32.xlu1 %v756_v45 }
 0x18f   : > { %v731_v46 = vpop.permute.xlu1 %730  ;;  %v733_v47 = vpop.permute.xlu0 %732 }
 0x190   : > { %v759_v48 = vsel %vm653_vm1, %v731_v46, 0.0  ;;  %v762_v49 = vsel %vm653_vm1, %v733_v47, 0.0 }
 0x191   : > { %760 = vadd.xlane.f32.xlu0 %v759_v48  ;;  %763 = vadd.xlane.f32.xlu1 %v762_v49  ;;  %v4700_v48 = vstv %s694_s25 }
 0x193   : > { %v735_v50 = vpop.permute.xlu1 %734 }
 0x194   : > { %v765_v51 = vsel %vm653_vm1, %v735_v50, 0.0 }
 0x195   : > { %766 = vadd.xlane.f32.xlu0 %v765_v51  ;;  %655 = vadd.xlane.f32.xlu1 %v654_v52 }
 0x199   : > { %658 = vadd.xlane.f32.xlu0 %v657_v53  ;;  %661 = vadd.xlane.f32.xlu1 %v660_v54 }
 0x19d   : > { %664 = vadd.xlane.f32.xlu0 %v663_v55  ;;  %667 = vadd.xlane.f32.xlu1 %v666_v56 }
 0x1a1   : > { %670 = vadd.xlane.f32.xlu0 %v669_v57  ;;  %673 = vadd.xlane.f32.xlu1 %v672_v58 }
 0x1a5   : > { %676 = vadd.xlane.f32.xlu0 %v675_v59 }
 0x212   : > { %v746_v60 = vpop.xlane.xlu0 %745 }
 0x213   : > { %v768_v61 = vmax.f32 %v746_v60, 1e-24 }
 0x215   : > { %4210 = vrsqrt.f32 %v768_v61 }
 0x216   : > { %v749_v62 = vpop.xlane.xlu1 %748  ;;  %v752_v63 = vpop.xlane.xlu0 %751 }
 0x217   : > { %v769_v0 = vmax.f32 %v749_v62, 1e-24  ;;  %v770_v1 = vmax.f32 %v752_v63, 1e-24 }
 0x219   : > { %4212 = vrsqrt.f32 %v769_v0 }
 0x21a   : > { %v758_v2 = vpop.xlane.xlu1 %757  ;;  %v755_v3 = vpop.xlane.xlu0 %754  ;;  %4214 = vrsqrt.f32 %v770_v1 }
 0x21b   : > { %v771_v4 = vmax.f32 %v755_v3, 1e-24  ;;  %v772_v5 = vmax.f32 %v758_v2, 1e-24 }
 0x21d   : > { %4216 = vrsqrt.f32 %v771_v4 }
 0x21e   : > { %v764_v6 = vpop.xlane.xlu1 %763  ;;  %v761_v7 = vpop.xlane.xlu0 %760  ;;  %4218 = vrsqrt.f32 %v772_v5 }
 0x21f   : > { %v774_v8 = vmax.f32 %v764_v6, 1e-24  ;;  %v773_v9 = vmax.f32 %v761_v7, 1e-24  ;;  %v4211_v10 = vpop.eup %4210 }
 0x220   : > { %v784_v21 = vmul.f32 %v4211_v10, %v4604_v14 }
 0x221   : > { %4220 = vrsqrt.f32 %v773_v9 }
 0x222   : > { %v767_v11 = vpop.xlane.xlu0 %766  ;;  %v656_v12 = vpop.xlane.xlu1 %655  ;;  %4222 = vrsqrt.f32 %v774_v8 }
 0x223   : > { %v4213_v13 = vpop.eup %4212  ;;  %v775_v16 = vmax.f32 %v767_v11, 1e-24  ;;  %v678_v18 = vmax.f32 %v656_v12, 1e-24 }
 0x224   : > { %v785_v24 = vmul.f32 %v4213_v13, %v4606_v15  ;;  %v4215_v27 = vpop.eup %4214 }
 0x225   : > { %4224 = vrsqrt.f32 %v775_v16  ;;  %v786_v38 = vmul.f32 %v4215_v27, %v4612_v19 }
 0x226   : > { %4226 = vrsqrt.f32 %v678_v18  ;;  %v662_v30 = vpop.xlane.xlu1 %661  ;;  %v4130_v36 = vpack.i.bf16 %v785_v24, %v784_v21 }
 0x227   : > { %v4217_v37 = vpop.eup %4216  ;;  %v680_v60 = vmax.f32 %v662_v30, 1e-24 }
 0x228   : > { %4131 = vrot.lane.b32.xlu1 %v4130_v36, %s4442_s24  ;;  %v787_v39 = vmul.f32 %v4217_v37, %v4616_v20  ;;  %v4219_v40 = vpop.eup %4218 }
 0x229   : > { %v788_v46 = vmul.f32 %v4219_v40, %v4628_v26 }
 0x22a   : > { %v668_v41 = vpop.xlane.xlu1 %667  ;;  %v4135_v43 = vpack.i.bf16 %v787_v39, %v786_v38 }
 0x22b   : > { %v682_v42 = vmax.f32 %v668_v41, 1e-24  ;;  %v4221_v44 = vpop.eup %4220 }
 0x22c   : > { %v4223_v45 = vpop.eup %4222  ;;  %4136 = vrot.lane.b32.xlu0 %v4135_v43, %s4442_s24  ;;  %v789_v47 = vmul.f32 %v4221_v44, %v4626_v25 }
 0x22d   : > { %4228 = vrsqrt.f32 %v682_v42  ;;  %v790_v52 = vmul.f32 %v4223_v45, %v4644_v32 }
 0x22e   : > { %v4140_v50 = vpack.i.bf16 %v789_v47, %v788_v46 }
 0x22f   : > { %v4225_v49 = vpop.eup %4224 }
 0x230   : > { %v4227_v51 = vpop.eup %4226  ;;  %v791_v53 = vmul.f32 %v4225_v49, %v4642_v31  ;;  %1684 = vrot.lane.b32.xlu0 %v4610_v17, %s4443_s26  ;;  %4141 = vrot.lane.b32.xlu1 %v4140_v50, %s4442_s24 }
 0x231   : > { %v696_v54 = vmul.f32 %v4227_v51, %v4700_v48 }
 0x232   : > { %v4145_v55 = vpack.i.bf16 %v791_v53, %v790_v52 }
 0x233   : > { %v704_v56 = vmul.f32 %v696_v54, %v4604_v14 }
 0x234   : > { %1688 = vrot.lane.b32.xlu0 %v4620_v22, %s4443_s26  ;;  %4146 = vrot.lane.b32.xlu1 %v4145_v55, %s4442_s24 }
 0x235   : > { %3820 = vmatprep.mubr.msk.f32.mxu1 %vm653_vm1, %v704_v56 }
 0x237   : > { %v4229_v57 = vpop.eup %4228 }
 0x238   : > { %1602 = vrot.lane.b32.xlu0 %v4610_v17, %s4444_s27  ;;  %1686 = vrot.lane.b32.xlu1 %v4624_v23, %s4443_s26  ;;  %v700_v58 = vmul.f32 %v4229_v57, %v4700_v48  ;;  %v659_v17 = vpop.xlane.xlu0 %658 }
 0x23a   : > { %v708_v59 = vmul.f32 %v700_v58, %v4628_v26 }
 0x23c   : > { %1692 = vrot.lane.b32.xlu0 %v4640_v29, %s4443_s26  ;;  %1690 = vrot.lane.b32.xlu1 %v4636_v28, %s4443_s26 }
 0x23d   : > { %3834 = vmatprep.mubr.msk.f32.mxu0 %vm653_vm1, %v708_v59 }
 0x240   : > { %1606 = vrot.lane.b32.xlu0 %v4620_v22, %s4444_s27  ;;  %1604 = vrot.lane.b32.xlu1 %v4624_v23, %s4444_s27  ;;  %v665_v22 = vpop.xlane.xlu0 %664  ;;  %v679_v23 = vmax.f32 %v659_v17, 1e-24 }
 0x241   : > { %v681_v61 = vmax.f32 %v665_v22, 1e-24 }
 0x242   : > { %4230 = vrsqrt.f32 %v679_v23 }
 0x243   : > { %4232 = vrsqrt.f32 %v680_v60 }
 0x244   : > { %1696 = vrot.lane.b32.xlu0 %v4656_v34, %s4443_s26  ;;  %1694 = vrot.lane.b32.xlu1 %v4652_v33, %s4443_s26  ;;  %4234 = vrsqrt.f32 %v681_v61  ;;  %v793_v61 = vld [vmem:[%s5486_s4 + $0x8] sm:$0xff] }
 0x248   : > { %1610 = vrot.lane.b32.xlu0 %v4640_v29, %s4444_s27  ;;  %1608 = vrot.lane.b32.xlu1 %v4636_v28, %s4444_s27  ;;  %v671_v29 = vpop.xlane.xlu0 %670  ;;  %v674_v28 = vpop.xlane.xlu1 %673 }
 0x249   : > { %v684_v62 = vmax.f32 %v674_v28, 1e-24 }
 0x24b   : > { %4236 = vrsqrt.f32 %v684_v62 }
 0x24c   : > { %1614 = vrot.lane.b32.xlu0 %v4656_v34, %s4444_s27  ;;  %1698 = vrot.lane.b32.xlu1 %v4664_v35, %s4443_s26  ;;  %v683_v34 = vmax.f32 %v671_v29, 1e-24  ;;  %v677_v0 = vpop.xlane.xlu0 %676  ;;  %v4231_v3 = vpop.eup %4230 }
 0x24d   : > { %v4233_v5 = vpop.eup %4232  ;;  %v685_v6 = vmax.f32 %v677_v0, 1e-24  ;;  %v697_v9 = vmul.f32 %v4231_v3, %v4700_v48 }
 0x24e   : > { %4238 = vrsqrt.f32 %v683_v34  ;;  %v698_v13 = vmul.f32 %v4233_v5, %v4700_v48  ;;  %v4235_v27 = vpop.eup %4234 }
 0x24f   : > { %4240 = vrsqrt.f32 %v685_v6  ;;  %v705_v24 = vmul.f32 %v697_v9, %v4606_v15  ;;  %v699_v44 = vmul.f32 %v4235_v27, %v4700_v48 }
 0x250   : > { %1612 = vrot.lane.b32.xlu1 %v4652_v33, %s4444_s27  ;;  %v706_v39 = vmul.f32 %v698_v13, %v4612_v19  ;;  %v3622_v33 = vld [vmem:[%s5486_s4 + $0x18] sm:$0xff] }
 0x251   : > { %v707_v53 = vmul.f32 %v699_v44, %v4616_v20 }
 0x254   : > { %1616 = vrot.lane.b32.xlu1 %v4664_v35, %s4444_s27 }
 0x255   : > { %v4237_v36 = vpop.eup %4236 }
 0x256   : > { %v702_v46 = vmul.f32 %v4237_v36, %v4700_v48 }
 0x258   : > { %v4239_v40 = vpop.eup %4238  ;;  %v710_v55 = vmul.f32 %v702_v46, %v4644_v32 }
 0x259   : > { %v701_v47 = vmul.f32 %v4239_v40, %v4700_v48  ;;  %v4241_v54 = vpop.eup %4240 }
 0x25a   : > { %v703_v22 = vmul.f32 %v4241_v54, %v4700_v48  ;;  %v792_v48 = vld [vmem:[%s5486_s4] sm:$0xff] }
 0x25b   : > { %v709_v56 = vmul.f32 %v701_v47, %v4626_v25 }
 0x25c   : > { %v711_v29 = vmul.f32 %v703_v22, %v4642_v31 }
 0x29a   : > { %v4132_v63 = vpop.permute.xlu1 %4131 }
 0x29b   : > { %v4134_v1 = vunpack.i.h.bf16 %v4132_v63  ;;  %v4133_v2 = vunpack.i.l.bf16 %v4132_v63 }
 0x29d   : > { %v3996_v35 = vpack.c.bf16 %v4134_v1, %v4133_v2 }
 0x29e   : > { %v4137_v4 = vpop.permute.xlu0 %4136 }
 0x29f   : > { %3998 = vmatprep.subr.msk.bf16.mxu1 %vm4746_vm2, %v3996_v35  ;;  %v4139_v7 = vunpack.i.h.bf16 %v4137_v4  ;;  %v4138_v8 = vunpack.i.l.bf16 %v4137_v4 }
 0x2a0   : > { %4001 = vmatpush3.bf16.xpose.msk.msra.mxu1 %vm4746_vm2, %v3996_v35 }
 0x2a1   : > { %v4002_v10 = vpack.c.bf16 %v4139_v7, %v4138_v8 }
 0x2a2   : > { %v1685_v11 = vpop.permute.xlu0 %1684  ;;  %v4142_v12 = vpop.permute.xlu1 %4141 }
 0x2a3   : > { %v4144_v16 = vunpack.i.h.bf16 %v4142_v12  ;;  %v4143_v18 = vunpack.i.l.bf16 %v4142_v12  ;;  %4004 = vmatprep.subr.msk.bf16.mxu1 %vm4746_vm2, %v4002_v10  ;;  %v1708_v21 = vsel %vm653_vm1, %v1685_v11, 0.0 }
 0x2a4   : > { %1709 = vadd.xlane.f32.xlu1 %v1708_v21 }
 0x2a5   : > { %v4008_v30 = vpack.c.bf16 %v4144_v16, %v4143_v18 }
 0x2a6   : > { %v1689_v37 = vpop.permute.xlu0 %1688  ;;  %v4147_v38 = vpop.permute.xlu1 %4146 }
 0x2a7   : > { %3821 = vmatmul.mubr.msk.f32.vlgmr.msra.gmra.mrb[0].mxu1 %vm653_vm1, %v705_v24  ;;  %v4149_v41 = vunpack.i.h.bf16 %v4147_v38  ;;  %v4148_v42 = vunpack.i.l.bf16 %v4147_v38  ;;  %4010 = vmatprep.subr.msk.bf16.mxu0 %vm4746_vm2, %v4008_v30  ;;  %v1714_v43 = vsel %vm653_vm1, %v1689_v37, 0.0 }
 0x2a8   : > { %4007 = vmatpush3.bf16.xpose.msk.msra.mxu1 %vm4746_vm2, %v4002_v10  ;;  %1715 = vadd.xlane.f32.xlu1 %v1714_v43 }
 0x2a9   : > { %3827 = vmatprep.mubr.msk.f32.mxu1 %vm653_vm1, %v706_v39  ;;  %v4014_v45 = vpack.c.bf16 %v4149_v41, %v4148_v42  ;;  %4013 = vmatpush3.bf16.xpose.msk.msra.mxu0 %vm4746_vm2, %v4008_v30 }
 0x2aa   : > { %v1603_v49 = vpop.permute.xlu0 %1602  ;;  %v1687_v50 = vpop.permute.xlu1 %1686 }
 0x2ab   : > { %4016 = vmatprep.subr.msk.bf16.mxu1 %vm4746_vm2, %v4014_v45  ;;  %v1626_v51 = vsel %vm653_vm1, %v1603_v49, 0.0  ;;  %v1711_v52 = vsel %vm653_vm1, %v1687_v50, 0.0 }
 0x2ac   : > { %1627 = vadd.xlane.f32.xlu1 %v1626_v51  ;;  %1712 = vadd.xlane.f32.xlu0 %v1711_v52 }
 0x2ae   : > { %v1693_v57 = vpop.permute.xlu0 %1692  ;;  %v1691_v58 = vpop.permute.xlu1 %1690 }
 0x2af   : > { %3828 = vmatmul.mubr.msk.f32.vlgmr.msra.gmra.mrb[2].mxu1 %vm653_vm1, %v707_v53  ;;  %v1720_v59 = vsel %vm653_vm1, %v1693_v57, 0.0  ;;  %v1717_v17 = vsel %vm653_vm1, %v1691_v58, 0.0  ;;  %v4837_v58 = vpack.i.bf16 %v4606_v15, %v4604_v14 }
 0x2b0   : > { %4019 = vmatpush3.bf16.xpose.msk.msra.mxu1 %vm4746_vm2, %v4014_v45  ;;  %3841 = vmatprep.mubr.msk.f32.mxu1 %vm653_vm1, %v710_v55 }
 0x2b1   : > { %3835 = vmatmul.mubr.msk.f32.vlgmr.msra.gmra.mrb[8].mxu0 %vm653_vm1, %v709_v56  ;;  %1721 = vadd.xlane.f32.xlu1 %v1720_v59 }
 0x2b2   : > { %1718 = vadd.xlane.f32.xlu0 %v1717_v17  ;;  %v1605_v23 = vpop.permute.xlu1 %1604  ;;  %v1607_v0 = vpop.permute.xlu0 %1606  ;;  %v4843_v17 = vpack.i.bf16 %v4626_v25, %v4628_v26 }
 0x2b3   : > { %v1629_v60 = vsel %vm653_vm1, %v1605_v23, 0.0  ;;  %v1632_v4 = vsel %vm653_vm1, %v1607_v0, 0.0 }
 0x2b6   : > { %1630 = vadd.xlane.f32.xlu0 %v1629_v60  ;;  %v1695_v28 = vpop.permute.xlu1 %1694  ;;  %v1697_v5 = vpop.permute.xlu0 %1696 }
 0x2b7   : > { %3842 = vmatmul.mubr.msk.f32.vlgmr.msra.gmra.mrb[4].mxu1 %vm653_vm1, %v711_v29  ;;  %v1726_v38 = vsel %vm653_vm1, %v1697_v5, 0.0  ;;  %v1723_v45 = vsel %vm653_vm1, %v1695_v28, 0.0  ;;  %v4848_v28 = vpack.i.bf16 %v4642_v31, %v4644_v32 }
 0x2ba   : > { %v1609_v35 = vpop.permute.xlu1 %1608  ;;  %v1611_v18 = vpop.permute.xlu0 %1610 }
 0x2bb   : > { %v1638_v43 = vsel %vm653_vm1, %v1611_v18, 0.0  ;;  %v1635_v52 = vsel %vm653_vm1, %v1609_v35, 0.0 }
 0x2be   : > { %v1699_v9 = vpop.permute.xlu1 %1698  ;;  %v1615_v41 = vpop.permute.xlu0 %1614 }
 0x2bf   : > { %v1644_v49 = vsel %vm653_vm1, %v1615_v41, 0.0  ;;  %v1729_v56 = vsel %vm653_vm1, %v1699_v9, 0.0 }
 0x2c2   : > { %v1613_v30 = vpop.permute.xlu1 %1612 }
 0x2c3   : > { %v1641_v57 = vsel %vm653_vm1, %v1613_v30, 0.0 }
 0x2c6   : > { %v1617_v42 = vpop.permute.xlu1 %1616 }
 0x2c7   : > { %v1647_v59 = vsel %vm653_vm1, %v1617_v42, 0.0 }
 0x331   : > { %v1710_v47 = vpop.xlane.xlu1 %1709 }
 0x332   : > { %v1732_v29 = vmax.f32 %v1710_v47, 1e-24 }
 0x335   : > { %v1716_v53 = vpop.xlane.xlu1 %1715 }
 0x336   : > { %v1734_v55 = vmax.f32 %v1716_v53, 1e-24 }
 0x339   : > { %v1713_v46 = vpop.xlane.xlu0 %1712  ;;  %v1628_v5 = vpop.xlane.xlu1 %1627 }
 0x33a   : > { %v1733_v23 = vmax.f32 %v1713_v46, 1e-24 }
 0x33e   : > { %v1722_v18 = vpop.xlane.xlu1 %1721 }
 0x33f   : > { %v1719_v51 = vpop.xlane.xlu0 %1718  ;;  %v1736_v46 = vmax.f32 %v1722_v18, 1e-24 }
 0x340   : > { %v1735_v54 = vmax.f32 %v1719_v51, 1e-24 }
 0x342   : > { %4242 = vrsqrt.f32 %v1735_v54 }
 0x343   : > { %4244 = vrsqrt.f32 %v1734_v55 }
 0x344   : > { %4246 = vrsqrt.f32 %v1733_v23 }
 0x345   : > { %4248 = vrsqrt.f32 %v1732_v29 }
 0x34c   : > { %v4243_v22 = vpop.eup %4242 }
 0x34d   : > { %v4245_v60 = vpop.eup %4244 }
 0x37a   : > { %v3822_v62 = vpop.f32.mrb[0].mxu1 }
 0x37b   : > { %v4797_v34 = vadd.f32 %v3822_v62, %v793_v61  ;;  %v876_v63 = vpop.f32.mrb[1].mxu1 }
 0x37c   : > { %v4799_v1 = vadd.f32 %v876_v63, %v792_v48  ;;  %v4247_v63 = vpop.eup %4246 }
 0x37d   : > { %v1161_v2 = vsel %vm513_vm0, %v4797_v34, -inf  ;;  %v4249_v0 = vpop.eup %4248  ;;  %v1749_v35 = vmul.f32 %v4247_v63, %v4606_v15 }
 0x37e   : > { %1162 = vmax.xlane.f32.xlu1 %v1161_v2  ;;  %v1158_v3 = vsel %vm513_vm0, %v4799_v1, -inf  ;;  %v4856_v2 = vpack.i.bf16 %v4616_v20, %v4612_v19 }
 0x37f   : > { %1159 = vmax.xlane.f32.xlu0 %v1158_v3  ;;  %v1748_v3 = vmul.f32 %v4249_v0, %v4604_v14 }
 0x382   : > { %1633 = vadd.xlane.f32.xlu1 %v1632_v4  ;;  %v3829_v6 = vpop.f32.mrb[2].mxu1  ;;  %v4170_v4 = vpack.i.bf16 %v1749_v35, %v1748_v3 }
 0x383   : > { %v4806_v7 = vadd.f32 %v3829_v6, %v793_v61  ;;  %v967_v8 = vpop.f32.mrb[3].mxu1  ;;  %v1650_v6 = vmax.f32 %v1628_v5, 1e-24 }
 0x384   : > { %v3836_v10 = vpop.f32.mrb[8].mxu0  ;;  %v4816_v24 = vadd.f32 %v967_v8, %v792_v48 }
 0x385   : > { %v4808_v11 = vadd.f32 %v3836_v10, %v793_v61  ;;  %v1058_v12 = vpop.f32.mrb[9].mxu0  ;;  %v1167_v13 = vsel %vm513_vm0, %v4806_v7, -inf  ;;  %4250 = vrsqrt.f32 %v1650_v6  ;;  %v4864_v10 = vstv %s3620_s22 }
 0x386   : > { %v4812_v16 = vadd.f32 %v1058_v12, %v792_v48  ;;  %1168 = vmax.xlane.f32.xlu0 %v1167_v13  ;;  %v1164_v40 = vsel %vm513_vm0, %v4816_v24, -inf }
 0x387   : > { %v1173_v27 = vsel %vm513_vm0, %v4808_v11, -inf }
 0x388   : > { %v1170_v21 = vsel %vm513_vm0, %v4812_v16, -inf }
 0x389   : > { %1171 = vmax.xlane.f32.xlu1 %v1170_v21  ;;  %v4869_v21 = vpop.xlane.xlu0 %1630 }
 0x38a   : > { %v3843_v36 = vpop.f32.mrb[4].mxu1  ;;  %1174 = vmax.xlane.f32.xlu0 %v1173_v27 }
 0x38b   : > { %v1149_v37 = vpop.f32.mrb[5].mxu1  ;;  %v4826_v44 = vadd.f32 %v3843_v36, %v793_v61  ;;  %v1751_v61 = vmul.f32 %v4243_v22, %v4616_v20 }
 0x38c   : > { %v4821_v39 = vadd.f32 %v1149_v37, %v792_v48  ;;  %v1750_v48 = vmul.f32 %v4245_v60, %v4612_v19 }
 0x38d   : > { %1727 = vadd.xlane.f32.xlu1 %v1726_v38  ;;  %v1179_v50 = vsel %vm513_vm0, %v4826_v44, -inf }
 0x38e   : > { %1165 = vmax.xlane.f32.xlu0 %v1164_v40  ;;  %v4175_v62 = vpack.i.bf16 %v1751_v61, %v1750_v48  ;;  %v1176_v8 = vsel %vm513_vm0, %v4821_v39, -inf }
 0x38f   : > { %v4251_v9 = vpop.eup %4250 }
 0x390   : > { %v1668_v12 = vmul.f32 %v4251_v9, %v4864_v10 }
 0x391   : > { %1639 = vadd.xlane.f32.xlu1 %v1638_v43 }
 0x392   : > { %1724 = vadd.xlane.f32.xlu0 %v1723_v45  ;;  %v1676_v13 = vmul.f32 %v1668_v12, %v4604_v14 }
 0x395   : > { %1645 = vadd.xlane.f32.xlu1 %v1644_v49 }
 0x396   : > { %1180 = vmax.xlane.f32.xlu0 %v1179_v50 }
 0x39a   : > { %1636 = vadd.xlane.f32.xlu0 %v1635_v52 }
 0x39e   : > { %1730 = vadd.xlane.f32.xlu0 %v1729_v56 }
 0x3a2   : > { %1642 = vadd.xlane.f32.xlu0 %v1641_v57 }
 0x3a6   : > { %4151 = vrot.lane.b32.xlu1 %v4837_v58, %s4445_s20  ;;  %1648 = vadd.xlane.f32.xlu0 %v1647_v59 }
 0x3aa   : > { %4161 = vrot.lane.b32.xlu1 %v4843_v17, %s4445_s20 }
 0x3ae   : > { %4166 = vrot.lane.b32.xlu1 %v4848_v28, %s4445_s20 }
 0x3b2   : > { %4176 = vrot.lane.b32.xlu1 %v4175_v62, %s4443_s26 }
 0x3bc   : > { %4156 = vrot.lane.b32.xlu0 %v4856_v2, %s4445_s20 }
 0x3c0   : > { %4171 = vrot.lane.b32.xlu0 %v4170_v4, %s4443_s26 }
 0x3d6   : > { %1177 = vmax.xlane.f32.xlu1 %v1176_v8 }
 0x3e7   : > { %1761 = vrot.lane.b32.xlu1 %v1676_v13, %s4444_s27 }
 0x40b   : > { %v4871_v27 = vpop.xlane.xlu1 %1162 }
 0x40c   : > { %v1160_v30 = vpop.xlane.xlu0 %1159 }
 0x40d   : > { %v1182_v36 = vsub.f32 %v4799_v1, %v1160_v30 }
 0x40f   : > { %v1190_v37 = vmul.f32 1.442695, %v1182_v36  ;;  %v4874_v38 = vpop.xlane.xlu1 %1633 }
 0x411   : > { %4252 = vpow2.f32 %v1190_v37 }
 0x412   : > { %4254 = vrsqrt.f32 %v1736_v46 }
 0x413   : > { %v4876_v40 = vpop.xlane.xlu0 %1168 }
 0x416   : > { %v1172_v41 = vpop.xlane.xlu1 %1171 }
 0x417   : > { %v4878_v42 = vpop.xlane.xlu0 %1174  ;;  %v1186_v14 = vsub.f32 %v4812_v16, %v1172_v41 }
 0x419   : > { %v1198_v50 = vmul.f32 1.442695, %v1186_v14 }
 0x41a   : > { %v1728_v43 = vpop.xlane.xlu1 %1727 }
 0x41b   : > { %v4881_v45 = vpop.eup %4252  ;;  %v1166_v47 = vpop.xlane.xlu0 %1165  ;;  %v1738_v3 = vmax.f32 %v1728_v43, 1e-24  ;;  %v1183_v43 = vsub.f32 %v4797_v34, %v4871_v27  ;;  %v1187_v27 = vsub.f32 %v4808_v11, %v4878_v42 }
 0x41c   : > { %v1184_v49 = vsub.f32 %v4816_v24, %v1166_v47  ;;  %v1206_v1 = vsel %vm513_vm0, %v4881_v45, 0.0  ;;  %v4255_v22 = vpop.eup %4254 }
 0x41d   : > { %1207 = vadd.xlane.f32.xlu1 %v1206_v1  ;;  %v1752_v6 = vmul.f32 %v4255_v22, %v4628_v26 }
 0x41e   : > { %v1194_v51 = vmul.f32 1.442695, %v1184_v49  ;;  %v4886_v52 = vpop.xlane.xlu1 %1639 }
 0x41f   : > { %v1725_v53 = vpop.xlane.xlu0 %1724 }
 0x420   : > { %4256 = vpow2.f32 %v1194_v51  ;;  %v1737_v54 = vmax.f32 %v1725_v53, 1e-24  ;;  %v1192_v53 = vmul.f32 1.442695, %v1183_v43 }
 0x421   : > { %4258 = vpow2.f32 %v1198_v50 }
 0x422   : > { %4260 = vrsqrt.f32 %v1737_v54  ;;  %v4888_v16 = vpop.xlane.xlu1 %1645  ;;  %v1185_v54 = vsub.f32 %v4806_v7, %v4876_v40 }
 0x423   : > { %v1181_v55 = vpop.xlane.xlu0 %1180 }
 0x424   : > { %v1196_v34 = vmul.f32 1.442695, %v1185_v54  ;;  %v1189_v22 = vsub.f32 %v4826_v44, %v1181_v55  ;;  %v1651_v55 = vmax.f32 %v4869_v21, 1e-24 }
 0x426   : > { %v4152_v56 = vpop.permute.xlu1 %4151  ;;  %v1204_v7 = vmul.f32 1.442695, %v1189_v22 }
 0x427   : > { %v4154_v57 = vunpack.i.h.bf16 %v4152_v56  ;;  %v4153_v24 = vunpack.i.l.bf16 %v4152_v56  ;;  %v4890_v59 = vpop.xlane.xlu0 %1636 }
 0x429   : > { %v4020_v23 = vpack.c.bf16 %v4154_v57, %v4153_v24  ;;  %v1200_v24 = vmul.f32 1.442695, %v1187_v27 }
 0x42a   : > { %v4892_v60 = vpop.eup %4256  ;;  %v4162_v29 = vpop.permute.xlu1 %4161 }
 0x42b   : > { %v4894_v61 = vpop.eup %4258  ;;  %v4164_v48 = vunpack.i.h.bf16 %v4162_v29  ;;  %v4163_v62 = vunpack.i.l.bf16 %v4162_v29  ;;  %4021 = vmatprep.subr.bf16.mxu0 %v4020_v23  ;;  %v1731_v63 = vpop.xlane.xlu0 %1730  ;;  %v1212_v0 = vsel %vm513_vm0, %v4892_v60, 0.0 }
 0x42c   : > { %v4261_v35 = vpop.eup %4260  ;;  %4023 = vmatpush3.bf16.msra.mxu0 %v4020_v23  ;;  %v1739_v4 = vmax.f32 %v1731_v63, 1e-24  ;;  %1213 = vadd.xlane.f32.xlu1 %v1212_v0  ;;  %v1218_v12 = vsel %vm513_vm0, %v4894_v61, 0.0  ;;  %v1652_v0 = vmax.f32 %v4874_v38, 1e-24 }
 0x42d   : > { %v4028_v5 = vpack.c.bf16 %v4164_v48, %v4163_v62  ;;  %v1753_v8 = vmul.f32 %v4261_v35, %v4626_v25  ;;  %v1653_v38 = vmax.f32 %v4890_v59, 1e-24 }
 0x42e   : > { %4262 = vrsqrt.f32 %v1739_v4  ;;  %v4939_v42 = vpop.permute.xlu1 %4166 }
 0x42f   : > { %4029 = vmatprep.subr.bf16.mxu1 %v4028_v5  ;;  %v4900_v9 = vpop.xlane.xlu0 %1642  ;;  %v4180_v13 = vpack.i.bf16 %v1753_v8, %v1752_v6  ;;  %4264 = vrsqrt.f32 %v1738_v3  ;;  %v1654_v3 = vmax.f32 %v4886_v52, 1e-24  ;;  %v1656_v8 = vmax.f32 %v4888_v16, 1e-24 }
 0x430   : > { %4031 = vmatpush3.bf16.msra.mxu1 %v4028_v5  ;;  %1219 = vadd.xlane.f32.xlu1 %v1218_v12  ;;  %4266 = vpow2.f32 %v1192_v53 }
 0x431   : > { %4181 = vrot.lane.b32.xlu0 %v4180_v13, %s4443_s26  ;;  %4268 = vpow2.f32 %v1196_v34 }
 0x432   : > { %4270 = vpow2.f32 %v1200_v24  ;;  %v4945_v35 = vpop.permute.xlu1 %4176 }
 0x433   : > { %v4905_v18 = vpop.xlane.xlu0 %1648  ;;  %4272 = vpow2.f32 %v1204_v7 }
 0x434   : > { %4274 = vrsqrt.f32 %v1651_v55 }
 0x435   : > { %4276 = vrsqrt.f32 %v1652_v0 }
 0x436   : > { %4278 = vrsqrt.f32 %v1654_v3 }
 0x437   : > { %v4157_v30 = vpop.permute.xlu0 %4156 }
 0x438   : > { %v4263_v36 = vpop.eup %4262  ;;  %v4159_v37 = vunpack.i.h.bf16 %v4157_v30  ;;  %v4158_v41 = vunpack.i.l.bf16 %v4157_v30 }
 0x439   : > { %v4265_v14 = vpop.eup %4264  ;;  %v1755_v49 = vmul.f32 %v4263_v36, %v4642_v31 }
 0x43a   : > { %v4909_v46 = vpack.c.bf16 %v4159_v37, %v4158_v41  ;;  %v1754_v51 = vmul.f32 %v4265_v14, %v4644_v32  ;;  %v4925_v40 = vpop.eup %4266 }
 0x43b   : > { %v4172_v47 = vpop.permute.xlu0 %4171  ;;  %v1209_v23 = vsel %vm513_vm0, %v4925_v40, 0.0  ;;  %v4929_v29 = vpop.eup %4268 }
 0x43c   : > { %v4174_v1 = vunpack.i.h.bf16 %v4172_v47  ;;  %v4173_v50 = vunpack.i.l.bf16 %v4172_v47  ;;  %4025 = vmatprep.subr.bf16.mxu0 %v4909_v46  ;;  %v4185_v57 = vpack.i.bf16 %v1755_v49, %v1754_v51  ;;  %v1215_v48 = vsel %vm513_vm0, %v4929_v29, 0.0  ;;  %v4933_v62 = vpop.eup %4270 }
 0x43d   : > { %v1221_v11 = vsel %vm513_vm0, %v4933_v62, 0.0  ;;  %v4937_v44 = vpop.eup %4272 }
 0x43e   : > { %v4916_v56 = vpack.c.bf16 %v4174_v1, %v4173_v50  ;;  %v1227_v63 = vsel %vm513_vm0, %v4937_v44, 0.0  ;;  %v4275_v21 = vpop.eup %4274 }
 0x43f   : > { %v1669_v12 = vmul.f32 %v4275_v21, %v4864_v10  ;;  %v4277_v13 = vpop.eup %4276 }
 0x440   : > { %4038 = vmatprep.subr.msk.bf16.mxu1 %vm4746_vm2, %v4916_v56  ;;  %v1670_v36 = vmul.f32 %v4277_v13, %v4864_v10  ;;  %v4279_v52 = vpop.eup %4278 }
 0x441   : > { %4186 = vrot.lane.b32.xlu1 %v4185_v57, %s4443_s26  ;;  %v1677_v30 = vmul.f32 %v1669_v12, %v4606_v15  ;;  %v1672_v59 = vmul.f32 %v4279_v52, %v4864_v10  ;;  %v1657_v15 = vmax.f32 %v4905_v18, 1e-24 }
 0x442   : > { %v1678_v41 = vmul.f32 %v1670_v36, %v4612_v19 }
 0x443   : > { %v1680_v43 = vmul.f32 %v1672_v59, %v4628_v26 }
 0x450   : > { %1210 = vadd.xlane.f32.xlu0 %v1209_v23 }
 0x454   : > { %1216 = vadd.xlane.f32.xlu0 %v1215_v48 }
 0x458   : > { %1222 = vadd.xlane.f32.xlu0 %v1221_v11  ;;  %v4168_v11 = vunpack.i.l.bf16 %v4939_v42 }
 0x45c   : > { %1228 = vadd.xlane.f32.xlu0 %v1227_v63 }
 0x463   : > { %v1178_v4 = vpop.xlane.xlu1 %1177 }
 0x464   : > { %v1188_v5 = vsub.f32 %v4821_v39, %v1178_v4  ;;  %v1655_v39 = vmax.f32 %v4900_v9, 1e-24  ;;  %v4179_v4 = vunpack.i.h.bf16 %v4945_v35 }
 0x466   : > { %v1202_v6 = vmul.f32 1.442695, %v1188_v5  ;;  %v4178_v5 = vunpack.i.l.bf16 %v4945_v35 }
 0x467   : > { %v1762_v54 = vpop.permute.xlu1 %1761 }
 0x468   : > { %4280 = vpow2.f32 %v1202_v6 }
 0x469   : > { %4282 = vrsqrt.f32 %v1656_v8  ;;  %v4042_v8 = vpack.c.bf16 %v4179_v4, %v4178_v5 }
 0x46a   : > { %4284 = vrsqrt.f32 %v1653_v38 }
 0x46b   : > { %4286 = vrsqrt.f32 %v1655_v39 }
 0x46c   : > { %4288 = vrsqrt.f32 %v1657_v15 }
 0x472   : > { %v4954_v37 = vpop.eup %4280  ;;  %1763 = vrot.lane.b32.xlu0 %v1677_v30, %s4444_s27 }
 0x473   : > { %v1224_v16 = vsel %vm513_vm0, %v4954_v37, 0.0  ;;  %v4283_v14 = vpop.eup %4282 }
 0x474   : > { %1225 = vadd.xlane.f32.xlu1 %v1224_v16  ;;  %v1674_v9 = vmul.f32 %v4283_v14, %v4864_v10  ;;  %v4285_v47 = vpop.eup %4284 }
 0x475   : > { %v1671_v19 = vmul.f32 %v4285_v47, %v4864_v10  ;;  %v4287_v1 = vpop.eup %4286 }
 0x476   : > { %1856 = vrot.lane.b32.xlu0 %v1678_v41, %s4444_s27  ;;  %v1682_v49 = vmul.f32 %v1674_v9, %v4644_v32  ;;  %v1673_v18 = vmul.f32 %v4287_v1, %v4864_v10  ;;  %v4289_v51 = vpop.eup %4288  ;;  %v3621_v1 = vld [vmem:[%s5486_s4 + $0x10] sm:$0xff] }
 0x477   : > { %v1679_v50 = vmul.f32 %v1671_v19, %v4616_v20  ;;  %v1675_v53 = vmul.f32 %v4289_v51, %v4864_v10 }
 0x478   : > { %v1681_v26 = vmul.f32 %v1673_v18, %v4626_v25 }
 0x479   : > { %v1683_v32 = vmul.f32 %v1675_v53, %v4642_v31 }
 0x47a   : > { %1951 = vrot.lane.b32.xlu0 %v1680_v43, %s4444_s27 }
 0x47e   : > { %2046 = vrot.lane.b32.xlu0 %v1682_v49, %s4444_s27 }
 0x485   : > { %1858 = vrot.lane.b32.xlu1 %v1679_v50, %s4444_s27 }
 0x489   : > { %1953 = vrot.lane.b32.xlu1 %v1681_v26, %s4444_s27 }
 0x48d   : > { %2048 = vrot.lane.b32.xlu1 %v1683_v32, %s4444_s27  ;;  %s4446_s27 = smov 88  }
 0x4a3   : > { %v4182_v22 = vpop.permute.xlu0 %4181 }
 0x4a4   : > { %v4183_v21 = vunpack.i.l.bf16 %v4182_v22 }
 0x4aa   : > { %v1208_v57 = vpop.xlane.xlu1 %1207 }
 0x4ab   : > { %4290 = vrcp.f32 %v1208_v57 }
 0x4b5   : > { %v4291_v34 = vpop.eup %4290 }
 0x4b6   : > { %v1238_v20 = vmul.f32 %v4291_v34, %v4881_v45  ;;  %v4169_v45 = vunpack.i.h.bf16 %v4939_v42 }
 0x4b8   : > { %3848 = vmatprep.mubr.msk.f32.mxu0 %vm513_vm0, %v1238_v20  ;;  %v4032_v3 = vpack.c.bf16 %v4169_v45, %v4168_v11 }
 0x4b9   : > { %v1214_v27 = vpop.xlane.xlu1 %1213 }
 0x4bd   : > { %v1220_v24 = vpop.xlane.xlu1 %1219 }
 0x4be   : > { %4292 = vrcp.f32 %v1220_v24 }
 0x4bf   : > { %4294 = vrcp.f32 %v1214_v27 }
 0x4c8   : > { %v4293_v25 = vpop.eup %4292 }
 0x4c9   : > { %v1242_v10 = vmul.f32 %v4293_v25, %v4894_v61  ;;  %v4295_v48 = vpop.eup %4294 }
 0x4ca   : > { %v1240_v61 = vmul.f32 %v4295_v48, %v4892_v60 }
 0x4cb   : > { %3862 = vmatprep.mubr.msk.f32.mxu1 %vm513_vm0, %v1242_v10 }
 0x4dd   : > { %v1211_v31 = vpop.xlane.xlu0 %1210 }
 0x4de   : > { %4296 = vrcp.f32 %v1211_v31 }
 0x4e1   : > { %v1217_v7 = vpop.xlane.xlu0 %1216 }
 0x4e2   : > { %4298 = vrcp.f32 %v1217_v7 }
 0x4e5   : > { %v1223_v23 = vpop.xlane.xlu0 %1222 }
 0x4e6   : > { %4300 = vrcp.f32 %v1223_v23 }
 0x4e8   : > { %v4297_v55 = vpop.eup %4296 }
 0x4e9   : > { %v1239_v63 = vmul.f32 %v4297_v55, %v4925_v40  ;;  %v1229_v0 = vpop.xlane.xlu0 %1228  ;;  %v4184_v40 = vunpack.i.h.bf16 %v4182_v22 }
 0x4ea   : > { %4302 = vrcp.f32 %v1229_v0 }
 0x4eb   : > { %3849 = vmatmul.mubr.msk.f32.vlgmr.msra.gmra.mrb[10].mxu0 %vm513_vm0, %v1239_v63  ;;  %v4048_v13 = vpack.c.bf16 %v4184_v40, %v4183_v21 }
 0x4ec   : > { %v4299_v6 = vpop.eup %4298  ;;  %4027 = vmatpush3.bf16.msra.mxu0 %v4909_v46  ;;  %3855 = vmatprep.mubr.msk.f32.mxu0 %vm513_vm0, %v1240_v61 }
 0x4ed   : > { %v1241_v42 = vmul.f32 %v4299_v6, %v4929_v29  ;;  %4033 = vmatprep.subr.bf16.mxu0 %v4032_v3  ;;  %v1764_v12 = vpop.permute.xlu0 %1763 }
 0x4ef   : > { %3856 = vmatmul.mubr.msk.f32.vlgmr.msra.gmra.mrb[12].mxu0 %vm513_vm0, %v1241_v42 }
 0x4f0   : > { %v4301_v60 = vpop.eup %4300  ;;  %4035 = vmatpush3.bf16.msra.mxu0 %v4032_v3 }
 0x4f1   : > { %v1243_v35 = vmul.f32 %v4301_v60, %v4933_v62  ;;  %4044 = vmatprep.subr.msk.bf16.mxu0 %vm4746_vm2, %v4042_v8  ;;  %v1857_v46 = vpop.permute.xlu0 %1856  ;;  %v4187_v62 = vpop.permute.xlu1 %4186 }
 0x4f2   : > { %v4189_v39 = vunpack.i.h.bf16 %v4187_v62  ;;  %v4188_v16 = vunpack.i.l.bf16 %v4187_v62 }
 0x4f3   : > { %3863 = vmatmul.mubr.msk.f32.vlgmr.msra.gmra.mrb[6].mxu1 %vm513_vm0, %v1243_v35 }
 0x4f4   : > { %4041 = vmatpush3.bf16.xpose.msk.msra.mxu1 %vm4746_vm2, %v4916_v56  ;;  %3876 = vmatprep.mubr.msk.f32.mxu1 %vm653_vm1, %v1762_v54  ;;  %v4303_v36 = vpop.eup %4302  ;;  %v4054_v14 = vpack.c.bf16 %v4189_v39, %v4188_v16 }
 0x4f5   : > { %4050 = vmatprep.subr.msk.bf16.mxu1 %vm4746_vm2, %v4048_v13  ;;  %v1952_v29 = vpop.permute.xlu0 %1951  ;;  %v1245_v59 = vmul.f32 %v4303_v36, %v4937_v44 }
 0x4f9   : > { %v2047_v15 = vpop.permute.xlu0 %2046 }
 0x4fb   : > { %3877 = vmatmul.mubr.msk.f32.vlgmr.msra.gmra.mrb[8].mxu1 %vm653_vm1, %v1764_v12 }
 0x4fc   : > { %4053 = vmatpush3.bf16.xpose.msk.msra.mxu1 %vm4746_vm2, %v4048_v13  ;;  %3890 = vmatprep.mubr.msk.f32.mxu1 %vm653_vm1, %v1952_v29 }
 0x501   : > { %v1226_v38 = vpop.xlane.xlu1 %1225 }
 0x502   : > { %4304 = vrcp.f32 %v1226_v38 }
 0x505   : > { %v1859_v30 = vpop.permute.xlu1 %1858 }
 0x509   : > { %v1954_v56 = vpop.permute.xlu1 %1953 }
 0x50a   : > { %3891 = vmatmul.mubr.msk.f32.vlgmr.msra.gmra.mrb[10].mxu1 %vm653_vm1, %v1954_v56 }
 0x50c   : > { %v4305_v52 = vpop.eup %4304 }
 0x50d   : > { %v1244_v41 = vmul.f32 %v4305_v52, %v4954_v37  ;;  %v2049_v44 = vpop.permute.xlu1 %2048 }
 0x50f   : > { %3869 = vmatprep.mubr.msk.f32.mxu0 %vm513_vm0, %v1244_v41 }
 0x510   : > { %3870 = vmatmul.mubr.msk.f32.vlgmr.msra.gmra.mrb[14].mxu0 %vm513_vm0, %v1245_v59 }
 0x511   : > { %4047 = vmatpush3.bf16.xpose.msk.msra.mxu0 %vm4746_vm2, %v4042_v8  ;;  %3883 = vmatprep.mubr.msk.f32.mxu0 %vm653_vm1, %v1857_v46 }
 0x512   : > { %4056 = vmatprep.subr.msk.bf16.mxu0 %vm4746_vm2, %v4054_v14 }
 0x518   : > { %3884 = vmatmul.mubr.msk.f32.vlgmr.msra.gmra.mrb[16].mxu0 %vm653_vm1, %v1859_v30 }
 0x519   : > { %4059 = vmatpush3.bf16.xpose.msk.msra.mxu0 %vm4746_vm2, %v4054_v14  ;;  %3897 = vmatprep.mubr.msk.f32.mxu0 %vm653_vm1, %v2047_v15 }
 0x520   : > { %3898 = vmatmul.mubr.msk.f32.vlgmr.msra.gmra.mrb[18].mxu0 %vm653_vm1, %v2049_v44 }
 0x5be   : > { %v5022_v37 = vpop.f32.mrb[10].mxu0 }
 0x5bf   : > { %v5024_v43 = vpop.f32.mrb[11].mxu0 }
 0x5c2   : > { %v5026_v9 = vpop.f32.mrb[12].mxu0 }
 0x5c3   : > { %v5028_v47 = vpop.f32.mrb[13].mxu0 }
 0x5c6   : > { %v5030_v49 = vpop.f32.mrb[6].mxu1 }
 0x5c7   : > { %v5032_v19 = vpop.f32.mrb[7].mxu1 }
 0x5ce   : > { %v3878_v50 = vpop.f32.mrb[8].mxu1 }
 0x5cf   : > { %v1851_v18 = vadd.f32 %v3878_v50, %v3622_v33  ;;  %v1845_v51 = vpop.f32.mrb[9].mxu1 }
 0x5d0   : > { %v1846_v26 = vadd.f32 %v3621_v1, %v1845_v51 }
 0x5d1   : > { %v2142_v53 = vsel %vm513_vm0, %v1851_v18, -inf }
 0x5d2   : > { %2143 = vmax.xlane.f32.xlu1 %v2142_v53  ;;  %v2139_v32 = vsel %vm513_vm0, %v1846_v26, -inf }
 0x5d3   : > { %2140 = vmax.xlane.f32.xlu0 %v2139_v32 }
 0x5dd   : > { %v3892_v54 = vpop.f32.mrb[10].mxu1 }
 0x5de   : > { %v2035_v57 = vpop.f32.mrb[11].mxu1  ;;  %v2041_v23 = vadd.f32 %v3892_v54, %v3622_v33 }
 0x5df   : > { %v2036_v34 = vadd.f32 %v3621_v1, %v2035_v57 }
 0x5e0   : > { %v2154_v61 = vsel %vm513_vm0, %v2041_v23, -inf }
 0x5e1   : > { %v2151_v20 = vsel %vm513_vm0, %v2036_v34, -inf }
 0x5e2   : > { %2152 = vmax.xlane.f32.xlu1 %v2151_v20 }
 0x5e3   : > { %v5043_v27 = vpop.f32.mrb[14].mxu0 }
 0x5e4   : > { %v5045_v24 = vpop.f32.mrb[15].mxu0 }
 0x5eb   : > { %v3885_v25 = vpop.f32.mrb[16].mxu0 }
 0x5ec   : > { %v1940_v10 = vpop.f32.mrb[17].mxu0  ;;  %v1946_v31 = vadd.f32 %v3885_v25, %v3622_v33 }
 0x5ed   : > { %v1941_v22 = vadd.f32 %v3621_v1, %v1940_v10 }
 0x5ee   : > { %v2148_v45 = vsel %vm513_vm0, %v1946_v31, -inf }
 0x5ef   : > { %v2145_v7 = vsel %vm513_vm0, %v1941_v22, -inf }
 0x5f0   : > { %2146 = vmax.xlane.f32.xlu0 %v2145_v7 }
 0x5f3   : > { %v3899_v48 = vpop.f32.mrb[18].mxu0 }
 0x5f4   : > { %v2130_v11 = vpop.f32.mrb[19].mxu0  ;;  %2149 = vmax.xlane.f32.xlu0 %v2148_v45  ;;  %v2136_v63 = vadd.f32 %v3899_v48, %v3622_v33 }
 0x5f5   : > { %v5049_v55 = vadd.f32 %v3621_v1, %v2130_v11 }
 0x5f6   : > { %v2160_v3 = vsel %vm513_vm0, %v2136_v63, -inf }
 0x5f7   : > { %v2157_v0 = vsel %vm513_vm0, %v5049_v55, -inf }
 0x5f8   : > { %2158 = vmax.xlane.f32.xlu1 %v2157_v0  ;;  %2155 = vmax.xlane.f32.xlu0 %v2154_v61 }
 0x5fc   : > { %2161 = vmax.xlane.f32.xlu0 %v2160_v3 }
 0x609   : > { %4191 = vrot.lane.b32.xlu1 %v4837_v58, %s4446_s27 }
 0x65f   : > { %v2144_v4 = vpop.xlane.xlu1 %2143 }
 0x660   : > { %v2164_v5 = vsub.f32 %v1851_v18, %v2144_v4  ;;  %v2141_v6 = vpop.xlane.xlu0 %2140 }
 0x661   : > { %v2163_v42 = vsub.f32 %v1846_v26, %v2141_v6 }
 0x662   : > { %v2173_v8 = vmul.f32 1.442695, %v2164_v5 }
 0x663   : > { %v2171_v40 = vmul.f32 1.442695, %v2163_v42 }
 0x664   : > { %4306 = vpow2.f32 %v2173_v8 }
 0x665   : > { %4308 = vpow2.f32 %v2171_v40 }
 0x66e   : > { %v5057_v21 = vpop.eup %4306 }
 0x66f   : > { %v4309_v12 = vpop.eup %4308  ;;  %v2153_v60 = vpop.xlane.xlu1 %2152  ;;  %v2190_v35 = vsel %vm513_vm0, %v5057_v21, 0.0 }
 0x670   : > { %v2167_v13 = vsub.f32 %v2036_v34, %v2153_v60  ;;  %2191 = vadd.xlane.f32.xlu0 %v2190_v35  ;;  %v2187_v46 = vsel %vm513_vm0, %v4309_v12, 0.0 }
 0x671   : > { %2188 = vadd.xlane.f32.xlu1 %v2187_v46 }
 0x672   : > { %v2179_v58 = vmul.f32 1.442695, %v2167_v13 }
 0x674   : > { %4310 = vpow2.f32 %v2179_v58 }
 0x67d   : > { %v2147_v29 = vpop.xlane.xlu0 %2146 }
 0x67e   : > { %v4311_v62 = vpop.eup %4310  ;;  %v2165_v38 = vsub.f32 %v1941_v22, %v2147_v29 }
 0x67f   : > { %v2199_v30 = vsel %vm513_vm0, %v4311_v62, 0.0 }
 0x680   : > { %v2175_v56 = vmul.f32 1.442695, %v2165_v38  ;;  %2200 = vadd.xlane.f32.xlu1 %v2199_v30 }
 0x681   : > { %v2150_v36 = vpop.xlane.xlu0 %2149 }
 0x682   : > { %4312 = vpow2.f32 %v2175_v56  ;;  %v2166_v52 = vsub.f32 %v1946_v31, %v2150_v36 }
 0x684   : > { %v2177_v14 = vmul.f32 1.442695, %v2166_v52 }
 0x685   : > { %v2159_v39 = vpop.xlane.xlu1 %2158  ;;  %v2156_v16 = vpop.xlane.xlu0 %2155 }
 0x686   : > { %v2168_v41 = vsub.f32 %v2041_v23, %v2156_v16  ;;  %v2169_v10 = vsub.f32 %v5049_v55, %v2159_v39 }
 0x688   : > { %v2181_v59 = vmul.f32 1.442695, %v2168_v41  ;;  %v2183_v22 = vmul.f32 1.442695, %v2169_v10 }
 0x689   : > { %v4192_v15 = vpop.permute.xlu1 %4191  ;;  %v2162_v44 = vpop.xlane.xlu0 %2161 }
 0x68a   : > { %v4194_v33 = vunpack.i.h.bf16 %v4192_v15  ;;  %v4193_v1 = vunpack.i.l.bf16 %v4192_v15  ;;  %v2170_v50 = vsub.f32 %v2136_v63, %v2162_v44  ;;  %4314 = vpow2.f32 %v2181_v59  ;;  %v643_v15 = vld [vmem:[%s5488_s6] sm:$0xff] }
 0x68b   : > { %4316 = vpow2.f32 %v2177_v14  ;;  %v644_v14 = vld [vmem:[%s5488_s6 + $0x8] sm:$0xff] }
 0x68c   : > { %v4313_v18 = vpop.eup %4312  ;;  %v4060_v51 = vpack.c.bf16 %v4194_v33, %v4193_v1  ;;  %v2185_v26 = vmul.f32 1.442695, %v2170_v50 }
 0x68d   : > { %v2193_v53 = vsel %vm513_vm0, %v4313_v18, 0.0 }
 0x68e   : > { %4061 = vmatprep.subr.bf16.mxu1 %v4060_v51  ;;  %2194 = vadd.xlane.f32.xlu1 %v2193_v53  ;;  %4318 = vpow2.f32 %v2185_v26 }
 0x68f   : > { %4063 = vmatpush3.bf16.msra.mxu1 %v4060_v51  ;;  %4320 = vpow2.f32 %v2183_v22 }
 0x694   : > { %v4315_v32 = vpop.eup %4314 }
 0x695   : > { %v2202_v54 = vsel %vm513_vm0, %v4315_v32, 0.0  ;;  %v4317_v57 = vpop.eup %4316 }
 0x696   : > { %2203 = vadd.xlane.f32.xlu0 %v2202_v54  ;;  %v2196_v34 = vsel %vm513_vm0, %v4317_v57, 0.0 }
 0x698   : > { %v5066_v20 = vpop.eup %4318 }
 0x699   : > { %v2208_v25 = vsel %vm513_vm0, %v5066_v20, 0.0  ;;  %v4321_v31 = vpop.eup %4320 }
 0x69a   : > { %2197 = vadd.xlane.f32.xlu0 %v2196_v34  ;;  %v2205_v7 = vsel %vm513_vm0, %v4321_v31, 0.0 }
 0x69e   : > { %2209 = vadd.xlane.f32.xlu0 %v2208_v25 }
 0x69f   : > { %4201 = vrot.lane.b32.xlu1 %v4843_v17, %s4446_s27 }
 0x6b4   : > { %4196 = vrot.lane.b32.xlu0 %v4856_v2, %s4446_s27 }
 0x6c3   : > { %2206 = vadd.xlane.f32.xlu1 %v2205_v7 }
 0x6d4   : > { %4206 = vrot.lane.b32.xlu1 %v4848_v28, %s4446_s27  ;;  %s495_s27 = sld [smem:[#allocation2 + %s4528_s30]] }
 0x6fd   : > { %v2192_v23 = vpop.xlane.xlu0 %2191 }
 0x6fe   : > { %4322 = vrcp.f32 %v2192_v23  ;;  %v2189_v48 = vpop.xlane.xlu1 %2188 }
 0x6ff   : > { %4324 = vrcp.f32 %v2189_v48 }
 0x708   : > { %v4323_v45 = vpop.eup %4322 }
 0x709   : > { %v4325_v17 = vpop.eup %4324  ;;  %v2220_v55 = vmul.f32 %v4323_v45, %v5057_v21 }
 0x70a   : > { %v2219_v11 = vmul.f32 %v4325_v17, %v4309_v12 }
 0x70c   : > { %3904 = vmatprep.mubr.msk.f32.mxu1 %vm513_vm0, %v2219_v11 }
 0x70d   : > { %v2201_v63 = vpop.xlane.xlu1 %2200  ;;  %3905 = vmatmul.mubr.msk.f32.vlgmr.msra.gmra.mrb[12].mxu1 %vm513_vm0, %v2220_v55 }
 0x70e   : > { %4326 = vrcp.f32 %v2201_v63 }
 0x718   : > { %v4327_v2 = vpop.eup %4326 }
 0x719   : > { %v2223_v0 = vmul.f32 %v4327_v2, %v4311_v62 }
 0x71b   : > { %v2195_v61 = vpop.xlane.xlu1 %2194  ;;  %3918 = vmatprep.mubr.msk.f32.mxu1 %vm513_vm0, %v2223_v0 }
 0x71c   : > { %4328 = vrcp.f32 %v2195_v61 }
 0x71f   : > { %v4202_v28 = vpop.permute.xlu1 %4201 }
 0x720   : > { %v4204_v3 = vunpack.i.h.bf16 %v4202_v28  ;;  %v4203_v4 = vunpack.i.l.bf16 %v4202_v28 }
 0x722   : > { %v4068_v5 = vpack.c.bf16 %v4204_v3, %v4203_v4 }
 0x723   : > { %v2204_v6 = vpop.xlane.xlu0 %2203 }
 0x724   : > { %4069 = vmatprep.subr.bf16.mxu1 %v4068_v5  ;;  %4330 = vrcp.f32 %v2204_v6 }
 0x725   : > { %4071 = vmatpush3.bf16.msra.mxu1 %v4068_v5 }
 0x726   : > { %v4329_v42 = vpop.eup %4328  ;;  %3928 = vmatprep.subr.mxu1 %v644_v14 }
 0x727   : > { %v2221_v8 = vmul.f32 %v4329_v42, %v4313_v18  ;;  %v2198_v40 = vpop.xlane.xlu0 %2197 }
 0x728   : > { %4332 = vrcp.f32 %v2198_v40 }
 0x729   : > { %3911 = vmatprep.mubr.msk.f32.mxu0 %vm513_vm0, %v2221_v8 }
 0x72b   : > { %v2210_v21 = vpop.xlane.xlu0 %2209 }
 0x72c   : > { %4334 = vrcp.f32 %v2210_v21 }
 0x72e   : > { %v4331_v12 = vpop.eup %4330 }
 0x72f   : > { %v2224_v60 = vmul.f32 %v4331_v12, %v4315_v32  ;;  %v4197_v35 = vpop.permute.xlu0 %4196 }
 0x730   : > { %v4199_v13 = vunpack.i.h.bf16 %v4197_v35  ;;  %v4198_v46 = vunpack.i.l.bf16 %v4197_v35 }
 0x731   : > { %3919 = vmatmul.mubr.msk.f32.vlgmr.msra.gmra.mrb[14].mxu1 %vm513_vm0, %v2224_v60 }
 0x732   : > { %v4064_v58 = vpack.c.bf16 %v4199_v13, %v4198_v46  ;;  %v4333_v29 = vpop.eup %4332  ;;  %3929 = vmatpush3.msra.mxu1 %v644_v14  ;;  %v3010_v46 = vld [vmem:[%s5491_s9] sm:$0xff] }
 0x733   : > { %v2222_v62 = vmul.f32 %v4333_v29, %v4317_v57  ;;  %3942 = vmatprep.subr.mxu1 %v643_v15 }
 0x734   : > { %4065 = vmatprep.subr.bf16.mxu0 %v4064_v58 }
 0x735   : > { %4067 = vmatpush3.bf16.msra.mxu0 %v4064_v58  ;;  %v3011_v58 = vld [vmem:[%s5491_s9 + $0x8] sm:$0xff] }
 0x736   : > { %v4335_v39 = vpop.eup %4334  ;;  %v4076_v29 = vpack.c.bf16 %v3011_v58, %v3010_v46 }
 0x737   : > { %v2226_v59 = vmul.f32 %v4335_v39, %v5066_v20 }
 0x738   : > { %3912 = vmatmul.mubr.msk.f32.vlgmr.msra.gmra.mrb[20].mxu0 %vm513_vm0, %v2222_v62 }
 0x750   : > { %v2207_v38 = vpop.xlane.xlu1 %2206 }
 0x751   : > { %4336 = vrcp.f32 %v2207_v38 }
 0x754   : > { %v4207_v30 = vpop.permute.xlu1 %4206 }
 0x755   : > { %v4209_v56 = vunpack.i.h.bf16 %v4207_v30  ;;  %v4208_v36 = vunpack.i.l.bf16 %v4207_v30 }
 0x757   : > { %v4072_v52 = vpack.c.bf16 %v4209_v56, %v4208_v36 }
 0x759   : > { %4073 = vmatprep.subr.bf16.mxu0 %v4072_v52 }
 0x75a   : > { %4075 = vmatpush3.bf16.msra.mxu0 %v4072_v52 }
 0x75b   : > { %v4337_v16 = vpop.eup %4336  ;;  %4077 = vmatprep.subr.bf16.mxu0 %v4076_v29 }
 0x75c   : > { %v2225_v41 = vmul.f32 %v4337_v16, %v4321_v31 }
 0x75e   : > { %3925 = vmatprep.mubr.msk.f32.mxu0 %vm513_vm0, %v2225_v41 }
 0x75f   : > { %3926 = vmatmul.mubr.msk.f32.vlgmr.msra.gmra.mrb[22].mxu0 %vm513_vm0, %v2226_v59 }
 0x760   : > { %4079 = vmatpush3.bf16.msra.mxu0 %v4076_v29 }
 0x7e0   : > { %v3906_v44 = vpop.f32.mrb[12].mxu1 }
 0x7e1   : > { %v2305_v33 = vpop.f32.mrb[13].mxu1 }
 0x7e2   : > { %3930 = vmatprep.mubr.msk.f32.mxu1 %vm653_vm1, %v2305_v33  ;;  %v5190_v33 = vstv %s495_s27 }
 0x7e3   : > { %3931 = vmatmul.mubr.msk.f32.vlgmr.msra.gmra.mrb[16].mxu1 %vm653_vm1, %v3906_v44 }
 0x7e4   : > { %3943 = vmatpush3.msra.mxu1 %v643_v15 }
 0x804   : > { %v3920_v1 = vpop.f32.mrb[14].mxu1 }
 0x805   : > { %v2479_v50 = vpop.f32.mrb[15].mxu1 }
 0x80b   : > { %v3913_v18 = vpop.f32.mrb[20].mxu0 }
 0x80c   : > { %v2392_v51 = vpop.f32.mrb[21].mxu0 }
 0x80d   : > { %3933 = vmatprep.mubr.msk.f32.mxu1 %vm653_vm1, %v2392_v51 }
 0x80e   : > { %3934 = vmatmul.mubr.msk.f32.gmra.mrb[18].mxu1 %vm653_vm1, %v3913_v18 }
 0x80f   : > { %3936 = vmatprep.mubr.msk.f32.mxu1 %vm653_vm1, %v2479_v50 }
 0x812   : > { %3937 = vmatmul.mubr.msk.f32.gmra.mrb[20].mxu1 %vm653_vm1, %v3920_v1  ;;  %v2978_v1 = vlaneseq }
 0x832   : > { %v3927_v26 = vpop.f32.mrb[22].mxu0 }
 0x833   : > { %v2566_v53 = vpop.f32.mrb[23].mxu0 }
 0x834   : > { %3939 = vmatprep.mubr.msk.f32.mxu1 %vm653_vm1, %v2566_v53  ;;  %v2848_v53 = vld [vmem:[%s5490_s8] sm:$0x1] }
 0x835   : > { %3940 = vmatmul.mubr.msk.f32.gmra.mrb[22].mxu1 %vm653_vm1, %v3927_v26 }
 0x836   : > { %3944 = vmatprep.mubr.msk.f32.mxu1 %vm653_vm1, %v5024_v43 }
 0x839   : > { %3945 = vmatmul.mubr.msk.f32.vlgmr.msra.gmra.mrb[16].mxu1 %vm653_vm1, %v5022_v37  ;;  %v3663_v37 = vld [vmem:[%s5489_s7] ss:$0 sm:$0xff] }
 0x83a   : > { %3947 = vmatprep.mubr.msk.f32.mxu1 %vm653_vm1, %v5028_v47 }
 0x83d   : > { %3948 = vmatmul.mubr.msk.f32.gmra.mrb[18].mxu1 %vm653_vm1, %v5026_v9 }
 0x83e   : > { %3950 = vmatprep.mubr.msk.f32.mxu1 %vm653_vm1, %v5032_v19 }
 0x841   : > { %3951 = vmatmul.mubr.msk.f32.gmra.mrb[20].mxu1 %vm653_vm1, %v5030_v49 }
 0x842   : > { %3953 = vmatprep.mubr.msk.f32.mxu1 %vm653_vm1, %v5045_v24 }
 0x845   : > { %3954 = vmatmul.mubr.msk.f32.gmra.mrb[22].mxu1 %vm653_vm1, %v5043_v27 }
 0x90c   : > { %v3946_v43 = vpop.f32.mrb[16].mxu1 }
 0x90d   : > { %v5121_v47 = vadd.f32 %v3946_v43, %v3663_v37  ;;  %v2794_v9 = vpop.f32.mrb[17].mxu1 }
 0x90e   : > { %v5123_v32 = vadd.f32 %v3663_v37, %v2794_v9 }
 0x90f   : > { %v2860_v19 = vsel %vm513_vm0, %v5121_v47, 0.0  ;;  %v2891_v27 = vmul.f32 %v5121_v47, %v5121_v47 }
 0x910   : > { %2861 = vadd.xlane.f32.xlu1 %v2860_v19  ;;  %v3949_v49 = vpop.f32.mrb[18].mxu1  ;;  %v2857_v24 = vsel %vm513_vm0, %v5123_v32, 0.0  ;;  %v2890_v10 = vmul.f32 %v5123_v32, %v5123_v32 }
 0x911   : > { %2858 = vadd.xlane.f32.xlu0 %v2857_v24  ;;  %v2804_v54 = vpop.f32.mrb[19].mxu1  ;;  %v2901_v20 = vsel %vm513_vm0, %v2891_v27, 0.0  ;;  %v5140_v7 = vadd.f32 %v3949_v49, %v3663_v37  ;;  %v2850_v49 = vmul.f32 %v5190_v33, %v2848_v53  ;;  %v2851_v24 = vld [vmem:[%s5490_s8 + $0x1] sm:$0x1]  ;;  %v2979_v27 = vshrl.u32 %v2978_v1, 7 }
 0x912   : > { %v5131_v57 = vadd.f32 %v3663_v37, %v2804_v54  ;;  %v2898_v45 = vsel %vm513_vm0, %v2890_v10, 0.0 }
 0x913   : > { %v2866_v55 = vsel %vm513_vm0, %v5140_v7, 0.0  ;;  %v2893_v2 = vmul.f32 %v5140_v7, %v5140_v7 }
 0x914   : > { %v3952_v34 = vpop.f32.mrb[20].mxu1  ;;  %v2863_v25 = vsel %vm513_vm0, %v5131_v57, 0.0  ;;  %v2892_v22 = vmul.f32 %v5131_v57, %v5131_v57 }
 0x915   : > { %2902 = vadd.xlane.f32.xlu0 %v2901_v20  ;;  %2864 = vadd.xlane.f32.xlu1 %v2863_v25  ;;  %v2814_v31 = vpop.f32.mrb[21].mxu1  ;;  %v5154_v61 = vadd.f32 %v3952_v34, %v3663_v37  ;;  %v2907_v3 = vsel %vm513_vm0, %v2893_v2, 0.0 }
 0x916   : > { %v5142_v23 = vadd.f32 %v3663_v37, %v2814_v31  ;;  %v2904_v17 = vsel %vm513_vm0, %v2892_v22, 0.0  ;;  %v2852_v31 = vadd.f32 %v2851_v24, %v2850_v49 }
 0x917   : > { %v2872_v5 = vsel %vm513_vm0, %v5154_v61, 0.0  ;;  %v2895_v42 = vmul.f32 %v5154_v61, %v5154_v61 }
 0x918   : > { %v3955_v48 = vpop.f32.mrb[22].mxu1  ;;  %v2869_v63 = vsel %vm513_vm0, %v5142_v23, 0.0  ;;  %v2894_v0 = vmul.f32 %v5142_v23, %v5142_v23 }
 0x919   : > { %2899 = vadd.xlane.f32.xlu0 %v2898_v45  ;;  %2905 = vadd.xlane.f32.xlu1 %v2904_v17  ;;  %v2824_v11 = vpop.f32.mrb[23].mxu1  ;;  %v5168_v40 = vadd.f32 %v3955_v48, %v3663_v37  ;;  %v2913_v21 = vsel %vm513_vm0, %v2895_v42, 0.0  ;;  %v2853_v48 = vld [vmem:[%s5490_s8 + $0x2] sm:$0x1]  ;;  %v5208_v45 = vsub.s32 0, %v2979_v27 }
 0x91a   : > { %v5156_v28 = vadd.f32 %v3663_v37, %v2824_v11  ;;  %v2910_v4 = vsel %vm513_vm0, %v2894_v0, 0.0  ;;  %v2855_v42 = vld [vmem:[%s5490_s8 + $0x3] sm:$0x1] }
 0x91b   : > { %v2878_v60 = vsel %vm513_vm0, %v5168_v40, 0.0  ;;  %v2897_v35 = vmul.f32 %v5168_v40, %v5168_v40 }
 0x91c   : > { %v2875_v6 = vsel %vm513_vm0, %v5156_v28, 0.0  ;;  %v2896_v8 = vmul.f32 %v5156_v28, %v5156_v28 }
 0x91d   : > { %2867 = vadd.xlane.f32.xlu0 %v2866_v55  ;;  %2870 = vadd.xlane.f32.xlu1 %v2869_v63  ;;  %v2919_v13 = vsel %vm513_vm0, %v2897_v35, 0.0 }
 0x91e   : > { %v2916_v12 = vsel %vm513_vm0, %v2896_v8, 0.0  ;;  %v5220_v8 = vrot.slane %v2852_v31, %v5208_v45 }
 0x921   : > { %2908 = vadd.xlane.f32.xlu0 %v2907_v3  ;;  %2911 = vadd.xlane.f32.xlu1 %v2910_v4  ;;  %v2854_v3 = vmul.f32 %v2853_v48, %v5190_v33 }
 0x923   : > { %v2856_v58 = vadd.f32 %v2855_v42, %v2854_v3  ;;  %v4390_v3 = vld [vmem:[%s4583_s21 + $0x20] sm:$0xff] }
 0x925   : > { %2873 = vadd.xlane.f32.xlu0 %v2872_v5  ;;  %2876 = vadd.xlane.f32.xlu1 %v2875_v6  ;;  %v5237_v1 = vrot.slane %v2856_v58, %v5208_v45 }
 0x929   : > { %2914 = vadd.xlane.f32.xlu0 %v2913_v21  ;;  %2917 = vadd.xlane.f32.xlu1 %v2916_v12 }
 0x92d   : > { %2879 = vadd.xlane.f32.xlu0 %v2878_v60 }
 0x931   : > { %2920 = vadd.xlane.f32.xlu0 %v2919_v13 }
 0x99d   : > { %v2862_v62 = vpop.xlane.xlu1 %2861 }
 0x99e   : > { %v2859_v38 = vpop.xlane.xlu0 %2858  ;;  %v2883_v30 = vmul.f32 0.0625, %v2862_v62 }
 0x99f   : > { %v5184_v56 = vmul.f32 0.0625, %v2859_v38 }
 0x9a0   : > { %v2931_v39 = vmul.f32 %v2883_v30, %v2883_v30  ;;  %v2947_v4 = vsub.f32 %v5121_v47, %v2883_v30 }
 0x9a1   : > { %v2930_v14 = vmul.f32 %v5184_v56, %v5184_v56  ;;  %v2946_v47 = vsub.f32 %v5123_v32, %v5184_v56 }
 0x9a2   : > { %v2903_v36 = vpop.xlane.xlu0 %2902  ;;  %v2865_v52 = vpop.xlane.xlu1 %2864 }
 0x9a3   : > { %v2923_v16 = vmul.f32 0.0625, %v2903_v36  ;;  %v5186_v41 = vmul.f32 0.0625, %v2865_v52 }
 0x9a5   : > { %v2939_v59 = vsub.f32 %v2923_v16, %v2931_v39  ;;  %v2932_v18 = vmul.f32 %v5186_v41, %v5186_v41  ;;  %v2948_v29 = vsub.f32 %v5131_v57, %v5186_v41 }
 0x9a6   : > { %v2900_v15 = vpop.xlane.xlu0 %2899  ;;  %v2906_v44 = vpop.xlane.xlu1 %2905 }
 0x9a7   : > { %v2955_v50 = vadd.f32 1e-05, %v2939_v59  ;;  %v2922_v51 = vmul.f32 0.0625, %v2900_v15  ;;  %v2924_v26 = vmul.f32 0.0625, %v2906_v44 }
 0x9a9   : > { %4338 = vrsqrt.f32 %v2955_v50  ;;  %v2938_v37 = vsub.f32 %v2922_v51, %v2930_v14  ;;  %v2940_v43 = vsub.f32 %v2924_v26, %v2932_v18  ;;  %v4386_v50 = vld [vmem:[%s4583_s21 + $0x8] sm:$0xff] }
 0x9aa   : > { %v2868_v9 = vpop.xlane.xlu0 %2867  ;;  %v2871_v19 = vpop.xlane.xlu1 %2870 }
 0x9ab   : > { %v2954_v54 = vadd.f32 1e-05, %v2938_v37  ;;  %v2956_v34 = vadd.f32 1e-05, %v2940_v43  ;;  %v5201_v20 = vmul.f32 0.0625, %v2868_v9  ;;  %v5203_v25 = vmul.f32 0.0625, %v2871_v19 }
 0x9ac   : > { %v4387_v43 = vld [vmem:[%s4583_s21] sm:$0xff]  ;;  %v4388_v19 = vld [vmem:[%s4583_s21 + $0x10] sm:$0xff] }
 0x9ad   : > { %4340 = vrsqrt.f32 %v2954_v54  ;;  %v2933_v17 = vmul.f32 %v5201_v20, %v5201_v20  ;;  %v2934_v11 = vmul.f32 %v5203_v25, %v5203_v25  ;;  %v2949_v24 = vsub.f32 %v5140_v7, %v5201_v20 }
 0x9ae   : > { %4342 = vrsqrt.f32 %v2956_v34  ;;  %v2909_v10 = vpop.xlane.xlu0 %2908  ;;  %v2912_v22 = vpop.xlane.xlu1 %2911 }
 0x9af   : > { %v2925_v55 = vmul.f32 0.0625, %v2909_v10  ;;  %v2926_v63 = vmul.f32 0.0625, %v2912_v22  ;;  %v2950_v10 = vsub.f32 %v5142_v23, %v5203_v25 }
 0x9b1   : > { %v2941_v2 = vsub.f32 %v2925_v55, %v2933_v17  ;;  %v2942_v0 = vsub.f32 %v2926_v63, %v2934_v11 }
 0x9b2   : > { %v2874_v5 = vpop.xlane.xlu0 %2873  ;;  %v2877_v6 = vpop.xlane.xlu1 %2876 }
 0x9b3   : > { %v4339_v21 = vpop.eup %4338  ;;  %v2957_v12 = vadd.f32 1e-05, %v2941_v2  ;;  %v2958_v60 = vadd.f32 1e-05, %v2942_v0  ;;  %v5222_v35 = vmul.f32 0.0625, %v2874_v5  ;;  %v5224_v13 = vmul.f32 0.0625, %v2877_v6 }
 0x9b4   : > { %v2971_v46 = vmul.f32 %v4339_v21, %v2947_v4  ;;  %v4389_v2 = vld [vmem:[%s4583_s21 + $0x18] sm:$0xff] }
 0x9b5   : > { %4344 = vrsqrt.f32 %v2957_v12  ;;  %v2935_v52 = vmul.f32 %v5222_v35, %v5222_v35  ;;  %v2936_v39 = vmul.f32 %v5224_v13, %v5224_v13  ;;  %v2951_v5 = vsub.f32 %v5154_v61, %v5222_v35 }
 0x9b6   : > { %4346 = vrsqrt.f32 %v2958_v60  ;;  %v2915_v62 = vpop.xlane.xlu0 %2914  ;;  %v2918_v38 = vpop.xlane.xlu1 %2917  ;;  %v2983_v30 = vmul.f32 %v5220_v8, %v2971_v46  ;;  %v2952_v21 = vsub.f32 %v5156_v28, %v5224_v13  ;;  %v4392_v28 = vld [vmem:[%s4583_s21 + $0x30] sm:$0xff] }
 0x9b7   : > { %v4341_v36 = vpop.eup %4340  ;;  %v2927_v16 = vmul.f32 0.0625, %v2915_v62  ;;  %v2928_v59 = vmul.f32 0.0625, %v2918_v38 }
 0x9b8   : > { %v4343_v32 = vpop.eup %4342  ;;  %v2970_v56 = vmul.f32 %v4341_v36, %v2946_v47  ;;  %v2991_v18 = vadd.f32 %v4386_v50, %v2983_v30  ;;  %v4391_v47 = vld [vmem:[%s4583_s21 + $0x28] sm:$0xff] }
 0x9b9   : > { %v2943_v57 = vsub.f32 %v2927_v16, %v2935_v52  ;;  %v2944_v41 = vsub.f32 %v2928_v59, %v2936_v39  ;;  %v2972_v14 = vmul.f32 %v4343_v32, %v2948_v29  ;;  %v4393_v16 = vld [vmem:[%s4583_s21 + $0x38] sm:$0xff]  ;;  %v3188_v32 = vld [vmem:[%s5493_s11] sm:$0xff] }
 0x9ba   : > { %v2880_v15 = vpop.xlane.xlu0 %2879  ;;  %v2982_v44 = vmul.f32 %v5220_v8, %v2970_v56  ;;  %v5251_v48 = vadd.f32 %v5237_v1, %v2991_v18  ;;  %v3189_v56 = vld [vmem:[%s5493_s11 + $0x8] sm:$0xff] }
 0x9bb   : > { %v2959_v51 = vadd.f32 1e-05, %v2943_v57  ;;  %v2960_v26 = vadd.f32 1e-05, %v2944_v41  ;;  %v2889_v53 = vmul.f32 0.0625, %v2880_v15  ;;  %v2984_v37 = vmul.f32 %v5220_v8, %v2972_v14  ;;  %v3191_v41 = vld [vmem:[%s5493_s11 + $0x18] sm:$0xff] }
 0x9bc   : > { %v2990_v9 = vadd.f32 %v4387_v43, %v2982_v44  ;;  %v4080_v57 = vpack.c.bf16 %v3189_v56, %v3188_v32  ;;  %v3664_v15 = vld [vmem:[%s5492_s10] ss:$0 sm:$0xff] }
 0x9bd   : > { %4348 = vrsqrt.f32 %v2959_v51  ;;  %v2992_v49 = vadd.f32 %v4388_v19, %v2984_v37  ;;  %v2937_v22 = vmul.f32 %v2889_v53, %v2889_v53  ;;  %v2953_v62 = vsub.f32 %v5168_v40, %v2889_v53 }
 0x9be   : > { %4350 = vrsqrt.f32 %v2960_v26  ;;  %v2921_v27 = vpop.xlane.xlu0 %2920  ;;  %v5246_v54 = vadd.f32 %v5237_v1, %v2990_v9  ;;  %4081 = vmatprep.subr.bf16.mxu0 %v4080_v57 }
 0x9bf   : > { %v4345_v34 = vpop.eup %4344  ;;  %v2929_v31 = vmul.f32 0.0625, %v2921_v27  ;;  %v5256_v7 = vadd.f32 %v5237_v1, %v2992_v49 }
 0x9c0   : > { %v4347_v17 = vpop.eup %4346  ;;  %3960 = vmatprep.mubr.msk.f32.mxu0 %vm513_vm0, %v5246_v54  ;;  %v2973_v20 = vmul.f32 %v4345_v34, %v2949_v24 }
 0x9c1   : > { %v2945_v11 = vsub.f32 %v2929_v31, %v2937_v22  ;;  %3961 = vmatmul.mubr.msk.f32.vlgmr.msra.gmra.mrb[24].mxu0 %vm513_vm0, %v5251_v48  ;;  %v2974_v55 = vmul.f32 %v4347_v17, %v2950_v10 }
 0x9c2   : > { %3963 = vmatprep.mubr.msk.f32.mxu0 %vm513_vm0, %v5256_v7  ;;  %v2985_v23 = vmul.f32 %v5220_v8, %v2973_v20  ;;  %4083 = vmatpush3.bf16.msra.mxu0 %v4080_v57 }
 0x9c3   : > { %v2961_v25 = vadd.f32 1e-05, %v2945_v11  ;;  %v2986_v63 = vmul.f32 %v5220_v8, %v2974_v55 }
 0x9c4   : > { %v2993_v0 = vadd.f32 %v4389_v2, %v2985_v23 }
 0x9c5   : > { %4352 = vrsqrt.f32 %v2961_v25  ;;  %v2994_v4 = vadd.f32 %v4390_v3, %v2986_v63 }
 0x9c6   : > { %v5269_v6 = vadd.f32 %v5237_v1, %v2993_v0 }
 0x9c7   : > { %v4349_v42 = vpop.eup %4348  ;;  %v5274_v12 = vadd.f32 %v5237_v1, %v2994_v4 }
 0x9c8   : > { %v4351_v60 = vpop.eup %4350  ;;  %3964 = vmatmul.mubr.msk.f32.gmra.mrb[26].mxu0 %vm513_vm0, %v5269_v6  ;;  %v2975_v46 = vmul.f32 %v4349_v42, %v2951_v5 }
 0x9c9   : > { %3966 = vmatprep.mubr.msk.f32.mxu0 %vm513_vm0, %v5274_v12  ;;  %v2976_v61 = vmul.f32 %v4351_v60, %v2952_v21 }
 0x9ca   : > { %v2987_v35 = vmul.f32 %v5220_v8, %v2975_v46 }
 0x9cb   : > { %v2988_v58 = vmul.f32 %v5220_v8, %v2976_v61 }
 0x9cc   : > { %v2995_v29 = vadd.f32 %v4391_v47, %v2987_v35 }
 0x9cd   : > { %v2996_v13 = vadd.f32 %v4392_v28, %v2988_v58 }
 0x9ce   : > { %v5286_v38 = vadd.f32 %v5237_v1, %v2995_v29 }
 0x9cf   : > { %v4353_v30 = vpop.eup %4352  ;;  %v5289_v36 = vadd.f32 %v5237_v1, %v2996_v13 }
 0x9d0   : > { %3967 = vmatmul.mubr.msk.f32.gmra.mrb[28].mxu0 %vm513_vm0, %v5286_v38  ;;  %v2977_v52 = vmul.f32 %v4353_v30, %v2953_v62 }
 0x9d1   : > { %3969 = vmatprep.mubr.msk.f32.mxu0 %vm513_vm0, %v5289_v36 }
 0x9d2   : > { %v2989_v39 = vmul.f32 %v5220_v8, %v2977_v52  ;;  %v3190_v8 = vld [vmem:[%s5493_s11 + $0x10] sm:$0xff] }
 0x9d3   : > { %v4084_v14 = vpack.c.bf16 %v3191_v41, %v3190_v8 }
 0x9d4   : > { %v2997_v59 = vadd.f32 %v4393_v16, %v2989_v39 }
 0x9d5   : > { %4085 = vmatprep.subr.bf16.mxu0 %v4084_v14 }
 0x9d6   : > { %v5298_v40 = vadd.f32 %v5237_v1, %v2997_v59  ;;  %4087 = vmatpush3.bf16.msra.mxu0 %v4084_v14 }
 0x9d8   : > { %3970 = vmatmul.mubr.msk.f32.gmra.mrb[30].mxu0 %vm513_vm0, %v5298_v40 }
 0xa94   : > { %v3962_v44 = vpop.f32.mrb[24].mxu0 }
 0xa95   : > { %v3115_v1 = vadd.f32 %v3962_v44, %v3664_v15  ;;  %v3109_v50 = vpop.f32.mrb[25].mxu0 }
 0xa96   : > { %v3110_v18 = vadd.f32 %v3664_v15, %v3109_v50  ;;  %v3673_v50 = vld [vmem:[%s5494_s12] ss:$0 sm:$0xff] }
 0xa97   : > { %v3157_v51 = vmul.f32 0.70710677, %v3115_v1  ;;  %v3149_v55 = vmul.f32 0.5, %v3115_v1 }
 0xa98   : > { %v3156_v26 = vmul.f32 0.70710677, %v3110_v18  ;;  %v3148_v17 = vmul.f32 0.5, %v3110_v18 }
 0xa99   : > { %4354 = verf.f32 %v3157_v51 }
 0xa9a   : > { %4356 = verf.f32 %v3156_v26 }
 0xa9b   : > { %v3965_v53 = vpop.f32.mrb[26].mxu0 }
 0xa9c   : > { %v3125_v37 = vadd.f32 %v3965_v53, %v3664_v15  ;;  %v3119_v43 = vpop.f32.mrb[27].mxu0 }
 0xa9d   : > { %v3120_v9 = vadd.f32 %v3664_v15, %v3119_v43 }
 0xa9e   : > { %v3159_v19 = vmul.f32 0.70710677, %v3125_v37  ;;  %v3151_v61 = vmul.f32 0.5, %v3125_v37 }
 0xa9f   : > { %v3158_v49 = vmul.f32 0.70710677, %v3120_v9  ;;  %v3150_v42 = vmul.f32 0.5, %v3120_v9 }
 0xaa0   : > { %4358 = verf.f32 %v3159_v19 }
 0xaa1   : > { %4360 = verf.f32 %v3158_v49 }
 0xaa3   : > { %v4355_v24 = vpop.eup %4354  ;;  %v3968_v27 = vpop.f32.mrb[28].mxu0 }
 0xaa4   : > { %v4357_v34 = vpop.eup %4356  ;;  %v3173_v10 = vadd.f32 1.0, %v4355_v24  ;;  %v3135_v22 = vadd.f32 %v3968_v27, %v3664_v15  ;;  %v3129_v31 = vpop.f32.mrb[29].mxu0 }
 0xaa5   : > { %v3172_v20 = vadd.f32 1.0, %v4357_v34  ;;  %v3130_v11 = vadd.f32 %v3664_v15, %v3129_v31 }
 0xaa6   : > { %v3161_v23 = vmul.f32 0.70710677, %v3135_v22  ;;  %v3181_v2 = vmul.f32 %v3173_v10, %v3149_v55  ;;  %v3153_v16 = vmul.f32 0.5, %v3135_v22 }
 0xaa7   : > { %v3180_v25 = vmul.f32 %v3172_v20, %v3148_v17  ;;  %v3160_v63 = vmul.f32 0.70710677, %v3130_v11  ;;  %v3152_v52 = vmul.f32 0.5, %v3130_v11 }
 0xaa8   : > { %4362 = verf.f32 %v3161_v23 }
 0xaa9   : > { %4364 = verf.f32 %v3160_v63  ;;  %3980 = vmatprep.mubr.msk.f32.mxu0 %vm3199_vm3, %v3180_v25 }
 0xaaa   : > { %v4359_v0 = vpop.eup %4358  ;;  %3981 = vmatmul.mubr.msk.f32.vlgmr.msra.gmra.mrb[32].mxu0 %vm3199_vm3, %v3181_v2 }
 0xaab   : > { %v4361_v3 = vpop.eup %4360  ;;  %v3175_v4 = vadd.f32 1.0, %v4359_v0  ;;  %v3971_v5 = vpop.f32.mrb[30].mxu0 }
 0xaac   : > { %v3174_v21 = vadd.f32 1.0, %v4361_v3  ;;  %v3145_v60 = vadd.f32 %v3971_v5, %v3664_v15  ;;  %v3139_v46 = vpop.f32.mrb[31].mxu0 }
 0xaad   : > { %v3140_v35 = vadd.f32 %v3664_v15, %v3139_v46  ;;  %v3183_v29 = vmul.f32 %v3175_v4, %v3151_v61 }
 0xaae   : > { %v3182_v58 = vmul.f32 %v3174_v21, %v3150_v42  ;;  %v3163_v47 = vmul.f32 0.70710677, %v3145_v60  ;;  %v3155_v15 = vmul.f32 0.5, %v3145_v60 }
 0xaaf   : > { %v3162_v28 = vmul.f32 0.70710677, %v3140_v35  ;;  %v3154_v41 = vmul.f32 0.5, %v3140_v35 }
 0xab0   : > { %4366 = verf.f32 %v3163_v47  ;;  %3983 = vmatprep.mubr.msk.f32.mxu0 %vm3199_vm3, %v3182_v58 }
 0xab1   : > { %4368 = verf.f32 %v3162_v28  ;;  %3984 = vmatmul.mubr.msk.f32.gmra.mrb[34].mxu0 %vm3199_vm3, %v3183_v29 }
 0xab2   : > { %v4363_v13 = vpop.eup %4362 }
 0xab3   : > { %v4365_v62 = vpop.eup %4364  ;;  %v3177_v30 = vadd.f32 1.0, %v4363_v13 }
 0xab4   : > { %v3176_v39 = vadd.f32 1.0, %v4365_v62 }
 0xab5   : > { %v3185_v32 = vmul.f32 %v3177_v30, %v3153_v16 }
 0xab6   : > { %v3184_v59 = vmul.f32 %v3176_v39, %v3152_v52 }
 0xab8   : > { %3986 = vmatprep.mubr.msk.f32.mxu0 %vm3199_vm3, %v3184_v59 }
 0xab9   : > { %3987 = vmatmul.mubr.msk.f32.gmra.mrb[36].mxu0 %vm3199_vm3, %v3185_v32 }
 0xaba   : > { %v4367_v56 = vpop.eup %4366 }
 0xabb   : > { %v4369_v57 = vpop.eup %4368  ;;  %v3179_v8 = vadd.f32 1.0, %v4367_v56 }
 0xabc   : > { %v3178_v14 = vadd.f32 1.0, %v4369_v57 }
 0xabd   : > { %v3187_v1 = vmul.f32 %v3179_v8, %v3155_v15 }
 0xabe   : > { %v3186_v44 = vmul.f32 %v3178_v14, %v3154_v41 }
 0xac0   : > { %3989 = vmatprep.mubr.msk.f32.mxu0 %vm3199_vm3, %v3186_v44 }
 0xac1   : > { %3990 = vmatmul.mubr.msk.f32.gmra.mrb[38].mxu0 %vm3199_vm3, %v3187_v1 }
 0xb7d   : > { %v3982_v18 = vpop.f32.mrb[32].mxu0 }
 0xb7e   : > { %v5328_v51 = vadd.f32 %v3982_v18, %v3673_v50  ;;  %v3290_v26 = vpop.f32.mrb[33].mxu0 }
 0xb7f   : > { %v5330_v53 = vadd.f32 %v3673_v50, %v3290_v26 }
 0xb80   : > { %v3340_v37 = vsel %vm513_vm0, %v5328_v51, 0.0  ;;  %v3370_v43 = vmul.f32 %v5328_v51, %v5328_v51 }
 0xb81   : > { %3341 = vadd.xlane.f32.xlu0 %v3340_v37  ;;  %v3337_v9 = vsel %vm513_vm0, %v5330_v53, 0.0  ;;  %v3369_v19 = vmul.f32 %v5330_v53, %v5330_v53 }
 0xb82   : > { %3338 = vadd.xlane.f32.xlu1 %v3337_v9  ;;  %v3380_v24 = vsel %vm513_vm0, %v3370_v43, 0.0 }
 0xb83   : > { %v3377_v10 = vsel %vm513_vm0, %v3369_v19, 0.0 }
 0xb84   : > { %v3985_v49 = vpop.f32.mrb[34].mxu0 }
 0xb85   : > { %v5341_v27 = vadd.f32 %v3985_v49, %v3673_v50  ;;  %3381 = vadd.xlane.f32.xlu0 %v3380_v24  ;;  %v3300_v34 = vpop.f32.mrb[35].mxu0  ;;  %v3333_v24 = vld [vmem:[%s5495_s13 + $0x2] sm:$0x1] }
 0xb86   : > { %v5344_v22 = vadd.f32 %v3673_v50, %v3300_v34  ;;  %3378 = vadd.xlane.f32.xlu1 %v3377_v10  ;;  %v3331_v34 = vld [vmem:[%s5495_s13 + $0x1] sm:$0x1] }
 0xb87   : > { %v3346_v31 = vsel %vm513_vm0, %v5341_v27, 0.0  ;;  %v3372_v20 = vmul.f32 %v5341_v27, %v5341_v27 }
 0xb88   : > { %v3343_v17 = vsel %vm513_vm0, %v5344_v22, 0.0  ;;  %v3371_v11 = vmul.f32 %v5344_v22, %v5344_v22 }
 0xb89   : > { %3347 = vadd.xlane.f32.xlu0 %v3346_v31  ;;  %v3386_v23 = vsel %vm513_vm0, %v3372_v20, 0.0 }
 0xb8a   : > { %3344 = vadd.xlane.f32.xlu1 %v3343_v17  ;;  %v3383_v2 = vsel %vm513_vm0, %v3371_v11, 0.0 }
 0xb8c   : > { %v3988_v55 = vpop.f32.mrb[36].mxu0 }
 0xb8d   : > { %v5355_v25 = vadd.f32 %v3988_v55, %v3673_v50  ;;  %3387 = vadd.xlane.f32.xlu0 %v3386_v23  ;;  %v3310_v63 = vpop.f32.mrb[37].mxu0  ;;  %v3334_v23 = vmul.f32 %v3333_v24, %v5190_v33 }
 0xb8e   : > { %v5358_v0 = vadd.f32 %v3673_v50, %v3310_v63  ;;  %3384 = vadd.xlane.f32.xlu1 %v3383_v2 }
 0xb8f   : > { %v3352_v3 = vsel %vm513_vm0, %v5355_v25, 0.0  ;;  %v3374_v5 = vmul.f32 %v5355_v25, %v5355_v25 }
 0xb90   : > { %v3349_v4 = vsel %vm513_vm0, %v5358_v0, 0.0  ;;  %v3373_v42 = vmul.f32 %v5358_v0, %v5358_v0 }
 0xb91   : > { %3353 = vadd.xlane.f32.xlu0 %v3352_v3  ;;  %v3392_v60 = vsel %vm513_vm0, %v3374_v5, 0.0 }
 0xb92   : > { %3350 = vadd.xlane.f32.xlu1 %v3349_v4  ;;  %v3389_v35 = vsel %vm513_vm0, %v3373_v42, 0.0  ;;  %v3335_v4 = vld [vmem:[%s5495_s13 + $0x3] sm:$0x1] }
 0xb94   : > { %v3991_v21 = vpop.f32.mrb[38].mxu0 }
 0xb95   : > { %v5369_v46 = vadd.f32 %v3991_v21, %v3673_v50  ;;  %3393 = vadd.xlane.f32.xlu0 %v3392_v60  ;;  %v3320_v61 = vpop.f32.mrb[39].mxu0 }
 0xb96   : > { %v5372_v58 = vadd.f32 %v3673_v50, %v3320_v61  ;;  %3390 = vadd.xlane.f32.xlu1 %v3389_v35  ;;  %v3329_v50 = vld [vmem:[%s5495_s13] sm:$0x1]  ;;  %v3336_v35 = vadd.f32 %v3335_v4, %v3334_v23 }
 0xb97   : > { %v3358_v47 = vsel %vm513_vm0, %v5369_v46, 0.0  ;;  %v3376_v28 = vmul.f32 %v5369_v46, %v5369_v46  ;;  %v3330_v19 = vmul.f32 %v3329_v50, %v5190_v33 }
 0xb98   : > { %v3355_v29 = vsel %vm513_vm0, %v5372_v58, 0.0  ;;  %v3375_v13 = vmul.f32 %v5372_v58, %v5372_v58 }
 0xb99   : > { %3359 = vadd.xlane.f32.xlu0 %v3358_v47  ;;  %v3398_v62 = vsel %vm513_vm0, %v3376_v28, 0.0  ;;  %v3332_v63 = vadd.f32 %v3331_v34, %v3330_v19 }
 0xb9a   : > { %3356 = vadd.xlane.f32.xlu1 %v3355_v29  ;;  %v3395_v30 = vsel %vm513_vm0, %v3375_v13, 0.0 }
 0xb9b   : > { %v5412_v33 = vrot.slane %v3332_v63, %v5208_v45 }
 0xb9d   : > { %3399 = vadd.xlane.f32.xlu0 %v3398_v62 }
 0xb9e   : > { %3396 = vadd.xlane.f32.xlu1 %v3395_v30 }
 0xc0e   : > { %v3342_v52 = vpop.xlane.xlu0 %3341 }
 0xc0f   : > { %v3362_v39 = vmul.f32 0.0625, %v3342_v52  ;;  %v3339_v16 = vpop.xlane.xlu1 %3338 }
 0xc10   : > { %v3361_v59 = vmul.f32 0.0625, %v3339_v16 }
 0xc11   : > { %v3410_v56 = vmul.f32 %v3362_v39, %v3362_v39  ;;  %v3426_v47 = vsub.f32 %v5328_v51, %v3362_v39 }
 0xc12   : > { %v3382_v32 = vpop.xlane.xlu0 %3381  ;;  %v3409_v41 = vmul.f32 %v3361_v59, %v3361_v59  ;;  %v3425_v13 = vsub.f32 %v5330_v53, %v3361_v59 }
 0xc13   : > { %v3402_v57 = vmul.f32 0.0625, %v3382_v32  ;;  %v3379_v8 = vpop.xlane.xlu1 %3378 }
 0xc14   : > { %v3401_v14 = vmul.f32 0.0625, %v3379_v8  ;;  %v5420_v8 = vrot.slane %v3336_v35, %v5208_v45 }
 0xc15   : > { %v3418_v15 = vsub.f32 %v3402_v57, %v3410_v56 }
 0xc16   : > { %v3417_v44 = vsub.f32 %v3401_v14, %v3409_v41  ;;  %v3348_v1 = vpop.xlane.xlu0 %3347 }
 0xc17   : > { %v3434_v18 = vadd.f32 1e-05, %v3418_v15  ;;  %v5387_v26 = vmul.f32 0.0625, %v3348_v1  ;;  %v3345_v37 = vpop.xlane.xlu1 %3344 }
 0xc18   : > { %v3433_v43 = vadd.f32 1e-05, %v3417_v44  ;;  %v5389_v9 = vmul.f32 0.0625, %v3345_v37 }
 0xc19   : > { %4370 = vrsqrt.f32 %v3434_v18  ;;  %v3412_v10 = vmul.f32 %v5387_v26, %v5387_v26  ;;  %v3428_v19 = vsub.f32 %v5341_v27, %v5387_v26 }
 0xc1a   : > { %4372 = vrsqrt.f32 %v3433_v43  ;;  %v3388_v49 = vpop.xlane.xlu0 %3387  ;;  %v3411_v20 = vmul.f32 %v5389_v9, %v5389_v9  ;;  %v3427_v34 = vsub.f32 %v5344_v22, %v5389_v9 }
 0xc1b   : > { %v3404_v31 = vmul.f32 0.0625, %v3388_v49  ;;  %v3385_v17 = vpop.xlane.xlu1 %3384 }
 0xc1c   : > { %v3403_v11 = vmul.f32 0.0625, %v3385_v17 }
 0xc1d   : > { %v3420_v55 = vsub.f32 %v3404_v31, %v3412_v10 }
 0xc1e   : > { %v3419_v2 = vsub.f32 %v3403_v11, %v3411_v20  ;;  %v3354_v3 = vpop.xlane.xlu0 %3353 }
 0xc1f   : > { %v3436_v5 = vadd.f32 1e-05, %v3420_v55  ;;  %v5406_v42 = vmul.f32 0.0625, %v3354_v3  ;;  %v3351_v21 = vpop.xlane.xlu1 %3350 }
 0xc20   : > { %v3435_v60 = vadd.f32 1e-05, %v3419_v2  ;;  %v5408_v61 = vmul.f32 0.0625, %v3351_v21 }
 0xc21   : > { %4374 = vrsqrt.f32 %v3436_v5  ;;  %v3414_v62 = vmul.f32 %v5406_v42, %v5406_v42  ;;  %v3430_v21 = vsub.f32 %v5355_v25, %v5406_v42 }
 0xc22   : > { %4376 = vrsqrt.f32 %v3435_v60  ;;  %v3394_v29 = vpop.xlane.xlu0 %3393  ;;  %v3413_v56 = vmul.f32 %v5408_v61, %v5408_v61 }
 0xc23   : > { %v4371_v28 = vpop.eup %4370  ;;  %v3406_v30 = vmul.f32 0.0625, %v3394_v29  ;;  %v3391_v52 = vpop.xlane.xlu1 %3390 }
 0xc24   : > { %v4373_v16 = vpop.eup %4372  ;;  %v3450_v32 = vmul.f32 %v4371_v28, %v3426_v47  ;;  %v3405_v51 = vmul.f32 0.0625, %v3391_v52  ;;  %v3429_v47 = vsub.f32 %v5358_v0, %v5408_v61 }
 0xc25   : > { %v3449_v39 = vmul.f32 %v4373_v16, %v3425_v13  ;;  %v3422_v57 = vsub.f32 %v3406_v30, %v3414_v62 }
 0xc26   : > { %v3462_v41 = vmul.f32 %v5412_v33, %v3450_v32  ;;  %v3421_v53 = vsub.f32 %v3405_v51, %v3413_v56  ;;  %v3360_v59 = vpop.xlane.xlu0 %3359 }
 0xc27   : > { %v3461_v14 = vmul.f32 %v5412_v33, %v3449_v39  ;;  %v3438_v15 = vadd.f32 1e-05, %v3422_v57  ;;  %v3368_v44 = vmul.f32 0.0625, %v3360_v59  ;;  %v3357_v1 = vpop.xlane.xlu1 %3356 }
 0xc28   : > { %v3470_v50 = vadd.f32 %v3462_v41, %v5251_v48  ;;  %v3437_v18 = vadd.f32 1e-05, %v3421_v53  ;;  %v3367_v37 = vmul.f32 0.0625, %v3357_v1 }
 0xc29   : > { %v3469_v45 = vadd.f32 %v3461_v14, %v5246_v54  ;;  %4378 = vrsqrt.f32 %v3438_v15  ;;  %v3416_v10 = vmul.f32 %v3368_v44, %v3368_v44  ;;  %v3432_v0 = vsub.f32 %v5369_v46, %v3368_v44 }
 0xc2a   : > { %v3482_v43 = vadd.f32 %v5420_v8, %v3470_v50  ;;  %4380 = vrsqrt.f32 %v3437_v18  ;;  %v3400_v48 = vpop.xlane.xlu0 %3399  ;;  %v3415_v11 = vmul.f32 %v3367_v37, %v3367_v37  ;;  %v3431_v52 = vsub.f32 %v5372_v58, %v3367_v37 }
 0xc2b   : > { %v4375_v49 = vpop.eup %4374  ;;  %v3481_v24 = vadd.f32 %v5420_v8, %v3469_v45  ;;  %v3408_v31 = vmul.f32 0.0625, %v3400_v48  ;;  %v3397_v17 = vpop.xlane.xlu1 %3396 }
 0xc2c   : > { %v4377_v20 = vpop.eup %4376  ;;  %3490 = vst.msk [vmem:[%s5430_s19 + $0x8] sm:$0xff] %vm513_vm0, %v3482_v43  ;;  %v3452_v54 = vmul.f32 %v4375_v49, %v3428_v19  ;;  %v3407_v55 = vmul.f32 0.0625, %v3397_v17 }
 0xc2d   : > { %3489 = vst.msk [vmem:[%s5430_s19] sm:$0xff] %vm513_vm0, %v3481_v24  ;;  %v3451_v27 = vmul.f32 %v4377_v20, %v3427_v34  ;;  %v3424_v26 = vsub.f32 %v3408_v31, %v3416_v10 }
 0xc2e   : > { %v3464_v23 = vmul.f32 %v5412_v33, %v3452_v54  ;;  %v3423_v63 = vsub.f32 %v3407_v55, %v3415_v11 }
 0xc2f   : > { %v3463_v22 = vmul.f32 %v5412_v33, %v3451_v27  ;;  %v3440_v9 = vadd.f32 1e-05, %v3424_v26 }
 0xc30   : > { %v3472_v2 = vadd.f32 %v3464_v23, %v5269_v6  ;;  %v3439_v3 = vadd.f32 1e-05, %v3423_v63 }
 0xc31   : > { %v3471_v4 = vadd.f32 %v3463_v22, %v5256_v7  ;;  %4382 = vrsqrt.f32 %v3440_v9 }
 0xc32   : > { %v3484_v5 = vadd.f32 %v5420_v8, %v3472_v2  ;;  %4384 = vrsqrt.f32 %v3439_v3 }
 0xc33   : > { %v4379_v60 = vpop.eup %4378  ;;  %v3483_v35 = vadd.f32 %v5420_v8, %v3471_v4 }
 0xc34   : > { %v4381_v29 = vpop.eup %4380  ;;  %3492 = vst.msk [vmem:[%s5430_s19 + $0x18] sm:$0xff] %vm513_vm0, %v3484_v5  ;;  %v3454_v6 = vmul.f32 %v4379_v60, %v3430_v21 }
 0xc35   : > { %3491 = vst.msk [vmem:[%s5430_s19 + $0x10] sm:$0xff] %vm513_vm0, %v3483_v35  ;;  %v3453_v7 = vmul.f32 %v4381_v29, %v3429_v47 }
 0xc36   : > { %v3466_v28 = vmul.f32 %v5412_v33, %v3454_v6 }
 0xc37   : > { %v3465_v25 = vmul.f32 %v5412_v33, %v3453_v7 }
 0xc38   : > { %v3474_v42 = vadd.f32 %v3466_v28, %v5286_v38 }
 0xc39   : > { %v3473_v13 = vadd.f32 %v3465_v25, %v5274_v12 }
 0xc3a   : > { %v3486_v62 = vadd.f32 %v5420_v8, %v3474_v42 }
 0xc3b   : > { %v4383_v61 = vpop.eup %4382  ;;  %v3485_v30 = vadd.f32 %v5420_v8, %v3473_v13 }
 0xc3c   : > { %v4385_v16 = vpop.eup %4384  ;;  %3494 = vst.msk [vmem:[%s5430_s19 + $0x28] sm:$0xff] %vm513_vm0, %v3486_v62  ;;  %v3456_v32 = vmul.f32 %v4383_v61, %v3432_v0 }
 0xc3d   : > { %3493 = vst.msk [vmem:[%s5430_s19 + $0x20] sm:$0xff] %vm513_vm0, %v3485_v30  ;;  %v3455_v38 = vmul.f32 %v4385_v16, %v3431_v52 }
 0xc3e   : > { %v3468_v12 = vmul.f32 %v5412_v33, %v3456_v32 }
 0xc3f   : > { %v3467_v56 = vmul.f32 %v5412_v33, %v3455_v38 }
 0xc40   : > { %v3476_v51 = vadd.f32 %v3468_v12, %v5298_v40 }
 0xc41   : > { %v3475_v46 = vadd.f32 %v3467_v56, %v5289_v36 }
 0xc42   : > { %v3488_v39 = vadd.f32 %v5420_v8, %v3476_v51 }
 0xc43   : > { %v3487_v57 = vadd.f32 %v5420_v8, %v3475_v46 }
 0xc44   : > { %3496 = vst.msk [vmem:[%s5430_s19 + $0x38] sm:$0xff] %vm513_vm0, %v3488_v39 }
 0xc45   : > { %3495 = vst.msk [vmem:[%s5430_s19 + $0x30] sm:$0xff] %vm513_vm0, %v3487_v57 }
 0xc46 PF: > { %s26_s29 = sadd.s32 1, %s4438_s29  }
 0xc47   : > { %p23_p5 = scmp.ge.s32.totalorder %s26_s29, 4  }
 0xc49   :  { %25 = sbr.rel (!%p23_p5) target bundleno = 2 (0x2), region = 116 }
 0xc50   :  { %3518 = vsyncpa [#allocation3], 1 }
 0xc51   :  { %3520 = vsyncpa [#allocation3 + $0x1], 1 }
 0xc52   :  { %3521 = vsyncpa [#allocation5], 1 }

</bundles_post_ra>
